<compile_context>
chip_gen: v6e
topology: v6e:2x2x1
jax: 0.10.0
libtpu: 0.0.40
codegen_flags: <defaults>
</compile_context>

<pallas_src>
import functools

import jax
import jax.numpy as jnp
from jax import lax
from jax.experimental import pallas as pl
from jax.experimental.pallas import tpu as pltpu

LANE = 128


def _round_up(x, m):
    return (x + m - 1) // m * m


def _pick_chunk(T, max_tc=16):
    """Largest divisor of T that is <= max_tc (chunk of timesteps per grid step)."""
    for c in range(min(T, max_tc), 0, -1):
        if T % c == 0:
            return c
    return 1


def _sigmoid(x):
    # sigmoid(x) = 0.5 * (1 + tanh(0.5 x)) : one EUP op instead of exp + reciprocal.
    return 0.5 * (jnp.tanh(0.5 * x) + 1.0)


# ----------------------------------------------------------------------------
# Pallas kernel: row-tiled GEMM with bias  (used for the hoisted input
# projection of every LSTM layer and for the final Linear).
# ----------------------------------------------------------------------------
def _gemm_bias_kernel(x_ref, w_ref, b_ref, o_ref):
    o_ref[...] = (
        jnp.dot(x_ref[...], w_ref[...], preferred_element_type=jnp.float32)
        + b_ref[...]
    ).astype(o_ref.dtype)


def gemm_bias(x2d, w_t, b_row, *, tm=512):
    """x2d: (M, K) @ w_t: (K, N) + b_row: (1, N) -> (M, N).  N multiple of 128."""
    M, K = x2d.shape
    N = w_t.shape[1]
    tm = min(tm, M)
    grid_m = pl.cdiv(M, tm)
    return pl.pallas_call(
        _gemm_bias_kernel,
        out_shape=jax.ShapeDtypeStruct((M, N), jnp.float32),
        grid_spec=pltpu.PrefetchScalarGridSpec(
            num_scalar_prefetch=0,
            grid=(grid_m,),
            in_specs=[
                pl.BlockSpec((tm, K), lambda m: (m, 0)),
                pl.BlockSpec((K, N), lambda m: (0, 0)),   # loop-invariant weight
                pl.BlockSpec((1, N), lambda m: (0, 0)),
            ],
            out_specs=pl.BlockSpec((tm, N), lambda m: (m, 0)),
        ),
        compiler_params=pltpu.CompilerParams(
            dimension_semantics=("parallel",),
        ),
    )(x2d, w_t, b_row)


# ----------------------------------------------------------------------------
# Pallas kernel: fused bidirectional LSTM recurrence over the full sequence.
# grid = (direction, time-chunk); h/c carried across chunks in VMEM scratch.
# Per step only: gates = pre[t] + h @ W_hh^T   (input projection already done).
# ----------------------------------------------------------------------------
def _bilstm_kernel(pre_ref, whh_t_ref, h_out_ref, h_sc, c_sc):
    d = pl.program_id(0)          # 0 = forward, 1 = backward

    @pl.when(pl.program_id(1) == 0)
    def _():
        h_sc[...] = jnp.zeros_like(h_sc)
        c_sc[...] = jnp.zeros_like(c_sc)

    whh_t = whh_t_ref[0]          # (Hp, 4*Hp)
    Tc = pre_ref.shape[0]
    Hp = h_sc.shape[1]

    def step(s, carry):
        # within-chunk row; reversed for the backward direction
        r = jnp.where(d == 0, s, Tc - 1 - s)
        gates = pre_ref[r] + jnp.dot(
            h_sc[...], whh_t, preferred_element_type=jnp.float32
        )                          # (B, 4*Hp), lane-aligned gate blocks
        i_g = _sigmoid(gates[:, 0 * Hp:1 * Hp])
        f_g = _sigmoid(gates[:, 1 * Hp:2 * Hp])
        g_g = jnp.tanh(gates[:, 2 * Hp:3 * Hp])
        o_g = _sigmoid(gates[:, 3 * Hp:4 * Hp])
        c_new = f_g * c_sc[...] + i_g * g_g
        h_new = o_g * jnp.tanh(c_new)
        c_sc[...] = c_new
        h_sc[...] = h_new
        h_out_ref[r] = h_new       # lane-dense (B, Hp) store into the chunk slab
        return carry

    lax.fori_loop(0, Tc, step, 0, unroll=True)


def bilstm_layer(pre, whh_t_both, *, T, B, Hp, Tc):
    """pre: (T, B, 2*4*Hp) preactivations [fwd | bwd], whh_t_both: (2, Hp, 4*Hp).
    Returns (T, B, 2*Hp) with columns [0:Hp]=fwd h, [Hp:2Hp]=bwd h (padded lanes 0)."""
    G = 4 * Hp
    Nc = T // Tc

    def time_map(d, i):
        # forward walks chunks 0..Nc-1; backward walks Nc-1..0 (reversal via index_map)
        return (jnp.where(d == 0, i, Nc - 1 - i), 0, d)

    return pl.pallas_call(
        _bilstm_kernel,
        out_shape=jax.ShapeDtypeStruct((T, B, 2 * Hp), jnp.float32),
        grid_spec=pltpu.PrefetchScalarGridSpec(
            num_scalar_prefetch=0,
            grid=(2, Nc),
            in_specs=[
                pl.BlockSpec((Tc, B, G), time_map),
                pl.BlockSpec((1, Hp, G), lambda d, i: (d, 0, 0)),
            ],
            out_specs=pl.BlockSpec((Tc, B, Hp), time_map),
            scratch_shapes=[
                pltpu.VMEM((B, Hp), jnp.float32),   # h
                pltpu.VMEM((B, Hp), jnp.float32),   # c
            ],
        ),
        compiler_params=pltpu.CompilerParams(
            # direction axis shards across TensorCores on v7x; time is sequential
            dimension_semantics=("parallel", "arbitrary"),
        ),
    )(pre, whh_t_both)


# ----------------------------------------------------------------------------
# Parameter init (PyTorch layout) and one-time kernel-layout preparation.
# ----------------------------------------------------------------------------
def init_params(key, vocab_size, tagset_size, embedding_dim, hidden_dim, rnn_layers):
    H = hidden_dim // 2
    params = {}
    key, k = jax.random.split(key)
    params["embedding"] = jax.random.normal(k, (vocab_size, embedding_dim), jnp.float32)

    scale = 1.0 / jnp.sqrt(jnp.float32(H))
    lstm_layers = []
    for layer in range(rnn_layers):
        in_dim = embedding_dim if layer == 0 else hidden_dim
        dirs = []
        for _direction in range(2):
            key, k1, k2, k3, k4 = jax.random.split(key, 5)
            dirs.append(dict(
                w_ih=jax.random.uniform(k1, (4 * H, in_dim), jnp.float32, -scale, scale),
                w_hh=jax.random.uniform(k2, (4 * H, H), jnp.float32, -scale, scale),
                b_ih=jax.random.uniform(k3, (4 * H,), jnp.float32, -scale, scale),
                b_hh=jax.random.uniform(k4, (4 * H,), jnp.float32, -scale, scale),
            ))
        lstm_layers.append(dirs)
    params["lstm"] = lstm_layers

    scale_l = 1.0 / jnp.sqrt(jnp.float32(hidden_dim))
    key, k1, k2 = jax.random.split(key, 3)
    params["linear_w"] = jax.random.uniform(
        k1, (tagset_size, hidden_dim), jnp.float32, -scale_l, scale_l)
    params["linear_b"] = jax.random.uniform(
        k2, (tagset_size,), jnp.float32, -scale_l, scale_l)
    return params


def _pad_gates_cols(w, H, Hp):
    """w: (4H, in_dim) PyTorch gate layout [i;f;g;o] -> (in_dim, 4*Hp) transposed,
    with each gate's columns zero-padded to Hp lanes."""
    in_dim = w.shape[1]
    w_t = jnp.transpose(w).reshape(in_dim, 4, H)
    out = jnp.zeros((in_dim, 4, Hp), jnp.float32).at[:, :, :H].set(w_t)
    return out.reshape(in_dim, 4 * Hp)


def _pad_gates_bias(b, H, Hp):
    b4 = b.reshape(4, H)
    out = jnp.zeros((4, Hp), jnp.float32).at[:, :H].set(b4)
    return out.reshape(4 * Hp)


def _expand_bidir_rows(w_t, H, Hp):
    """Remap input-feature rows from the dense [fwd(H), bwd(H)] layout to the
    padded [fwd(Hp), bwd(Hp)] layout produced by the recurrence kernel."""
    cols = w_t.shape[1]
    out = jnp.zeros((2 * Hp, cols), jnp.float32)
    out = out.at[:H].set(w_t[:H])
    out = out.at[Hp:Hp + H].set(w_t[H:2 * H])
    return out


def prepare_kernel_params(params, *, hidden_dim, tagset_size):
    """One-time layout conversion: transpose, gate-pad to 128 lanes, fuse biases,
    concatenate fwd/bwd direction weights."""
    H = hidden_dim // 2
    Hp = _round_up(H, LANE)
    G = 4 * Hp

    layers = []
    for layer_idx, layer in enumerate(params["lstm"]):
        wih_cols, whh_rows, b_cols = [], [], []
        for p in layer:  # [forward, backward]
            wih_t = _pad_gates_cols(p["w_ih"], H, Hp)          # (in_dim, G)
            if layer_idx > 0:
                wih_t = _expand_bidir_rows(wih_t, H, Hp)       # (2*Hp, G)
            whh_t = _pad_gates_cols(p["w_hh"], H, Hp)          # (H, G)
            whh_t = jnp.zeros((Hp, G), jnp.float32).at[:H].set(whh_t)
            b = _pad_gates_bias(p["b_ih"] + p["b_hh"], H, Hp)  # (G,)
            wih_cols.append(wih_t)
            whh_rows.append(whh_t)
            b_cols.append(b)
        layers.append(dict(
            wih_t=jnp.concatenate(wih_cols, axis=1),           # (in_dim_pad, 2G)
            bias=jnp.concatenate(b_cols).reshape(1, 2 * G),    # (1, 2G)
            whh_t=jnp.stack(whh_rows, axis=0),                 # (2, Hp, G)
        ))

    tag_pad = _round_up(tagset_size, LANE)
    lin_w_t = jnp.transpose(params["linear_w"])                # (2H, tagset)
    lin_w_t = _expand_bidir_rows(lin_w_t, H, Hp)               # (2*Hp, tagset)
    lin_w_t = jnp.zeros((2 * Hp, tag_pad), jnp.float32).at[:, :tagset_size].set(lin_w_t)
    lin_b = jnp.zeros((1, tag_pad), jnp.float32).at[0, :tagset_size].set(params["linear_b"])

    return dict(
        embedding=params["embedding"],
        layers=layers,
        lin_w_t=lin_w_t,
        lin_b=lin_b,
    )


# ----------------------------------------------------------------------------
# Full model forward
# ----------------------------------------------------------------------------
@functools.partial(jax.jit, static_argnames=("tagset_size",))
def lstm_model_forward(kparams, sentence, tagset_size):
    """sentence: (T, B) int32. Returns output (T, B, tagset_size)."""
    T, B = sentence.shape

    # Embedding lookup (glue).
    x = jnp.take(kparams["embedding"], sentence, axis=0)       # (T, B, E)
    # dropout1: identity at inference.  TODO(synk): stochastic dropout not modeled.

    Tc = _pick_chunk(T)
    for layer in kparams["layers"]:
        Hp = layer["whh_t"].shape[1]
        G = 4 * Hp
        in_dim = x.shape[-1]
        # (1) hoisted input projection: one big GEMM for both directions.
        pre = gemm_bias(x.reshape(T * B, in_dim), layer["wih_t"], layer["bias"])
        pre = pre.reshape(T, B, 2 * G)
        # (2) fused bidirectional recurrence (time reversal via index_map).
        x = bilstm_layer(pre, layer["whh_t"], T=T, B=B, Hp=Hp, Tc=Tc)

    # dropout2: identity at inference.
    Hp = kparams["layers"][-1]["whh_t"].shape[1]
    out = gemm_bias(x.reshape(T * B, 2 * Hp), kparams["lin_w_t"], kparams["lin_b"])
    return out[:, :tagset_size].reshape(T, B, tagset_size)


# ----------------------------------------------------------------------------
# Pure-JAX reference (PyTorch semantics) for a correctness check.
# ----------------------------------------------------------------------------
def reference_forward(params, sentence):
    T, B = sentence.shape
    x = params["embedding"][sentence]
    for layer in params["lstm"]:
        outs = []
        for d, p in enumerate(layer):
            H = p["w_hh"].shape[1]
            h = jnp.zeros((B, H), jnp.float32)
            c = jnp.zeros((B, H), jnp.float32)
            seq = x if d == 0 else x[::-1]
            hs = []
            for t in range(T):
                gates = (seq[t] @ p["w_ih"].T + h @ p["w_hh"].T
                         + p["b_ih"] + p["b_hh"])
                i_g, f_g, g_g, o_g = jnp.split(gates, 4, axis=-1)
                i_g = jax.nn.sigmoid(i_g)
                f_g = jax.nn.sigmoid(f_g)
                g_g = jnp.tanh(g_g)
                o_g = jax.nn.sigmoid(o_g)
                c = f_g * c + i_g * g_g
                h = o_g * jnp.tanh(c)
                hs.append(h)
            hs = jnp.stack(hs)
            if d == 1:
                hs = hs[::-1]
            outs.append(hs)
        x = jnp.concatenate(outs, axis=-1)
    out = x.reshape(T * B, -1) @ params["linear_w"].T + params["linear_b"]
    return out.reshape(T, B, -1)


if __name__ == "__main__":
    vocab_size = 50
    tagset_size = 10
    embedding_dim = 32
    hidden_dim = 32          # per-direction hidden = 16 (padded to 128 lanes in-kernel)
    rnn_layers = 2
    T, B = 8, 2

    key = jax.random.PRNGKey(0)
    key, pkey, skey = jax.random.split(key, 3)
    params = init_params(pkey, vocab_size, tagset_size, embedding_dim,
                         hidden_dim, rnn_layers)
    sentence = jax.random.randint(skey, (T, B), 0, vocab_size, dtype=jnp.int32)

    # One-time weight layout preparation (outside the jitted forward).
    kparams = prepare_kernel_params(params, hidden_dim=hidden_dim,
                                    tagset_size=tagset_size)

    out = lstm_model_forward(kparams, sentence, tagset_size)
    out = jax.block_until_ready(out)
    assert out.shape == (T, B, tagset_size), out.shape
    assert out.dtype == jnp.float32

    ref = reference_forward(params, sentence)
    max_err = float(jnp.max(jnp.abs(out - ref)))
    assert max_err < 1e-3, f"max |out - ref| = {max_err}"
    print("KERNEL_OK")
</pallas_src>

<mosaic_0001>
module attributes {stable_mosaic.version = 11 : i64} {
  func.func @_gemm_bias_kernel(%arg0: i32, %arg1: memref<16x32xf32, #tpu.memory_space<vmem>>, %arg2: memref<32x1024xf32, #tpu.memory_space<vmem>>, %arg3: memref<1x1024xf32, #tpu.memory_space<vmem>>, %arg4: memref<16x1024xf32, #tpu.memory_space<vmem>>) attributes {dimension_semantics = [#tpu.dimension_semantics<parallel>], iteration_bounds = array<i64: 1>, scalar_prefetch = 0 : i64, scratch_operands = 0 : i64, tpu.core_type = #tpu.core_type<tc>, window_params = [{transform_indices = @transform_0, window_bounds = array<i64: 16, 32>}, {pipeline_mode = #tpu.pipeline_mode<synchronous>, transform_indices = @transform_1, window_bounds = array<i64: 32, 1024>}, {pipeline_mode = #tpu.pipeline_mode<synchronous>, transform_indices = @transform_2, window_bounds = array<i64: 1, 1024>}, {transform_indices = @transform_3, window_bounds = array<i64: 16, 1024>}]} {
    %c0 = arith.constant 0 : index
    %c0_0 = arith.constant 0 : index
    %0 = vector.load %arg1[%c0, %c0_0] : memref<16x32xf32, #tpu.memory_space<vmem>>, vector<16x32xf32>
    %c0_1 = arith.constant 0 : index
    %c0_2 = arith.constant 0 : index
    %1 = vector.load %arg2[%c0_1, %c0_2] : memref<32x1024xf32, #tpu.memory_space<vmem>>, vector<32x1024xf32>
    %cst = arith.constant dense<0.000000e+00> : vector<16x1024xf32>
    %2 = tpu.matmul %0, %1, %cst {dimension_numbers = #tpu.dot_dimension_numbers<[1], [0], [0], [1], [0, 0, 1, 1], [], []>} : vector<16x32xf32>, vector<32x1024xf32>, vector<16x1024xf32> -> vector<16x1024xf32>
    %c0_3 = arith.constant 0 : index
    %c0_4 = arith.constant 0 : index
    %3 = vector.load %arg3[%c0_3, %c0_4] : memref<1x1024xf32, #tpu.memory_space<vmem>>, vector<1x1024xf32>
    %4 = vector.broadcast %3 : vector<1x1024xf32> to vector<16x1024xf32>
    %5 = arith.addf %2, %4 : vector<16x1024xf32>
    %c0_5 = arith.constant 0 : index
    %c0_6 = arith.constant 0 : index
    %6 = vector.load %arg4[%c0_5, %c0_6] : memref<16x1024xf32, #tpu.memory_space<vmem>>, vector<16x1024xf32>
    tpu.vector_store %arg4[%c0_5, %c0_6], %5 {strides = array<i32>} : memref<16x1024xf32, #tpu.memory_space<vmem>>, vector<16x1024xf32>,
    return
  }
  func.func @transform_0(%arg0: i32) -> (i32, i32) {
    %c0_i32 = arith.constant 0 : i32
    %c0_i32_0 = arith.constant 0 : i32
    return %arg0, %c0_i32 : i32, i32
  }
  func.func @transform_1(%arg0: i32) -> (i32, i32) {
    %c0_i32 = arith.constant 0 : i32
    %c0_i32_0 = arith.constant 0 : i32
    %c0_i32_1 = arith.constant 0 : i32
    return %c0_i32, %c0_i32_0 : i32, i32
  }
  func.func @transform_2(%arg0: i32) -> (i32, i32) {
    %c0_i32 = arith.constant 0 : i32
    %c0_i32_0 = arith.constant 0 : i32
    %c0_i32_1 = arith.constant 0 : i32
    return %c0_i32, %c0_i32_0 : i32, i32
  }
  func.func @transform_3(%arg0: i32) -> (i32, i32) {
    %c0_i32 = arith.constant 0 : i32
    %c0_i32_0 = arith.constant 0 : i32
    return %arg0, %c0_i32 : i32, i32
  }
}

module attributes {stable_mosaic.version = 11 : i64} {
  func.func @_bilstm_kernel(%arg0: i32, %arg1: i32, %arg2: memref<8x2x512xf32, #tpu.memory_space<vmem>>, %arg3: memref<1x128x512xf32, #tpu.memory_space<vmem>>, %arg4: memref<8x2x128xf32, #tpu.memory_space<vmem>>, %arg5: memref<2x128xf32, #tpu.memory_space<vmem>>, %arg6: memref<2x128xf32, #tpu.memory_space<vmem>>) attributes {dimension_semantics = [#tpu.dimension_semantics<parallel>, #tpu.dimension_semantics<arbitrary>], iteration_bounds = array<i64: 2, 1>, scalar_prefetch = 0 : i64, scratch_operands = 2 : i64, tpu.core_type = #tpu.core_type<tc>, window_params = [{transform_indices = @transform_0, window_bounds = array<i64: 8, 2, 512>}, {transform_indices = @transform_1, window_bounds = array<i64: 1, 128, 512>}, {transform_indices = @transform_2, window_bounds = array<i64: 8, 2, 128>}]} {
    %c0_i32 = arith.constant 0 : i32
    %0 = arith.cmpi eq, %arg1, %c0_i32 : i32
    %1 = arith.extui %0 : i1 to i32
    %c0_i32_0 = arith.constant 0 : i32
    %2 = arith.cmpi ne, %1, %c0_i32_0 : i32
    scf.if %2 {
      %cst_195 = arith.constant 0.000000e+00 : f32
      %381 = vector.broadcast %cst_195 : f32 to vector<2x128xf32>
      %c0_196 = arith.constant 0 : index
      %c0_197 = arith.constant 0 : index
      %382 = vector.load %arg5[%c0_196, %c0_197] : memref<2x128xf32, #tpu.memory_space<vmem>>, vector<2x128xf32>
      tpu.vector_store %arg5[%c0_196, %c0_197], %381 {strides = array<i32>} : memref<2x128xf32, #tpu.memory_space<vmem>>, vector<2x128xf32>,
      %cst_198 = arith.constant 0.000000e+00 : f32
      %383 = vector.broadcast %cst_198 : f32 to vector<2x128xf32>
      %c0_199 = arith.constant 0 : index
      %c0_200 = arith.constant 0 : index
      %384 = vector.load %arg6[%c0_199, %c0_200] : memref<2x128xf32, #tpu.memory_space<vmem>>, vector<2x128xf32>
      tpu.vector_store %arg6[%c0_199, %c0_200], %383 {strides = array<i32>} : memref<2x128xf32, #tpu.memory_space<vmem>>, vector<2x128xf32>,
    } else {
    }
    %c0 = arith.constant 0 : index
    %c0_1 = arith.constant 0 : index
    %c0_2 = arith.constant 0 : index
    %3 = vector.load %arg3[%c0, %c0_1, %c0_2] : memref<1x128x512xf32, #tpu.memory_space<vmem>>, vector<1x128x512xf32>
    %4 = vector.shape_cast %3 : vector<1x128x512xf32> to vector<128x512xf32>
    %c0_i32_3 = arith.constant 0 : i32
    %c0_i32_4 = arith.constant 0 : i32
    %5 = arith.cmpi eq, %arg0, %c0_i32_4 : i32
    %c7_i32 = arith.constant 7 : i32
    %6 = arith.subi %c7_i32, %c0_i32_3 : i32
    %7 = arith.select %5, %c0_i32_3, %6 : i32
    %8 = arith.index_cast %7 : i32 to index
    %c0_5 = arith.constant 0 : index
    %c0_6 = arith.constant 0 : index
    %9 = vector.load %arg2[%8, %c0_5, %c0_6] : memref<8x2x512xf32, #tpu.memory_space<vmem>>, vector<1x2x512xf32>
    %10 = vector.shape_cast %9 : vector<1x2x512xf32> to vector<2x512xf32>
    %c0_7 = arith.constant 0 : index
    %c0_8 = arith.constant 0 : index
    %11 = vector.load %arg5[%c0_7, %c0_8] : memref<2x128xf32, #tpu.memory_space<vmem>>, vector<2x128xf32>
    %cst = arith.constant dense<0.000000e+00> : vector<2x512xf32>
    %12 = tpu.matmul %11, %4, %cst {dimension_numbers = #tpu.dot_dimension_numbers<[1], [0], [0], [1], [0, 0, 1, 1], [], []>} : vector<2x128xf32>, vector<128x512xf32>, vector<2x512xf32> -> vector<2x512xf32>
    %13 = arith.addf %10, %12 : vector<2x512xf32>
    %14 = vector.extract_strided_slice %13 {offsets = [0, 0], sizes = [2, 128], strides = [1, 1]} : vector<2x512xf32> to vector<2x128xf32>
    %cst_9 = arith.constant 5.000000e-01 : f32
    %15 = vector.broadcast %cst_9 : f32 to vector<2x128xf32>
    %16 = arith.mulf %15, %14 : vector<2x128xf32>
    %17 = math.tanh %16 : vector<2x128xf32>
    %cst_10 = arith.constant 1.000000e+00 : f32
    %18 = vector.broadcast %cst_10 : f32 to vector<2x128xf32>
    %19 = arith.addf %17, %18 : vector<2x128xf32>
    %cst_11 = arith.constant 5.000000e-01 : f32
    %20 = vector.broadcast %cst_11 : f32 to vector<2x128xf32>
    %21 = arith.mulf %20, %19 : vector<2x128xf32>
    %22 = vector.extract_strided_slice %13 {offsets = [0, 128], sizes = [2, 128], strides = [1, 1]} : vector<2x512xf32> to vector<2x128xf32>
    %cst_12 = arith.constant 5.000000e-01 : f32
    %23 = vector.broadcast %cst_12 : f32 to vector<2x128xf32>
    %24 = arith.mulf %23, %22 : vector<2x128xf32>
    %25 = math.tanh %24 : vector<2x128xf32>
    %cst_13 = arith.constant 1.000000e+00 : f32
    %26 = vector.broadcast %cst_13 : f32 to vector<2x128xf32>
    %27 = arith.addf %25, %26 : vector<2x128xf32>
    %cst_14 = arith.constant 5.000000e-01 : f32
    %28 = vector.broadcast %cst_14 : f32 to vector<2x128xf32>
    %29 = arith.mulf %28, %27 : vector<2x128xf32>
    %30 = vector.extract_strided_slice %13 {offsets = [0, 256], sizes = [2, 128], strides = [1, 1]} : vector<2x512xf32> to vector<2x128xf32>
    %31 = math.tanh %30 : vector<2x128xf32>
    %32 = vector.extract_strided_slice %13 {offsets = [0, 384], sizes = [2, 128], strides = [1, 1]} : vector<2x512xf32> to vector<2x128xf32>
    %cst_15 = arith.constant 5.000000e-01 : f32
    %33 = vector.broadcast %cst_15 : f32 to vector<2x128xf32>
    %34 = arith.mulf %33, %32 : vector<2x128xf32>
    %35 = math.tanh %34 : vector<2x128xf32>
    %cst_16 = arith.constant 1.000000e+00 : f32
    %36 = vector.broadcast %cst_16 : f32 to vector<2x128xf32>
    %37 = arith.addf %35, %36 : vector<2x128xf32>
    %cst_17 = arith.constant 5.000000e-01 : f32
    %38 = vector.broadcast %cst_17 : f32 to vector<2x128xf32>
    %39 = arith.mulf %38, %37 : vector<2x128xf32>
    %c0_18 = arith.constant 0 : index
    %c0_19 = arith.constant 0 : index
    %40 = vector.load %arg6[%c0_18, %c0_19] : memref<2x128xf32, #tpu.memory_space<vmem>>, vector<2x128xf32>
    %41 = arith.mulf %29, %40 : vector<2x128xf32>
    %42 = arith.mulf %21, %31 : vector<2x128xf32>
    %43 = arith.addf %41, %42 : vector<2x128xf32>
    %44 = math.tanh %43 : vector<2x128xf32>
    %45 = arith.mulf %39, %44 : vector<2x128xf32>
    %c0_20 = arith.constant 0 : index
    %c0_21 = arith.constant 0 : index
    %46 = vector.load %arg6[%c0_20, %c0_21] : memref<2x128xf32, #tpu.memory_space<vmem>>, vector<2x128xf32>
    tpu.vector_store %arg6[%c0_20, %c0_21], %43 {strides = array<i32>} : memref<2x128xf32, #tpu.memory_space<vmem>>, vector<2x128xf32>,
    %c0_22 = arith.constant 0 : index
    %c0_23 = arith.constant 0 : index
    %47 = vector.load %arg5[%c0_22, %c0_23] : memref<2x128xf32, #tpu.memory_space<vmem>>, vector<2x128xf32>
    tpu.vector_store %arg5[%c0_22, %c0_23], %45 {strides = array<i32>} : memref<2x128xf32, #tpu.memory_space<vmem>>, vector<2x128xf32>,
    %48 = arith.index_cast %7 : i32 to index
    %c0_24 = arith.constant 0 : index
    %c0_25 = arith.constant 0 : index
    %49 = vector.load %arg4[%48, %c0_24, %c0_25] : memref<8x2x128xf32, #tpu.memory_space<vmem>>, vector<1x2x128xf32>
    %50 = vector.shape_cast %49 : vector<1x2x128xf32> to vector<2x128xf32>
    %51 = vector.shape_cast %45 : vector<2x128xf32> to vector<1x2x128xf32>
    tpu.vector_store %arg4[%48, %c0_24, %c0_25], %51 {strides = array<i32>} : memref<8x2x128xf32, #tpu.memory_space<vmem>>, vector<1x2x128xf32>,
    %c1_i32 = arith.constant 1 : i32
    %c0_i32_26 = arith.constant 0 : i32
    %52 = arith.cmpi eq, %arg0, %c0_i32_26 : i32
    %c7_i32_27 = arith.constant 7 : i32
    %53 = arith.subi %c7_i32_27, %c1_i32 : i32
    %54 = arith.select %52, %c1_i32, %53 : i32
    %55 = arith.index_cast %54 : i32 to index
    %c0_28 = arith.constant 0 : index
    %c0_29 = arith.constant 0 : index
    %56 = vector.load %arg2[%55, %c0_28, %c0_29] : memref<8x2x512xf32, #tpu.memory_space<vmem>>, vector<1x2x512xf32>
    %57 = vector.shape_cast %56 : vector<1x2x512xf32> to vector<2x512xf32>
    %c0_30 = arith.constant 0 : index
    %c0_31 = arith.constant 0 : index
    %58 = vector.load %arg5[%c0_30, %c0_31] : memref<2x128xf32, #tpu.memory_space<vmem>>, vector<2x128xf32>
    %cst_32 = arith.constant dense<0.000000e+00> : vector<2x512xf32>
    %59 = tpu.matmul %58, %4, %cst_32 {dimension_numbers = #tpu.dot_dimension_numbers<[1], [0], [0], [1], [0, 0, 1, 1], [], []>} : vector<2x128xf32>, vector<128x512xf32>, vector<2x512xf32> -> vector<2x512xf32>
    %60 = arith.addf %57, %59 : vector<2x512xf32>
    %61 = vector.extract_strided_slice %60 {offsets = [0, 0], sizes = [2, 128], strides = [1, 1]} : vector<2x512xf32> to vector<2x128xf32>
    %cst_33 = arith.constant 5.000000e-01 : f32
    %62 = vector.broadcast %cst_33 : f32 to vector<2x128xf32>
    %63 = arith.mulf %62, %61 : vector<2x128xf32>
    %64 = math.tanh %63 : vector<2x128xf32>
    %cst_34 = arith.constant 1.000000e+00 : f32
    %65 = vector.broadcast %cst_34 : f32 to vector<2x128xf32>
    %66 = arith.addf %64, %65 : vector<2x128xf32>
    %cst_35 = arith.constant 5.000000e-01 : f32
    %67 = vector.broadcast %cst_35 : f32 to vector<2x128xf32>
    %68 = arith.mulf %67, %66 : vector<2x128xf32>
    %69 = vector.extract_strided_slice %60 {offsets = [0, 128], sizes = [2, 128], strides = [1, 1]} : vector<2x512xf32> to vector<2x128xf32>
    %cst_36 = arith.constant 5.000000e-01 : f32
    %70 = vector.broadcast %cst_36 : f32 to vector<2x128xf32>
    %71 = arith.mulf %70, %69 : vector<2x128xf32>
    %72 = math.tanh %71 : vector<2x128xf32>
    %cst_37 = arith.constant 1.000000e+00 : f32
    %73 = vector.broadcast %cst_37 : f32 to vector<2x128xf32>
    %74 = arith.addf %72, %73 : vector<2x128xf32>
    %cst_38 = arith.constant 5.000000e-01 : f32
    %75 = vector.broadcast %cst_38 : f32 to vector<2x128xf32>
    %76 = arith.mulf %75, %74 : vector<2x128xf32>
    %77 = vector.extract_strided_slice %60 {offsets = [0, 256], sizes = [2, 128], strides = [1, 1]} : vector<2x512xf32> to vector<2x128xf32>
    %78 = math.tanh %77 : vector<2x128xf32>
    %79 = vector.extract_strided_slice %60 {offsets = [0, 384], sizes = [2, 128], strides = [1, 1]} : vector<2x512xf32> to vector<2x128xf32>
    %cst_39 = arith.constant 5.000000e-01 : f32
    %80 = vector.broadcast %cst_39 : f32 to vector<2x128xf32>
    %81 = arith.mulf %80, %79 : vector<2x128xf32>
    %82 = math.tanh %81 : vector<2x128xf32>
    %cst_40 = arith.constant 1.000000e+00 : f32
    %83 = vector.broadcast %cst_40 : f32 to vector<2x128xf32>
    %84 = arith.addf %82, %83 : vector<2x128xf32>
    %cst_41 = arith.constant 5.000000e-01 : f32
    %85 = vector.broadcast %cst_41 : f32 to vector<2x128xf32>
    %86 = arith.mulf %85, %84 : vector<2x128xf32>
    %c0_42 = arith.constant 0 : index
    %c0_43 = arith.constant 0 : index
    %87 = vector.load %arg6[%c0_42, %c0_43] : memref<2x128xf32, #tpu.memory_space<vmem>>, vector<2x128xf32>
    %88 = arith.mulf %76, %87 : vector<2x128xf32>
    %89 = arith.mulf %68, %78 : vector<2x128xf32>
    %90 = arith.addf %88, %89 : vector<2x128xf32>
    %91 = math.tanh %90 : vector<2x128xf32>
    %92 = arith.mulf %86, %91 : vector<2x128xf32>
    %c0_44 = arith.constant 0 : index
    %c0_45 = arith.constant 0 : index
    %93 = vector.load %arg6[%c0_44, %c0_45] : memref<2x128xf32, #tpu.memory_space<vmem>>, vector<2x128xf32>
    tpu.vector_store %arg6[%c0_44, %c0_45], %90 {strides = array<i32>} : memref<2x128xf32, #tpu.memory_space<vmem>>, vector<2x128xf32>,
    %c0_46 = arith.constant 0 : index
    %c0_47 = arith.constant 0 : index
    %94 = vector.load %arg5[%c0_46, %c0_47] : memref<2x128xf32, #tpu.memory_space<vmem>>, vector<2x128xf32>
    tpu.vector_store %arg5[%c0_46, %c0_47], %92 {strides = array<i32>} : memref<2x128xf32, #tpu.memory_space<vmem>>, vector<2x128xf32>,
    %95 = arith.index_cast %54 : i32 to index
    %c0_48 = arith.constant 0 : index
    %c0_49 = arith.constant 0 : index
    %96 = vector.load %arg4[%95, %c0_48, %c0_49] : memref<8x2x128xf32, #tpu.memory_space<vmem>>, vector<1x2x128xf32>
    %97 = vector.shape_cast %96 : vector<1x2x128xf32> to vector<2x128xf32>
    %98 = vector.shape_cast %92 : vector<2x128xf32> to vector<1x2x128xf32>
    tpu.vector_store %arg4[%95, %c0_48, %c0_49], %98 {strides = array<i32>} : memref<8x2x128xf32, #tpu.memory_space<vmem>>, vector<1x2x128xf32>,
    %c2_i32 = arith.constant 2 : i32
    %c0_i32_50 = arith.constant 0 : i32
    %99 = arith.cmpi eq, %arg0, %c0_i32_50 : i32
    %c7_i32_51 = arith.constant 7 : i32
    %100 = arith.subi %c7_i32_51, %c2_i32 : i32
    %101 = arith.select %99, %c2_i32, %100 : i32
    %102 = arith.index_cast %101 : i32 to index
    %c0_52 = arith.constant 0 : index
    %c0_53 = arith.constant 0 : index
    %103 = vector.load %arg2[%102, %c0_52, %c0_53] : memref<8x2x512xf32, #tpu.memory_space<vmem>>, vector<1x2x512xf32>
    %104 = vector.shape_cast %103 : vector<1x2x512xf32> to vector<2x512xf32>
    %c0_54 = arith.constant 0 : index
    %c0_55 = arith.constant 0 : index
    %105 = vector.load %arg5[%c0_54, %c0_55] : memref<2x128xf32, #tpu.memory_space<vmem>>, vector<2x128xf32>
    %cst_56 = arith.constant dense<0.000000e+00> : vector<2x512xf32>
    %106 = tpu.matmul %105, %4, %cst_56 {dimension_numbers = #tpu.dot_dimension_numbers<[1], [0], [0], [1], [0, 0, 1, 1], [], []>} : vector<2x128xf32>, vector<128x512xf32>, vector<2x512xf32> -> vector<2x512xf32>
    %107 = arith.addf %104, %106 : vector<2x512xf32>
    %108 = vector.extract_strided_slice %107 {offsets = [0, 0], sizes = [2, 128], strides = [1, 1]} : vector<2x512xf32> to vector<2x128xf32>
    %cst_57 = arith.constant 5.000000e-01 : f32
    %109 = vector.broadcast %cst_57 : f32 to vector<2x128xf32>
    %110 = arith.mulf %109, %108 : vector<2x128xf32>
    %111 = math.tanh %110 : vector<2x128xf32>
    %cst_58 = arith.constant 1.000000e+00 : f32
    %112 = vector.broadcast %cst_58 : f32 to vector<2x128xf32>
    %113 = arith.addf %111, %112 : vector<2x128xf32>
    %cst_59 = arith.constant 5.000000e-01 : f32
    %114 = vector.broadcast %cst_59 : f32 to vector<2x128xf32>
    %115 = arith.mulf %114, %113 : vector<2x128xf32>
    %116 = vector.extract_strided_slice %107 {offsets = [0, 128], sizes = [2, 128], strides = [1, 1]} : vector<2x512xf32> to vector<2x128xf32>
    %cst_60 = arith.constant 5.000000e-01 : f32
    %117 = vector.broadcast %cst_60 : f32 to vector<2x128xf32>
    %118 = arith.mulf %117, %116 : vector<2x128xf32>
    %119 = math.tanh %118 : vector<2x128xf32>
    %cst_61 = arith.constant 1.000000e+00 : f32
    %120 = vector.broadcast %cst_61 : f32 to vector<2x128xf32>
    %121 = arith.addf %119, %120 : vector<2x128xf32>
    %cst_62 = arith.constant 5.000000e-01 : f32
    %122 = vector.broadcast %cst_62 : f32 to vector<2x128xf32>
    %123 = arith.mulf %122, %121 : vector<2x128xf32>
    %124 = vector.extract_strided_slice %107 {offsets = [0, 256], sizes = [2, 128], strides = [1, 1]} : vector<2x512xf32> to vector<2x128xf32>
    %125 = math.tanh %124 : vector<2x128xf32>
    %126 = vector.extract_strided_slice %107 {offsets = [0, 384], sizes = [2, 128], strides = [1, 1]} : vector<2x512xf32> to vector<2x128xf32>
    %cst_63 = arith.constant 5.000000e-01 : f32
    %127 = vector.broadcast %cst_63 : f32 to vector<2x128xf32>
    %128 = arith.mulf %127, %126 : vector<2x128xf32>
    %129 = math.tanh %128 : vector<2x128xf32>
    %cst_64 = arith.constant 1.000000e+00 : f32
    %130 = vector.broadcast %cst_64 : f32 to vector<2x128xf32>
    %131 = arith.addf %129, %130 : vector<2x128xf32>
    %cst_65 = arith.constant 5.000000e-01 : f32
    %132 = vector.broadcast %cst_65 : f32 to vector<2x128xf32>
    %133 = arith.mulf %132, %131 : vector<2x128xf32>
    %c0_66 = arith.constant 0 : index
    %c0_67 = arith.constant 0 : index
    %134 = vector.load %arg6[%c0_66, %c0_67] : memref<2x128xf32, #tpu.memory_space<vmem>>, vector<2x128xf32>
    %135 = arith.mulf %123, %134 : vector<2x128xf32>
    %136 = arith.mulf %115, %125 : vector<2x128xf32>
    %137 = arith.addf %135, %136 : vector<2x128xf32>
    %138 = math.tanh %137 : vector<2x128xf32>
    %139 = arith.mulf %133, %138 : vector<2x128xf32>
    %c0_68 = arith.constant 0 : index
    %c0_69 = arith.constant 0 : index
    %140 = vector.load %arg6[%c0_68, %c0_69] : memref<2x128xf32, #tpu.memory_space<vmem>>, vector<2x128xf32>
    tpu.vector_store %arg6[%c0_68, %c0_69], %137 {strides = array<i32>} : memref<2x128xf32, #tpu.memory_space<vmem>>, vector<2x128xf32>,
    %c0_70 = arith.constant 0 : index
    %c0_71 = arith.constant 0 : index
    %141 = vector.load %arg5[%c0_70, %c0_71] : memref<2x128xf32, #tpu.memory_space<vmem>>, vector<2x128xf32>
    tpu.vector_store %arg5[%c0_70, %c0_71], %139 {strides = array<i32>} : memref<2x128xf32, #tpu.memory_space<vmem>>, vector<2x128xf32>,
    %142 = arith.index_cast %101 : i32 to index
    %c0_72 = arith.constant 0 : index
    %c0_73 = arith.constant 0 : index
    %143 = vector.load %arg4[%142, %c0_72, %c0_73] : memref<8x2x128xf32, #tpu.memory_space<vmem>>, vector<1x2x128xf32>
    %144 = vector.shape_cast %143 : vector<1x2x128xf32> to vector<2x128xf32>
    %145 = vector.shape_cast %139 : vector<2x128xf32> to vector<1x2x128xf32>
    tpu.vector_store %arg4[%142, %c0_72, %c0_73], %145 {strides = array<i32>} : memref<8x2x128xf32, #tpu.memory_space<vmem>>, vector<1x2x128xf32>,
    %c3_i32 = arith.constant 3 : i32
    %c0_i32_74 = arith.constant 0 : i32
    %146 = arith.cmpi eq, %arg0, %c0_i32_74 : i32
    %c7_i32_75 = arith.constant 7 : i32
    %147 = arith.subi %c7_i32_75, %c3_i32 : i32
    %148 = arith.select %146, %c3_i32, %147 : i32
    %149 = arith.index_cast %148 : i32 to index
    %c0_76 = arith.constant 0 : index
    %c0_77 = arith.constant 0 : index
    %150 = vector.load %arg2[%149, %c0_76, %c0_77] : memref<8x2x512xf32, #tpu.memory_space<vmem>>, vector<1x2x512xf32>
    %151 = vector.shape_cast %150 : vector<1x2x512xf32> to vector<2x512xf32>
    %c0_78 = arith.constant 0 : index
    %c0_79 = arith.constant 0 : index
    %152 = vector.load %arg5[%c0_78, %c0_79] : memref<2x128xf32, #tpu.memory_space<vmem>>, vector<2x128xf32>
    %cst_80 = arith.constant dense<0.000000e+00> : vector<2x512xf32>
    %153 = tpu.matmul %152, %4, %cst_80 {dimension_numbers = #tpu.dot_dimension_numbers<[1], [0], [0], [1], [0, 0, 1, 1], [], []>} : vector<2x128xf32>, vector<128x512xf32>, vector<2x512xf32> -> vector<2x512xf32>
    %154 = arith.addf %151, %153 : vector<2x512xf32>
    %155 = vector.extract_strided_slice %154 {offsets = [0, 0], sizes = [2, 128], strides = [1, 1]} : vector<2x512xf32> to vector<2x128xf32>
    %cst_81 = arith.constant 5.000000e-01 : f32
    %156 = vector.broadcast %cst_81 : f32 to vector<2x128xf32>
    %157 = arith.mulf %156, %155 : vector<2x128xf32>
    %158 = math.tanh %157 : vector<2x128xf32>
    %cst_82 = arith.constant 1.000000e+00 : f32
    %159 = vector.broadcast %cst_82 : f32 to vector<2x128xf32>
    %160 = arith.addf %158, %159 : vector<2x128xf32>
    %cst_83 = arith.constant 5.000000e-01 : f32
    %161 = vector.broadcast %cst_83 : f32 to vector<2x128xf32>
    %162 = arith.mulf %161, %160 : vector<2x128xf32>
    %163 = vector.extract_strided_slice %154 {offsets = [0, 128], sizes = [2, 128], strides = [1, 1]} : vector<2x512xf32> to vector<2x128xf32>
    %cst_84 = arith.constant 5.000000e-01 : f32
    %164 = vector.broadcast %cst_84 : f32 to vector<2x128xf32>
    %165 = arith.mulf %164, %163 : vector<2x128xf32>
    %166 = math.tanh %165 : vector<2x128xf32>
    %cst_85 = arith.constant 1.000000e+00 : f32
    %167 = vector.broadcast %cst_85 : f32 to vector<2x128xf32>
    %168 = arith.addf %166, %167 : vector<2x128xf32>
    %cst_86 = arith.constant 5.000000e-01 : f32
    %169 = vector.broadcast %cst_86 : f32 to vector<2x128xf32>
    %170 = arith.mulf %169, %168 : vector<2x128xf32>
    %171 = vector.extract_strided_slice %154 {offsets = [0, 256], sizes = [2, 128], strides = [1, 1]} : vector<2x512xf32> to vector<2x128xf32>
    %172 = math.tanh %171 : vector<2x128xf32>
    %173 = vector.extract_strided_slice %154 {offsets = [0, 384], sizes = [2, 128], strides = [1, 1]} : vector<2x512xf32> to vector<2x128xf32>
    %cst_87 = arith.constant 5.000000e-01 : f32
    %174 = vector.broadcast %cst_87 : f32 to vector<2x128xf32>
    %175 = arith.mulf %174, %173 : vector<2x128xf32>
    %176 = math.tanh %175 : vector<2x128xf32>
    %cst_88 = arith.constant 1.000000e+00 : f32
    %177 = vector.broadcast %cst_88 : f32 to vector<2x128xf32>
    %178 = arith.addf %176, %177 : vector<2x128xf32>
    %cst_89 = arith.constant 5.000000e-01 : f32
    %179 = vector.broadcast %cst_89 : f32 to vector<2x128xf32>
    %180 = arith.mulf %179, %178 : vector<2x128xf32>
    %c0_90 = arith.constant 0 : index
    %c0_91 = arith.constant 0 : index
    %181 = vector.load %arg6[%c0_90, %c0_91] : memref<2x128xf32, #tpu.memory_space<vmem>>, vector<2x128xf32>
    %182 = arith.mulf %170, %181 : vector<2x128xf32>
    %183 = arith.mulf %162, %172 : vector<2x128xf32>
    %184 = arith.addf %182, %183 : vector<2x128xf32>
    %185 = math.tanh %184 : vector<2x128xf32>
    %186 = arith.mulf %180, %185 : vector<2x128xf32>
    %c0_92 = arith.constant 0 : index
    %c0_93 = arith.constant 0 : index
    %187 = vector.load %arg6[%c0_92, %c0_93] : memref<2x128xf32, #tpu.memory_space<vmem>>, vector<2x128xf32>
    tpu.vector_store %arg6[%c0_92, %c0_93], %184 {strides = array<i32>} : memref<2x128xf32, #tpu.memory_space<vmem>>, vector<2x128xf32>,
    %c0_94 = arith.constant 0 : index
    %c0_95 = arith.constant 0 : index
    %188 = vector.load %arg5[%c0_94, %c0_95] : memref<2x128xf32, #tpu.memory_space<vmem>>, vector<2x128xf32>
    tpu.vector_store %arg5[%c0_94, %c0_95], %186 {strides = array<i32>} : memref<2x128xf32, #tpu.memory_space<vmem>>, vector<2x128xf32>,
    %189 = arith.index_cast %148 : i32 to index
    %c0_96 = arith.constant 0 : index
    %c0_97 = arith.constant 0 : index
    %190 = vector.load %arg4[%189, %c0_96, %c0_97] : memref<8x2x128xf32, #tpu.memory_space<vmem>>, vector<1x2x128xf32>
    %191 = vector.shape_cast %190 : vector<1x2x128xf32> to vector<2x128xf32>
    %192 = vector.shape_cast %186 : vector<2x128xf32> to vector<1x2x128xf32>
    tpu.vector_store %arg4[%189, %c0_96, %c0_97], %192 {strides = array<i32>} : memref<8x2x128xf32, #tpu.memory_space<vmem>>, vector<1x2x128xf32>,
    %c4_i32 = arith.constant 4 : i32
    %c0_i32_98 = arith.constant 0 : i32
    %193 = arith.cmpi eq, %arg0, %c0_i32_98 : i32
    %c7_i32_99 = arith.constant 7 : i32
    %194 = arith.subi %c7_i32_99, %c4_i32 : i32
    %195 = arith.select %193, %c4_i32, %194 : i32
    %196 = arith.index_cast %195 : i32 to index
    %c0_100 = arith.constant 0 : index
    %c0_101 = arith.constant 0 : index
    %197 = vector.load %arg2[%196, %c0_100, %c0_101] : memref<8x2x512xf32, #tpu.memory_space<vmem>>, vector<1x2x512xf32>
    %198 = vector.shape_cast %197 : vector<1x2x512xf32> to vector<2x512xf32>
    %c0_102 = arith.constant 0 : index
    %c0_103 = arith.constant 0 : index
    %199 = vector.load %arg5[%c0_102, %c0_103] : memref<2x128xf32, #tpu.memory_space<vmem>>, vector<2x128xf32>
    %cst_104 = arith.constant dense<0.000000e+00> : vector<2x512xf32>
    %200 = tpu.matmul %199, %4, %cst_104 {dimension_numbers = #tpu.dot_dimension_numbers<[1], [0], [0], [1], [0, 0, 1, 1], [], []>} : vector<2x128xf32>, vector<128x512xf32>, vector<2x512xf32> -> vector<2x512xf32>
    %201 = arith.addf %198, %200 : vector<2x512xf32>
    %202 = vector.extract_strided_slice %201 {offsets = [0, 0], sizes = [2, 128], strides = [1, 1]} : vector<2x512xf32> to vector<2x128xf32>
    %cst_105 = arith.constant 5.000000e-01 : f32
    %203 = vector.broadcast %cst_105 : f32 to vector<2x128xf32>
    %204 = arith.mulf %203, %202 : vector<2x128xf32>
    %205 = math.tanh %204 : vector<2x128xf32>
    %cst_106 = arith.constant 1.000000e+00 : f32
    %206 = vector.broadcast %cst_106 : f32 to vector<2x128xf32>
    %207 = arith.addf %205, %206 : vector<2x128xf32>
    %cst_107 = arith.constant 5.000000e-01 : f32
    %208 = vector.broadcast %cst_107 : f32 to vector<2x128xf32>
    %209 = arith.mulf %208, %207 : vector<2x128xf32>
    %210 = vector.extract_strided_slice %201 {offsets = [0, 128], sizes = [2, 128], strides = [1, 1]} : vector<2x512xf32> to vector<2x128xf32>
    %cst_108 = arith.constant 5.000000e-01 : f32
    %211 = vector.broadcast %cst_108 : f32 to vector<2x128xf32>
    %212 = arith.mulf %211, %210 : vector<2x128xf32>
    %213 = math.tanh %212 : vector<2x128xf32>
    %cst_109 = arith.constant 1.000000e+00 : f32
    %214 = vector.broadcast %cst_109 : f32 to vector<2x128xf32>
    %215 = arith.addf %213, %214 : vector<2x128xf32>
    %cst_110 = arith.constant 5.000000e-01 : f32
    %216 = vector.broadcast %cst_110 : f32 to vector<2x128xf32>
    %217 = arith.mulf %216, %215 : vector<2x128xf32>
    %218 = vector.extract_strided_slice %201 {offsets = [0, 256], sizes = [2, 128], strides = [1, 1]} : vector<2x512xf32> to vector<2x128xf32>
    %219 = math.tanh %218 : vector<2x128xf32>
    %220 = vector.extract_strided_slice %201 {offsets = [0, 384], sizes = [2, 128], strides = [1, 1]} : vector<2x512xf32> to vector<2x128xf32>
    %cst_111 = arith.constant 5.000000e-01 : f32
    %221 = vector.broadcast %cst_111 : f32 to vector<2x128xf32>
    %222 = arith.mulf %221, %220 : vector<2x128xf32>
    %223 = math.tanh %222 : vector<2x128xf32>
    %cst_112 = arith.constant 1.000000e+00 : f32
    %224 = vector.broadcast %cst_112 : f32 to vector<2x128xf32>
    %225 = arith.addf %223, %224 : vector<2x128xf32>
    %cst_113 = arith.constant 5.000000e-01 : f32
    %226 = vector.broadcast %cst_113 : f32 to vector<2x128xf32>
    %227 = arith.mulf %226, %225 : vector<2x128xf32>
    %c0_114 = arith.constant 0 : index
    %c0_115 = arith.constant 0 : index
    %228 = vector.load %arg6[%c0_114, %c0_115] : memref<2x128xf32, #tpu.memory_space<vmem>>, vector<2x128xf32>
    %229 = arith.mulf %217, %228 : vector<2x128xf32>
    %230 = arith.mulf %209, %219 : vector<2x128xf32>
    %231 = arith.addf %229, %230 : vector<2x128xf32>
    %232 = math.tanh %231 : vector<2x128xf32>
    %233 = arith.mulf %227, %232 : vector<2x128xf32>
    %c0_116 = arith.constant 0 : index
    %c0_117 = arith.constant 0 : index
    %234 = vector.load %arg6[%c0_116, %c0_117] : memref<2x128xf32, #tpu.memory_space<vmem>>, vector<2x128xf32>
    tpu.vector_store %arg6[%c0_116, %c0_117], %231 {strides = array<i32>} : memref<2x128xf32, #tpu.memory_space<vmem>>, vector<2x128xf32>,
    %c0_118 = arith.constant 0 : index
    %c0_119 = arith.constant 0 : index
    %235 = vector.load %arg5[%c0_118, %c0_119] : memref<2x128xf32, #tpu.memory_space<vmem>>, vector<2x128xf32>
    tpu.vector_store %arg5[%c0_118, %c0_119], %233 {strides = array<i32>} : memref<2x128xf32, #tpu.memory_space<vmem>>, vector<2x128xf32>,
    %236 = arith.index_cast %195 : i32 to index
    %c0_120 = arith.constant 0 : index
    %c0_121 = arith.constant 0 : index
    %237 = vector.load %arg4[%236, %c0_120, %c0_121] : memref<8x2x128xf32, #tpu.memory_space<vmem>>, vector<1x2x128xf32>
    %238 = vector.shape_cast %237 : vector<1x2x128xf32> to vector<2x128xf32>
    %239 = vector.shape_cast %233 : vector<2x128xf32> to vector<1x2x128xf32>
    tpu.vector_store %arg4[%236, %c0_120, %c0_121], %239 {strides = array<i32>} : memref<8x2x128xf32, #tpu.memory_space<vmem>>, vector<1x2x128xf32>,
    %c5_i32 = arith.constant 5 : i32
    %c0_i32_122 = arith.constant 0 : i32
    %240 = arith.cmpi eq, %arg0, %c0_i32_122 : i32
    %c7_i32_123 = arith.constant 7 : i32
    %241 = arith.subi %c7_i32_123, %c5_i32 : i32
    %242 = arith.select %240, %c5_i32, %241 : i32
    %243 = arith.index_cast %242 : i32 to index
    %c0_124 = arith.constant 0 : index
    %c0_125 = arith.constant 0 : index
    %244 = vector.load %arg2[%243, %c0_124, %c0_125] : memref<8x2x512xf32, #tpu.memory_space<vmem>>, vector<1x2x512xf32>
    %245 = vector.shape_cast %244 : vector<1x2x512xf32> to vector<2x512xf32>
    %c0_126 = arith.constant 0 : index
    %c0_127 = arith.constant 0 : index
    %246 = vector.load %arg5[%c0_126, %c0_127] : memref<2x128xf32, #tpu.memory_space<vmem>>, vector<2x128xf32>
    %cst_128 = arith.constant dense<0.000000e+00> : vector<2x512xf32>
    %247 = tpu.matmul %246, %4, %cst_128 {dimension_numbers = #tpu.dot_dimension_numbers<[1], [0], [0], [1], [0, 0, 1, 1], [], []>} : vector<2x128xf32>, vector<128x512xf32>, vector<2x512xf32> -> vector<2x512xf32>
    %248 = arith.addf %245, %247 : vector<2x512xf32>
    %249 = vector.extract_strided_slice %248 {offsets = [0, 0], sizes = [2, 128], strides = [1, 1]} : vector<2x512xf32> to vector<2x128xf32>
    %cst_129 = arith.constant 5.000000e-01 : f32
    %250 = vector.broadcast %cst_129 : f32 to vector<2x128xf32>
    %251 = arith.mulf %250, %249 : vector<2x128xf32>
    %252 = math.tanh %251 : vector<2x128xf32>
    %cst_130 = arith.constant 1.000000e+00 : f32
    %253 = vector.broadcast %cst_130 : f32 to vector<2x128xf32>
    %254 = arith.addf %252, %253 : vector<2x128xf32>
    %cst_131 = arith.constant 5.000000e-01 : f32
    %255 = vector.broadcast %cst_131 : f32 to vector<2x128xf32>
    %256 = arith.mulf %255, %254 : vector<2x128xf32>
    %257 = vector.extract_strided_slice %248 {offsets = [0, 128], sizes = [2, 128], strides = [1, 1]} : vector<2x512xf32> to vector<2x128xf32>
    %cst_132 = arith.constant 5.000000e-01 : f32
    %258 = vector.broadcast %cst_132 : f32 to vector<2x128xf32>
    %259 = arith.mulf %258, %257 : vector<2x128xf32>
    %260 = math.tanh %259 : vector<2x128xf32>
    %cst_133 = arith.constant 1.000000e+00 : f32
    %261 = vector.broadcast %cst_133 : f32 to vector<2x128xf32>
    %262 = arith.addf %260, %261 : vector<2x128xf32>
    %cst_134 = arith.constant 5.000000e-01 : f32
    %263 = vector.broadcast %cst_134 : f32 to vector<2x128xf32>
    %264 = arith.mulf %263, %262 : vector<2x128xf32>
    %265 = vector.extract_strided_slice %248 {offsets = [0, 256], sizes = [2, 128], strides = [1, 1]} : vector<2x512xf32> to vector<2x128xf32>
    %266 = math.tanh %265 : vector<2x128xf32>
    %267 = vector.extract_strided_slice %248 {offsets = [0, 384], sizes = [2, 128], strides = [1, 1]} : vector<2x512xf32> to vector<2x128xf32>
    %cst_135 = arith.constant 5.000000e-01 : f32
    %268 = vector.broadcast %cst_135 : f32 to vector<2x128xf32>
    %269 = arith.mulf %268, %267 : vector<2x128xf32>
    %270 = math.tanh %269 : vector<2x128xf32>
    %cst_136 = arith.constant 1.000000e+00 : f32
    %271 = vector.broadcast %cst_136 : f32 to vector<2x128xf32>
    %272 = arith.addf %270, %271 : vector<2x128xf32>
    %cst_137 = arith.constant 5.000000e-01 : f32
    %273 = vector.broadcast %cst_137 : f32 to vector<2x128xf32>
    %274 = arith.mulf %273, %272 : vector<2x128xf32>
    %c0_138 = arith.constant 0 : index
    %c0_139 = arith.constant 0 : index
    %275 = vector.load %arg6[%c0_138, %c0_139] : memref<2x128xf32, #tpu.memory_space<vmem>>, vector<2x128xf32>
    %276 = arith.mulf %264, %275 : vector<2x128xf32>
    %277 = arith.mulf %256, %266 : vector<2x128xf32>
    %278 = arith.addf %276, %277 : vector<2x128xf32>
    %279 = math.tanh %278 : vector<2x128xf32>
    %280 = arith.mulf %274, %279 : vector<2x128xf32>
    %c0_140 = arith.constant 0 : index
    %c0_141 = arith.constant 0 : index
    %281 = vector.load %arg6[%c0_140, %c0_141] : memref<2x128xf32, #tpu.memory_space<vmem>>, vector<2x128xf32>
    tpu.vector_store %arg6[%c0_140, %c0_141], %278 {strides = array<i32>} : memref<2x128xf32, #tpu.memory_space<vmem>>, vector<2x128xf32>,
    %c0_142 = arith.constant 0 : index
    %c0_143 = arith.constant 0 : index
    %282 = vector.load %arg5[%c0_142, %c0_143] : memref<2x128xf32, #tpu.memory_space<vmem>>, vector<2x128xf32>
    tpu.vector_store %arg5[%c0_142, %c0_143], %280 {strides = array<i32>} : memref<2x128xf32, #tpu.memory_space<vmem>>, vector<2x128xf32>,
    %283 = arith.index_cast %242 : i32 to index
    %c0_144 = arith.constant 0 : index
    %c0_145 = arith.constant 0 : index
    %284 = vector.load %arg4[%283, %c0_144, %c0_145] : memref<8x2x128xf32, #tpu.memory_space<vmem>>, vector<1x2x128xf32>
    %285 = vector.shape_cast %284 : vector<1x2x128xf32> to vector<2x128xf32>
    %286 = vector.shape_cast %280 : vector<2x128xf32> to vector<1x2x128xf32>
    tpu.vector_store %arg4[%283, %c0_144, %c0_145], %286 {strides = array<i32>} : memref<8x2x128xf32, #tpu.memory_space<vmem>>, vector<1x2x128xf32>,
    %c6_i32 = arith.constant 6 : i32
    %c0_i32_146 = arith.constant 0 : i32
    %287 = arith.cmpi eq, %arg0, %c0_i32_146 : i32
    %c7_i32_147 = arith.constant 7 : i32
    %288 = arith.subi %c7_i32_147, %c6_i32 : i32
    %289 = arith.select %287, %c6_i32, %288 : i32
    %290 = arith.index_cast %289 : i32 to index
    %c0_148 = arith.constant 0 : index
    %c0_149 = arith.constant 0 : index
    %291 = vector.load %arg2[%290, %c0_148, %c0_149] : memref<8x2x512xf32, #tpu.memory_space<vmem>>, vector<1x2x512xf32>
    %292 = vector.shape_cast %291 : vector<1x2x512xf32> to vector<2x512xf32>
    %c0_150 = arith.constant 0 : index
    %c0_151 = arith.constant 0 : index
    %293 = vector.load %arg5[%c0_150, %c0_151] : memref<2x128xf32, #tpu.memory_space<vmem>>, vector<2x128xf32>
    %cst_152 = arith.constant dense<0.000000e+00> : vector<2x512xf32>
    %294 = tpu.matmul %293, %4, %cst_152 {dimension_numbers = #tpu.dot_dimension_numbers<[1], [0], [0], [1], [0, 0, 1, 1], [], []>} : vector<2x128xf32>, vector<128x512xf32>, vector<2x512xf32> -> vector<2x512xf32>
    %295 = arith.addf %292, %294 : vector<2x512xf32>
    %296 = vector.extract_strided_slice %295 {offsets = [0, 0], sizes = [2, 128], strides = [1, 1]} : vector<2x512xf32> to vector<2x128xf32>
    %cst_153 = arith.constant 5.000000e-01 : f32
    %297 = vector.broadcast %cst_153 : f32 to vector<2x128xf32>
    %298 = arith.mulf %297, %296 : vector<2x128xf32>
    %299 = math.tanh %298 : vector<2x128xf32>
    %cst_154 = arith.constant 1.000000e+00 : f32
    %300 = vector.broadcast %cst_154 : f32 to vector<2x128xf32>
    %301 = arith.addf %299, %300 : vector<2x128xf32>
    %cst_155 = arith.constant 5.000000e-01 : f32
    %302 = vector.broadcast %cst_155 : f32 to vector<2x128xf32>
    %303 = arith.mulf %302, %301 : vector<2x128xf32>
    %304 = vector.extract_strided_slice %295 {offsets = [0, 128], sizes = [2, 128], strides = [1, 1]} : vector<2x512xf32> to vector<2x128xf32>
    %cst_156 = arith.constant 5.000000e-01 : f32
    %305 = vector.broadcast %cst_156 : f32 to vector<2x128xf32>
    %306 = arith.mulf %305, %304 : vector<2x128xf32>
    %307 = math.tanh %306 : vector<2x128xf32>
    %cst_157 = arith.constant 1.000000e+00 : f32
    %308 = vector.broadcast %cst_157 : f32 to vector<2x128xf32>
    %309 = arith.addf %307, %308 : vector<2x128xf32>
    %cst_158 = arith.constant 5.000000e-01 : f32
    %310 = vector.broadcast %cst_158 : f32 to vector<2x128xf32>
    %311 = arith.mulf %310, %309 : vector<2x128xf32>
    %312 = vector.extract_strided_slice %295 {offsets = [0, 256], sizes = [2, 128], strides = [1, 1]} : vector<2x512xf32> to vector<2x128xf32>
    %313 = math.tanh %312 : vector<2x128xf32>
    %314 = vector.extract_strided_slice %295 {offsets = [0, 384], sizes = [2, 128], strides = [1, 1]} : vector<2x512xf32> to vector<2x128xf32>
    %cst_159 = arith.constant 5.000000e-01 : f32
    %315 = vector.broadcast %cst_159 : f32 to vector<2x128xf32>
    %316 = arith.mulf %315, %314 : vector<2x128xf32>
    %317 = math.tanh %316 : vector<2x128xf32>
    %cst_160 = arith.constant 1.000000e+00 : f32
    %318 = vector.broadcast %cst_160 : f32 to vector<2x128xf32>
    %319 = arith.addf %317, %318 : vector<2x128xf32>
    %cst_161 = arith.constant 5.000000e-01 : f32
    %320 = vector.broadcast %cst_161 : f32 to vector<2x128xf32>
    %321 = arith.mulf %320, %319 : vector<2x128xf32>
    %c0_162 = arith.constant 0 : index
    %c0_163 = arith.constant 0 : index
    %322 = vector.load %arg6[%c0_162, %c0_163] : memref<2x128xf32, #tpu.memory_space<vmem>>, vector<2x128xf32>
    %323 = arith.mulf %311, %322 : vector<2x128xf32>
    %324 = arith.mulf %303, %313 : vector<2x128xf32>
    %325 = arith.addf %323, %324 : vector<2x128xf32>
    %326 = math.tanh %325 : vector<2x128xf32>
    %327 = arith.mulf %321, %326 : vector<2x128xf32>
    %c0_164 = arith.constant 0 : index
    %c0_165 = arith.constant 0 : index
    %328 = vector.load %arg6[%c0_164, %c0_165] : memref<2x128xf32, #tpu.memory_space<vmem>>, vector<2x128xf32>
    tpu.vector_store %arg6[%c0_164, %c0_165], %325 {strides = array<i32>} : memref<2x128xf32, #tpu.memory_space<vmem>>, vector<2x128xf32>,
    %c0_166 = arith.constant 0 : index
    %c0_167 = arith.constant 0 : index
    %329 = vector.load %arg5[%c0_166, %c0_167] : memref<2x128xf32, #tpu.memory_space<vmem>>, vector<2x128xf32>
    tpu.vector_store %arg5[%c0_166, %c0_167], %327 {strides = array<i32>} : memref<2x128xf32, #tpu.memory_space<vmem>>, vector<2x128xf32>,
    %330 = arith.index_cast %289 : i32 to index
    %c0_168 = arith.constant 0 : index
    %c0_169 = arith.constant 0 : index
    %331 = vector.load %arg4[%330, %c0_168, %c0_169] : memref<8x2x128xf32, #tpu.memory_space<vmem>>, vector<1x2x128xf32>
    %332 = vector.shape_cast %331 : vector<1x2x128xf32> to vector<2x128xf32>
    %333 = vector.shape_cast %327 : vector<2x128xf32> to vector<1x2x128xf32>
    tpu.vector_store %arg4[%330, %c0_168, %c0_169], %333 {strides = array<i32>} : memref<8x2x128xf32, #tpu.memory_space<vmem>>, vector<1x2x128xf32>,
    %c7_i32_170 = arith.constant 7 : i32
    %c0_i32_171 = arith.constant 0 : i32
    %334 = arith.cmpi eq, %arg0, %c0_i32_171 : i32
    %c7_i32_172 = arith.constant 7 : i32
    %335 = arith.subi %c7_i32_172, %c7_i32_170 : i32
    %336 = arith.select %334, %c7_i32_170, %335 : i32
    %337 = arith.index_cast %336 : i32 to index
    %c0_173 = arith.constant 0 : index
    %c0_174 = arith.constant 0 : index
    %338 = vector.load %arg2[%337, %c0_173, %c0_174] : memref<8x2x512xf32, #tpu.memory_space<vmem>>, vector<1x2x512xf32>
    %339 = vector.shape_cast %338 : vector<1x2x512xf32> to vector<2x512xf32>
    %c0_175 = arith.constant 0 : index
    %c0_176 = arith.constant 0 : index
    %340 = vector.load %arg5[%c0_175, %c0_176] : memref<2x128xf32, #tpu.memory_space<vmem>>, vector<2x128xf32>
    %cst_177 = arith.constant dense<0.000000e+00> : vector<2x512xf32>
    %341 = tpu.matmul %340, %4, %cst_177 {dimension_numbers = #tpu.dot_dimension_numbers<[1], [0], [0], [1], [0, 0, 1, 1], [], []>} : vector<2x128xf32>, vector<128x512xf32>, vector<2x512xf32> -> vector<2x512xf32>
    %342 = arith.addf %339, %341 : vector<2x512xf32>
    %343 = vector.extract_strided_slice %342 {offsets = [0, 0], sizes = [2, 128], strides = [1, 1]} : vector<2x512xf32> to vector<2x128xf32>
    %cst_178 = arith.constant 5.000000e-01 : f32
    %344 = vector.broadcast %cst_178 : f32 to vector<2x128xf32>
    %345 = arith.mulf %344, %343 : vector<2x128xf32>
    %346 = math.tanh %345 : vector<2x128xf32>
    %cst_179 = arith.constant 1.000000e+00 : f32
    %347 = vector.broadcast %cst_179 : f32 to vector<2x128xf32>
    %348 = arith.addf %346, %347 : vector<2x128xf32>
    %cst_180 = arith.constant 5.000000e-01 : f32
    %349 = vector.broadcast %cst_180 : f32 to vector<2x128xf32>
    %350 = arith.mulf %349, %348 : vector<2x128xf32>
    %351 = vector.extract_strided_slice %342 {offsets = [0, 128], sizes = [2, 128], strides = [1, 1]} : vector<2x512xf32> to vector<2x128xf32>
    %cst_181 = arith.constant 5.000000e-01 : f32
    %352 = vector.broadcast %cst_181 : f32 to vector<2x128xf32>
    %353 = arith.mulf %352, %351 : vector<2x128xf32>
    %354 = math.tanh %353 : vector<2x128xf32>
    %cst_182 = arith.constant 1.000000e+00 : f32
    %355 = vector.broadcast %cst_182 : f32 to vector<2x128xf32>
    %356 = arith.addf %354, %355 : vector<2x128xf32>
    %cst_183 = arith.constant 5.000000e-01 : f32
    %357 = vector.broadcast %cst_183 : f32 to vector<2x128xf32>
    %358 = arith.mulf %357, %356 : vector<2x128xf32>
    %359 = vector.extract_strided_slice %342 {offsets = [0, 256], sizes = [2, 128], strides = [1, 1]} : vector<2x512xf32> to vector<2x128xf32>
    %360 = math.tanh %359 : vector<2x128xf32>
    %361 = vector.extract_strided_slice %342 {offsets = [0, 384], sizes = [2, 128], strides = [1, 1]} : vector<2x512xf32> to vector<2x128xf32>
    %cst_184 = arith.constant 5.000000e-01 : f32
    %362 = vector.broadcast %cst_184 : f32 to vector<2x128xf32>
    %363 = arith.mulf %362, %361 : vector<2x128xf32>
    %364 = math.tanh %363 : vector<2x128xf32>
    %cst_185 = arith.constant 1.000000e+00 : f32
    %365 = vector.broadcast %cst_185 : f32 to vector<2x128xf32>
    %366 = arith.addf %364, %365 : vector<2x128xf32>
    %cst_186 = arith.constant 5.000000e-01 : f32
    %367 = vector.broadcast %cst_186 : f32 to vector<2x128xf32>
    %368 = arith.mulf %367, %366 : vector<2x128xf32>
    %c0_187 = arith.constant 0 : index
    %c0_188 = arith.constant 0 : index
    %369 = vector.load %arg6[%c0_187, %c0_188] : memref<2x128xf32, #tpu.memory_space<vmem>>, vector<2x128xf32>
    %370 = arith.mulf %358, %369 : vector<2x128xf32>
    %371 = arith.mulf %350, %360 : vector<2x128xf32>
    %372 = arith.addf %370, %371 : vector<2x128xf32>
    %373 = math.tanh %372 : vector<2x128xf32>
    %374 = arith.mulf %368, %373 : vector<2x128xf32>
    %c0_189 = arith.constant 0 : index
    %c0_190 = arith.constant 0 : index
    %375 = vector.load %arg6[%c0_189, %c0_190] : memref<2x128xf32, #tpu.memory_space<vmem>>, vector<2x128xf32>
    tpu.vector_store %arg6[%c0_189, %c0_190], %372 {strides = array<i32>} : memref<2x128xf32, #tpu.memory_space<vmem>>, vector<2x128xf32>,
    %c0_191 = arith.constant 0 : index
    %c0_192 = arith.constant 0 : index
    %376 = vector.load %arg5[%c0_191, %c0_192] : memref<2x128xf32, #tpu.memory_space<vmem>>, vector<2x128xf32>
    tpu.vector_store %arg5[%c0_191, %c0_192], %374 {strides = array<i32>} : memref<2x128xf32, #tpu.memory_space<vmem>>, vector<2x128xf32>,
    %377 = arith.index_cast %336 : i32 to index
    %c0_193 = arith.constant 0 : index
    %c0_194 = arith.constant 0 : index
    %378 = vector.load %arg4[%377, %c0_193, %c0_194] : memref<8x2x128xf32, #tpu.memory_space<vmem>>, vector<1x2x128xf32>
    %379 = vector.shape_cast %378 : vector<1x2x128xf32> to vector<2x128xf32>
    %380 = vector.shape_cast %374 : vector<2x128xf32> to vector<1x2x128xf32>
    tpu.vector_store %arg4[%377, %c0_193, %c0_194], %380 {strides = array<i32>} : memref<8x2x128xf32, #tpu.memory_space<vmem>>, vector<1x2x128xf32>,
    %c8_i32 = arith.constant 8 : i32
    return
  }
  func.func @transform_0(%arg0: i32, %arg1: i32) -> (i32, i32, i32) {
    %c0_i32 = arith.constant 0 : i32
    %0 = arith.cmpi eq, %arg0, %c0_i32 : i32
    %c0_i32_0 = arith.constant 0 : i32
    %1 = arith.subi %c0_i32_0, %arg1 : i32
    %2 = arith.select %0, %arg1, %1 : i32
    %c0_i32_1 = arith.constant 0 : i32
    %c0_i32_2 = arith.constant 0 : i32
    return %2, %c0_i32_1, %arg0 : i32, i32, i32
  }
  func.func @transform_1(%arg0: i32, %arg1: i32) -> (i32, i32, i32) {
    %c0_i32 = arith.constant 0 : i32
    %c0_i32_0 = arith.constant 0 : i32
    %c0_i32_1 = arith.constant 0 : i32
    return %arg0, %c0_i32, %c0_i32_0 : i32, i32, i32
  }
  func.func @transform_2(%arg0: i32, %arg1: i32) -> (i32, i32, i32) {
    %c0_i32 = arith.constant 0 : i32
    %0 = arith.cmpi eq, %arg0, %c0_i32 : i32
    %c0_i32_0 = arith.constant 0 : i32
    %1 = arith.subi %c0_i32_0, %arg1 : i32
    %2 = arith.select %0, %arg1, %1 : i32
    %c0_i32_1 = arith.constant 0 : i32
    %c0_i32_2 = arith.constant 0 : i32
    return %2, %c0_i32_1, %arg0 : i32, i32, i32
  }
}

module attributes {stable_mosaic.version = 11 : i64} {
  func.func @_gemm_bias_kernel(%arg0: i32, %arg1: memref<16x256xf32, #tpu.memory_space<vmem>>, %arg2: memref<256x1024xf32, #tpu.memory_space<vmem>>, %arg3: memref<1x1024xf32, #tpu.memory_space<vmem>>, %arg4: memref<16x1024xf32, #tpu.memory_space<vmem>>) attributes {dimension_semantics = [#tpu.dimension_semantics<parallel>], iteration_bounds = array<i64: 1>, scalar_prefetch = 0 : i64, scratch_operands = 0 : i64, tpu.core_type = #tpu.core_type<tc>, window_params = [{transform_indices = @transform_0, window_bounds = array<i64: 16, 256>}, {pipeline_mode = #tpu.pipeline_mode<synchronous>, transform_indices = @transform_1, window_bounds = array<i64: 256, 1024>}, {pipeline_mode = #tpu.pipeline_mode<synchronous>, transform_indices = @transform_2, window_bounds = array<i64: 1, 1024>}, {transform_indices = @transform_3, window_bounds = array<i64: 16, 1024>}]} {
    %c0 = arith.constant 0 : index
    %c0_0 = arith.constant 0 : index
    %0 = vector.load %arg1[%c0, %c0_0] : memref<16x256xf32, #tpu.memory_space<vmem>>, vector<16x256xf32>
    %c0_1 = arith.constant 0 : index
    %c0_2 = arith.constant 0 : index
    %1 = vector.load %arg2[%c0_1, %c0_2] : memref<256x1024xf32, #tpu.memory_space<vmem>>, vector<256x1024xf32>
    %cst = arith.constant dense<0.000000e+00> : vector<16x1024xf32>
    %2 = tpu.matmul %0, %1, %cst {dimension_numbers = #tpu.dot_dimension_numbers<[1], [0], [0], [1], [0, 0, 1, 1], [], []>} : vector<16x256xf32>, vector<256x1024xf32>, vector<16x1024xf32> -> vector<16x1024xf32>
    %c0_3 = arith.constant 0 : index
    %c0_4 = arith.constant 0 : index
    %3 = vector.load %arg3[%c0_3, %c0_4] : memref<1x1024xf32, #tpu.memory_space<vmem>>, vector<1x1024xf32>
    %4 = vector.broadcast %3 : vector<1x1024xf32> to vector<16x1024xf32>
    %5 = arith.addf %2, %4 : vector<16x1024xf32>
    %c0_5 = arith.constant 0 : index
    %c0_6 = arith.constant 0 : index
    %6 = vector.load %arg4[%c0_5, %c0_6] : memref<16x1024xf32, #tpu.memory_space<vmem>>, vector<16x1024xf32>
    tpu.vector_store %arg4[%c0_5, %c0_6], %5 {strides = array<i32>} : memref<16x1024xf32, #tpu.memory_space<vmem>>, vector<16x1024xf32>,
    return
  }
  func.func @transform_0(%arg0: i32) -> (i32, i32) {
    %c0_i32 = arith.constant 0 : i32
    %c0_i32_0 = arith.constant 0 : i32
    return %arg0, %c0_i32 : i32, i32
  }
  func.func @transform_1(%arg0: i32) -> (i32, i32) {
    %c0_i32 = arith.constant 0 : i32
    %c0_i32_0 = arith.constant 0 : i32
    %c0_i32_1 = arith.constant 0 : i32
    return %c0_i32, %c0_i32_0 : i32, i32
  }
  func.func @transform_2(%arg0: i32) -> (i32, i32) {
    %c0_i32 = arith.constant 0 : i32
    %c0_i32_0 = arith.constant 0 : i32
    %c0_i32_1 = arith.constant 0 : i32
    return %c0_i32, %c0_i32_0 : i32, i32
  }
  func.func @transform_3(%arg0: i32) -> (i32, i32) {
    %c0_i32 = arith.constant 0 : i32
    %c0_i32_0 = arith.constant 0 : i32
    return %arg0, %c0_i32 : i32, i32
  }
}

module attributes {stable_mosaic.version = 11 : i64} {
  func.func @_bilstm_kernel(%arg0: i32, %arg1: i32, %arg2: memref<8x2x512xf32, #tpu.memory_space<vmem>>, %arg3: memref<1x128x512xf32, #tpu.memory_space<vmem>>, %arg4: memref<8x2x128xf32, #tpu.memory_space<vmem>>, %arg5: memref<2x128xf32, #tpu.memory_space<vmem>>, %arg6: memref<2x128xf32, #tpu.memory_space<vmem>>) attributes {dimension_semantics = [#tpu.dimension_semantics<parallel>, #tpu.dimension_semantics<arbitrary>], iteration_bounds = array<i64: 2, 1>, scalar_prefetch = 0 : i64, scratch_operands = 2 : i64, tpu.core_type = #tpu.core_type<tc>, window_params = [{transform_indices = @transform_0, window_bounds = array<i64: 8, 2, 512>}, {transform_indices = @transform_1, window_bounds = array<i64: 1, 128, 512>}, {transform_indices = @transform_2, window_bounds = array<i64: 8, 2, 128>}]} {
    %c0_i32 = arith.constant 0 : i32
    %0 = arith.cmpi eq, %arg1, %c0_i32 : i32
    %1 = arith.extui %0 : i1 to i32
    %c0_i32_0 = arith.constant 0 : i32
    %2 = arith.cmpi ne, %1, %c0_i32_0 : i32
    scf.if %2 {
      %cst_195 = arith.constant 0.000000e+00 : f32
      %381 = vector.broadcast %cst_195 : f32 to vector<2x128xf32>
      %c0_196 = arith.constant 0 : index
      %c0_197 = arith.constant 0 : index
      %382 = vector.load %arg5[%c0_196, %c0_197] : memref<2x128xf32, #tpu.memory_space<vmem>>, vector<2x128xf32>
      tpu.vector_store %arg5[%c0_196, %c0_197], %381 {strides = array<i32>} : memref<2x128xf32, #tpu.memory_space<vmem>>, vector<2x128xf32>,
      %cst_198 = arith.constant 0.000000e+00 : f32
      %383 = vector.broadcast %cst_198 : f32 to vector<2x128xf32>
      %c0_199 = arith.constant 0 : index
      %c0_200 = arith.constant 0 : index
      %384 = vector.load %arg6[%c0_199, %c0_200] : memref<2x128xf32, #tpu.memory_space<vmem>>, vector<2x128xf32>
      tpu.vector_store %arg6[%c0_199, %c0_200], %383 {strides = array<i32>} : memref<2x128xf32, #tpu.memory_space<vmem>>, vector<2x128xf32>,
    } else {
    }
    %c0 = arith.constant 0 : index
    %c0_1 = arith.constant 0 : index
    %c0_2 = arith.constant 0 : index
    %3 = vector.load %arg3[%c0, %c0_1, %c0_2] : memref<1x128x512xf32, #tpu.memory_space<vmem>>, vector<1x128x512xf32>
    %4 = vector.shape_cast %3 : vector<1x128x512xf32> to vector<128x512xf32>
    %c0_i32_3 = arith.constant 0 : i32
    %c0_i32_4 = arith.constant 0 : i32
    %5 = arith.cmpi eq, %arg0, %c0_i32_4 : i32
    %c7_i32 = arith.constant 7 : i32
    %6 = arith.subi %c7_i32, %c0_i32_3 : i32
    %7 = arith.select %5, %c0_i32_3, %6 : i32
    %8 = arith.index_cast %7 : i32 to index
    %c0_5 = arith.constant 0 : index
    %c0_6 = arith.constant 0 : index
    %9 = vector.load %arg2[%8, %c0_5, %c0_6] : memref<8x2x512xf32, #tpu.memory_space<vmem>>, vector<1x2x512xf32>
    %10 = vector.shape_cast %9 : vector<1x2x512xf32> to vector<2x512xf32>
    %c0_7 = arith.constant 0 : index
    %c0_8 = arith.constant 0 : index
    %11 = vector.load %arg5[%c0_7, %c0_8] : memref<2x128xf32, #tpu.memory_space<vmem>>, vector<2x128xf32>
    %cst = arith.constant dense<0.000000e+00> : vector<2x512xf32>
    %12 = tpu.matmul %11, %4, %cst {dimension_numbers = #tpu.dot_dimension_numbers<[1], [0], [0], [1], [0, 0, 1, 1], [], []>} : vector<2x128xf32>, vector<128x512xf32>, vector<2x512xf32> -> vector<2x512xf32>
    %13 = arith.addf %10, %12 : vector<2x512xf32>
    %14 = vector.extract_strided_slice %13 {offsets = [0, 0], sizes = [2, 128], strides = [1, 1]} : vector<2x512xf32> to vector<2x128xf32>
    %cst_9 = arith.constant 5.000000e-01 : f32
    %15 = vector.broadcast %cst_9 : f32 to vector<2x128xf32>
    %16 = arith.mulf %15, %14 : vector<2x128xf32>
    %17 = math.tanh %16 : vector<2x128xf32>
    %cst_10 = arith.constant 1.000000e+00 : f32
    %18 = vector.broadcast %cst_10 : f32 to vector<2x128xf32>
    %19 = arith.addf %17, %18 : vector<2x128xf32>
    %cst_11 = arith.constant 5.000000e-01 : f32
    %20 = vector.broadcast %cst_11 : f32 to vector<2x128xf32>
    %21 = arith.mulf %20, %19 : vector<2x128xf32>
    %22 = vector.extract_strided_slice %13 {offsets = [0, 128], sizes = [2, 128], strides = [1, 1]} : vector<2x512xf32> to vector<2x128xf32>
    %cst_12 = arith.constant 5.000000e-01 : f32
    %23 = vector.broadcast %cst_12 : f32 to vector<2x128xf32>
    %24 = arith.mulf %23, %22 : vector<2x128xf32>
    %25 = math.tanh %24 : vector<2x128xf32>
    %cst_13 = arith.constant 1.000000e+00 : f32
    %26 = vector.broadcast %cst_13 : f32 to vector<2x128xf32>
    %27 = arith.addf %25, %26 : vector<2x128xf32>
    %cst_14 = arith.constant 5.000000e-01 : f32
    %28 = vector.broadcast %cst_14 : f32 to vector<2x128xf32>
    %29 = arith.mulf %28, %27 : vector<2x128xf32>
    %30 = vector.extract_strided_slice %13 {offsets = [0, 256], sizes = [2, 128], strides = [1, 1]} : vector<2x512xf32> to vector<2x128xf32>
    %31 = math.tanh %30 : vector<2x128xf32>
    %32 = vector.extract_strided_slice %13 {offsets = [0, 384], sizes = [2, 128], strides = [1, 1]} : vector<2x512xf32> to vector<2x128xf32>
    %cst_15 = arith.constant 5.000000e-01 : f32
    %33 = vector.broadcast %cst_15 : f32 to vector<2x128xf32>
    %34 = arith.mulf %33, %32 : vector<2x128xf32>
    %35 = math.tanh %34 : vector<2x128xf32>
    %cst_16 = arith.constant 1.000000e+00 : f32
    %36 = vector.broadcast %cst_16 : f32 to vector<2x128xf32>
    %37 = arith.addf %35, %36 : vector<2x128xf32>
    %cst_17 = arith.constant 5.000000e-01 : f32
    %38 = vector.broadcast %cst_17 : f32 to vector<2x128xf32>
    %39 = arith.mulf %38, %37 : vector<2x128xf32>
    %c0_18 = arith.constant 0 : index
    %c0_19 = arith.constant 0 : index
    %40 = vector.load %arg6[%c0_18, %c0_19] : memref<2x128xf32, #tpu.memory_space<vmem>>, vector<2x128xf32>
    %41 = arith.mulf %29, %40 : vector<2x128xf32>
    %42 = arith.mulf %21, %31 : vector<2x128xf32>
    %43 = arith.addf %41, %42 : vector<2x128xf32>
    %44 = math.tanh %43 : vector<2x128xf32>
    %45 = arith.mulf %39, %44 : vector<2x128xf32>
    %c0_20 = arith.constant 0 : index
    %c0_21 = arith.constant 0 : index
    %46 = vector.load %arg6[%c0_20, %c0_21] : memref<2x128xf32, #tpu.memory_space<vmem>>, vector<2x128xf32>
    tpu.vector_store %arg6[%c0_20, %c0_21], %43 {strides = array<i32>} : memref<2x128xf32, #tpu.memory_space<vmem>>, vector<2x128xf32>,
    %c0_22 = arith.constant 0 : index
    %c0_23 = arith.constant 0 : index
    %47 = vector.load %arg5[%c0_22, %c0_23] : memref<2x128xf32, #tpu.memory_space<vmem>>, vector<2x128xf32>
    tpu.vector_store %arg5[%c0_22, %c0_23], %45 {strides = array<i32>} : memref<2x128xf32, #tpu.memory_space<vmem>>, vector<2x128xf32>,
    %48 = arith.index_cast %7 : i32 to index
    %c0_24 = arith.constant 0 : index
    %c0_25 = arith.constant 0 : index
    %49 = vector.load %arg4[%48, %c0_24, %c0_25] : memref<8x2x128xf32, #tpu.memory_space<vmem>>, vector<1x2x128xf32>
    %50 = vector.shape_cast %49 : vector<1x2x128xf32> to vector<2x128xf32>
    %51 = vector.shape_cast %45 : vector<2x128xf32> to vector<1x2x128xf32>
    tpu.vector_store %arg4[%48, %c0_24, %c0_25], %51 {strides = array<i32>} : memref<8x2x128xf32, #tpu.memory_space<vmem>>, vector<1x2x128xf32>,
    %c1_i32 = arith.constant 1 : i32
    %c0_i32_26 = arith.constant 0 : i32
    %52 = arith.cmpi eq, %arg0, %c0_i32_26 : i32
    %c7_i32_27 = arith.constant 7 : i32
    %53 = arith.subi %c7_i32_27, %c1_i32 : i32
    %54 = arith.select %52, %c1_i32, %53 : i32
    %55 = arith.index_cast %54 : i32 to index
    %c0_28 = arith.constant 0 : index
    %c0_29 = arith.constant 0 : index
    %56 = vector.load %arg2[%55, %c0_28, %c0_29] : memref<8x2x512xf32, #tpu.memory_space<vmem>>, vector<1x2x512xf32>
    %57 = vector.shape_cast %56 : vector<1x2x512xf32> to vector<2x512xf32>
    %c0_30 = arith.constant 0 : index
    %c0_31 = arith.constant 0 : index
    %58 = vector.load %arg5[%c0_30, %c0_31] : memref<2x128xf32, #tpu.memory_space<vmem>>, vector<2x128xf32>
    %cst_32 = arith.constant dense<0.000000e+00> : vector<2x512xf32>
    %59 = tpu.matmul %58, %4, %cst_32 {dimension_numbers = #tpu.dot_dimension_numbers<[1], [0], [0], [1], [0, 0, 1, 1], [], []>} : vector<2x128xf32>, vector<128x512xf32>, vector<2x512xf32> -> vector<2x512xf32>
    %60 = arith.addf %57, %59 : vector<2x512xf32>
    %61 = vector.extract_strided_slice %60 {offsets = [0, 0], sizes = [2, 128], strides = [1, 1]} : vector<2x512xf32> to vector<2x128xf32>
    %cst_33 = arith.constant 5.000000e-01 : f32
    %62 = vector.broadcast %cst_33 : f32 to vector<2x128xf32>
    %63 = arith.mulf %62, %61 : vector<2x128xf32>
    %64 = math.tanh %63 : vector<2x128xf32>
    %cst_34 = arith.constant 1.000000e+00 : f32
    %65 = vector.broadcast %cst_34 : f32 to vector<2x128xf32>
    %66 = arith.addf %64, %65 : vector<2x128xf32>
    %cst_35 = arith.constant 5.000000e-01 : f32
    %67 = vector.broadcast %cst_35 : f32 to vector<2x128xf32>
    %68 = arith.mulf %67, %66 : vector<2x128xf32>
    %69 = vector.extract_strided_slice %60 {offsets = [0, 128], sizes = [2, 128], strides = [1, 1]} : vector<2x512xf32> to vector<2x128xf32>
    %cst_36 = arith.constant 5.000000e-01 : f32
    %70 = vector.broadcast %cst_36 : f32 to vector<2x128xf32>
    %71 = arith.mulf %70, %69 : vector<2x128xf32>
    %72 = math.tanh %71 : vector<2x128xf32>
    %cst_37 = arith.constant 1.000000e+00 : f32
    %73 = vector.broadcast %cst_37 : f32 to vector<2x128xf32>
    %74 = arith.addf %72, %73 : vector<2x128xf32>
    %cst_38 = arith.constant 5.000000e-01 : f32
    %75 = vector.broadcast %cst_38 : f32 to vector<2x128xf32>
    %76 = arith.mulf %75, %74 : vector<2x128xf32>
    %77 = vector.extract_strided_slice %60 {offsets = [0, 256], sizes = [2, 128], strides = [1, 1]} : vector<2x512xf32> to vector<2x128xf32>
    %78 = math.tanh %77 : vector<2x128xf32>
    %79 = vector.extract_strided_slice %60 {offsets = [0, 384], sizes = [2, 128], strides = [1, 1]} : vector<2x512xf32> to vector<2x128xf32>
    %cst_39 = arith.constant 5.000000e-01 : f32
    %80 = vector.broadcast %cst_39 : f32 to vector<2x128xf32>
    %81 = arith.mulf %80, %79 : vector<2x128xf32>
    %82 = math.tanh %81 : vector<2x128xf32>
    %cst_40 = arith.constant 1.000000e+00 : f32
    %83 = vector.broadcast %cst_40 : f32 to vector<2x128xf32>
    %84 = arith.addf %82, %83 : vector<2x128xf32>
    %cst_41 = arith.constant 5.000000e-01 : f32
    %85 = vector.broadcast %cst_41 : f32 to vector<2x128xf32>
    %86 = arith.mulf %85, %84 : vector<2x128xf32>
    %c0_42 = arith.constant 0 : index
    %c0_43 = arith.constant 0 : index
    %87 = vector.load %arg6[%c0_42, %c0_43] : memref<2x128xf32, #tpu.memory_space<vmem>>, vector<2x128xf32>
    %88 = arith.mulf %76, %87 : vector<2x128xf32>
    %89 = arith.mulf %68, %78 : vector<2x128xf32>
    %90 = arith.addf %88, %89 : vector<2x128xf32>
    %91 = math.tanh %90 : vector<2x128xf32>
    %92 = arith.mulf %86, %91 : vector<2x128xf32>
    %c0_44 = arith.constant 0 : index
    %c0_45 = arith.constant 0 : index
    %93 = vector.load %arg6[%c0_44, %c0_45] : memref<2x128xf32, #tpu.memory_space<vmem>>, vector<2x128xf32>
    tpu.vector_store %arg6[%c0_44, %c0_45], %90 {strides = array<i32>} : memref<2x128xf32, #tpu.memory_space<vmem>>, vector<2x128xf32>,
    %c0_46 = arith.constant 0 : index
    %c0_47 = arith.constant 0 : index
    %94 = vector.load %arg5[%c0_46, %c0_47] : memref<2x128xf32, #tpu.memory_space<vmem>>, vector<2x128xf32>
    tpu.vector_store %arg5[%c0_46, %c0_47], %92 {strides = array<i32>} : memref<2x128xf32, #tpu.memory_space<vmem>>, vector<2x128xf32>,
    %95 = arith.index_cast %54 : i32 to index
    %c0_48 = arith.constant 0 : index
    %c0_49 = arith.constant 0 : index
    %96 = vector.load %arg4[%95, %c0_48, %c0_49] : memref<8x2x128xf32, #tpu.memory_space<vmem>>, vector<1x2x128xf32>
    %97 = vector.shape_cast %96 : vector<1x2x128xf32> to vector<2x128xf32>
    %98 = vector.shape_cast %92 : vector<2x128xf32> to vector<1x2x128xf32>
    tpu.vector_store %arg4[%95, %c0_48, %c0_49], %98 {strides = array<i32>} : memref<8x2x128xf32, #tpu.memory_space<vmem>>, vector<1x2x128xf32>,
    %c2_i32 = arith.constant 2 : i32
    %c0_i32_50 = arith.constant 0 : i32
    %99 = arith.cmpi eq, %arg0, %c0_i32_50 : i32
    %c7_i32_51 = arith.constant 7 : i32
    %100 = arith.subi %c7_i32_51, %c2_i32 : i32
    %101 = arith.select %99, %c2_i32, %100 : i32
    %102 = arith.index_cast %101 : i32 to index
    %c0_52 = arith.constant 0 : index
    %c0_53 = arith.constant 0 : index
    %103 = vector.load %arg2[%102, %c0_52, %c0_53] : memref<8x2x512xf32, #tpu.memory_space<vmem>>, vector<1x2x512xf32>
    %104 = vector.shape_cast %103 : vector<1x2x512xf32> to vector<2x512xf32>
    %c0_54 = arith.constant 0 : index
    %c0_55 = arith.constant 0 : index
    %105 = vector.load %arg5[%c0_54, %c0_55] : memref<2x128xf32, #tpu.memory_space<vmem>>, vector<2x128xf32>
    %cst_56 = arith.constant dense<0.000000e+00> : vector<2x512xf32>
    %106 = tpu.matmul %105, %4, %cst_56 {dimension_numbers = #tpu.dot_dimension_numbers<[1], [0], [0], [1], [0, 0, 1, 1], [], []>} : vector<2x128xf32>, vector<128x512xf32>, vector<2x512xf32> -> vector<2x512xf32>
    %107 = arith.addf %104, %106 : vector<2x512xf32>
    %108 = vector.extract_strided_slice %107 {offsets = [0, 0], sizes = [2, 128], strides = [1, 1]} : vector<2x512xf32> to vector<2x128xf32>
    %cst_57 = arith.constant 5.000000e-01 : f32
    %109 = vector.broadcast %cst_57 : f32 to vector<2x128xf32>
    %110 = arith.mulf %109, %108 : vector<2x128xf32>
    %111 = math.tanh %110 : vector<2x128xf32>
    %cst_58 = arith.constant 1.000000e+00 : f32
    %112 = vector.broadcast %cst_58 : f32 to vector<2x128xf32>
    %113 = arith.addf %111, %112 : vector<2x128xf32>
    %cst_59 = arith.constant 5.000000e-01 : f32
    %114 = vector.broadcast %cst_59 : f32 to vector<2x128xf32>
    %115 = arith.mulf %114, %113 : vector<2x128xf32>
    %116 = vector.extract_strided_slice %107 {offsets = [0, 128], sizes = [2, 128], strides = [1, 1]} : vector<2x512xf32> to vector<2x128xf32>
    %cst_60 = arith.constant 5.000000e-01 : f32
    %117 = vector.broadcast %cst_60 : f32 to vector<2x128xf32>
    %118 = arith.mulf %117, %116 : vector<2x128xf32>
    %119 = math.tanh %118 : vector<2x128xf32>
    %cst_61 = arith.constant 1.000000e+00 : f32
    %120 = vector.broadcast %cst_61 : f32 to vector<2x128xf32>
    %121 = arith.addf %119, %120 : vector<2x128xf32>
    %cst_62 = arith.constant 5.000000e-01 : f32
    %122 = vector.broadcast %cst_62 : f32 to vector<2x128xf32>
    %123 = arith.mulf %122, %121 : vector<2x128xf32>
    %124 = vector.extract_strided_slice %107 {offsets = [0, 256], sizes = [2, 128], strides = [1, 1]} : vector<2x512xf32> to vector<2x128xf32>
    %125 = math.tanh %124 : vector<2x128xf32>
    %126 = vector.extract_strided_slice %107 {offsets = [0, 384], sizes = [2, 128], strides = [1, 1]} : vector<2x512xf32> to vector<2x128xf32>
    %cst_63 = arith.constant 5.000000e-01 : f32
    %127 = vector.broadcast %cst_63 : f32 to vector<2x128xf32>
    %128 = arith.mulf %127, %126 : vector<2x128xf32>
    %129 = math.tanh %128 : vector<2x128xf32>
    %cst_64 = arith.constant 1.000000e+00 : f32
    %130 = vector.broadcast %cst_64 : f32 to vector<2x128xf32>
    %131 = arith.addf %129, %130 : vector<2x128xf32>
    %cst_65 = arith.constant 5.000000e-01 : f32
    %132 = vector.broadcast %cst_65 : f32 to vector<2x128xf32>
    %133 = arith.mulf %132, %131 : vector<2x128xf32>
    %c0_66 = arith.constant 0 : index
    %c0_67 = arith.constant 0 : index
    %134 = vector.load %arg6[%c0_66, %c0_67] : memref<2x128xf32, #tpu.memory_space<vmem>>, vector<2x128xf32>
    %135 = arith.mulf %123, %134 : vector<2x128xf32>
    %136 = arith.mulf %115, %125 : vector<2x128xf32>
    %137 = arith.addf %135, %136 : vector<2x128xf32>
    %138 = math.tanh %137 : vector<2x128xf32>
    %139 = arith.mulf %133, %138 : vector<2x128xf32>
    %c0_68 = arith.constant 0 : index
    %c0_69 = arith.constant 0 : index
    %140 = vector.load %arg6[%c0_68, %c0_69] : memref<2x128xf32, #tpu.memory_space<vmem>>, vector<2x128xf32>
    tpu.vector_store %arg6[%c0_68, %c0_69], %137 {strides = array<i32>} : memref<2x128xf32, #tpu.memory_space<vmem>>, vector<2x128xf32>,
    %c0_70 = arith.constant 0 : index
    %c0_71 = arith.constant 0 : index
    %141 = vector.load %arg5[%c0_70, %c0_71] : memref<2x128xf32, #tpu.memory_space<vmem>>, vector<2x128xf32>
    tpu.vector_store %arg5[%c0_70, %c0_71], %139 {strides = array<i32>} : memref<2x128xf32, #tpu.memory_space<vmem>>, vector<2x128xf32>,
    %142 = arith.index_cast %101 : i32 to index
    %c0_72 = arith.constant 0 : index
    %c0_73 = arith.constant 0 : index
    %143 = vector.load %arg4[%142, %c0_72, %c0_73] : memref<8x2x128xf32, #tpu.memory_space<vmem>>, vector<1x2x128xf32>
    %144 = vector.shape_cast %143 : vector<1x2x128xf32> to vector<2x128xf32>
    %145 = vector.shape_cast %139 : vector<2x128xf32> to vector<1x2x128xf32>
    tpu.vector_store %arg4[%142, %c0_72, %c0_73], %145 {strides = array<i32>} : memref<8x2x128xf32, #tpu.memory_space<vmem>>, vector<1x2x128xf32>,
    %c3_i32 = arith.constant 3 : i32
    %c0_i32_74 = arith.constant 0 : i32
    %146 = arith.cmpi eq, %arg0, %c0_i32_74 : i32
    %c7_i32_75 = arith.constant 7 : i32
    %147 = arith.subi %c7_i32_75, %c3_i32 : i32
    %148 = arith.select %146, %c3_i32, %147 : i32
    %149 = arith.index_cast %148 : i32 to index
    %c0_76 = arith.constant 0 : index
    %c0_77 = arith.constant 0 : index
    %150 = vector.load %arg2[%149, %c0_76, %c0_77] : memref<8x2x512xf32, #tpu.memory_space<vmem>>, vector<1x2x512xf32>
    %151 = vector.shape_cast %150 : vector<1x2x512xf32> to vector<2x512xf32>
    %c0_78 = arith.constant 0 : index
    %c0_79 = arith.constant 0 : index
    %152 = vector.load %arg5[%c0_78, %c0_79] : memref<2x128xf32, #tpu.memory_space<vmem>>, vector<2x128xf32>
    %cst_80 = arith.constant dense<0.000000e+00> : vector<2x512xf32>
    %153 = tpu.matmul %152, %4, %cst_80 {dimension_numbers = #tpu.dot_dimension_numbers<[1], [0], [0], [1], [0, 0, 1, 1], [], []>} : vector<2x128xf32>, vector<128x512xf32>, vector<2x512xf32> -> vector<2x512xf32>
    %154 = arith.addf %151, %153 : vector<2x512xf32>
    %155 = vector.extract_strided_slice %154 {offsets = [0, 0], sizes = [2, 128], strides = [1, 1]} : vector<2x512xf32> to vector<2x128xf32>
    %cst_81 = arith.constant 5.000000e-01 : f32
    %156 = vector.broadcast %cst_81 : f32 to vector<2x128xf32>
    %157 = arith.mulf %156, %155 : vector<2x128xf32>
    %158 = math.tanh %157 : vector<2x128xf32>
    %cst_82 = arith.constant 1.000000e+00 : f32
    %159 = vector.broadcast %cst_82 : f32 to vector<2x128xf32>
    %160 = arith.addf %158, %159 : vector<2x128xf32>
    %cst_83 = arith.constant 5.000000e-01 : f32
    %161 = vector.broadcast %cst_83 : f32 to vector<2x128xf32>
    %162 = arith.mulf %161, %160 : vector<2x128xf32>
    %163 = vector.extract_strided_slice %154 {offsets = [0, 128], sizes = [2, 128], strides = [1, 1]} : vector<2x512xf32> to vector<2x128xf32>
    %cst_84 = arith.constant 5.000000e-01 : f32
    %164 = vector.broadcast %cst_84 : f32 to vector<2x128xf32>
    %165 = arith.mulf %164, %163 : vector<2x128xf32>
    %166 = math.tanh %165 : vector<2x128xf32>
    %cst_85 = arith.constant 1.000000e+00 : f32
    %167 = vector.broadcast %cst_85 : f32 to vector<2x128xf32>
    %168 = arith.addf %166, %167 : vector<2x128xf32>
    %cst_86 = arith.constant 5.000000e-01 : f32
    %169 = vector.broadcast %cst_86 : f32 to vector<2x128xf32>
    %170 = arith.mulf %169, %168 : vector<2x128xf32>
    %171 = vector.extract_strided_slice %154 {offsets = [0, 256], sizes = [2, 128], strides = [1, 1]} : vector<2x512xf32> to vector<2x128xf32>
    %172 = math.tanh %171 : vector<2x128xf32>
    %173 = vector.extract_strided_slice %154 {offsets = [0, 384], sizes = [2, 128], strides = [1, 1]} : vector<2x512xf32> to vector<2x128xf32>
    %cst_87 = arith.constant 5.000000e-01 : f32
    %174 = vector.broadcast %cst_87 : f32 to vector<2x128xf32>
    %175 = arith.mulf %174, %173 : vector<2x128xf32>
    %176 = math.tanh %175 : vector<2x128xf32>
    %cst_88 = arith.constant 1.000000e+00 : f32
    %177 = vector.broadcast %cst_88 : f32 to vector<2x128xf32>
    %178 = arith.addf %176, %177 : vector<2x128xf32>
    %cst_89 = arith.constant 5.000000e-01 : f32
    %179 = vector.broadcast %cst_89 : f32 to vector<2x128xf32>
    %180 = arith.mulf %179, %178 : vector<2x128xf32>
    %c0_90 = arith.constant 0 : index
    %c0_91 = arith.constant 0 : index
    %181 = vector.load %arg6[%c0_90, %c0_91] : memref<2x128xf32, #tpu.memory_space<vmem>>, vector<2x128xf32>
    %182 = arith.mulf %170, %181 : vector<2x128xf32>
    %183 = arith.mulf %162, %172 : vector<2x128xf32>
    %184 = arith.addf %182, %183 : vector<2x128xf32>
    %185 = math.tanh %184 : vector<2x128xf32>
    %186 = arith.mulf %180, %185 : vector<2x128xf32>
    %c0_92 = arith.constant 0 : index
    %c0_93 = arith.constant 0 : index
    %187 = vector.load %arg6[%c0_92, %c0_93] : memref<2x128xf32, #tpu.memory_space<vmem>>, vector<2x128xf32>
    tpu.vector_store %arg6[%c0_92, %c0_93], %184 {strides = array<i32>} : memref<2x128xf32, #tpu.memory_space<vmem>>, vector<2x128xf32>,
    %c0_94 = arith.constant 0 : index
    %c0_95 = arith.constant 0 : index
    %188 = vector.load %arg5[%c0_94, %c0_95] : memref<2x128xf32, #tpu.memory_space<vmem>>, vector<2x128xf32>
    tpu.vector_store %arg5[%c0_94, %c0_95], %186 {strides = array<i32>} : memref<2x128xf32, #tpu.memory_space<vmem>>, vector<2x128xf32>,
    %189 = arith.index_cast %148 : i32 to index
    %c0_96 = arith.constant 0 : index
    %c0_97 = arith.constant 0 : index
    %190 = vector.load %arg4[%189, %c0_96, %c0_97] : memref<8x2x128xf32, #tpu.memory_space<vmem>>, vector<1x2x128xf32>
    %191 = vector.shape_cast %190 : vector<1x2x128xf32> to vector<2x128xf32>
    %192 = vector.shape_cast %186 : vector<2x128xf32> to vector<1x2x128xf32>
    tpu.vector_store %arg4[%189, %c0_96, %c0_97], %192 {strides = array<i32>} : memref<8x2x128xf32, #tpu.memory_space<vmem>>, vector<1x2x128xf32>,
    %c4_i32 = arith.constant 4 : i32
    %c0_i32_98 = arith.constant 0 : i32
    %193 = arith.cmpi eq, %arg0, %c0_i32_98 : i32
    %c7_i32_99 = arith.constant 7 : i32
    %194 = arith.subi %c7_i32_99, %c4_i32 : i32
    %195 = arith.select %193, %c4_i32, %194 : i32
    %196 = arith.index_cast %195 : i32 to index
    %c0_100 = arith.constant 0 : index
    %c0_101 = arith.constant 0 : index
    %197 = vector.load %arg2[%196, %c0_100, %c0_101] : memref<8x2x512xf32, #tpu.memory_space<vmem>>, vector<1x2x512xf32>
    %198 = vector.shape_cast %197 : vector<1x2x512xf32> to vector<2x512xf32>
    %c0_102 = arith.constant 0 : index
    %c0_103 = arith.constant 0 : index
    %199 = vector.load %arg5[%c0_102, %c0_103] : memref<2x128xf32, #tpu.memory_space<vmem>>, vector<2x128xf32>
    %cst_104 = arith.constant dense<0.000000e+00> : vector<2x512xf32>
    %200 = tpu.matmul %199, %4, %cst_104 {dimension_numbers = #tpu.dot_dimension_numbers<[1], [0], [0], [1], [0, 0, 1, 1], [], []>} : vector<2x128xf32>, vector<128x512xf32>, vector<2x512xf32> -> vector<2x512xf32>
    %201 = arith.addf %198, %200 : vector<2x512xf32>
    %202 = vector.extract_strided_slice %201 {offsets = [0, 0], sizes = [2, 128], strides = [1, 1]} : vector<2x512xf32> to vector<2x128xf32>
    %cst_105 = arith.constant 5.000000e-01 : f32
    %203 = vector.broadcast %cst_105 : f32 to vector<2x128xf32>
    %204 = arith.mulf %203, %202 : vector<2x128xf32>
    %205 = math.tanh %204 : vector<2x128xf32>
    %cst_106 = arith.constant 1.000000e+00 : f32
    %206 = vector.broadcast %cst_106 : f32 to vector<2x128xf32>
    %207 = arith.addf %205, %206 : vector<2x128xf32>
    %cst_107 = arith.constant 5.000000e-01 : f32
    %208 = vector.broadcast %cst_107 : f32 to vector<2x128xf32>
    %209 = arith.mulf %208, %207 : vector<2x128xf32>
    %210 = vector.extract_strided_slice %201 {offsets = [0, 128], sizes = [2, 128], strides = [1, 1]} : vector<2x512xf32> to vector<2x128xf32>
    %cst_108 = arith.constant 5.000000e-01 : f32
    %211 = vector.broadcast %cst_108 : f32 to vector<2x128xf32>
    %212 = arith.mulf %211, %210 : vector<2x128xf32>
    %213 = math.tanh %212 : vector<2x128xf32>
    %cst_109 = arith.constant 1.000000e+00 : f32
    %214 = vector.broadcast %cst_109 : f32 to vector<2x128xf32>
    %215 = arith.addf %213, %214 : vector<2x128xf32>
    %cst_110 = arith.constant 5.000000e-01 : f32
    %216 = vector.broadcast %cst_110 : f32 to vector<2x128xf32>
    %217 = arith.mulf %216, %215 : vector<2x128xf32>
    %218 = vector.extract_strided_slice %201 {offsets = [0, 256], sizes = [2, 128], strides = [1, 1]} : vector<2x512xf32> to vector<2x128xf32>
    %219 = math.tanh %218 : vector<2x128xf32>
    %220 = vector.extract_strided_slice %201 {offsets = [0, 384], sizes = [2, 128], strides = [1, 1]} : vector<2x512xf32> to vector<2x128xf32>
    %cst_111 = arith.constant 5.000000e-01 : f32
    %221 = vector.broadcast %cst_111 : f32 to vector<2x128xf32>
    %222 = arith.mulf %221, %220 : vector<2x128xf32>
    %223 = math.tanh %222 : vector<2x128xf32>
    %cst_112 = arith.constant 1.000000e+00 : f32
    %224 = vector.broadcast %cst_112 : f32 to vector<2x128xf32>
    %225 = arith.addf %223, %224 : vector<2x128xf32>
    %cst_113 = arith.constant 5.000000e-01 : f32
    %226 = vector.broadcast %cst_113 : f32 to vector<2x128xf32>
    %227 = arith.mulf %226, %225 : vector<2x128xf32>
    %c0_114 = arith.constant 0 : index
    %c0_115 = arith.constant 0 : index
    %228 = vector.load %arg6[%c0_114, %c0_115] : memref<2x128xf32, #tpu.memory_space<vmem>>, vector<2x128xf32>
    %229 = arith.mulf %217, %228 : vector<2x128xf32>
    %230 = arith.mulf %209, %219 : vector<2x128xf32>
    %231 = arith.addf %229, %230 : vector<2x128xf32>
    %232 = math.tanh %231 : vector<2x128xf32>
    %233 = arith.mulf %227, %232 : vector<2x128xf32>
    %c0_116 = arith.constant 0 : index
    %c0_117 = arith.constant 0 : index
    %234 = vector.load %arg6[%c0_116, %c0_117] : memref<2x128xf32, #tpu.memory_space<vmem>>, vector<2x128xf32>
    tpu.vector_store %arg6[%c0_116, %c0_117], %231 {strides = array<i32>} : memref<2x128xf32, #tpu.memory_space<vmem>>, vector<2x128xf32>,
    %c0_118 = arith.constant 0 : index
    %c0_119 = arith.constant 0 : index
    %235 = vector.load %arg5[%c0_118, %c0_119] : memref<2x128xf32, #tpu.memory_space<vmem>>, vector<2x128xf32>
    tpu.vector_store %arg5[%c0_118, %c0_119], %233 {strides = array<i32>} : memref<2x128xf32, #tpu.memory_space<vmem>>, vector<2x128xf32>,
    %236 = arith.index_cast %195 : i32 to index
    %c0_120 = arith.constant 0 : index
    %c0_121 = arith.constant 0 : index
    %237 = vector.load %arg4[%236, %c0_120, %c0_121] : memref<8x2x128xf32, #tpu.memory_space<vmem>>, vector<1x2x128xf32>
    %238 = vector.shape_cast %237 : vector<1x2x128xf32> to vector<2x128xf32>
    %239 = vector.shape_cast %233 : vector<2x128xf32> to vector<1x2x128xf32>
    tpu.vector_store %arg4[%236, %c0_120, %c0_121], %239 {strides = array<i32>} : memref<8x2x128xf32, #tpu.memory_space<vmem>>, vector<1x2x128xf32>,
    %c5_i32 = arith.constant 5 : i32
    %c0_i32_122 = arith.constant 0 : i32
    %240 = arith.cmpi eq, %arg0, %c0_i32_122 : i32
    %c7_i32_123 = arith.constant 7 : i32
    %241 = arith.subi %c7_i32_123, %c5_i32 : i32
    %242 = arith.select %240, %c5_i32, %241 : i32
    %243 = arith.index_cast %242 : i32 to index
    %c0_124 = arith.constant 0 : index
    %c0_125 = arith.constant 0 : index
    %244 = vector.load %arg2[%243, %c0_124, %c0_125] : memref<8x2x512xf32, #tpu.memory_space<vmem>>, vector<1x2x512xf32>
    %245 = vector.shape_cast %244 : vector<1x2x512xf32> to vector<2x512xf32>
    %c0_126 = arith.constant 0 : index
    %c0_127 = arith.constant 0 : index
    %246 = vector.load %arg5[%c0_126, %c0_127] : memref<2x128xf32, #tpu.memory_space<vmem>>, vector<2x128xf32>
    %cst_128 = arith.constant dense<0.000000e+00> : vector<2x512xf32>
    %247 = tpu.matmul %246, %4, %cst_128 {dimension_numbers = #tpu.dot_dimension_numbers<[1], [0], [0], [1], [0, 0, 1, 1], [], []>} : vector<2x128xf32>, vector<128x512xf32>, vector<2x512xf32> -> vector<2x512xf32>
    %248 = arith.addf %245, %247 : vector<2x512xf32>
    %249 = vector.extract_strided_slice %248 {offsets = [0, 0], sizes = [2, 128], strides = [1, 1]} : vector<2x512xf32> to vector<2x128xf32>
    %cst_129 = arith.constant 5.000000e-01 : f32
    %250 = vector.broadcast %cst_129 : f32 to vector<2x128xf32>
    %251 = arith.mulf %250, %249 : vector<2x128xf32>
    %252 = math.tanh %251 : vector<2x128xf32>
    %cst_130 = arith.constant 1.000000e+00 : f32
    %253 = vector.broadcast %cst_130 : f32 to vector<2x128xf32>
    %254 = arith.addf %252, %253 : vector<2x128xf32>
    %cst_131 = arith.constant 5.000000e-01 : f32
    %255 = vector.broadcast %cst_131 : f32 to vector<2x128xf32>
    %256 = arith.mulf %255, %254 : vector<2x128xf32>
    %257 = vector.extract_strided_slice %248 {offsets = [0, 128], sizes = [2, 128], strides = [1, 1]} : vector<2x512xf32> to vector<2x128xf32>
    %cst_132 = arith.constant 5.000000e-01 : f32
    %258 = vector.broadcast %cst_132 : f32 to vector<2x128xf32>
    %259 = arith.mulf %258, %257 : vector<2x128xf32>
    %260 = math.tanh %259 : vector<2x128xf32>
    %cst_133 = arith.constant 1.000000e+00 : f32
    %261 = vector.broadcast %cst_133 : f32 to vector<2x128xf32>
    %262 = arith.addf %260, %261 : vector<2x128xf32>
    %cst_134 = arith.constant 5.000000e-01 : f32
    %263 = vector.broadcast %cst_134 : f32 to vector<2x128xf32>
    %264 = arith.mulf %263, %262 : vector<2x128xf32>
    %265 = vector.extract_strided_slice %248 {offsets = [0, 256], sizes = [2, 128], strides = [1, 1]} : vector<2x512xf32> to vector<2x128xf32>
    %266 = math.tanh %265 : vector<2x128xf32>
    %267 = vector.extract_strided_slice %248 {offsets = [0, 384], sizes = [2, 128], strides = [1, 1]} : vector<2x512xf32> to vector<2x128xf32>
    %cst_135 = arith.constant 5.000000e-01 : f32
    %268 = vector.broadcast %cst_135 : f32 to vector<2x128xf32>
    %269 = arith.mulf %268, %267 : vector<2x128xf32>
    %270 = math.tanh %269 : vector<2x128xf32>
    %cst_136 = arith.constant 1.000000e+00 : f32
    %271 = vector.broadcast %cst_136 : f32 to vector<2x128xf32>
    %272 = arith.addf %270, %271 : vector<2x128xf32>
    %cst_137 = arith.constant 5.000000e-01 : f32
    %273 = vector.broadcast %cst_137 : f32 to vector<2x128xf32>
    %274 = arith.mulf %273, %272 : vector<2x128xf32>
    %c0_138 = arith.constant 0 : index
    %c0_139 = arith.constant 0 : index
    %275 = vector.load %arg6[%c0_138, %c0_139] : memref<2x128xf32, #tpu.memory_space<vmem>>, vector<2x128xf32>
    %276 = arith.mulf %264, %275 : vector<2x128xf32>
    %277 = arith.mulf %256, %266 : vector<2x128xf32>
    %278 = arith.addf %276, %277 : vector<2x128xf32>
    %279 = math.tanh %278 : vector<2x128xf32>
    %280 = arith.mulf %274, %279 : vector<2x128xf32>
    %c0_140 = arith.constant 0 : index
    %c0_141 = arith.constant 0 : index
    %281 = vector.load %arg6[%c0_140, %c0_141] : memref<2x128xf32, #tpu.memory_space<vmem>>, vector<2x128xf32>
    tpu.vector_store %arg6[%c0_140, %c0_141], %278 {strides = array<i32>} : memref<2x128xf32, #tpu.memory_space<vmem>>, vector<2x128xf32>,
    %c0_142 = arith.constant 0 : index
    %c0_143 = arith.constant 0 : index
    %282 = vector.load %arg5[%c0_142, %c0_143] : memref<2x128xf32, #tpu.memory_space<vmem>>, vector<2x128xf32>
    tpu.vector_store %arg5[%c0_142, %c0_143], %280 {strides = array<i32>} : memref<2x128xf32, #tpu.memory_space<vmem>>, vector<2x128xf32>,
    %283 = arith.index_cast %242 : i32 to index
    %c0_144 = arith.constant 0 : index
    %c0_145 = arith.constant 0 : index
    %284 = vector.load %arg4[%283, %c0_144, %c0_145] : memref<8x2x128xf32, #tpu.memory_space<vmem>>, vector<1x2x128xf32>
    %285 = vector.shape_cast %284 : vector<1x2x128xf32> to vector<2x128xf32>
    %286 = vector.shape_cast %280 : vector<2x128xf32> to vector<1x2x128xf32>
    tpu.vector_store %arg4[%283, %c0_144, %c0_145], %286 {strides = array<i32>} : memref<8x2x128xf32, #tpu.memory_space<vmem>>, vector<1x2x128xf32>,
    %c6_i32 = arith.constant 6 : i32
    %c0_i32_146 = arith.constant 0 : i32
    %287 = arith.cmpi eq, %arg0, %c0_i32_146 : i32
    %c7_i32_147 = arith.constant 7 : i32
    %288 = arith.subi %c7_i32_147, %c6_i32 : i32
    %289 = arith.select %287, %c6_i32, %288 : i32
    %290 = arith.index_cast %289 : i32 to index
    %c0_148 = arith.constant 0 : index
    %c0_149 = arith.constant 0 : index
    %291 = vector.load %arg2[%290, %c0_148, %c0_149] : memref<8x2x512xf32, #tpu.memory_space<vmem>>, vector<1x2x512xf32>
    %292 = vector.shape_cast %291 : vector<1x2x512xf32> to vector<2x512xf32>
    %c0_150 = arith.constant 0 : index
    %c0_151 = arith.constant 0 : index
    %293 = vector.load %arg5[%c0_150, %c0_151] : memref<2x128xf32, #tpu.memory_space<vmem>>, vector<2x128xf32>
    %cst_152 = arith.constant dense<0.000000e+00> : vector<2x512xf32>
    %294 = tpu.matmul %293, %4, %cst_152 {dimension_numbers = #tpu.dot_dimension_numbers<[1], [0], [0], [1], [0, 0, 1, 1], [], []>} : vector<2x128xf32>, vector<128x512xf32>, vector<2x512xf32> -> vector<2x512xf32>
    %295 = arith.addf %292, %294 : vector<2x512xf32>
    %296 = vector.extract_strided_slice %295 {offsets = [0, 0], sizes = [2, 128], strides = [1, 1]} : vector<2x512xf32> to vector<2x128xf32>
    %cst_153 = arith.constant 5.000000e-01 : f32
    %297 = vector.broadcast %cst_153 : f32 to vector<2x128xf32>
    %298 = arith.mulf %297, %296 : vector<2x128xf32>
    %299 = math.tanh %298 : vector<2x128xf32>
    %cst_154 = arith.constant 1.000000e+00 : f32
    %300 = vector.broadcast %cst_154 : f32 to vector<2x128xf32>
    %301 = arith.addf %299, %300 : vector<2x128xf32>
    %cst_155 = arith.constant 5.000000e-01 : f32
    %302 = vector.broadcast %cst_155 : f32 to vector<2x128xf32>
    %303 = arith.mulf %302, %301 : vector<2x128xf32>
    %304 = vector.extract_strided_slice %295 {offsets = [0, 128], sizes = [2, 128], strides = [1, 1]} : vector<2x512xf32> to vector<2x128xf32>
    %cst_156 = arith.constant 5.000000e-01 : f32
    %305 = vector.broadcast %cst_156 : f32 to vector<2x128xf32>
    %306 = arith.mulf %305, %304 : vector<2x128xf32>
    %307 = math.tanh %306 : vector<2x128xf32>
    %cst_157 = arith.constant 1.000000e+00 : f32
    %308 = vector.broadcast %cst_157 : f32 to vector<2x128xf32>
    %309 = arith.addf %307, %308 : vector<2x128xf32>
    %cst_158 = arith.constant 5.000000e-01 : f32
    %310 = vector.broadcast %cst_158 : f32 to vector<2x128xf32>
    %311 = arith.mulf %310, %309 : vector<2x128xf32>
    %312 = vector.extract_strided_slice %295 {offsets = [0, 256], sizes = [2, 128], strides = [1, 1]} : vector<2x512xf32> to vector<2x128xf32>
    %313 = math.tanh %312 : vector<2x128xf32>
    %314 = vector.extract_strided_slice %295 {offsets = [0, 384], sizes = [2, 128], strides = [1, 1]} : vector<2x512xf32> to vector<2x128xf32>
    %cst_159 = arith.constant 5.000000e-01 : f32
    %315 = vector.broadcast %cst_159 : f32 to vector<2x128xf32>
    %316 = arith.mulf %315, %314 : vector<2x128xf32>
    %317 = math.tanh %316 : vector<2x128xf32>
    %cst_160 = arith.constant 1.000000e+00 : f32
    %318 = vector.broadcast %cst_160 : f32 to vector<2x128xf32>
    %319 = arith.addf %317, %318 : vector<2x128xf32>
    %cst_161 = arith.constant 5.000000e-01 : f32
    %320 = vector.broadcast %cst_161 : f32 to vector<2x128xf32>
    %321 = arith.mulf %320, %319 : vector<2x128xf32>
    %c0_162 = arith.constant 0 : index
    %c0_163 = arith.constant 0 : index
    %322 = vector.load %arg6[%c0_162, %c0_163] : memref<2x128xf32, #tpu.memory_space<vmem>>, vector<2x128xf32>
    %323 = arith.mulf %311, %322 : vector<2x128xf32>
    %324 = arith.mulf %303, %313 : vector<2x128xf32>
    %325 = arith.addf %323, %324 : vector<2x128xf32>
    %326 = math.tanh %325 : vector<2x128xf32>
    %327 = arith.mulf %321, %326 : vector<2x128xf32>
    %c0_164 = arith.constant 0 : index
    %c0_165 = arith.constant 0 : index
    %328 = vector.load %arg6[%c0_164, %c0_165] : memref<2x128xf32, #tpu.memory_space<vmem>>, vector<2x128xf32>
    tpu.vector_store %arg6[%c0_164, %c0_165], %325 {strides = array<i32>} : memref<2x128xf32, #tpu.memory_space<vmem>>, vector<2x128xf32>,
    %c0_166 = arith.constant 0 : index
    %c0_167 = arith.constant 0 : index
    %329 = vector.load %arg5[%c0_166, %c0_167] : memref<2x128xf32, #tpu.memory_space<vmem>>, vector<2x128xf32>
    tpu.vector_store %arg5[%c0_166, %c0_167], %327 {strides = array<i32>} : memref<2x128xf32, #tpu.memory_space<vmem>>, vector<2x128xf32>,
    %330 = arith.index_cast %289 : i32 to index
    %c0_168 = arith.constant 0 : index
    %c0_169 = arith.constant 0 : index
    %331 = vector.load %arg4[%330, %c0_168, %c0_169] : memref<8x2x128xf32, #tpu.memory_space<vmem>>, vector<1x2x128xf32>
    %332 = vector.shape_cast %331 : vector<1x2x128xf32> to vector<2x128xf32>
    %333 = vector.shape_cast %327 : vector<2x128xf32> to vector<1x2x128xf32>
    tpu.vector_store %arg4[%330, %c0_168, %c0_169], %333 {strides = array<i32>} : memref<8x2x128xf32, #tpu.memory_space<vmem>>, vector<1x2x128xf32>,
    %c7_i32_170 = arith.constant 7 : i32
    %c0_i32_171 = arith.constant 0 : i32
    %334 = arith.cmpi eq, %arg0, %c0_i32_171 : i32
    %c7_i32_172 = arith.constant 7 : i32
    %335 = arith.subi %c7_i32_172, %c7_i32_170 : i32
    %336 = arith.select %334, %c7_i32_170, %335 : i32
    %337 = arith.index_cast %336 : i32 to index
    %c0_173 = arith.constant 0 : index
    %c0_174 = arith.constant 0 : index
    %338 = vector.load %arg2[%337, %c0_173, %c0_174] : memref<8x2x512xf32, #tpu.memory_space<vmem>>, vector<1x2x512xf32>
    %339 = vector.shape_cast %338 : vector<1x2x512xf32> to vector<2x512xf32>
    %c0_175 = arith.constant 0 : index
    %c0_176 = arith.constant 0 : index
    %340 = vector.load %arg5[%c0_175, %c0_176] : memref<2x128xf32, #tpu.memory_space<vmem>>, vector<2x128xf32>
    %cst_177 = arith.constant dense<0.000000e+00> : vector<2x512xf32>
    %341 = tpu.matmul %340, %4, %cst_177 {dimension_numbers = #tpu.dot_dimension_numbers<[1], [0], [0], [1], [0, 0, 1, 1], [], []>} : vector<2x128xf32>, vector<128x512xf32>, vector<2x512xf32> -> vector<2x512xf32>
    %342 = arith.addf %339, %341 : vector<2x512xf32>
    %343 = vector.extract_strided_slice %342 {offsets = [0, 0], sizes = [2, 128], strides = [1, 1]} : vector<2x512xf32> to vector<2x128xf32>
    %cst_178 = arith.constant 5.000000e-01 : f32
    %344 = vector.broadcast %cst_178 : f32 to vector<2x128xf32>
    %345 = arith.mulf %344, %343 : vector<2x128xf32>
    %346 = math.tanh %345 : vector<2x128xf32>
    %cst_179 = arith.constant 1.000000e+00 : f32
    %347 = vector.broadcast %cst_179 : f32 to vector<2x128xf32>
    %348 = arith.addf %346, %347 : vector<2x128xf32>
    %cst_180 = arith.constant 5.000000e-01 : f32
    %349 = vector.broadcast %cst_180 : f32 to vector<2x128xf32>
    %350 = arith.mulf %349, %348 : vector<2x128xf32>
    %351 = vector.extract_strided_slice %342 {offsets = [0, 128], sizes = [2, 128], strides = [1, 1]} : vector<2x512xf32> to vector<2x128xf32>
    %cst_181 = arith.constant 5.000000e-01 : f32
    %352 = vector.broadcast %cst_181 : f32 to vector<2x128xf32>
    %353 = arith.mulf %352, %351 : vector<2x128xf32>
    %354 = math.tanh %353 : vector<2x128xf32>
    %cst_182 = arith.constant 1.000000e+00 : f32
    %355 = vector.broadcast %cst_182 : f32 to vector<2x128xf32>
    %356 = arith.addf %354, %355 : vector<2x128xf32>
    %cst_183 = arith.constant 5.000000e-01 : f32
    %357 = vector.broadcast %cst_183 : f32 to vector<2x128xf32>
    %358 = arith.mulf %357, %356 : vector<2x128xf32>
    %359 = vector.extract_strided_slice %342 {offsets = [0, 256], sizes = [2, 128], strides = [1, 1]} : vector<2x512xf32> to vector<2x128xf32>
    %360 = math.tanh %359 : vector<2x128xf32>
    %361 = vector.extract_strided_slice %342 {offsets = [0, 384], sizes = [2, 128], strides = [1, 1]} : vector<2x512xf32> to vector<2x128xf32>
    %cst_184 = arith.constant 5.000000e-01 : f32
    %362 = vector.broadcast %cst_184 : f32 to vector<2x128xf32>
    %363 = arith.mulf %362, %361 : vector<2x128xf32>
    %364 = math.tanh %363 : vector<2x128xf32>
    %cst_185 = arith.constant 1.000000e+00 : f32
    %365 = vector.broadcast %cst_185 : f32 to vector<2x128xf32>
    %366 = arith.addf %364, %365 : vector<2x128xf32>
    %cst_186 = arith.constant 5.000000e-01 : f32
    %367 = vector.broadcast %cst_186 : f32 to vector<2x128xf32>
    %368 = arith.mulf %367, %366 : vector<2x128xf32>
    %c0_187 = arith.constant 0 : index
    %c0_188 = arith.constant 0 : index
    %369 = vector.load %arg6[%c0_187, %c0_188] : memref<2x128xf32, #tpu.memory_space<vmem>>, vector<2x128xf32>
    %370 = arith.mulf %358, %369 : vector<2x128xf32>
    %371 = arith.mulf %350, %360 : vector<2x128xf32>
    %372 = arith.addf %370, %371 : vector<2x128xf32>
    %373 = math.tanh %372 : vector<2x128xf32>
    %374 = arith.mulf %368, %373 : vector<2x128xf32>
    %c0_189 = arith.constant 0 : index
    %c0_190 = arith.constant 0 : index
    %375 = vector.load %arg6[%c0_189, %c0_190] : memref<2x128xf32, #tpu.memory_space<vmem>>, vector<2x128xf32>
    tpu.vector_store %arg6[%c0_189, %c0_190], %372 {strides = array<i32>} : memref<2x128xf32, #tpu.memory_space<vmem>>, vector<2x128xf32>,
    %c0_191 = arith.constant 0 : index
    %c0_192 = arith.constant 0 : index
    %376 = vector.load %arg5[%c0_191, %c0_192] : memref<2x128xf32, #tpu.memory_space<vmem>>, vector<2x128xf32>
    tpu.vector_store %arg5[%c0_191, %c0_192], %374 {strides = array<i32>} : memref<2x128xf32, #tpu.memory_space<vmem>>, vector<2x128xf32>,
    %377 = arith.index_cast %336 : i32 to index
    %c0_193 = arith.constant 0 : index
    %c0_194 = arith.constant 0 : index
    %378 = vector.load %arg4[%377, %c0_193, %c0_194] : memref<8x2x128xf32, #tpu.memory_space<vmem>>, vector<1x2x128xf32>
    %379 = vector.shape_cast %378 : vector<1x2x128xf32> to vector<2x128xf32>
    %380 = vector.shape_cast %374 : vector<2x128xf32> to vector<1x2x128xf32>
    tpu.vector_store %arg4[%377, %c0_193, %c0_194], %380 {strides = array<i32>} : memref<8x2x128xf32, #tpu.memory_space<vmem>>, vector<1x2x128xf32>,
    %c8_i32 = arith.constant 8 : i32
    return
  }
  func.func @transform_0(%arg0: i32, %arg1: i32) -> (i32, i32, i32) {
    %c0_i32 = arith.constant 0 : i32
    %0 = arith.cmpi eq, %arg0, %c0_i32 : i32
    %c0_i32_0 = arith.constant 0 : i32
    %1 = arith.subi %c0_i32_0, %arg1 : i32
    %2 = arith.select %0, %arg1, %1 : i32
    %c0_i32_1 = arith.constant 0 : i32
    %c0_i32_2 = arith.constant 0 : i32
    return %2, %c0_i32_1, %arg0 : i32, i32, i32
  }
  func.func @transform_1(%arg0: i32, %arg1: i32) -> (i32, i32, i32) {
    %c0_i32 = arith.constant 0 : i32
    %c0_i32_0 = arith.constant 0 : i32
    %c0_i32_1 = arith.constant 0 : i32
    return %arg0, %c0_i32, %c0_i32_0 : i32, i32, i32
  }
  func.func @transform_2(%arg0: i32, %arg1: i32) -> (i32, i32, i32) {
    %c0_i32 = arith.constant 0 : i32
    %0 = arith.cmpi eq, %arg0, %c0_i32 : i32
    %c0_i32_0 = arith.constant 0 : i32
    %1 = arith.subi %c0_i32_0, %arg1 : i32
    %2 = arith.select %0, %arg1, %1 : i32
    %c0_i32_1 = arith.constant 0 : i32
    %c0_i32_2 = arith.constant 0 : i32
    return %2, %c0_i32_1, %arg0 : i32, i32, i32
  }
}

module attributes {stable_mosaic.version = 11 : i64} {
  func.func @_gemm_bias_kernel(%arg0: i32, %arg1: memref<16x256xf32, #tpu.memory_space<vmem>>, %arg2: memref<256x128xf32, #tpu.memory_space<vmem>>, %arg3: memref<1x128xf32, #tpu.memory_space<vmem>>, %arg4: memref<16x128xf32, #tpu.memory_space<vmem>>) attributes {dimension_semantics = [#tpu.dimension_semantics<parallel>], iteration_bounds = array<i64: 1>, scalar_prefetch = 0 : i64, scratch_operands = 0 : i64, tpu.core_type = #tpu.core_type<tc>, window_params = [{transform_indices = @transform_0, window_bounds = array<i64: 16, 256>}, {pipeline_mode = #tpu.pipeline_mode<synchronous>, transform_indices = @transform_1, window_bounds = array<i64: 256, 128>}, {pipeline_mode = #tpu.pipeline_mode<synchronous>, transform_indices = @transform_2, window_bounds = array<i64: 1, 128>}, {transform_indices = @transform_3, window_bounds = array<i64: 16, 128>}]} {
    %c0 = arith.constant 0 : index
    %c0_0 = arith.constant 0 : index
    %0 = vector.load %arg1[%c0, %c0_0] : memref<16x256xf32, #tpu.memory_space<vmem>>, vector<16x256xf32>
    %c0_1 = arith.constant 0 : index
    %c0_2 = arith.constant 0 : index
    %1 = vector.load %arg2[%c0_1, %c0_2] : memref<256x128xf32, #tpu.memory_space<vmem>>, vector<256x128xf32>
    %cst = arith.constant dense<0.000000e+00> : vector<16x128xf32>
    %2 = tpu.matmul %0, %1, %cst {dimension_numbers = #tpu.dot_dimension_numbers<[1], [0], [0], [1], [0, 0, 1, 1], [], []>} : vector<16x256xf32>, vector<256x128xf32>, vector<16x128xf32> -> vector<16x128xf32>
    %c0_3 = arith.constant 0 : index
    %c0_4 = arith.constant 0 : index
    %3 = vector.load %arg3[%c0_3, %c0_4] : memref<1x128xf32, #tpu.memory_space<vmem>>, vector<1x128xf32>
    %4 = vector.broadcast %3 : vector<1x128xf32> to vector<16x128xf32>
    %5 = arith.addf %2, %4 : vector<16x128xf32>
    %c0_5 = arith.constant 0 : index
    %c0_6 = arith.constant 0 : index
    %6 = vector.load %arg4[%c0_5, %c0_6] : memref<16x128xf32, #tpu.memory_space<vmem>>, vector<16x128xf32>
    tpu.vector_store %arg4[%c0_5, %c0_6], %5 {strides = array<i32>} : memref<16x128xf32, #tpu.memory_space<vmem>>, vector<16x128xf32>,
    return
  }
  func.func @transform_0(%arg0: i32) -> (i32, i32) {
    %c0_i32 = arith.constant 0 : i32
    %c0_i32_0 = arith.constant 0 : i32
    return %arg0, %c0_i32 : i32, i32
  }
  func.func @transform_1(%arg0: i32) -> (i32, i32) {
    %c0_i32 = arith.constant 0 : i32
    %c0_i32_0 = arith.constant 0 : i32
    %c0_i32_1 = arith.constant 0 : i32
    return %c0_i32, %c0_i32_0 : i32, i32
  }
  func.func @transform_2(%arg0: i32) -> (i32, i32) {
    %c0_i32 = arith.constant 0 : i32
    %c0_i32_0 = arith.constant 0 : i32
    %c0_i32_1 = arith.constant 0 : i32
    return %c0_i32, %c0_i32_0 : i32, i32
  }
  func.func @transform_3(%arg0: i32) -> (i32, i32) {
    %c0_i32 = arith.constant 0 : i32
    %c0_i32_0 = arith.constant 0 : i32
    return %arg0, %c0_i32 : i32, i32
  }
}

</mosaic_0001>

<bundles_post_ra>
// kernel: lstm_model_forward.5
= control target key start
LH: loop header
LB: loop body
LE: loop exit
PB: predicated region body
PF: predicated region fallthrough
CT: control target
= control target key end

     0   :  { %8 = vsyncpa [#allocation3], 0  ;;  %s611_s0 = inlined_call_operand.vmem [shape: f32[16,32], index: 0, kind: input, shape index: {}]   ;;  %s612_s1 = inlined_call_operand.hbm [shape: f32[32,1024], index: 1, kind: input, shape index: {}]   ;;  %s613_s2 = inlined_call_operand.hbm [shape: f32[1,1024], index: 2, kind: input, shape index: {}]   ;;  %s614_s3 = inlined_call_operand.vmem [shape: f32[16,1024], index: 3, kind: output, shape index: {}]  }
   0x1   :  { %9 = vsyncpa [#allocation5], 0  ;;  %s510_s12 = smov [#allocation2]  }
   0x2   :  { %s17_s13 = sshll.u32 %s510_s12, 4  ;;  %s18_s13 = int_to_ptr.vmem [resolvable:$true] %s17_s13 }
   0x3   :  { %s474_s14 = scalar_lea.vmem %s18_s13, 4096  ;;  %p479_p1 = scmp.lt.s32.totalorder %s18_s13, %s18_s13 }
   0x4   :  { %p475_p0 = scmp.ne.s32.totalorder %s18_s13, %s474_s14  ;;  %p480_p2 = scmp.lt.s32.totalorder %s474_s14, %s474_s14 }
   0x6   :  { %p481_p3 = por %p480_p2, %p479_p1 }
   0x8   :  { %p482_p4 = pnand %p481_p3, %p475_p0 }
   0xa   :  { %485 = shalt.err (!%p482_p4)
}
   0xb   :  { %s511_s15 = smov 1024   ;;  %s512_s16 = smov 64  }
   0xc   :  { %23 = dma.hbm_to_vmem [thread:$0]  %s612_s1, 4096, %s18_s13, [#allocation3], %s511_s15, %s511_s15, %s512_s16  }
   0xd   :  { %s513_s19 = smov [#allocation4]  }
   0xe   :  { %s30_s20 = sshll.u32 %s513_s19, 4  ;;  %s31_s20 = int_to_ptr.vmem [resolvable:$true] %s30_s20 }
   0xf   :  { %s494_s21 = scalar_lea.vmem %s31_s20, 128  ;;  %p499_p6 = scmp.lt.s32.totalorder %s31_s20, %s31_s20 }
  0x10   :  { %p495_p5 = scmp.ne.s32.totalorder %s31_s20, %s494_s21  ;;  %p500_p7 = scmp.lt.s32.totalorder %s494_s21, %s494_s21 }
  0x12   :  { %p501_p8 = por %p500_p7, %p499_p6 }
  0x14   :  { %p502_p9 = pnand %p501_p8, %p495_p5 }
  0x16   :  { %505 = shalt.err (!%p502_p9)
}
  0x17   :  { %33 = dma.hbm_to_vmem [thread:$0]  %s613_s2, 128, %s31_s20, [#allocation5]  }
  0x18   :  { %506 = dma.done.wait [#allocation3], 4096  }
  0x19   :  { %507 = vsyncadd [#allocation3], 4294963200 }
  0x1a   :  { %508 = dma.done.wait [#allocation5], 128  }
  0x1b   :  { %509 = vsyncadd [#allocation5], 4294967168  ;;  %v514_v0 = vmov 0.0   ;;  %v67_v1 = vld [vmem:[#allocation2 + $0xc8] sm:$0xff]  ;;  %v69_v2 = vld [vmem:[#allocation2 + $0xd8] sm:$0xff]  ;;  %vm116_vm0 = vcmask 261120   ;;  %v76_v35 = vlaneseq }
  0x1c   :  { %187 = vmatprep.mubr.f32.mxu0 %v514_v0  ;;  %264 = vmatprep.mubr.f32.mxu1 %v514_v0  ;;  %v66_v3 = vld [vmem:[#allocation2 + $0xc0] sm:$0xff]  ;;  %v68_v4 = vld [vmem:[#allocation2 + $0xd0] sm:$0xff]  ;;  %v59_v5 = vld [vmem:[#allocation2 + $0x88] sm:$0xff] }
  0x1d   :  { %147 = vmatprep.subr.mxu0 %v67_v1  ;;  %224 = vmatprep.subr.mxu1 %v69_v2  ;;  %v61_v6 = vld [vmem:[#allocation2 + $0x98] sm:$0xff]  ;;  %v58_v7 = vld [vmem:[#allocation2 + $0x80] sm:$0xff]  ;;  %v60_v8 = vld [vmem:[#allocation2 + $0x90] sm:$0xff]  ;;  %v77_v36 = vshrl.u32 %v76_v35, 7 }
  0x1e   :  { %148 = vmatpush1.msra.mxu0 %v66_v3  ;;  %225 = vmatpush1.msra.mxu1 %v68_v4  ;;  %v51_v9 = vld [vmem:[#allocation2 + $0x48] sm:$0xff]  ;;  %v53_v10 = vld [vmem:[#allocation2 + $0x58] sm:$0xff]  ;;  %v50_v11 = vld [vmem:[#allocation2 + $0x40] sm:$0xff] }
  0x1f   :  { %149 = vmatprep.subr.mxu0 %v59_v5  ;;  %226 = vmatprep.subr.mxu1 %v61_v6  ;;  %v52_v12 = vld [vmem:[#allocation2 + $0x50] sm:$0xff]  ;;  %v43_v13 = vld [vmem:[#allocation2 + $0x8] sm:$0xff]  ;;  %v45_v14 = vld [vmem:[#allocation2 + $0x18] sm:$0xff]  ;;  %v78_v37 = vsub.s32 0, %v77_v36  ;;  %v86_v38 = vsub.s32 2, %v77_v36  ;;  %v82_v40 = vsub.s32 1, %v77_v36 }
  0x20   :  { %150 = vmatpush1.msra.mxu0 %v58_v7  ;;  %227 = vmatpush1.msra.mxu1 %v60_v8  ;;  %v42_v15 = vld [vmem:[#allocation2] sm:$0xff]  ;;  %v44_v16 = vld [vmem:[#allocation2 + $0x10] sm:$0xff]  ;;  %v71_v18 = vld [vmem:[#allocation2 + $0xe8] sm:$0xff]  ;;  %v90_v41 = vsub.s32 3, %v77_v36  ;;  %v94_v54 = vsub.s32 4, %v77_v36  ;;  %v102_v55 = vsub.s32 6, %v77_v36 }
  0x21   :  { %151 = vmatprep.subr.mxu0 %v51_v9  ;;  %228 = vmatprep.subr.mxu1 %v53_v10  ;;  %v40_v17 = vld [vmem:[%s611_s0] sm:$0xff]  ;;  %v73_v19 = vld [vmem:[#allocation2 + $0xf8] sm:$0xff]  ;;  %v72_v21 = vld [vmem:[#allocation2 + $0xf0] sm:$0xff]  ;;  %v98_v60 = vsub.s32 5, %v77_v36  ;;  %v106_v61 = vsub.s32 7, %v77_v36 }
  0x22   :  { %152 = vmatpush1.msra.mxu0 %v50_v11  ;;  %229 = vmatpush1.msra.mxu1 %v52_v12  ;;  %v70_v20 = vld [vmem:[#allocation2 + $0xe0] sm:$0xff]  ;;  %v63_v22 = vld [vmem:[#allocation2 + $0xa8] sm:$0xff]  ;;  %v65_v23 = vld [vmem:[#allocation2 + $0xb8] sm:$0xff] }
  0x23   :  { %153 = vmatprep.subr.mxu0 %v43_v13  ;;  %230 = vmatprep.subr.mxu1 %v45_v14  ;;  %v62_v24 = vld [vmem:[#allocation2 + $0xa0] sm:$0xff]  ;;  %v64_v25 = vld [vmem:[#allocation2 + $0xb0] sm:$0xff]  ;;  %v41_v26 = vld [vmem:[%s611_s0 + $0x8] sm:$0xff] }
  0x24   :  { %154 = vmatpush1.msra.mxu0 %v42_v15  ;;  %231 = vmatpush1.msra.mxu1 %v44_v16  ;;  %v55_v27 = vld [vmem:[#allocation2 + $0x68] sm:$0xff]  ;;  %v57_v28 = vld [vmem:[#allocation2 + $0x78] sm:$0xff]  ;;  %v54_v29 = vld [vmem:[#allocation2 + $0x60] sm:$0xff] }
  0x25   :  { %453 = vmatmul.mubr.msk.f32.vlgmr.msra.gmra.mxu0 %vm116_vm0, %v40_v17  ;;  %455 = vmatmul.mubr.msk.f32.vlgmr.msra.gmra.mxu1 %vm116_vm0, %v40_v17  ;;  %v56_v30 = vld [vmem:[#allocation2 + $0x70] sm:$0xff]  ;;  %v47_v31 = vld [vmem:[#allocation2 + $0x28] sm:$0xff]  ;;  %v49_v32 = vld [vmem:[#allocation2 + $0x38] sm:$0xff] }
  0x26   :  { %301 = vmatprep.subr.mxu0 %v71_v18  ;;  %378 = vmatprep.subr.mxu1 %v73_v19  ;;  %v46_v33 = vld [vmem:[#allocation2 + $0x20] sm:$0xff]  ;;  %v48_v34 = vld [vmem:[#allocation2 + $0x30] sm:$0xff] }
  0x27   :  { %302 = vmatpush1.msra.mxu0 %v70_v20  ;;  %379 = vmatpush1.msra.mxu1 %v72_v21  ;;  %v74_v39 = vld [vmem:[#allocation4] sm:$0xff] }
  0x28   :  { %303 = vmatprep.subr.mxu0 %v63_v22  ;;  %380 = vmatprep.subr.mxu1 %v65_v23  ;;  %v79_v42 = vrot.slane %v74_v39, %v78_v37  ;;  %v87_v43 = vrot.slane %v74_v39, %v86_v38  ;;  %v83_v44 = vrot.slane %v74_v39, %v82_v40 }
  0x29   :  { %193 = vmatprep.mubr.f32.mxu0 %v514_v0  ;;  %270 = vmatprep.mubr.f32.mxu1 %v514_v0  ;;  %v91_v45 = vrot.slane %v74_v39, %v90_v41  ;;  %v95_v2 = vrot.slane %v74_v39, %v94_v54  ;;  %v103_v3 = vrot.slane %v74_v39, %v102_v55 }
  0x2a   :  { %304 = vmatpush1.msra.mxu0 %v62_v24  ;;  %381 = vmatpush1.msra.mxu1 %v64_v25  ;;  %v99_v4 = vrot.slane %v74_v39, %v98_v60  ;;  %v107_v5 = vrot.slane %v74_v39, %v106_v61 }
  0x2b   :  { %454 = vmatmul.mubr.msk.f32.gmra.mxu0 %vm116_vm0, %v41_v26  ;;  %456 = vmatmul.mubr.msk.f32.gmra.mxu1 %vm116_vm0, %v41_v26 }
  0x2c   :  { %305 = vmatprep.subr.mxu0 %v55_v27  ;;  %382 = vmatprep.subr.mxu1 %v57_v28 }
  0x2d   :  { %306 = vmatpush1.msra.mxu0 %v54_v29  ;;  %383 = vmatpush1.msra.mxu1 %v56_v30 }
  0x2e   :  { %307 = vmatprep.subr.mxu0 %v47_v31  ;;  %384 = vmatprep.subr.mxu1 %v49_v32 }
  0x2f   :  { %308 = vmatpush1.msra.mxu0 %v46_v33  ;;  %341 = vmatprep.mubr.f32.mxu0 %v514_v0 }
  0x30   :  { %385 = vmatpush1.msra.mxu1 %v48_v34  ;;  %418 = vmatprep.mubr.f32.mxu1 %v514_v0 }
  0x31   :  { %457 = vmatmul.mubr.msk.f32.vlgmr.msra.gmra.mxu0 %vm116_vm0, %v40_v17  ;;  %459 = vmatmul.mubr.msk.f32.vlgmr.msra.gmra.mxu1 %vm116_vm0, %v40_v17 }
  0x32   :  { %347 = vmatprep.mubr.f32.mxu0 %v514_v0  ;;  %424 = vmatprep.mubr.f32.mxu1 %v514_v0 }
  0x35   :  { %458 = vmatmul.mubr.msk.f32.gmra.mxu0 %vm116_vm0, %v41_v26  ;;  %460 = vmatmul.mubr.msk.f32.gmra.mxu1 %vm116_vm0, %v41_v26 }
  0xe5   :  { %v189_v46 = vpop.f32.mrf.mxu0  ;;  %v266_v47 = vpop.f32.mrf.mxu1 }
  0xe6   :  { %v190_v48 = vadd.f32 %v189_v46, %v79_v42  ;;  %v267_v49 = vadd.f32 %v266_v47, %v87_v43 }
  0xe7   :  { %v191_v50 = vpop.f32.mrf.mxu0  ;;  %v268_v51 = vpop.f32.mrf.mxu1 }
  0xe8   :  { %431 = vst [vmem:[%s614_s3] sm:$0xff] %v190_v48  ;;  %433 = vst [vmem:[%s614_s3 + $0x10] sm:$0xff] %v267_v49  ;;  %v192_v52 = vadd.f32 %v191_v50, %v83_v44  ;;  %v269_v53 = vadd.f32 %v268_v51, %v91_v45 }
  0xea   :  { %432 = vst [vmem:[%s614_s3 + $0x8] sm:$0xff] %v192_v52  ;;  %434 = vst [vmem:[%s614_s3 + $0x18] sm:$0xff] %v269_v53 }
  0xeb   :  { %v195_v56 = vpop.f32.mrf.mxu0  ;;  %v272_v57 = vpop.f32.mrf.mxu1 }
  0xec   :  { %v196_v58 = vadd.f32 %v195_v56, %v79_v42  ;;  %v273_v59 = vadd.f32 %v272_v57, %v87_v43 }
  0xed   :  { %v197_v62 = vpop.f32.mrf.mxu0  ;;  %v274_v63 = vpop.f32.mrf.mxu1 }
  0xee   :  { %439 = vst [vmem:[%s614_s3 + $0x40] sm:$0xff] %v196_v58  ;;  %441 = vst [vmem:[%s614_s3 + $0x50] sm:$0xff] %v273_v59  ;;  %v198_v0 = vadd.f32 %v197_v62, %v83_v44  ;;  %v275_v1 = vadd.f32 %v274_v63, %v91_v45 }
  0xf0   :  { %440 = vst [vmem:[%s614_s3 + $0x48] sm:$0xff] %v198_v0  ;;  %442 = vst [vmem:[%s614_s3 + $0x58] sm:$0xff] %v275_v1 }
  0xf1   :  { %v343_v6 = vpop.f32.mrf.mxu0  ;;  %v420_v7 = vpop.f32.mrf.mxu1 }
  0xf2   :  { %v344_v8 = vadd.f32 %v343_v6, %v95_v2  ;;  %v421_v9 = vadd.f32 %v420_v7, %v103_v3 }
  0xf3   :  { %v345_v10 = vpop.f32.mrf.mxu0  ;;  %v422_v11 = vpop.f32.mrf.mxu1 }
  0xf4   :  { %435 = vst [vmem:[%s614_s3 + $0x20] sm:$0xff] %v344_v8  ;;  %437 = vst [vmem:[%s614_s3 + $0x30] sm:$0xff] %v421_v9  ;;  %v346_v12 = vadd.f32 %v345_v10, %v99_v4  ;;  %v423_v13 = vadd.f32 %v422_v11, %v107_v5 }
  0xf5   :  { %v349_v14 = vpop.f32.mrf.mxu0  ;;  %v426_v15 = vpop.f32.mrf.mxu1 }
  0xf6   :  { %436 = vst [vmem:[%s614_s3 + $0x28] sm:$0xff] %v346_v12  ;;  %438 = vst [vmem:[%s614_s3 + $0x38] sm:$0xff] %v423_v13  ;;  %v350_v16 = vadd.f32 %v349_v14, %v95_v2  ;;  %v427_v17 = vadd.f32 %v426_v15, %v103_v3 }
  0xf7   :  { %v351_v18 = vpop.f32.mrf.mxu0  ;;  %v428_v19 = vpop.f32.mrf.mxu1 }
  0xf8   :  { %443 = vst [vmem:[%s614_s3 + $0x60] sm:$0xff] %v350_v16  ;;  %445 = vst [vmem:[%s614_s3 + $0x70] sm:$0xff] %v427_v17  ;;  %v352_v20 = vadd.f32 %v351_v18, %v99_v4  ;;  %v429_v21 = vadd.f32 %v428_v19, %v107_v5 }
  0xfa   :  { %444 = vst [vmem:[%s614_s3 + $0x68] sm:$0xff] %v352_v20  ;;  %446 = vst [vmem:[%s614_s3 + $0x78] sm:$0xff] %v429_v21 }
  0xfb   :  { %451 = vsyncpa [#allocation3], 1 }
  0xfc   :  { %452 = vsyncpa [#allocation5], 1 }

// kernel: lstm_model_forward.7
= control target key start
LH: loop header
LB: loop body
LE: loop exit
PB: predicated region body
PF: predicated region fallthrough
CT: control target
= control target key end

     0   :  { %s1507_s1 = inlined_call_operand.vmem [shape: f32[256,1024], index: 1, kind: input, shape index: {}]   ;;  %s1508_s0 = inlined_call_operand.vmem [shape: f32[16,256], index: 0, kind: input, shape index: {}]   ;;  %s1509_s2 = inlined_call_operand.vmem [shape: f32[1,1024], index: 2, kind: input, shape index: {}]   ;;  %s1510_s3 = inlined_call_operand.vmem [shape: f32[16,1024], index: 3, kind: output, shape index: {}]  }
   0x1   :  { %v139_v0 = vld [vmem:[%s1507_s1 + $0x3c8] sm:$0xff]  ;;  %v141_v1 = vld [vmem:[%s1507_s1 + $0x3d8] sm:$0xff]  ;;  %v138_v2 = vld [vmem:[%s1507_s1 + $0x3c0] sm:$0xff] }
   0x2   :  { %316 = vmatprep.subr.mxu0 %v139_v0  ;;  %393 = vmatprep.subr.mxu1 %v141_v1  ;;  %v140_v3 = vld [vmem:[%s1507_s1 + $0x3d0] sm:$0xff]  ;;  %v131_v4 = vld [vmem:[%s1507_s1 + $0x388] sm:$0xff]  ;;  %v133_v5 = vld [vmem:[%s1507_s1 + $0x398] sm:$0xff] }
   0x3   :  { %317 = vmatpush1.msra.mxu0 %v138_v2  ;;  %394 = vmatpush1.msra.mxu1 %v140_v3  ;;  %v130_v6 = vld [vmem:[%s1507_s1 + $0x380] sm:$0xff]  ;;  %v132_v7 = vld [vmem:[%s1507_s1 + $0x390] sm:$0xff]  ;;  %v123_v8 = vld [vmem:[%s1507_s1 + $0x348] sm:$0xff] }
   0x4   :  { %318 = vmatprep.subr.mxu0 %v131_v4  ;;  %395 = vmatprep.subr.mxu1 %v133_v5  ;;  %v125_v9 = vld [vmem:[%s1507_s1 + $0x358] sm:$0xff]  ;;  %v122_v10 = vld [vmem:[%s1507_s1 + $0x340] sm:$0xff]  ;;  %v124_v11 = vld [vmem:[%s1507_s1 + $0x350] sm:$0xff] }
   0x5   :  { %319 = vmatpush1.msra.mxu0 %v130_v6  ;;  %396 = vmatpush1.msra.mxu1 %v132_v7  ;;  %v115_v12 = vld [vmem:[%s1507_s1 + $0x308] sm:$0xff]  ;;  %v117_v13 = vld [vmem:[%s1507_s1 + $0x318] sm:$0xff]  ;;  %v114_v14 = vld [vmem:[%s1507_s1 + $0x300] sm:$0xff] }
   0x6   :  { %320 = vmatprep.subr.mxu0 %v123_v8  ;;  %397 = vmatprep.subr.mxu1 %v125_v9  ;;  %v116_v15 = vld [vmem:[%s1507_s1 + $0x310] sm:$0xff]  ;;  %v107_v16 = vld [vmem:[%s1507_s1 + $0x2c8] sm:$0xff]  ;;  %v109_v17 = vld [vmem:[%s1507_s1 + $0x2d8] sm:$0xff] }
   0x7   :  { %321 = vmatpush1.msra.mxu0 %v122_v10  ;;  %398 = vmatpush1.msra.mxu1 %v124_v11  ;;  %v106_v18 = vld [vmem:[%s1507_s1 + $0x2c0] sm:$0xff]  ;;  %v108_v19 = vld [vmem:[%s1507_s1 + $0x2d0] sm:$0xff]  ;;  %v99_v20 = vld [vmem:[%s1507_s1 + $0x288] sm:$0xff] }
   0x8   :  { %322 = vmatprep.subr.mxu0 %v115_v12  ;;  %399 = vmatprep.subr.mxu1 %v117_v13  ;;  %v101_v21 = vld [vmem:[%s1507_s1 + $0x298] sm:$0xff]  ;;  %v98_v22 = vld [vmem:[%s1507_s1 + $0x280] sm:$0xff]  ;;  %v100_v23 = vld [vmem:[%s1507_s1 + $0x290] sm:$0xff] }
   0x9   :  { %323 = vmatpush1.msra.mxu0 %v114_v14  ;;  %400 = vmatpush1.msra.mxu1 %v116_v15  ;;  %v91_v24 = vld [vmem:[%s1507_s1 + $0x248] sm:$0xff]  ;;  %v93_v25 = vld [vmem:[%s1507_s1 + $0x258] sm:$0xff]  ;;  %v90_v26 = vld [vmem:[%s1507_s1 + $0x240] sm:$0xff] }
   0xa   :  { %324 = vmatprep.subr.mxu0 %v107_v16  ;;  %401 = vmatprep.subr.mxu1 %v109_v17  ;;  %v92_v27 = vld [vmem:[%s1507_s1 + $0x250] sm:$0xff]  ;;  %v83_v28 = vld [vmem:[%s1507_s1 + $0x208] sm:$0xff]  ;;  %v85_v29 = vld [vmem:[%s1507_s1 + $0x218] sm:$0xff] }
   0xb   :  { %325 = vmatpush1.msra.mxu0 %v106_v18  ;;  %402 = vmatpush1.msra.mxu1 %v108_v19  ;;  %v82_v30 = vld [vmem:[%s1507_s1 + $0x200] sm:$0xff]  ;;  %v84_v31 = vld [vmem:[%s1507_s1 + $0x210] sm:$0xff]  ;;  %v75_v32 = vld [vmem:[%s1507_s1 + $0x1c8] sm:$0xff] }
   0xc   :  { %326 = vmatprep.subr.mxu0 %v99_v20  ;;  %403 = vmatprep.subr.mxu1 %v101_v21  ;;  %v77_v33 = vld [vmem:[%s1507_s1 + $0x1d8] sm:$0xff]  ;;  %v74_v34 = vld [vmem:[%s1507_s1 + $0x1c0] sm:$0xff]  ;;  %v76_v35 = vld [vmem:[%s1507_s1 + $0x1d0] sm:$0xff] }
   0xd   :  { %327 = vmatpush1.msra.mxu0 %v98_v22  ;;  %404 = vmatpush1.msra.mxu1 %v100_v23  ;;  %v67_v36 = vld [vmem:[%s1507_s1 + $0x188] sm:$0xff]  ;;  %v69_v37 = vld [vmem:[%s1507_s1 + $0x198] sm:$0xff]  ;;  %v66_v38 = vld [vmem:[%s1507_s1 + $0x180] sm:$0xff] }
   0xe   :  { %328 = vmatprep.subr.mxu0 %v91_v24  ;;  %405 = vmatprep.subr.mxu1 %v93_v25  ;;  %v68_v39 = vld [vmem:[%s1507_s1 + $0x190] sm:$0xff]  ;;  %v59_v40 = vld [vmem:[%s1507_s1 + $0x148] sm:$0xff]  ;;  %v61_v41 = vld [vmem:[%s1507_s1 + $0x158] sm:$0xff] }
   0xf   :  { %329 = vmatpush1.msra.mxu0 %v90_v26  ;;  %406 = vmatpush1.msra.mxu1 %v92_v27  ;;  %v58_v42 = vld [vmem:[%s1507_s1 + $0x140] sm:$0xff]  ;;  %v60_v43 = vld [vmem:[%s1507_s1 + $0x150] sm:$0xff]  ;;  %v51_v44 = vld [vmem:[%s1507_s1 + $0x108] sm:$0xff] }
  0x10   :  { %330 = vmatprep.subr.mxu0 %v83_v28  ;;  %407 = vmatprep.subr.mxu1 %v85_v29  ;;  %v53_v45 = vld [vmem:[%s1507_s1 + $0x118] sm:$0xff]  ;;  %v50_v46 = vld [vmem:[%s1507_s1 + $0x100] sm:$0xff]  ;;  %v52_v47 = vld [vmem:[%s1507_s1 + $0x110] sm:$0xff] }
  0x11   :  { %331 = vmatpush1.msra.mxu0 %v82_v30  ;;  %408 = vmatpush1.msra.mxu1 %v84_v31  ;;  %v43_v48 = vld [vmem:[%s1507_s1 + $0xc8] sm:$0xff]  ;;  %v45_v49 = vld [vmem:[%s1507_s1 + $0xd8] sm:$0xff]  ;;  %v42_v50 = vld [vmem:[%s1507_s1 + $0xc0] sm:$0xff] }
  0x12   :  { %332 = vmatprep.subr.mxu0 %v75_v32  ;;  %409 = vmatprep.subr.mxu1 %v77_v33  ;;  %v44_v51 = vld [vmem:[%s1507_s1 + $0xd0] sm:$0xff]  ;;  %v35_v52 = vld [vmem:[%s1507_s1 + $0x88] sm:$0xff]  ;;  %v37_v53 = vld [vmem:[%s1507_s1 + $0x98] sm:$0xff] }
  0x13   :  { %333 = vmatpush1.msra.mxu0 %v74_v34  ;;  %410 = vmatpush1.msra.mxu1 %v76_v35  ;;  %v34_v54 = vld [vmem:[%s1507_s1 + $0x80] sm:$0xff]  ;;  %v36_v55 = vld [vmem:[%s1507_s1 + $0x90] sm:$0xff]  ;;  %v27_v56 = vld [vmem:[%s1507_s1 + $0x48] sm:$0xff] }
  0x14   :  { %334 = vmatprep.subr.mxu0 %v67_v36  ;;  %411 = vmatprep.subr.mxu1 %v69_v37  ;;  %v29_v57 = vld [vmem:[%s1507_s1 + $0x58] sm:$0xff]  ;;  %v26_v58 = vld [vmem:[%s1507_s1 + $0x40] sm:$0xff]  ;;  %v28_v59 = vld [vmem:[%s1507_s1 + $0x50] sm:$0xff] }
  0x15   :  { %335 = vmatpush1.msra.mxu0 %v66_v38  ;;  %412 = vmatpush1.msra.mxu1 %v68_v39  ;;  %v19_v60 = vld [vmem:[%s1507_s1 + $0x8] sm:$0xff]  ;;  %v21_v61 = vld [vmem:[%s1507_s1 + $0x18] sm:$0xff]  ;;  %v18_v62 = vld [vmem:[%s1507_s1] sm:$0xff] }
  0x16   :  { %336 = vmatprep.subr.mxu0 %v59_v40  ;;  %413 = vmatprep.subr.mxu1 %v61_v41  ;;  %v20_v63 = vld [vmem:[%s1507_s1 + $0x10] sm:$0xff]  ;;  %v267_v0 = vld [vmem:[%s1507_s1 + $0x7c8] sm:$0xff]  ;;  %v269_v1 = vld [vmem:[%s1507_s1 + $0x7d8] sm:$0xff] }
  0x17   :  { %337 = vmatpush1.msra.mxu0 %v58_v42  ;;  %414 = vmatpush1.msra.mxu1 %v60_v43  ;;  %v266_v2 = vld [vmem:[%s1507_s1 + $0x7c0] sm:$0xff]  ;;  %v268_v3 = vld [vmem:[%s1507_s1 + $0x7d0] sm:$0xff]  ;;  %v259_v4 = vld [vmem:[%s1507_s1 + $0x788] sm:$0xff] }
  0x18   :  { %338 = vmatprep.subr.mxu0 %v51_v44  ;;  %415 = vmatprep.subr.mxu1 %v53_v45  ;;  %v261_v5 = vld [vmem:[%s1507_s1 + $0x798] sm:$0xff]  ;;  %v258_v6 = vld [vmem:[%s1507_s1 + $0x780] sm:$0xff]  ;;  %v260_v7 = vld [vmem:[%s1507_s1 + $0x790] sm:$0xff] }
  0x19   :  { %339 = vmatpush1.msra.mxu0 %v50_v46  ;;  %416 = vmatpush1.msra.mxu1 %v52_v47  ;;  %v251_v8 = vld [vmem:[%s1507_s1 + $0x748] sm:$0xff]  ;;  %v253_v9 = vld [vmem:[%s1507_s1 + $0x758] sm:$0xff]  ;;  %v250_v10 = vld [vmem:[%s1507_s1 + $0x740] sm:$0xff] }
  0x1a   :  { %340 = vmatprep.subr.mxu0 %v43_v48  ;;  %417 = vmatprep.subr.mxu1 %v45_v49  ;;  %v252_v11 = vld [vmem:[%s1507_s1 + $0x750] sm:$0xff]  ;;  %v243_v12 = vld [vmem:[%s1507_s1 + $0x708] sm:$0xff]  ;;  %v245_v13 = vld [vmem:[%s1507_s1 + $0x718] sm:$0xff] }
  0x1b   :  { %341 = vmatpush1.msra.mxu0 %v42_v50  ;;  %418 = vmatpush1.msra.mxu1 %v44_v51  ;;  %v242_v14 = vld [vmem:[%s1507_s1 + $0x700] sm:$0xff]  ;;  %v244_v15 = vld [vmem:[%s1507_s1 + $0x710] sm:$0xff]  ;;  %v235_v16 = vld [vmem:[%s1507_s1 + $0x6c8] sm:$0xff] }
  0x1c   :  { %342 = vmatprep.subr.mxu0 %v35_v52  ;;  %419 = vmatprep.subr.mxu1 %v37_v53  ;;  %v237_v17 = vld [vmem:[%s1507_s1 + $0x6d8] sm:$0xff]  ;;  %v234_v18 = vld [vmem:[%s1507_s1 + $0x6c0] sm:$0xff]  ;;  %v236_v19 = vld [vmem:[%s1507_s1 + $0x6d0] sm:$0xff] }
  0x1d   :  { %343 = vmatpush1.msra.mxu0 %v34_v54  ;;  %420 = vmatpush1.msra.mxu1 %v36_v55  ;;  %v227_v20 = vld [vmem:[%s1507_s1 + $0x688] sm:$0xff]  ;;  %v229_v21 = vld [vmem:[%s1507_s1 + $0x698] sm:$0xff]  ;;  %v226_v22 = vld [vmem:[%s1507_s1 + $0x680] sm:$0xff] }
  0x1e   :  { %344 = vmatprep.subr.mxu0 %v27_v56  ;;  %421 = vmatprep.subr.mxu1 %v29_v57  ;;  %v228_v23 = vld [vmem:[%s1507_s1 + $0x690] sm:$0xff]  ;;  %v219_v24 = vld [vmem:[%s1507_s1 + $0x648] sm:$0xff]  ;;  %v221_v25 = vld [vmem:[%s1507_s1 + $0x658] sm:$0xff] }
  0x1f   :  { %345 = vmatpush1.msra.mxu0 %v26_v58  ;;  %422 = vmatpush1.msra.mxu1 %v28_v59  ;;  %v218_v26 = vld [vmem:[%s1507_s1 + $0x640] sm:$0xff]  ;;  %v220_v27 = vld [vmem:[%s1507_s1 + $0x650] sm:$0xff]  ;;  %v211_v28 = vld [vmem:[%s1507_s1 + $0x608] sm:$0xff] }
  0x20   :  { %346 = vmatprep.subr.mxu0 %v19_v60  ;;  %423 = vmatprep.subr.mxu1 %v21_v61  ;;  %v213_v29 = vld [vmem:[%s1507_s1 + $0x618] sm:$0xff]  ;;  %v210_v30 = vld [vmem:[%s1507_s1 + $0x600] sm:$0xff]  ;;  %v212_v31 = vld [vmem:[%s1507_s1 + $0x610] sm:$0xff] }
  0x21   :  { %347 = vmatpush1.msra.mxu0 %v18_v62  ;;  %424 = vmatpush1.msra.mxu1 %v20_v63  ;;  %v203_v32 = vld [vmem:[%s1507_s1 + $0x5c8] sm:$0xff]  ;;  %v205_v33 = vld [vmem:[%s1507_s1 + $0x5d8] sm:$0xff]  ;;  %v202_v34 = vld [vmem:[%s1507_s1 + $0x5c0] sm:$0xff] }
  0x22   :  { %348 = vmatprep.subr.mxu0 %v267_v0  ;;  %425 = vmatprep.subr.mxu1 %v269_v1  ;;  %v204_v35 = vld [vmem:[%s1507_s1 + $0x5d0] sm:$0xff]  ;;  %v195_v36 = vld [vmem:[%s1507_s1 + $0x588] sm:$0xff]  ;;  %v197_v37 = vld [vmem:[%s1507_s1 + $0x598] sm:$0xff] }
  0x23   :  { %349 = vmatpush2.msra.mxu0 %v266_v2  ;;  %426 = vmatpush2.msra.mxu1 %v268_v3  ;;  %v194_v38 = vld [vmem:[%s1507_s1 + $0x580] sm:$0xff]  ;;  %v196_v39 = vld [vmem:[%s1507_s1 + $0x590] sm:$0xff]  ;;  %v187_v40 = vld [vmem:[%s1507_s1 + $0x548] sm:$0xff] }
  0x24   :  { %350 = vmatprep.subr.mxu0 %v259_v4  ;;  %427 = vmatprep.subr.mxu1 %v261_v5  ;;  %v189_v41 = vld [vmem:[%s1507_s1 + $0x558] sm:$0xff]  ;;  %v186_v42 = vld [vmem:[%s1507_s1 + $0x540] sm:$0xff]  ;;  %v188_v43 = vld [vmem:[%s1507_s1 + $0x550] sm:$0xff] }
  0x25   :  { %351 = vmatpush2.msra.mxu0 %v258_v6  ;;  %428 = vmatpush2.msra.mxu1 %v260_v7  ;;  %v179_v44 = vld [vmem:[%s1507_s1 + $0x508] sm:$0xff]  ;;  %v181_v45 = vld [vmem:[%s1507_s1 + $0x518] sm:$0xff]  ;;  %v178_v46 = vld [vmem:[%s1507_s1 + $0x500] sm:$0xff] }
  0x26   :  { %352 = vmatprep.subr.mxu0 %v251_v8  ;;  %429 = vmatprep.subr.mxu1 %v253_v9  ;;  %v180_v47 = vld [vmem:[%s1507_s1 + $0x510] sm:$0xff]  ;;  %v171_v48 = vld [vmem:[%s1507_s1 + $0x4c8] sm:$0xff]  ;;  %v173_v49 = vld [vmem:[%s1507_s1 + $0x4d8] sm:$0xff] }
  0x27   :  { %353 = vmatpush2.msra.mxu0 %v250_v10  ;;  %430 = vmatpush2.msra.mxu1 %v252_v11  ;;  %v170_v50 = vld [vmem:[%s1507_s1 + $0x4c0] sm:$0xff]  ;;  %v172_v51 = vld [vmem:[%s1507_s1 + $0x4d0] sm:$0xff]  ;;  %v163_v52 = vld [vmem:[%s1507_s1 + $0x488] sm:$0xff] }
  0x28   :  { %354 = vmatprep.subr.mxu0 %v243_v12  ;;  %431 = vmatprep.subr.mxu1 %v245_v13  ;;  %v165_v53 = vld [vmem:[%s1507_s1 + $0x498] sm:$0xff]  ;;  %v162_v54 = vld [vmem:[%s1507_s1 + $0x480] sm:$0xff]  ;;  %v164_v55 = vld [vmem:[%s1507_s1 + $0x490] sm:$0xff] }
  0x29   :  { %355 = vmatpush2.msra.mxu0 %v242_v14  ;;  %432 = vmatpush2.msra.mxu1 %v244_v15  ;;  %v155_v56 = vld [vmem:[%s1507_s1 + $0x448] sm:$0xff]  ;;  %v157_v57 = vld [vmem:[%s1507_s1 + $0x458] sm:$0xff]  ;;  %v154_v58 = vld [vmem:[%s1507_s1 + $0x440] sm:$0xff] }
  0x2a   :  { %356 = vmatprep.subr.mxu0 %v235_v16  ;;  %433 = vmatprep.subr.mxu1 %v237_v17  ;;  %v156_v59 = vld [vmem:[%s1507_s1 + $0x450] sm:$0xff]  ;;  %v147_v60 = vld [vmem:[%s1507_s1 + $0x408] sm:$0xff]  ;;  %v149_v61 = vld [vmem:[%s1507_s1 + $0x418] sm:$0xff] }
  0x2b   :  { %357 = vmatpush2.msra.mxu0 %v234_v18  ;;  %434 = vmatpush2.msra.mxu1 %v236_v19  ;;  %v146_v62 = vld [vmem:[%s1507_s1 + $0x400] sm:$0xff]  ;;  %v1048_v63 = vld [vmem:[%s1508_s0 + $0x8] sm:$0xff]  ;;  %v148_v0 = vld [vmem:[%s1507_s1 + $0x410] sm:$0xff] }
  0x2c   :  { %358 = vmatprep.subr.mxu0 %v227_v20  ;;  %435 = vmatprep.subr.mxu1 %v229_v21  ;;  %v1056_v1 = vld [vmem:[%s1508_s0] sm:$0xff]  ;;  %v143_v2 = vld [vmem:[%s1507_s1 + $0x3e8] sm:$0xff]  ;;  %v145_v3 = vld [vmem:[%s1507_s1 + $0x3f8] sm:$0xff] }
  0x2d   :  { %359 = vmatpush2.msra.mxu0 %v226_v22  ;;  %436 = vmatpush2.msra.mxu1 %v228_v23  ;;  %v142_v4 = vld [vmem:[%s1507_s1 + $0x3e0] sm:$0xff]  ;;  %v144_v5 = vld [vmem:[%s1507_s1 + $0x3f0] sm:$0xff]  ;;  %v135_v6 = vld [vmem:[%s1507_s1 + $0x3a8] sm:$0xff] }
  0x2e   :  { %360 = vmatprep.subr.mxu0 %v219_v24  ;;  %437 = vmatprep.subr.mxu1 %v221_v25  ;;  %v137_v7 = vld [vmem:[%s1507_s1 + $0x3b8] sm:$0xff]  ;;  %v134_v8 = vld [vmem:[%s1507_s1 + $0x3a0] sm:$0xff]  ;;  %v136_v9 = vld [vmem:[%s1507_s1 + $0x3b0] sm:$0xff] }
  0x2f   :  { %361 = vmatpush2.msra.mxu0 %v218_v26  ;;  %438 = vmatpush2.msra.mxu1 %v220_v27  ;;  %v127_v10 = vld [vmem:[%s1507_s1 + $0x368] sm:$0xff]  ;;  %v129_v11 = vld [vmem:[%s1507_s1 + $0x378] sm:$0xff]  ;;  %v126_v12 = vld [vmem:[%s1507_s1 + $0x360] sm:$0xff] }
  0x30   :  { %362 = vmatprep.subr.mxu0 %v211_v28  ;;  %439 = vmatprep.subr.mxu1 %v213_v29  ;;  %v128_v13 = vld [vmem:[%s1507_s1 + $0x370] sm:$0xff]  ;;  %v119_v14 = vld [vmem:[%s1507_s1 + $0x328] sm:$0xff]  ;;  %v121_v15 = vld [vmem:[%s1507_s1 + $0x338] sm:$0xff] }
  0x31   :  { %363 = vmatpush2.msra.mxu0 %v210_v30  ;;  %440 = vmatpush2.msra.mxu1 %v212_v31  ;;  %v118_v16 = vld [vmem:[%s1507_s1 + $0x320] sm:$0xff]  ;;  %v120_v17 = vld [vmem:[%s1507_s1 + $0x330] sm:$0xff]  ;;  %v111_v18 = vld [vmem:[%s1507_s1 + $0x2e8] sm:$0xff] }
  0x32   :  { %364 = vmatprep.subr.mxu0 %v203_v32  ;;  %441 = vmatprep.subr.mxu1 %v205_v33  ;;  %v113_v19 = vld [vmem:[%s1507_s1 + $0x2f8] sm:$0xff]  ;;  %v110_v20 = vld [vmem:[%s1507_s1 + $0x2e0] sm:$0xff]  ;;  %v112_v21 = vld [vmem:[%s1507_s1 + $0x2f0] sm:$0xff] }
  0x33   :  { %365 = vmatpush2.msra.mxu0 %v202_v34  ;;  %442 = vmatpush2.msra.mxu1 %v204_v35  ;;  %v103_v22 = vld [vmem:[%s1507_s1 + $0x2a8] sm:$0xff]  ;;  %v105_v23 = vld [vmem:[%s1507_s1 + $0x2b8] sm:$0xff]  ;;  %v102_v24 = vld [vmem:[%s1507_s1 + $0x2a0] sm:$0xff] }
  0x34   :  { %366 = vmatprep.subr.mxu0 %v195_v36  ;;  %443 = vmatprep.subr.mxu1 %v197_v37  ;;  %v104_v25 = vld [vmem:[%s1507_s1 + $0x2b0] sm:$0xff]  ;;  %v95_v26 = vld [vmem:[%s1507_s1 + $0x268] sm:$0xff]  ;;  %v97_v27 = vld [vmem:[%s1507_s1 + $0x278] sm:$0xff] }
  0x35   :  { %367 = vmatpush2.msra.mxu0 %v194_v38  ;;  %444 = vmatpush2.msra.mxu1 %v196_v39  ;;  %v94_v28 = vld [vmem:[%s1507_s1 + $0x260] sm:$0xff]  ;;  %v96_v29 = vld [vmem:[%s1507_s1 + $0x270] sm:$0xff]  ;;  %v87_v30 = vld [vmem:[%s1507_s1 + $0x228] sm:$0xff] }
  0x36   :  { %368 = vmatprep.subr.mxu0 %v187_v40  ;;  %445 = vmatprep.subr.mxu1 %v189_v41  ;;  %v89_v31 = vld [vmem:[%s1507_s1 + $0x238] sm:$0xff]  ;;  %v86_v32 = vld [vmem:[%s1507_s1 + $0x220] sm:$0xff]  ;;  %v88_v33 = vld [vmem:[%s1507_s1 + $0x230] sm:$0xff] }
  0x37   :  { %369 = vmatpush2.msra.mxu0 %v186_v42  ;;  %446 = vmatpush2.msra.mxu1 %v188_v43  ;;  %v79_v34 = vld [vmem:[%s1507_s1 + $0x1e8] sm:$0xff]  ;;  %v81_v35 = vld [vmem:[%s1507_s1 + $0x1f8] sm:$0xff]  ;;  %v78_v36 = vld [vmem:[%s1507_s1 + $0x1e0] sm:$0xff] }
  0x38   :  { %370 = vmatprep.subr.mxu0 %v179_v44  ;;  %447 = vmatprep.subr.mxu1 %v181_v45  ;;  %v80_v37 = vld [vmem:[%s1507_s1 + $0x1f0] sm:$0xff]  ;;  %v71_v38 = vld [vmem:[%s1507_s1 + $0x1a8] sm:$0xff]  ;;  %v73_v39 = vld [vmem:[%s1507_s1 + $0x1b8] sm:$0xff] }
  0x39   :  { %371 = vmatpush2.msra.mxu0 %v178_v46  ;;  %448 = vmatpush2.msra.mxu1 %v180_v47  ;;  %v70_v40 = vld [vmem:[%s1507_s1 + $0x1a0] sm:$0xff]  ;;  %v72_v41 = vld [vmem:[%s1507_s1 + $0x1b0] sm:$0xff]  ;;  %v63_v42 = vld [vmem:[%s1507_s1 + $0x168] sm:$0xff] }
  0x3a   :  { %372 = vmatprep.subr.mxu0 %v171_v48  ;;  %449 = vmatprep.subr.mxu1 %v173_v49  ;;  %v65_v43 = vld [vmem:[%s1507_s1 + $0x178] sm:$0xff]  ;;  %v62_v44 = vld [vmem:[%s1507_s1 + $0x160] sm:$0xff]  ;;  %v64_v45 = vld [vmem:[%s1507_s1 + $0x170] sm:$0xff] }
  0x3b   :  { %373 = vmatpush2.msra.mxu0 %v170_v50  ;;  %450 = vmatpush2.msra.mxu1 %v172_v51  ;;  %v55_v46 = vld [vmem:[%s1507_s1 + $0x128] sm:$0xff]  ;;  %v57_v47 = vld [vmem:[%s1507_s1 + $0x138] sm:$0xff]  ;;  %v54_v48 = vld [vmem:[%s1507_s1 + $0x120] sm:$0xff] }
  0x3c   :  { %374 = vmatprep.subr.mxu0 %v163_v52  ;;  %451 = vmatprep.subr.mxu1 %v165_v53  ;;  %v56_v49 = vld [vmem:[%s1507_s1 + $0x130] sm:$0xff]  ;;  %v47_v50 = vld [vmem:[%s1507_s1 + $0xe8] sm:$0xff]  ;;  %v49_v51 = vld [vmem:[%s1507_s1 + $0xf8] sm:$0xff] }
  0x3d   :  { %375 = vmatpush2.msra.mxu0 %v162_v54  ;;  %452 = vmatpush2.msra.mxu1 %v164_v55  ;;  %v46_v52 = vld [vmem:[%s1507_s1 + $0xe0] sm:$0xff]  ;;  %v48_v53 = vld [vmem:[%s1507_s1 + $0xf0] sm:$0xff]  ;;  %v39_v54 = vld [vmem:[%s1507_s1 + $0xa8] sm:$0xff] }
  0x3e   :  { %376 = vmatprep.subr.mxu0 %v155_v56  ;;  %453 = vmatprep.subr.mxu1 %v157_v57  ;;  %v41_v55 = vld [vmem:[%s1507_s1 + $0xb8] sm:$0xff]  ;;  %v38_v56 = vld [vmem:[%s1507_s1 + $0xa0] sm:$0xff]  ;;  %v40_v57 = vld [vmem:[%s1507_s1 + $0xb0] sm:$0xff] }
  0x3f   :  { %377 = vmatpush2.msra.mxu0 %v154_v58  ;;  %454 = vmatpush2.msra.mxu1 %v156_v59  ;;  %v31_v58 = vld [vmem:[%s1507_s1 + $0x68] sm:$0xff]  ;;  %v33_v59 = vld [vmem:[%s1507_s1 + $0x78] sm:$0xff] }
  0x40   :  { %378 = vmatprep.subr.mxu0 %v147_v60  ;;  %455 = vmatprep.subr.mxu1 %v149_v61  ;;  %v30_v60 = vld [vmem:[%s1507_s1 + $0x60] sm:$0xff]  ;;  %v32_v61 = vld [vmem:[%s1507_s1 + $0x70] sm:$0xff] }
  0x41   :  { %379 = vmatpush2.msra.mxu0 %v146_v62  ;;  %380 = vmatprep.mubr.f32.mxu0 %v1048_v63  ;;  %v23_v62 = vld [vmem:[%s1507_s1 + $0x28] sm:$0xff] }
  0x42   :  { %456 = vmatpush2.msra.mxu1 %v148_v0  ;;  %457 = vmatprep.mubr.f32.mxu1 %v1048_v63  ;;  %v25_v0 = vld [vmem:[%s1507_s1 + $0x38] sm:$0xff] }
  0x43   :  { %381 = vmatmul.mubr.f32.vlgmr.msra.gmra.mxu0 %v1056_v1  ;;  %458 = vmatmul.mubr.f32.vlgmr.msra.gmra.mxu1 %v1056_v1 }
  0x44   :  { %470 = vmatprep.subr.mxu0 %v143_v2  ;;  %547 = vmatprep.subr.mxu1 %v145_v3  ;;  %v22_v2 = vld [vmem:[%s1507_s1 + $0x20] sm:$0xff]  ;;  %v24_v3 = vld [vmem:[%s1507_s1 + $0x30] sm:$0xff] }
  0x45   :  { %471 = vmatpush1.msra.mxu0 %v142_v4  ;;  %548 = vmatpush1.msra.mxu1 %v144_v5  ;;  %v271_v4 = vld [vmem:[%s1507_s1 + $0x7e8] sm:$0xff]  ;;  %v273_v5 = vld [vmem:[%s1507_s1 + $0x7f8] sm:$0xff] }
  0x46   :  { %472 = vmatprep.subr.mxu0 %v135_v6  ;;  %549 = vmatprep.subr.mxu1 %v137_v7  ;;  %v270_v6 = vld [vmem:[%s1507_s1 + $0x7e0] sm:$0xff]  ;;  %v272_v7 = vld [vmem:[%s1507_s1 + $0x7f0] sm:$0xff] }
  0x47   :  { %473 = vmatpush1.msra.mxu0 %v134_v8  ;;  %550 = vmatpush1.msra.mxu1 %v136_v9  ;;  %v263_v8 = vld [vmem:[%s1507_s1 + $0x7a8] sm:$0xff]  ;;  %v265_v9 = vld [vmem:[%s1507_s1 + $0x7b8] sm:$0xff] }
  0x48   :  { %474 = vmatprep.subr.mxu0 %v127_v10  ;;  %551 = vmatprep.subr.mxu1 %v129_v11  ;;  %v262_v10 = vld [vmem:[%s1507_s1 + $0x7a0] sm:$0xff]  ;;  %v264_v11 = vld [vmem:[%s1507_s1 + $0x7b0] sm:$0xff] }
  0x49   :  { %475 = vmatpush1.msra.mxu0 %v126_v12  ;;  %552 = vmatpush1.msra.mxu1 %v128_v13  ;;  %v255_v12 = vld [vmem:[%s1507_s1 + $0x768] sm:$0xff]  ;;  %v257_v13 = vld [vmem:[%s1507_s1 + $0x778] sm:$0xff] }
  0x4a   :  { %476 = vmatprep.subr.mxu0 %v119_v14  ;;  %553 = vmatprep.subr.mxu1 %v121_v15  ;;  %v254_v14 = vld [vmem:[%s1507_s1 + $0x760] sm:$0xff]  ;;  %v256_v15 = vld [vmem:[%s1507_s1 + $0x770] sm:$0xff] }
  0x4b   :  { %477 = vmatpush1.msra.mxu0 %v118_v16  ;;  %554 = vmatpush1.msra.mxu1 %v120_v17  ;;  %v247_v16 = vld [vmem:[%s1507_s1 + $0x728] sm:$0xff]  ;;  %v249_v17 = vld [vmem:[%s1507_s1 + $0x738] sm:$0xff] }
  0x4c   :  { %478 = vmatprep.subr.mxu0 %v111_v18  ;;  %555 = vmatprep.subr.mxu1 %v113_v19  ;;  %v246_v18 = vld [vmem:[%s1507_s1 + $0x720] sm:$0xff]  ;;  %v248_v19 = vld [vmem:[%s1507_s1 + $0x730] sm:$0xff] }
  0x4d   :  { %479 = vmatpush1.msra.mxu0 %v110_v20  ;;  %556 = vmatpush1.msra.mxu1 %v112_v21  ;;  %v239_v20 = vld [vmem:[%s1507_s1 + $0x6e8] sm:$0xff]  ;;  %v241_v21 = vld [vmem:[%s1507_s1 + $0x6f8] sm:$0xff] }
  0x4e   :  { %480 = vmatprep.subr.mxu0 %v103_v22  ;;  %557 = vmatprep.subr.mxu1 %v105_v23  ;;  %v238_v22 = vld [vmem:[%s1507_s1 + $0x6e0] sm:$0xff]  ;;  %v240_v23 = vld [vmem:[%s1507_s1 + $0x6f0] sm:$0xff] }
  0x4f   :  { %481 = vmatpush1.msra.mxu0 %v102_v24  ;;  %558 = vmatpush1.msra.mxu1 %v104_v25  ;;  %v231_v24 = vld [vmem:[%s1507_s1 + $0x6a8] sm:$0xff]  ;;  %v233_v25 = vld [vmem:[%s1507_s1 + $0x6b8] sm:$0xff] }
  0x50   :  { %482 = vmatprep.subr.mxu0 %v95_v26  ;;  %559 = vmatprep.subr.mxu1 %v97_v27  ;;  %v230_v26 = vld [vmem:[%s1507_s1 + $0x6a0] sm:$0xff]  ;;  %v232_v27 = vld [vmem:[%s1507_s1 + $0x6b0] sm:$0xff] }
  0x51   :  { %483 = vmatpush1.msra.mxu0 %v94_v28  ;;  %560 = vmatpush1.msra.mxu1 %v96_v29  ;;  %v223_v28 = vld [vmem:[%s1507_s1 + $0x668] sm:$0xff]  ;;  %v225_v29 = vld [vmem:[%s1507_s1 + $0x678] sm:$0xff] }
  0x52   :  { %484 = vmatprep.subr.mxu0 %v87_v30  ;;  %561 = vmatprep.subr.mxu1 %v89_v31  ;;  %v222_v30 = vld [vmem:[%s1507_s1 + $0x660] sm:$0xff]  ;;  %v224_v31 = vld [vmem:[%s1507_s1 + $0x670] sm:$0xff] }
  0x53   :  { %485 = vmatpush1.msra.mxu0 %v86_v32  ;;  %562 = vmatpush1.msra.mxu1 %v88_v33  ;;  %v215_v32 = vld [vmem:[%s1507_s1 + $0x628] sm:$0xff]  ;;  %v217_v33 = vld [vmem:[%s1507_s1 + $0x638] sm:$0xff] }
  0x54   :  { %486 = vmatprep.subr.mxu0 %v79_v34  ;;  %563 = vmatprep.subr.mxu1 %v81_v35  ;;  %v214_v34 = vld [vmem:[%s1507_s1 + $0x620] sm:$0xff]  ;;  %v216_v35 = vld [vmem:[%s1507_s1 + $0x630] sm:$0xff] }
  0x55   :  { %487 = vmatpush1.msra.mxu0 %v78_v36  ;;  %564 = vmatpush1.msra.mxu1 %v80_v37  ;;  %v207_v36 = vld [vmem:[%s1507_s1 + $0x5e8] sm:$0xff]  ;;  %v209_v37 = vld [vmem:[%s1507_s1 + $0x5f8] sm:$0xff] }
  0x56   :  { %488 = vmatprep.subr.mxu0 %v71_v38  ;;  %565 = vmatprep.subr.mxu1 %v73_v39  ;;  %v206_v38 = vld [vmem:[%s1507_s1 + $0x5e0] sm:$0xff]  ;;  %v208_v39 = vld [vmem:[%s1507_s1 + $0x5f0] sm:$0xff] }
  0x57   :  { %489 = vmatpush1.msra.mxu0 %v70_v40  ;;  %566 = vmatpush1.msra.mxu1 %v72_v41  ;;  %v199_v40 = vld [vmem:[%s1507_s1 + $0x5a8] sm:$0xff]  ;;  %v201_v41 = vld [vmem:[%s1507_s1 + $0x5b8] sm:$0xff] }
  0x58   :  { %490 = vmatprep.subr.mxu0 %v63_v42  ;;  %567 = vmatprep.subr.mxu1 %v65_v43  ;;  %v198_v42 = vld [vmem:[%s1507_s1 + $0x5a0] sm:$0xff]  ;;  %v200_v43 = vld [vmem:[%s1507_s1 + $0x5b0] sm:$0xff] }
  0x59   :  { %491 = vmatpush1.msra.mxu0 %v62_v44  ;;  %568 = vmatpush1.msra.mxu1 %v64_v45  ;;  %v191_v44 = vld [vmem:[%s1507_s1 + $0x568] sm:$0xff]  ;;  %v193_v45 = vld [vmem:[%s1507_s1 + $0x578] sm:$0xff] }
  0x5a   :  { %492 = vmatprep.subr.mxu0 %v55_v46  ;;  %569 = vmatprep.subr.mxu1 %v57_v47  ;;  %v190_v46 = vld [vmem:[%s1507_s1 + $0x560] sm:$0xff]  ;;  %v192_v47 = vld [vmem:[%s1507_s1 + $0x570] sm:$0xff] }
  0x5b   :  { %493 = vmatpush1.msra.mxu0 %v54_v48  ;;  %570 = vmatpush1.msra.mxu1 %v56_v49  ;;  %v183_v48 = vld [vmem:[%s1507_s1 + $0x528] sm:$0xff]  ;;  %v185_v49 = vld [vmem:[%s1507_s1 + $0x538] sm:$0xff] }
  0x5c   :  { %494 = vmatprep.subr.mxu0 %v47_v50  ;;  %571 = vmatprep.subr.mxu1 %v49_v51  ;;  %v182_v50 = vld [vmem:[%s1507_s1 + $0x520] sm:$0xff]  ;;  %v184_v51 = vld [vmem:[%s1507_s1 + $0x530] sm:$0xff] }
  0x5d   :  { %495 = vmatpush1.msra.mxu0 %v46_v52  ;;  %572 = vmatpush1.msra.mxu1 %v48_v53  ;;  %v175_v52 = vld [vmem:[%s1507_s1 + $0x4e8] sm:$0xff]  ;;  %v177_v53 = vld [vmem:[%s1507_s1 + $0x4f8] sm:$0xff] }
  0x5e   :  { %496 = vmatprep.subr.mxu0 %v39_v54  ;;  %573 = vmatprep.subr.mxu1 %v41_v55  ;;  %v17_v54 = vld [vmem:[%s1508_s0 + $0x18] sm:$0xff]  ;;  %v174_v55 = vld [vmem:[%s1507_s1 + $0x4e0] sm:$0xff] }
  0x5f   :  { %497 = vmatpush1.msra.mxu0 %v38_v56  ;;  %574 = vmatpush1.msra.mxu1 %v40_v57  ;;  %v176_v56 = vld [vmem:[%s1507_s1 + $0x4f0] sm:$0xff] }
  0x60   :  { %498 = vmatprep.subr.mxu0 %v31_v58  ;;  %575 = vmatprep.subr.mxu1 %v33_v59  ;;  %v16_v57 = vld [vmem:[%s1508_s0 + $0x10] sm:$0xff]  ;;  %v167_v58 = vld [vmem:[%s1507_s1 + $0x4a8] sm:$0xff]  ;;  %v169_v59 = vld [vmem:[%s1507_s1 + $0x4b8] sm:$0xff] }
  0x61   :  { %499 = vmatpush1.msra.mxu0 %v30_v60  ;;  %576 = vmatpush1.msra.mxu1 %v32_v61  ;;  %v166_v60 = vld [vmem:[%s1507_s1 + $0x4a0] sm:$0xff]  ;;  %v168_v61 = vld [vmem:[%s1507_s1 + $0x4b0] sm:$0xff] }
  0x62   :  { %500 = vmatprep.subr.mxu0 %v23_v62  ;;  %577 = vmatprep.subr.mxu1 %v25_v0  ;;  %v159_v62 = vld [vmem:[%s1507_s1 + $0x468] sm:$0xff]  ;;  %v161_v0 = vld [vmem:[%s1507_s1 + $0x478] sm:$0xff] }
  0x63   :  { %501 = vmatpush1.msra.mxu0 %v22_v2  ;;  %578 = vmatpush1.msra.mxu1 %v24_v3  ;;  %v158_v2 = vld [vmem:[%s1507_s1 + $0x460] sm:$0xff]  ;;  %v160_v3 = vld [vmem:[%s1507_s1 + $0x470] sm:$0xff] }
  0x64   :  { %502 = vmatprep.subr.mxu0 %v271_v4  ;;  %579 = vmatprep.subr.mxu1 %v273_v5  ;;  %v151_v4 = vld [vmem:[%s1507_s1 + $0x428] sm:$0xff]  ;;  %v153_v5 = vld [vmem:[%s1507_s1 + $0x438] sm:$0xff] }
  0x65   :  { %503 = vmatpush2.msra.mxu0 %v270_v6  ;;  %580 = vmatpush2.msra.mxu1 %v272_v7  ;;  %v150_v6 = vld [vmem:[%s1507_s1 + $0x420] sm:$0xff]  ;;  %v152_v7 = vld [vmem:[%s1507_s1 + $0x430] sm:$0xff] }
  0x66   :  { %504 = vmatprep.subr.mxu0 %v263_v8  ;;  %581 = vmatprep.subr.mxu1 %v265_v9  ;;  %v276_v8 = vlaneseq }
  0x67   :  { %505 = vmatpush2.msra.mxu0 %v262_v10  ;;  %582 = vmatpush2.msra.mxu1 %v264_v11 }
  0x68   :  { %506 = vmatprep.subr.mxu0 %v255_v12  ;;  %583 = vmatprep.subr.mxu1 %v257_v13  ;;  %v277_v9 = vshrl.u32 %v276_v8, 7  ;;  %v274_v12 = vld [vmem:[%s1509_s2] sm:$0xff] }
  0x69   :  { %507 = vmatpush2.msra.mxu0 %v254_v14  ;;  %584 = vmatpush2.msra.mxu1 %v256_v15 }
  0x6a   :  { %508 = vmatprep.subr.mxu0 %v247_v16  ;;  %585 = vmatprep.subr.mxu1 %v249_v17  ;;  %v278_v10 = vsub.s32 0, %v277_v9  ;;  %v286_v11 = vsub.s32 2, %v277_v9  ;;  %v282_v13 = vsub.s32 1, %v277_v9  ;;  %v290_v14 = vsub.s32 3, %v277_v9 }
  0x6b   :  { %509 = vmatpush2.msra.mxu0 %v246_v18  ;;  %586 = vmatpush2.msra.mxu1 %v248_v19 }
  0x6c   :  { %510 = vmatprep.subr.mxu0 %v239_v20  ;;  %587 = vmatprep.subr.mxu1 %v241_v21  ;;  %v279_v15 = vrot.slane %v274_v12, %v278_v10  ;;  %v283_v16 = vrot.slane %v274_v12, %v282_v13  ;;  %v291_v17 = vrot.slane %v274_v12, %v290_v14 }
  0x6d   :  { %511 = vmatpush2.msra.mxu0 %v238_v22  ;;  %588 = vmatpush2.msra.mxu1 %v240_v23 }
  0x6e   :  { %512 = vmatprep.subr.mxu0 %v231_v24  ;;  %589 = vmatprep.subr.mxu1 %v233_v25 }
  0x6f   :  { %513 = vmatpush2.msra.mxu0 %v230_v26  ;;  %590 = vmatpush2.msra.mxu1 %v232_v27 }
  0x70   :  { %514 = vmatprep.subr.mxu0 %v223_v28  ;;  %591 = vmatprep.subr.mxu1 %v225_v29  ;;  %v294_v29 = vsub.s32 4, %v277_v9 }
  0x71   :  { %515 = vmatpush2.msra.mxu0 %v222_v30  ;;  %592 = vmatpush2.msra.mxu1 %v224_v31  ;;  %v302_v30 = vsub.s32 6, %v277_v9 }
  0x72   :  { %516 = vmatprep.subr.mxu0 %v215_v32  ;;  %593 = vmatprep.subr.mxu1 %v217_v33 }
  0x73   :  { %517 = vmatpush2.msra.mxu0 %v214_v34  ;;  %594 = vmatpush2.msra.mxu1 %v216_v35  ;;  %v298_v35 = vsub.s32 5, %v277_v9 }
  0x74   :  { %518 = vmatprep.subr.mxu0 %v207_v36  ;;  %595 = vmatprep.subr.mxu1 %v209_v37  ;;  %v306_v36 = vsub.s32 7, %v277_v9  ;;  %v295_v37 = vrot.slane %v274_v12, %v294_v29 }
  0x75   :  { %519 = vmatpush2.msra.mxu0 %v206_v38  ;;  %596 = vmatpush2.msra.mxu1 %v208_v39  ;;  %v303_v38 = vrot.slane %v274_v12, %v302_v30  ;;  %v299_v39 = vrot.slane %v274_v12, %v298_v35 }
  0x76   :  { %520 = vmatprep.subr.mxu0 %v199_v40  ;;  %597 = vmatprep.subr.mxu1 %v201_v41  ;;  %v307_v40 = vrot.slane %v274_v12, %v306_v36 }
  0x77   :  { %521 = vmatpush2.msra.mxu0 %v198_v42  ;;  %598 = vmatpush2.msra.mxu1 %v200_v43 }
  0x78   :  { %522 = vmatprep.subr.mxu0 %v191_v44  ;;  %599 = vmatprep.subr.mxu1 %v193_v45 }
  0x79   :  { %523 = vmatpush2.msra.mxu0 %v190_v46  ;;  %600 = vmatpush2.msra.mxu1 %v192_v47 }
  0x7a   :  { %524 = vmatprep.subr.mxu0 %v183_v48  ;;  %601 = vmatprep.subr.mxu1 %v185_v49 }
  0x7b   :  { %525 = vmatpush2.msra.mxu0 %v182_v50  ;;  %602 = vmatpush2.msra.mxu1 %v184_v51 }
  0x7c   :  { %526 = vmatprep.subr.mxu0 %v175_v52  ;;  %603 = vmatprep.subr.mxu1 %v177_v53 }
  0x7d   :  { %386 = vmatprep.mubr.f32.mxu0 %v17_v54  ;;  %463 = vmatprep.mubr.f32.mxu1 %v17_v54 }
  0x7e   :  { %527 = vmatpush2.msra.mxu0 %v174_v55  ;;  %604 = vmatpush2.msra.mxu1 %v176_v56 }
  0x7f   :  { %387 = vmatmul.mubr.f32.gmra.mxu0 %v16_v57  ;;  %464 = vmatmul.mubr.f32.gmra.mxu1 %v16_v57 }
  0x80   :  { %528 = vmatprep.subr.mxu0 %v167_v58  ;;  %605 = vmatprep.subr.mxu1 %v169_v59 }
  0x81   :  { %529 = vmatpush2.msra.mxu0 %v166_v60  ;;  %606 = vmatpush2.msra.mxu1 %v168_v61 }
  0x82   :  { %530 = vmatprep.subr.mxu0 %v159_v62  ;;  %607 = vmatprep.subr.mxu1 %v161_v0 }
  0x83   :  { %531 = vmatpush2.msra.mxu0 %v158_v2  ;;  %608 = vmatpush2.msra.mxu1 %v160_v3 }
  0x84   :  { %532 = vmatprep.subr.mxu0 %v151_v4  ;;  %609 = vmatprep.subr.mxu1 %v153_v5 }
  0x85   :  { %533 = vmatpush2.msra.mxu0 %v150_v6  ;;  %534 = vmatprep.mubr.f32.mxu0 %v1048_v63 }
  0x86   :  { %610 = vmatpush2.msra.mxu1 %v152_v7  ;;  %611 = vmatprep.mubr.f32.mxu1 %v1048_v63  ;;  %v287_v63 = vrot.slane %v274_v12, %v286_v11 }
  0x87   :  { %535 = vmatmul.mubr.f32.vlgmr.msra.gmra.mxu0 %v1056_v1  ;;  %612 = vmatmul.mubr.f32.vlgmr.msra.gmra.mxu1 %v1056_v1 }
  0x88   :  { %540 = vmatprep.mubr.f32.mxu0 %v17_v54  ;;  %617 = vmatprep.mubr.f32.mxu1 %v17_v54 }
  0x8b   :  { %541 = vmatmul.mubr.f32.gmra.mxu0 %v16_v57  ;;  %618 = vmatmul.mubr.f32.gmra.mxu1 %v16_v57 }
 0x103   :  { %v382_v18 = vpop.f32.mrf.mxu0  ;;  %v459_v1 = vpop.f32.mrf.mxu1 }
 0x104   :  { %v383_v19 = vadd.f32 %v382_v18, %v279_v15  ;;  %v460_v20 = vadd.f32 %v459_v1, %v287_v63 }
 0x105   :  { %v384_v21 = vpop.f32.mrf.mxu0  ;;  %v461_v22 = vpop.f32.mrf.mxu1 }
 0x106   :  { %624 = vst [vmem:[%s1510_s3] sm:$0xff] %v383_v19  ;;  %626 = vst [vmem:[%s1510_s3 + $0x10] sm:$0xff] %v460_v20  ;;  %v385_v23 = vadd.f32 %v384_v21, %v283_v16  ;;  %v462_v24 = vadd.f32 %v461_v22, %v291_v17 }
 0x108   :  { %625 = vst [vmem:[%s1510_s3 + $0x8] sm:$0xff] %v385_v23  ;;  %627 = vst [vmem:[%s1510_s3 + $0x18] sm:$0xff] %v462_v24 }
 0x13f   :  { %v388_v25 = vpop.f32.mrf.mxu0  ;;  %v465_v26 = vpop.f32.mrf.mxu1 }
 0x140   :  { %v389_v27 = vadd.f32 %v388_v25, %v279_v15  ;;  %v466_v28 = vadd.f32 %v465_v26, %v287_v63 }
 0x141   :  { %v390_v31 = vpop.f32.mrf.mxu0  ;;  %v467_v32 = vpop.f32.mrf.mxu1 }
 0x142   :  { %632 = vst [vmem:[%s1510_s3 + $0x40] sm:$0xff] %v389_v27  ;;  %634 = vst [vmem:[%s1510_s3 + $0x50] sm:$0xff] %v466_v28  ;;  %v391_v33 = vadd.f32 %v390_v31, %v283_v16  ;;  %v468_v34 = vadd.f32 %v467_v32, %v291_v17 }
 0x144   :  { %633 = vst [vmem:[%s1510_s3 + $0x48] sm:$0xff] %v391_v33  ;;  %635 = vst [vmem:[%s1510_s3 + $0x58] sm:$0xff] %v468_v34 }
 0x147   :  { %v536_v41 = vpop.f32.mrf.mxu0  ;;  %v613_v42 = vpop.f32.mrf.mxu1 }
 0x148   :  { %v537_v43 = vadd.f32 %v536_v41, %v295_v37  ;;  %v614_v44 = vadd.f32 %v613_v42, %v303_v38 }
 0x149   :  { %v538_v45 = vpop.f32.mrf.mxu0  ;;  %v615_v46 = vpop.f32.mrf.mxu1 }
 0x14a   :  { %628 = vst [vmem:[%s1510_s3 + $0x20] sm:$0xff] %v537_v43  ;;  %630 = vst [vmem:[%s1510_s3 + $0x30] sm:$0xff] %v614_v44  ;;  %v539_v47 = vadd.f32 %v538_v45, %v299_v39  ;;  %v616_v48 = vadd.f32 %v615_v46, %v307_v40 }
 0x14b   :  { %v542_v49 = vpop.f32.mrf.mxu0  ;;  %v619_v50 = vpop.f32.mrf.mxu1 }
 0x14c   :  { %629 = vst [vmem:[%s1510_s3 + $0x28] sm:$0xff] %v539_v47  ;;  %631 = vst [vmem:[%s1510_s3 + $0x38] sm:$0xff] %v616_v48  ;;  %v543_v51 = vadd.f32 %v542_v49, %v295_v37  ;;  %v620_v52 = vadd.f32 %v619_v50, %v303_v38 }
 0x14d   :  { %v544_v53 = vpop.f32.mrf.mxu0  ;;  %v621_v54 = vpop.f32.mrf.mxu1 }
 0x14e   :  { %636 = vst [vmem:[%s1510_s3 + $0x60] sm:$0xff] %v543_v51  ;;  %638 = vst [vmem:[%s1510_s3 + $0x70] sm:$0xff] %v620_v52  ;;  %v545_v55 = vadd.f32 %v544_v53, %v299_v39  ;;  %v622_v56 = vadd.f32 %v621_v54, %v307_v40 }
 0x150   :  { %637 = vst [vmem:[%s1510_s3 + $0x68] sm:$0xff] %v545_v55  ;;  %639 = vst [vmem:[%s1510_s3 + $0x78] sm:$0xff] %v622_v56 }

// kernel: lstm_model_forward.6
= control target key start
LH: loop header
LB: loop body
LE: loop exit
PB: predicated region body
PF: predicated region fallthrough
CT: control target
= control target key end

     0   :  { %7 = vsyncpa [#allocation6], 0  ;;  %s3648_s0 = inlined_call_operand.vmem [shape: f32[8,2,1024], index: 0, kind: input, shape index: {}]   ;;  %s3649_s1 = inlined_call_operand.hbm [shape: f32[2,128,512], index: 1, kind: input, shape index: {}]   ;;  %s3650_s2 = inlined_call_operand.vmem [shape: f32[8,2,256], index: 2, kind: output, shape index: {}]  }
   0x1   :  { %9 = vsyncpa [#allocation6 + $0x1], 0  ;;  %s2529_s9 = smov 0   ;;  %s2531_s10 = smov 0  }
   0x2   :  { %s2533_s11 = smov 0   ;;  %s2535_s12 = smov 0  }
   0x3   :  { %s2537_s13 = smov 0   ;;  %s2539_s14 = smov 0  }
   0x4 LB: > { %s2181_s15 = sadd.s32 4294967295, %s2507_s14   ;;  %s27_s16 = sadd.s32 1, %s2503_s13  ;;  %s2507_s14 = sphi %s2539_s14, %s15_s14   ;;  %s2503_s13 = sphi %s2537_s13, %s3874_s13   ;;  %s2499_s12 = sphi %s2535_s12, %s3873_s12   ;;  %s2495_s11 = sphi %s2533_s11, %s3872_s11   ;;  %s2491_s10 = sphi %s2531_s10, %s3871_s10   ;;  %s2487_s9 = sphi %s2529_s9, %s3870_s9  }
   0x5   : > { %p29_p0 = scmp.ge.s32.totalorder %s27_s16, 2  ;;  %s42_s17 = sadd.s32 1, %s2495_s11 }
   0x6   : > { %p49_p1 = scmp.ne.s32.totalorder %s2495_s11, %s2491_s10  ;;  %p50_p2 = scmp.eq.s32.totalorder %s2507_s14, 0 }
   0x7   : > { %s3876_s16 = smov (%p29_p0, %s27_s16), 0  ;;  %p81_p4 = scmp.ne.s32.totalorder %s2491_s10, %s2487_s9 }
   0x8   : > { %p2565_p3 = por %p50_p2, %p49_p1  ;;  %s38_s19 = ssub.s32 %s2503_s13, %s3876_s16 }
   0x9   : > { %p82_p5 = scmp.eq.s32.totalorder %s2181_s15, 0  ;;  %p40_p6 = scmp.eq.s32.totalorder %s38_s19, 0 }
   0xa   : > { %p113_p7 = scmp.eq.s32.totalorder %s2181_s15, 1  ;;  %p2184_p10 = scmp.ge.s32.totalorder %s2507_s14, 2 }
   0xb   : > { %p2572_p8 = por %p82_p5, %p81_p4 }
   0xc   : > { %s2577_s21 = scalar_select %p40_p6, %s2495_s11, %s42_s17  }
   0xd   : > { %p2579_p9 = por %p113_p7, %p49_p1  ;;  %135 = sbr.rel (%p2184_p10) target bundleno = 42 (0x2a), region = 16 }
  0x12   : > { %138 = sbr.rel (!%p2565_p3) target bundleno = 26 (0x1a), region = 20  ;;  %s140_s23 = sand.u32 (%p2565_p3), 1, %s2495_s11  }
  0x13   : > { %s2223_s24 = sshll.u32 (%p2565_p3), %s2503_s13, 3  ;;  %s2185_s25 = sshll.u32 (%p2565_p3), %s140_s23, 6 }
  0x14   : > { %s151_s28 = scalar_lea.vmem (%p2565_p3), %s3648_s0, %s2223_s24  ;;  %s142_s29 = scalar_lea.vmem (%p2565_p3), [#allocation4], %s2185_s25 }
  0x15   : > { %v194_v0 = vld [vmem:[%s151_s28] sm:$0xff] (%p2565_p3)  ;;  %v196_v1 = vld [vmem:[%s151_s28 + $0x10] sm:$0xff] (%p2565_p3) }
  0x16   : > { %v198_v2 = vld [vmem:[%s151_s28 + $0x20] sm:$0xff] (%p2565_p3)  ;;  %195 = vst [vmem:[%s142_s29] sm:$0xff] (%p2565_p3), %v194_v0  ;;  %197 = vst [vmem:[%s142_s29 + $0x8] sm:$0xff] (%p2565_p3), %v196_v1  ;;  %v200_v3 = vld [vmem:[%s151_s28 + $0x30] sm:$0xff] (%p2565_p3) }
  0x17   : > { %199 = vst [vmem:[%s142_s29 + $0x10] sm:$0xff] %v198_v2  ;;  %v202_v4 = vld [vmem:[%s151_s28 + $0x40] sm:$0xff]  ;;  %v204_v5 = vld [vmem:[%s151_s28 + $0x50] sm:$0xff]  ;;  %201 = vst [vmem:[%s142_s29 + $0x18] sm:$0xff] %v200_v3 }
  0x18   : > { %203 = vst [vmem:[%s142_s29 + $0x20] sm:$0xff] %v202_v4  ;;  %205 = vst [vmem:[%s142_s29 + $0x28] sm:$0xff] %v204_v5  ;;  %v206_v6 = vld [vmem:[%s151_s28 + $0x60] sm:$0xff]  ;;  %v208_v7 = vld [vmem:[%s151_s28 + $0x70] sm:$0xff] }
  0x19   : > { %207 = vst [vmem:[%s142_s29 + $0x30] sm:$0xff] %v206_v6  ;;  %209 = vst [vmem:[%s142_s29 + $0x38] sm:$0xff] %v208_v7 }
  0x1a PF: > { %s216_s30 = sand.u32 1, %s2495_s11   ;;  %s2224_s3 = sshll.u32 %s2503_s13, 13 }
  0x1b   : > { %s2188_s4 = sshll.u32 %s216_s30, 9  ;;  %s226_s7 = scalar_lea.hbm %s3649_s1, %s2224_s3 }
  0x1c   : > { %s220_s8 = scalar_lea.vmem [#allocation5], %s2188_s4  ;;  %s217_s15 = scalar_lea.sflag [#allocation6], %s216_s30 }
  0x1d   : > { %s227_s9 = sshll.u32 %s220_s8, 4  ;;  %s2509_s19 = smov [#allocation5]   ;;  %s228_s9 = int_to_ptr.vmem [resolvable:$true] %s227_s9 }
  0x1e   : > { %s2443_s17 = scalar_lea.vmem %s228_s9, 8192  ;;  %s2447_s23 = sshll.u32 %s2509_s19, 4  ;;  %s2448_s23 = int_to_ptr.vmem [resolvable:$false] %s2447_s23 }
  0x1f   : > { %p2444_p11 = scmp.ne.s32.totalorder %s228_s9, %s2443_s17  ;;  %s2449_s24 = scalar_lea.vmem %s2448_s23, 16384 }
  0x20   : > { %p2450_p0 = scmp.lt.s32.totalorder %s228_s9, %s2448_s23  ;;  %p2451_p1 = scmp.lt.s32.totalorder %s2449_s24, %s2443_s17 }
  0x21   : > { %p2445_p12 = pnand %p2444_p11, %p2565_p3 }
  0x22   : > { %p2452_p2 = por %p2451_p1, %p2450_p0 }
  0x23   : > { %p2446_p13 = pneg %p2445_p12 }
  0x25   : > { %p2453_p4 = pnand %p2452_p2, %p2446_p13 }
  0x27   : > { %2456 = shalt.err (!%p2453_p4)
}
  0x28   : > { %s2510_s25 = smov 512   ;;  %s2511_s26 = smov 32  }
  0x29   : > { %2233 = dma.hbm_to_vmem [thread:$0]  (%p2565_p3), %s226_s7, 8192, %s228_s9, %s217_s15, %s2510_s25, %s2510_s25, %s2511_s26  }
  0x2a PF: > { %p2191_p5 = scmp.ge.s32.totalorder %s2507_s14, 1  ;;  %p235_p6 = scmp.lt.s32.totalorder %s2507_s14, 3 }
  0x2c   : > { %p236_p7 = pnand %p2191_p5, %p235_p6 }
  0x2e   : > { %239 = sbr.rel (%p236_p7) target bundleno = 2119 (0x847), region = 62 }
  0x33   : > { %s2603_s27 = sand.u32 1, %s2491_s10  }
  0x34   : > { %s2192_s28 = sshll.u32 %s2603_s27, 6  ;;  %s2193_s29 = sshll.u32 %s2603_s27, 9 }
  0x35   : > { %s2607_s30 = scalar_lea.vmem [#allocation4], %s2192_s28  ;;  %s249_s18 = scalar_lea.sflag [#allocation6], %s2603_s27 }
  0x36   : > { %s2610_s3 = scalar_lea.vmem [#allocation5], %s2193_s29 }
  0x37   : > { %2482 = dma.done.wait (%p2572_p8), %s249_s18, 8192  }
  0x38   : > { %2484 = vsyncadd (%p2572_p8), %s249_s18, 4294959104  ;;  %v3651_v8 = vmov 0.0   ;;  %v2621_v9 = vld [vmem:[%s2610_s3 + $0x1e8] sm:$0xff]  ;;  %v2624_v10 = vld [vmem:[%s2610_s3 + $0x1f8] sm:$0xff]  ;;  %p355_p3 = scmp.eq.s32.totalorder %s2499_s12, 0  ;;  %s2194_s6 = sshll.u32 %s2603_s27, 4 }
  0x39   : > { %426 = vmatprep.mubr.f32.mxu0 %v3651_v8  ;;  %289 = vst [vmem:[#allocation2] sm:$0x3] %v3651_v8  ;;  %290 = vst [vmem:[#allocation3] sm:$0x3] %v3651_v8  ;;  %497 = vmatprep.mubr.f32.mxu1 %v3651_v8  ;;  %v2627_v11 = vld [vmem:[%s2610_s3 + $0x1e0] sm:$0xff]  ;;  %v2632_v12 = vld [vmem:[%s2610_s3 + $0x1f0] sm:$0xff] }
  0x3a   : > { %3735 = vst [vmem:[#allocation9_spill] sm:$0xff] %v2621_v9  ;;  %3736 = vst [vmem:[#allocation10_spill] sm:$0xff] %v2624_v10  ;;  %362 = vmatprep.subr.mxu0 %v2621_v9  ;;  %433 = vmatprep.subr.mxu1 %v2624_v10  ;;  %v2635_v13 = vld [vmem:[%s2610_s3 + $0x1c8] sm:$0xff]  ;;  %v2638_v14 = vld [vmem:[%s2610_s3 + $0x1d8] sm:$0xff]  ;;  %s2947_s20 = scalar_select %p355_p3, 0, 7 }
  0x3b   : > { %363 = vmatpush1.msra.mxu0 %v2627_v11  ;;  %434 = vmatpush1.msra.mxu1 %v2632_v12  ;;  %v2643_v15 = vld [vmem:[%s2610_s3 + $0x1c0] sm:$0xff]  ;;  %v2646_v16 = vld [vmem:[%s2610_s3 + $0x1d0] sm:$0xff]  ;;  %v2649_v17 = vld [vmem:[%s2610_s3 + $0x1a8] sm:$0xff]  ;;  %s2957_s8 = scalar_lea.vmem [#allocation7], %s2194_s6 }
  0x3c   : > { %364 = vmatprep.subr.mxu0 %v2635_v13  ;;  %435 = vmatprep.subr.mxu1 %v2638_v14  ;;  %v2654_v18 = vld [vmem:[%s2610_s3 + $0x1b8] sm:$0xff]  ;;  %v2657_v19 = vld [vmem:[%s2610_s3 + $0x1a0] sm:$0xff]  ;;  %v2660_v20 = vld [vmem:[%s2610_s3 + $0x1b0] sm:$0xff]  ;;  %s2225_s4 = sshll.u32 %s2947_s20, 3  ;;  %s2197_s7 = sshll.u32 %s2947_s20, 1 }
  0x3d   : > { %365 = vmatpush1.msra.mxu0 %v2643_v15  ;;  %436 = vmatpush1.msra.mxu1 %v2646_v16  ;;  %v2665_v21 = vld [vmem:[%s2610_s3 + $0x188] sm:$0xff]  ;;  %v2668_v22 = vld [vmem:[%s2610_s3 + $0x198] sm:$0xff]  ;;  %v2673_v23 = vld [vmem:[%s2610_s3 + $0x180] sm:$0xff]  ;;  %s359_s5 = scalar_lea.vmem %s2607_s30, %s2225_s4 [#allocation4]  ;;  %s556_s9 = scalar_lea.vmem %s2957_s8, %s2197_s7 [#allocation7] }
  0x3e   : > { %366 = vmatprep.subr.mxu0 %v2649_v17  ;;  %437 = vmatprep.subr.mxu1 %v2654_v18  ;;  %v2676_v24 = vld [vmem:[%s2610_s3 + $0x190] sm:$0xff]  ;;  %v2681_v25 = vld [vmem:[%s2610_s3 + $0x168] sm:$0xff]  ;;  %v2684_v26 = vld [vmem:[%s2610_s3 + $0x178] sm:$0xff]  ;;  %s3028_s15 = scalar_select %p355_p3, 1, 6 }
  0x3f   : > { %367 = vmatpush1.msra.mxu0 %v2657_v19  ;;  %438 = vmatpush1.msra.mxu1 %v2660_v20  ;;  %v2689_v27 = vld [vmem:[%s2610_s3 + $0x160] sm:$0xff]  ;;  %v2692_v28 = vld [vmem:[%s2610_s3 + $0x170] sm:$0xff]  ;;  %v2697_v29 = vld [vmem:[%s2610_s3 + $0x148] sm:$0xff]  ;;  %s3104_s25 = scalar_select %p355_p3, 2, 5 }
  0x40   : > { %368 = vmatprep.subr.mxu0 %v2665_v21  ;;  %439 = vmatprep.subr.mxu1 %v2668_v22  ;;  %v2700_v30 = vld [vmem:[%s2610_s3 + $0x158] sm:$0xff]  ;;  %v2705_v31 = vld [vmem:[%s2610_s3 + $0x140] sm:$0xff]  ;;  %v2708_v32 = vld [vmem:[%s2610_s3 + $0x150] sm:$0xff]  ;;  %s2226_s17 = sshll.u32 %s3028_s15, 3  ;;  %s2200_s23 = sshll.u32 %s3028_s15, 1 }
  0x41   : > { %369 = vmatpush1.msra.mxu0 %v2673_v23  ;;  %440 = vmatpush1.msra.mxu1 %v2676_v24  ;;  %v2713_v33 = vld [vmem:[%s2610_s3 + $0x128] sm:$0xff]  ;;  %v2716_v34 = vld [vmem:[%s2610_s3 + $0x138] sm:$0xff]  ;;  %v2721_v35 = vld [vmem:[%s2610_s3 + $0x120] sm:$0xff]  ;;  %s561_s19 = scalar_lea.vmem %s2607_s30, %s2226_s17 [#allocation4]  ;;  %s758_s24 = scalar_lea.vmem %s2957_s8, %s2200_s23 [#allocation7] }
  0x42   : > { %370 = vmatprep.subr.mxu0 %v2681_v25  ;;  %441 = vmatprep.subr.mxu1 %v2684_v26  ;;  %v2724_v36 = vld [vmem:[%s2610_s3 + $0x130] sm:$0xff]  ;;  %v2729_v37 = vld [vmem:[%s2610_s3 + $0x108] sm:$0xff]  ;;  %v2732_v38 = vld [vmem:[%s2610_s3 + $0x118] sm:$0xff]  ;;  %s2227_s26 = sshll.u32 %s3104_s25, 3  ;;  %s2203_s28 = sshll.u32 %s3104_s25, 1 }
  0x43   : > { %371 = vmatpush1.msra.mxu0 %v2689_v27  ;;  %442 = vmatpush1.msra.mxu1 %v2692_v28  ;;  %v2737_v39 = vld [vmem:[%s2610_s3 + $0x100] sm:$0xff]  ;;  %v2740_v40 = vld [vmem:[%s2610_s3 + $0x110] sm:$0xff]  ;;  %v2745_v41 = vld [vmem:[%s2610_s3 + $0xe8] sm:$0xff]  ;;  %s763_s27 = scalar_lea.vmem %s2607_s30, %s2227_s26 [#allocation4]  ;;  %s960_s29 = scalar_lea.vmem %s2957_s8, %s2203_s28 [#allocation7] }
  0x44   : > { %372 = vmatprep.subr.mxu0 %v2697_v29  ;;  %443 = vmatprep.subr.mxu1 %v2700_v30  ;;  %v2748_v42 = vld [vmem:[%s2610_s3 + $0xf8] sm:$0xff]  ;;  %v2753_v43 = vld [vmem:[%s2610_s3 + $0xe0] sm:$0xff]  ;;  %v2756_v44 = vld [vmem:[%s2610_s3 + $0xf0] sm:$0xff]  ;;  %s3186_s18 = scalar_select %p355_p3, 3, 4 }
  0x45   : > { %373 = vmatpush1.msra.mxu0 %v2705_v31  ;;  %444 = vmatpush1.msra.mxu1 %v2708_v32  ;;  %v2761_v45 = vld [vmem:[%s2610_s3 + $0xc8] sm:$0xff]  ;;  %v2764_v46 = vld [vmem:[%s2610_s3 + $0xd8] sm:$0xff]  ;;  %v2769_v47 = vld [vmem:[%s2610_s3 + $0xc0] sm:$0xff]  ;;  %s3448_s7 = scalar_select %p355_p3, 4, 3 }
  0x46   : > { %374 = vmatprep.subr.mxu0 %v2713_v33  ;;  %445 = vmatprep.subr.mxu1 %v2716_v34  ;;  %v2772_v48 = vld [vmem:[%s2610_s3 + $0xd0] sm:$0xff]  ;;  %v2777_v49 = vld [vmem:[%s2610_s3 + $0xa8] sm:$0xff]  ;;  %v2780_v50 = vld [vmem:[%s2610_s3 + $0xb8] sm:$0xff]  ;;  %s2228_s20 = sshll.u32 %s3186_s18, 3 }
  0x47   : > { %375 = vmatpush1.msra.mxu0 %v2721_v35  ;;  %446 = vmatpush1.msra.mxu1 %v2724_v36  ;;  %v2785_v51 = vld [vmem:[%s2610_s3 + $0xa0] sm:$0xff]  ;;  %v2788_v52 = vld [vmem:[%s2610_s3 + $0xb0] sm:$0xff]  ;;  %v2793_v53 = vld [vmem:[%s2610_s3 + $0x88] sm:$0xff]  ;;  %s965_s4 = scalar_lea.vmem %s2607_s30, %s2228_s20 [#allocation4]  ;;  %s2209_s15 = sshll.u32 %s3448_s7, 1 }
  0x48   : > { %376 = vmatprep.subr.mxu0 %v2729_v37  ;;  %447 = vmatprep.subr.mxu1 %v2732_v38  ;;  %v2796_v54 = vld [vmem:[%s2610_s3 + $0x98] sm:$0xff]  ;;  %v2801_v55 = vld [vmem:[%s2610_s3 + $0x80] sm:$0xff]  ;;  %v2804_v56 = vld [vmem:[%s2610_s3 + $0x90] sm:$0xff]  ;;  %s1364_s17 = scalar_lea.vmem %s2957_s8, %s2209_s15 [#allocation7] }
  0x49   : > { %377 = vmatpush1.msra.mxu0 %v2737_v39  ;;  %448 = vmatpush1.msra.mxu1 %v2740_v40  ;;  %3737 = vst [vmem:[#allocation11_spill] sm:$0xff] %v2804_v56  ;;  %v2809_v57 = vld [vmem:[%s2610_s3 + $0x68] sm:$0xff]  ;;  %v2812_v58 = vld [vmem:[%s2610_s3 + $0x78] sm:$0xff]  ;;  %v2817_v59 = vld [vmem:[%s2610_s3 + $0x60] sm:$0xff] }
  0x4a   : > { %378 = vmatprep.subr.mxu0 %v2745_v41  ;;  %449 = vmatprep.subr.mxu1 %v2748_v42  ;;  %3738 = vst [vmem:[#allocation12_spill] sm:$0xff] %v2809_v57  ;;  %3739 = vst [vmem:[#allocation13_spill] sm:$0xff] %v2812_v58  ;;  %v2820_v60 = vld [vmem:[%s2610_s3 + $0x70] sm:$0xff]  ;;  %v2825_v61 = vld [vmem:[%s2610_s3 + $0x48] sm:$0xff] }
  0x4b   : > { %379 = vmatpush1.msra.mxu0 %v2753_v43  ;;  %450 = vmatpush1.msra.mxu1 %v2756_v44  ;;  %3740 = vst [vmem:[#allocation14_spill] sm:$0xff] %v2817_v59  ;;  %3741 = vst [vmem:[#allocation15_spill] sm:$0xff] %v2820_v60  ;;  %v2828_v62 = vld [vmem:[%s2610_s3 + $0x58] sm:$0xff]  ;;  %v2833_v63 = vld [vmem:[%s2610_s3 + $0x40] sm:$0xff] }
  0x4c   : > { %380 = vmatprep.subr.mxu0 %v2761_v45  ;;  %451 = vmatprep.subr.mxu1 %v2764_v46  ;;  %3742 = vst [vmem:[#allocation16_spill] sm:$0xff] %v2825_v61  ;;  %3743 = vst [vmem:[#allocation17_spill] sm:$0xff] %v2828_v62  ;;  %v2836_v0 = vld [vmem:[%s2610_s3 + $0x50] sm:$0xff]  ;;  %v2841_v1 = vld [vmem:[%s2610_s3 + $0x28] sm:$0xff] }
  0x4d   : > { %381 = vmatpush1.msra.mxu0 %v2769_v47  ;;  %452 = vmatpush1.msra.mxu1 %v2772_v48  ;;  %3744 = vst [vmem:[#allocation18_spill] sm:$0xff] %v2833_v63  ;;  %3745 = vst [vmem:[#allocation19_spill] sm:$0xff] %v2836_v0  ;;  %v2844_v2 = vld [vmem:[%s2610_s3 + $0x38] sm:$0xff]  ;;  %v2849_v3 = vld [vmem:[%s2610_s3 + $0x20] sm:$0xff] }
  0x4e   : > { %382 = vmatprep.subr.mxu0 %v2777_v49  ;;  %453 = vmatprep.subr.mxu1 %v2780_v50  ;;  %3746 = vst [vmem:[#allocation20_spill] sm:$0xff] %v2841_v1  ;;  %3747 = vst [vmem:[#allocation21_spill] sm:$0xff] %v2844_v2  ;;  %v2852_v4 = vld [vmem:[%s2610_s3 + $0x30] sm:$0xff]  ;;  %v2857_v5 = vld [vmem:[%s2610_s3 + $0x8] sm:$0xff] }
  0x4f   : > { %383 = vmatpush1.msra.mxu0 %v2785_v51  ;;  %454 = vmatpush1.msra.mxu1 %v2788_v52  ;;  %3748 = vst [vmem:[#allocation22_spill] sm:$0xff] %v2849_v3  ;;  %3749 = vst [vmem:[#allocation23_spill] sm:$0xff] %v2852_v4  ;;  %v2860_v6 = vld [vmem:[%s2610_s3 + $0x18] sm:$0xff]  ;;  %v2865_v7 = vld [vmem:[%s2610_s3] sm:$0xff] }
  0x50   : > { %384 = vmatprep.subr.mxu0 %v2793_v53  ;;  %455 = vmatprep.subr.mxu1 %v2796_v54  ;;  %3750 = vst [vmem:[#allocation24_spill] sm:$0xff] %v2857_v5  ;;  %3751 = vst [vmem:[#allocation25_spill] sm:$0xff] %v2860_v6  ;;  %v2868_v8 = vld [vmem:[%s2610_s3 + $0x10] sm:$0xff] }
  0x51   : > { %385 = vmatpush1.msra.mxu0 %v2801_v55  ;;  %456 = vmatpush1.msra.mxu1 %v2804_v56  ;;  %3752 = vst [vmem:[#allocation26_spill] sm:$0xff] %v2865_v7  ;;  %3753 = vst [vmem:[#allocation27_spill] sm:$0xff] %v2868_v8 }
  0x52   : > { %386 = vmatprep.subr.mxu0 %v2809_v57  ;;  %457 = vmatprep.subr.mxu1 %v2812_v58 }
  0x53   : > { %387 = vmatpush1.msra.mxu0 %v2817_v59  ;;  %458 = vmatpush1.msra.mxu1 %v2820_v60 }
  0x54   : > { %388 = vmatprep.subr.mxu0 %v2825_v61  ;;  %459 = vmatprep.subr.mxu1 %v2828_v62  ;;  %v361_v62 = vld [vmem:[#allocation2] sm:$0x3] }
  0x55   : > { %389 = vmatpush1.msra.mxu0 %v2833_v63  ;;  %460 = vmatpush1.msra.mxu1 %v2836_v0 }
  0x56   : > { %390 = vmatprep.subr.mxu0 %v2841_v1  ;;  %461 = vmatprep.subr.mxu1 %v2844_v2 }
  0x57   : > { %391 = vmatpush1.msra.mxu0 %v2849_v3  ;;  %462 = vmatpush1.msra.mxu1 %v2852_v4 }
  0x58   : > { %392 = vmatprep.subr.mxu0 %v2857_v5  ;;  %463 = vmatprep.subr.mxu1 %v2860_v6 }
  0x59   : > { %393 = vmatpush1.msra.mxu0 %v2865_v7  ;;  %464 = vmatpush1.msra.mxu1 %v2868_v8 }
  0x5a   : > { %427 = vmatmul.mubr.f32.vlgmr.msra.gmra.mxu0 %v361_v62  ;;  %498 = vmatmul.mubr.f32.vlgmr.msra.gmra.mxu1 %v361_v62  ;;  %v3754_v62 = vld [vmem:[#allocation17_spill] sm:$0xff] }
  0x5b   : > { %564 = vmatprep.subr.mxu0 %v2621_v9  ;;  %635 = vmatprep.subr.mxu1 %v2624_v10 }
  0x5c   : > { %565 = vmatpush1.msra.mxu0 %v2627_v11  ;;  %636 = vmatpush1.msra.mxu1 %v2632_v12 }
  0x5d   : > { %566 = vmatprep.subr.mxu0 %v2635_v13  ;;  %637 = vmatprep.subr.mxu1 %v2638_v14 }
  0x5e   : > { %567 = vmatpush1.msra.mxu0 %v2643_v15  ;;  %638 = vmatpush1.msra.mxu1 %v2646_v16 }
  0x5f   : > { %568 = vmatprep.subr.mxu0 %v2649_v17  ;;  %639 = vmatprep.subr.mxu1 %v2654_v18 }
  0x60   : > { %569 = vmatpush1.msra.mxu0 %v2657_v19  ;;  %640 = vmatpush1.msra.mxu1 %v2660_v20 }
  0x61   : > { %570 = vmatprep.subr.mxu0 %v2665_v21  ;;  %641 = vmatprep.subr.mxu1 %v2668_v22 }
  0x62   : > { %571 = vmatpush1.msra.mxu0 %v2673_v23  ;;  %642 = vmatpush1.msra.mxu1 %v2676_v24 }
  0x63   : > { %572 = vmatprep.subr.mxu0 %v2681_v25  ;;  %643 = vmatprep.subr.mxu1 %v2684_v26 }
  0x64   : > { %573 = vmatpush1.msra.mxu0 %v2689_v27  ;;  %644 = vmatpush1.msra.mxu1 %v2692_v28 }
  0x65   : > { %574 = vmatprep.subr.mxu0 %v2697_v29  ;;  %645 = vmatprep.subr.mxu1 %v2700_v30 }
  0x66   : > { %575 = vmatpush1.msra.mxu0 %v2705_v31  ;;  %646 = vmatpush1.msra.mxu1 %v2708_v32 }
  0x67   : > { %576 = vmatprep.subr.mxu0 %v2713_v33  ;;  %647 = vmatprep.subr.mxu1 %v2716_v34 }
  0x68   : > { %577 = vmatpush1.msra.mxu0 %v2721_v35  ;;  %648 = vmatpush1.msra.mxu1 %v2724_v36 }
  0x69   : > { %578 = vmatprep.subr.mxu0 %v2729_v37  ;;  %649 = vmatprep.subr.mxu1 %v2732_v38 }
  0x6a   : > { %579 = vmatpush1.msra.mxu0 %v2737_v39  ;;  %650 = vmatpush1.msra.mxu1 %v2740_v40 }
  0x6b   : > { %580 = vmatprep.subr.mxu0 %v2745_v41  ;;  %651 = vmatprep.subr.mxu1 %v2748_v42 }
  0x6c   : > { %581 = vmatpush1.msra.mxu0 %v2753_v43  ;;  %652 = vmatpush1.msra.mxu1 %v2756_v44 }
  0x6d   : > { %582 = vmatprep.subr.mxu0 %v2761_v45  ;;  %653 = vmatprep.subr.mxu1 %v2764_v46 }
  0x6e   : > { %583 = vmatpush1.msra.mxu0 %v2769_v47  ;;  %654 = vmatpush1.msra.mxu1 %v2772_v48 }
  0x6f   : > { %584 = vmatprep.subr.mxu0 %v2777_v49  ;;  %655 = vmatprep.subr.mxu1 %v2780_v50 }
  0x70   : > { %585 = vmatpush1.msra.mxu0 %v2785_v51  ;;  %656 = vmatpush1.msra.mxu1 %v2788_v52 }
  0x71   : > { %586 = vmatprep.subr.mxu0 %v2793_v53  ;;  %657 = vmatprep.subr.mxu1 %v2796_v54 }
  0x72   : > { %587 = vmatpush1.msra.mxu0 %v2801_v55  ;;  %658 = vmatpush1.msra.mxu1 %v2804_v56 }
  0x73   : > { %588 = vmatprep.subr.mxu0 %v2809_v57  ;;  %659 = vmatprep.subr.mxu1 %v2812_v58 }
  0x74   : > { %589 = vmatpush1.msra.mxu0 %v2817_v59  ;;  %660 = vmatpush1.msra.mxu1 %v2820_v60 }
  0x75   : > { %590 = vmatprep.subr.mxu0 %v2825_v61  ;;  %661 = vmatprep.subr.mxu1 %v3754_v62  ;;  %v3755_v62 = vmov 0.0   ;;  %v360_v61 = vld [vmem:[%s359_s5] sm:$0xff]  ;;  %s2206_s5 = sshll.u32 %s3186_s18, 1 }
  0x76   : > { %591 = vmatpush1.msra.mxu0 %v2833_v63  ;;  %662 = vmatpush1.msra.mxu1 %v2836_v0  ;;  %s1162_s6 = scalar_lea.vmem %s2957_s8, %s2206_s5 [#allocation7] }
  0x77   : > { %592 = vmatprep.subr.mxu0 %v2841_v1  ;;  %663 = vmatprep.subr.mxu1 %v2844_v2  ;;  %v513_v2 = vlaneseq }
  0x78   : > { %593 = vmatpush1.msra.mxu0 %v2849_v3  ;;  %664 = vmatpush1.msra.mxu1 %v2852_v4  ;;  %v2513_v3 = vmov 1983009808  }
  0x79   : > { %594 = vmatprep.subr.mxu0 %v2857_v5  ;;  %665 = vmatprep.subr.mxu1 %v2860_v6  ;;  %v511_v4 = vunpack.c.l.s4 %v2513_v3  ;;  %v514_v6 = vshrl.u32 %v513_v2, 7 }
  0x7a   : > { %595 = vmatpush1.msra.mxu0 %v2865_v7  ;;  %628 = vmatprep.mubr.f32.mxu0 %v3755_v62 }
  0x7b   : > { %666 = vmatpush1.msra.mxu1 %v2868_v8  ;;  %699 = vmatprep.mubr.f32.mxu1 %v3755_v62  ;;  %v512_v7 = vunpack.c.0.s8 %v511_v4 }
  0x7c   : > { %766 = vmatprep.subr.mxu0 %v2621_v9  ;;  %837 = vmatprep.subr.mxu1 %v2624_v10 }
  0x7d   : > { %v2950_v8 = vsub.s32 %v512_v7, %v514_v6 }
 0x11a   : > { %v428_v5 = vpop.f32.mrf.mxu0  ;;  %v499_v1 = vpop.f32.mrf.mxu1 }
 0x11c   : > { %v430_v62 = vpop.f32.mrf.mxu0  ;;  %v501_v9 = vpop.f32.mrf.mxu1 }
 0x11d   : > { %v508_v0 = vcombine.low %v428_v5, %v430_v62  ;;  %v509_v10 = vcombine.low %v499_v1, %v501_v9 }
 0x11f   : > { %v516_v63 = vrot.slane %v508_v0, %v2950_v8  ;;  %v523_v3 = vrot.slane %v509_v10, %v2950_v8  ;;  %v547_v10 = vld [vmem:[#allocation3] sm:$0x3] }
 0x121   : > { %v524_v60 = vcombine.low %v516_v63, %v523_v3 }
 0x123   : > { %v526_v59 = vadd.f32 %v524_v60, %v360_v61 }
 0x125   : > { %v527_v58 = vmul.f32 0.5, %v526_v59  ;;  %v532_v4 = vrot.slane %v526_v59, 2  ;;  %v538_v57 = vrot.slane %v526_v59, 4  ;;  %v541_v6 = vrot.slane %v526_v59, 6 }
 0x127   : > { %2287 = vtanh.f32 %v527_v58  ;;  %v534_v2 = vmul.f32 0.5, %v532_v4  ;;  %v543_v7 = vmul.f32 0.5, %v541_v6 }
 0x129   : > { %2289 = vtanh.f32 %v534_v2 }
 0x12a   : > { %2291 = vtanh.f32 %v538_v57 }
 0x12b   : > { %2293 = vtanh.f32 %v543_v7 }
 0x134   : > { %v2288_v5 = vpop.eup %2287 }
 0x135   : > { %v529_v62 = vadd.f32 1.0, %v2288_v5  ;;  %v3756_v5 = vld [vmem:[#allocation12_spill] sm:$0xff] }
 0x136   : > { %v2290_v9 = vpop.eup %2289 }
 0x137   : > { %v530_v0 = vmul.f32 0.5, %v529_v62  ;;  %v536_v1 = vadd.f32 1.0, %v2290_v9  ;;  %v2292_v60 = vpop.eup %2291  ;;  %v3757_v62 = vld [vmem:[#allocation13_spill] sm:$0xff]  ;;  %v3758_v9 = vld [vmem:[#allocation14_spill] sm:$0xff] }
 0x138   : > { %v2294_v4 = vpop.eup %2293 }
 0x139   : > { %v537_v63 = vmul.f32 0.5, %v536_v1  ;;  %v549_v3 = vmul.f32 %v2292_v60, %v530_v0  ;;  %v545_v57 = vadd.f32 1.0, %v2294_v4  ;;  %v3759_v0 = vld [vmem:[#allocation15_spill] sm:$0xff]  ;;  %v3760_v1 = vld [vmem:[#allocation16_spill] sm:$0xff] }
 0x13a   : > { %v3763_v60 = vld [vmem:[#allocation19_spill] sm:$0xff] }
 0x13b   : > { %v548_v61 = vmul.f32 %v547_v10, %v537_v63  ;;  %v546_v59 = vmul.f32 0.5, %v545_v57  ;;  %v3761_v10 = vld [vmem:[#allocation17_spill] sm:$0xff]  ;;  %v3762_v63 = vld [vmem:[#allocation18_spill] sm:$0xff]  ;;  %v3767_v4 = vld [vmem:[#allocation23_spill] sm:$0xff] }
 0x13c   : > { %v3768_v57 = vld [vmem:[#allocation24_spill] sm:$0xff] }
 0x13d   : > { %v550_v58 = vadd.f32 %v549_v3, %v548_v61  ;;  %v3764_v61 = vld [vmem:[#allocation20_spill] sm:$0xff]  ;;  %v3765_v3 = vld [vmem:[#allocation21_spill] sm:$0xff] }
 0x13f   : > { %2295 = vtanh.f32 %v550_v58  ;;  %553 = vst [vmem:[#allocation3] sm:$0x3] %v550_v58  ;;  %v3766_v58 = vld [vmem:[#allocation22_spill] sm:$0xff] }
 0x14c   : > { %v2296_v2 = vpop.eup %2295 }
 0x14d   : > { %v552_v6 = vmul.f32 %v2296_v2, %v546_v59  ;;  %v3769_v59 = vld [vmem:[#allocation25_spill] sm:$0xff]  ;;  %v3770_v2 = vld [vmem:[#allocation26_spill] sm:$0xff] }
 0x14f   : > { %554 = vst [vmem:[#allocation2] sm:$0x3] %v552_v6  ;;  %557 = vst [vmem:[%s556_s9] sm:$0x3] %v552_v6  ;;  %v3771_v6 = vmov 0.0   ;;  %s2229_s9 = sshll.u32 %s3448_s7, 3 }
 0x156   : > { %v563_v7 = vld [vmem:[#allocation2] sm:$0x3] }
 0x157   : > { %629 = vmatmul.mubr.f32.vlgmr.msra.gmra.mxu0 %v563_v7  ;;  %700 = vmatmul.mubr.f32.vlgmr.msra.gmra.mxu1 %v563_v7  ;;  %v3772_v7 = vld [vmem:[#allocation27_spill] sm:$0xff] }
 0x158   : > { %767 = vmatpush1.msra.mxu0 %v2627_v11  ;;  %838 = vmatpush1.msra.mxu1 %v2632_v12 }
 0x159   : > { %768 = vmatprep.subr.mxu0 %v2635_v13  ;;  %839 = vmatprep.subr.mxu1 %v2638_v14 }
 0x15a   : > { %769 = vmatpush1.msra.mxu0 %v2643_v15  ;;  %840 = vmatpush1.msra.mxu1 %v2646_v16 }
 0x15b   : > { %770 = vmatprep.subr.mxu0 %v2649_v17  ;;  %841 = vmatprep.subr.mxu1 %v2654_v18 }
 0x15c   : > { %771 = vmatpush1.msra.mxu0 %v2657_v19  ;;  %842 = vmatpush1.msra.mxu1 %v2660_v20 }
 0x15d   : > { %772 = vmatprep.subr.mxu0 %v2665_v21  ;;  %843 = vmatprep.subr.mxu1 %v2668_v22 }
 0x15e   : > { %773 = vmatpush1.msra.mxu0 %v2673_v23  ;;  %844 = vmatpush1.msra.mxu1 %v2676_v24 }
 0x15f   : > { %774 = vmatprep.subr.mxu0 %v2681_v25  ;;  %845 = vmatprep.subr.mxu1 %v2684_v26 }
 0x160   : > { %775 = vmatpush1.msra.mxu0 %v2689_v27  ;;  %846 = vmatpush1.msra.mxu1 %v2692_v28 }
 0x161   : > { %776 = vmatprep.subr.mxu0 %v2697_v29  ;;  %847 = vmatprep.subr.mxu1 %v2700_v30 }
 0x162   : > { %777 = vmatpush1.msra.mxu0 %v2705_v31  ;;  %848 = vmatpush1.msra.mxu1 %v2708_v32 }
 0x163   : > { %778 = vmatprep.subr.mxu0 %v2713_v33  ;;  %849 = vmatprep.subr.mxu1 %v2716_v34 }
 0x164   : > { %779 = vmatpush1.msra.mxu0 %v2721_v35  ;;  %850 = vmatpush1.msra.mxu1 %v2724_v36 }
 0x165   : > { %780 = vmatprep.subr.mxu0 %v2729_v37  ;;  %851 = vmatprep.subr.mxu1 %v2732_v38 }
 0x166   : > { %781 = vmatpush1.msra.mxu0 %v2737_v39  ;;  %852 = vmatpush1.msra.mxu1 %v2740_v40 }
 0x167   : > { %782 = vmatprep.subr.mxu0 %v2745_v41  ;;  %853 = vmatprep.subr.mxu1 %v2748_v42 }
 0x168   : > { %783 = vmatpush1.msra.mxu0 %v2753_v43  ;;  %854 = vmatpush1.msra.mxu1 %v2756_v44 }
 0x169   : > { %784 = vmatprep.subr.mxu0 %v2761_v45  ;;  %855 = vmatprep.subr.mxu1 %v2764_v46 }
 0x16a   : > { %785 = vmatpush1.msra.mxu0 %v2769_v47  ;;  %856 = vmatpush1.msra.mxu1 %v2772_v48 }
 0x16b   : > { %786 = vmatprep.subr.mxu0 %v2777_v49  ;;  %857 = vmatprep.subr.mxu1 %v2780_v50 }
 0x16c   : > { %787 = vmatpush1.msra.mxu0 %v2785_v51  ;;  %858 = vmatpush1.msra.mxu1 %v2788_v52 }
 0x16d   : > { %788 = vmatprep.subr.mxu0 %v2793_v53  ;;  %859 = vmatprep.subr.mxu1 %v2796_v54 }
 0x16e   : > { %789 = vmatpush1.msra.mxu0 %v2801_v55  ;;  %860 = vmatpush1.msra.mxu1 %v2804_v56 }
 0x16f   : > { %790 = vmatprep.subr.mxu0 %v3756_v5  ;;  %861 = vmatprep.subr.mxu1 %v3757_v62 }
 0x170   : > { %791 = vmatpush1.msra.mxu0 %v3758_v9  ;;  %862 = vmatpush1.msra.mxu1 %v3759_v0 }
 0x171   : > { %792 = vmatprep.subr.mxu0 %v3760_v1  ;;  %863 = vmatprep.subr.mxu1 %v3761_v10 }
 0x172   : > { %793 = vmatpush1.msra.mxu0 %v3762_v63  ;;  %864 = vmatpush1.msra.mxu1 %v3763_v60  ;;  %v562_v63 = vld [vmem:[%s561_s19] sm:$0xff]  ;;  %s3524_s19 = scalar_select %p355_p3, 5, 2 }
 0x173   : > { %794 = vmatprep.subr.mxu0 %v3764_v61  ;;  %865 = vmatprep.subr.mxu1 %v3765_v3  ;;  %v3773_v61 = vld [vmem:[#allocation9_spill] sm:$0xff]  ;;  %v3774_v3 = vld [vmem:[#allocation10_spill] sm:$0xff] }
 0x174   : > { %795 = vmatpush1.msra.mxu0 %v3766_v58  ;;  %866 = vmatpush1.msra.mxu1 %v3767_v4  ;;  %s2230_s23 = sshll.u32 %s3524_s19, 3  ;;  %s2212_s25 = sshll.u32 %s3524_s19, 1 }
 0x175   : > { %796 = vmatprep.subr.mxu0 %v3768_v57  ;;  %867 = vmatprep.subr.mxu1 %v3769_v59  ;;  %s1566_s26 = scalar_lea.vmem %s2957_s8, %s2212_s25 [#allocation7] }
 0x176   : > { %797 = vmatpush1.msra.mxu0 %v3770_v2  ;;  %830 = vmatprep.mubr.f32.mxu0 %v3771_v6 }
 0x177   : > { %868 = vmatpush1.msra.mxu1 %v3772_v7  ;;  %901 = vmatprep.mubr.f32.mxu1 %v3771_v6 }
 0x178   : > { %968 = vmatprep.subr.mxu0 %v3773_v61  ;;  %1039 = vmatprep.subr.mxu1 %v3774_v3 }
 0x217   : > { %v630_v4 = vpop.f32.mrf.mxu0  ;;  %v701_v57 = vpop.f32.mrf.mxu1 }
 0x219   : > { %v632_v59 = vpop.f32.mrf.mxu0  ;;  %v703_v58 = vpop.f32.mrf.mxu1 }
 0x21a   : > { %v710_v2 = vcombine.low %v630_v4, %v632_v59  ;;  %v711_v60 = vcombine.low %v701_v57, %v703_v58 }
 0x21c   : > { %v718_v7 = vrot.slane %v710_v2, %v2950_v8  ;;  %v725_v6 = vrot.slane %v711_v60, %v2950_v8 }
 0x21e   : > { %v726_v61 = vcombine.low %v718_v7, %v725_v6  ;;  %v3776_v7 = vld [vmem:[#allocation12_spill] sm:$0xff] }
 0x220   : > { %v728_v10 = vadd.f32 %v726_v61, %v562_v63  ;;  %v749_v63 = vld [vmem:[#allocation3] sm:$0x3] }
 0x222   : > { %v729_v3 = vmul.f32 0.5, %v728_v10  ;;  %v734_v1 = vrot.slane %v728_v10, 2  ;;  %v740_v9 = vrot.slane %v728_v10, 4  ;;  %v743_v62 = vrot.slane %v728_v10, 6 }
 0x224   : > { %2297 = vtanh.f32 %v729_v3  ;;  %v736_v0 = vmul.f32 0.5, %v734_v1  ;;  %v745_v5 = vmul.f32 0.5, %v743_v62 }
 0x226   : > { %2299 = vtanh.f32 %v736_v0 }
 0x227   : > { %2301 = vtanh.f32 %v740_v9 }
 0x228   : > { %2303 = vtanh.f32 %v745_v5  ;;  %v3775_v5 = vld [vmem:[#allocation11_spill] sm:$0xff] }
 0x231   : > { %v2298_v56 = vpop.eup %2297 }
 0x232   : > { %v731_v4 = vadd.f32 1.0, %v2298_v56 }
 0x233   : > { %v2300_v58 = vpop.eup %2299 }
 0x234   : > { %v732_v57 = vmul.f32 0.5, %v731_v4  ;;  %v738_v59 = vadd.f32 1.0, %v2300_v58  ;;  %v2302_v2 = vpop.eup %2301  ;;  %v3777_v4 = vld [vmem:[#allocation13_spill] sm:$0xff]  ;;  %v3778_v58 = vld [vmem:[#allocation14_spill] sm:$0xff] }
 0x235   : > { %v2304_v0 = vpop.eup %2303 }
 0x236   : > { %v739_v60 = vmul.f32 0.5, %v738_v59  ;;  %v751_v6 = vmul.f32 %v2302_v2, %v732_v57  ;;  %v747_v9 = vadd.f32 1.0, %v2304_v0  ;;  %v3779_v57 = vld [vmem:[#allocation15_spill] sm:$0xff]  ;;  %v3780_v59 = vld [vmem:[#allocation16_spill] sm:$0xff]  ;;  %v3782_v2 = vld [vmem:[#allocation18_spill] sm:$0xff] }
 0x237   : > { %v3787_v0 = vld [vmem:[#allocation23_spill] sm:$0xff] }
 0x238   : > { %v750_v61 = vmul.f32 %v749_v63, %v739_v60  ;;  %v748_v62 = vmul.f32 0.5, %v747_v9  ;;  %v3781_v60 = vld [vmem:[#allocation17_spill] sm:$0xff]  ;;  %v3783_v63 = vld [vmem:[#allocation19_spill] sm:$0xff]  ;;  %v3788_v9 = vld [vmem:[#allocation24_spill] sm:$0xff] }
 0x23a   : > { %v752_v3 = vadd.f32 %v751_v6, %v750_v61  ;;  %v3784_v61 = vld [vmem:[#allocation20_spill] sm:$0xff]  ;;  %v3785_v6 = vld [vmem:[#allocation21_spill] sm:$0xff] }
 0x23c   : > { %2305 = vtanh.f32 %v752_v3  ;;  %755 = vst [vmem:[#allocation3] sm:$0x3] %v752_v3  ;;  %v3786_v3 = vld [vmem:[#allocation22_spill] sm:$0xff] }
 0x249   : > { %v2306_v1 = vpop.eup %2305 }
 0x24a   : > { %v754_v56 = vmul.f32 %v2306_v1, %v748_v62  ;;  %v3789_v62 = vld [vmem:[#allocation25_spill] sm:$0xff]  ;;  %v3790_v1 = vld [vmem:[#allocation26_spill] sm:$0xff] }
 0x24c   : > { %756 = vst [vmem:[#allocation2] sm:$0x3] %v754_v56  ;;  %759 = vst [vmem:[%s758_s24] sm:$0x3] %v754_v56  ;;  %v3791_v56 = vmov 0.0   ;;  %s1369_s24 = scalar_lea.vmem %s2607_s30, %s2230_s23 [#allocation4] }
 0x253   : > { %v765_v10 = vld [vmem:[#allocation2] sm:$0x3] }
 0x254   : > { %831 = vmatmul.mubr.f32.vlgmr.msra.gmra.mxu0 %v765_v10  ;;  %902 = vmatmul.mubr.f32.vlgmr.msra.gmra.mxu1 %v765_v10  ;;  %v3792_v10 = vld [vmem:[#allocation27_spill] sm:$0xff] }
 0x255   : > { %969 = vmatpush1.msra.mxu0 %v2627_v11  ;;  %1040 = vmatpush1.msra.mxu1 %v2632_v12 }
 0x256   : > { %970 = vmatprep.subr.mxu0 %v2635_v13  ;;  %1041 = vmatprep.subr.mxu1 %v2638_v14 }
 0x257   : > { %971 = vmatpush1.msra.mxu0 %v2643_v15  ;;  %1042 = vmatpush1.msra.mxu1 %v2646_v16 }
 0x258   : > { %972 = vmatprep.subr.mxu0 %v2649_v17  ;;  %1043 = vmatprep.subr.mxu1 %v2654_v18 }
 0x259   : > { %973 = vmatpush1.msra.mxu0 %v2657_v19  ;;  %1044 = vmatpush1.msra.mxu1 %v2660_v20 }
 0x25a   : > { %974 = vmatprep.subr.mxu0 %v2665_v21  ;;  %1045 = vmatprep.subr.mxu1 %v2668_v22 }
 0x25b   : > { %975 = vmatpush1.msra.mxu0 %v2673_v23  ;;  %1046 = vmatpush1.msra.mxu1 %v2676_v24 }
 0x25c   : > { %976 = vmatprep.subr.mxu0 %v2681_v25  ;;  %1047 = vmatprep.subr.mxu1 %v2684_v26 }
 0x25d   : > { %977 = vmatpush1.msra.mxu0 %v2689_v27  ;;  %1048 = vmatpush1.msra.mxu1 %v2692_v28 }
 0x25e   : > { %978 = vmatprep.subr.mxu0 %v2697_v29  ;;  %1049 = vmatprep.subr.mxu1 %v2700_v30 }
 0x25f   : > { %979 = vmatpush1.msra.mxu0 %v2705_v31  ;;  %1050 = vmatpush1.msra.mxu1 %v2708_v32 }
 0x260   : > { %980 = vmatprep.subr.mxu0 %v2713_v33  ;;  %1051 = vmatprep.subr.mxu1 %v2716_v34 }
 0x261   : > { %981 = vmatpush1.msra.mxu0 %v2721_v35  ;;  %1052 = vmatpush1.msra.mxu1 %v2724_v36 }
 0x262   : > { %982 = vmatprep.subr.mxu0 %v2729_v37  ;;  %1053 = vmatprep.subr.mxu1 %v2732_v38 }
 0x263   : > { %983 = vmatpush1.msra.mxu0 %v2737_v39  ;;  %1054 = vmatpush1.msra.mxu1 %v2740_v40 }
 0x264   : > { %984 = vmatprep.subr.mxu0 %v2745_v41  ;;  %1055 = vmatprep.subr.mxu1 %v2748_v42 }
 0x265   : > { %985 = vmatpush1.msra.mxu0 %v2753_v43  ;;  %1056 = vmatpush1.msra.mxu1 %v2756_v44 }
 0x266   : > { %986 = vmatprep.subr.mxu0 %v2761_v45  ;;  %1057 = vmatprep.subr.mxu1 %v2764_v46 }
 0x267   : > { %987 = vmatpush1.msra.mxu0 %v2769_v47  ;;  %1058 = vmatpush1.msra.mxu1 %v2772_v48 }
 0x268   : > { %988 = vmatprep.subr.mxu0 %v2777_v49  ;;  %1059 = vmatprep.subr.mxu1 %v2780_v50 }
 0x269   : > { %989 = vmatpush1.msra.mxu0 %v2785_v51  ;;  %1060 = vmatpush1.msra.mxu1 %v2788_v52 }
 0x26a   : > { %990 = vmatprep.subr.mxu0 %v2793_v53  ;;  %1061 = vmatprep.subr.mxu1 %v2796_v54 }
 0x26b   : > { %991 = vmatpush1.msra.mxu0 %v2801_v55  ;;  %1062 = vmatpush1.msra.mxu1 %v3775_v5 }
 0x26c   : > { %992 = vmatprep.subr.mxu0 %v3776_v7  ;;  %1063 = vmatprep.subr.mxu1 %v3777_v4 }
 0x26d   : > { %993 = vmatpush1.msra.mxu0 %v3778_v58  ;;  %1064 = vmatpush1.msra.mxu1 %v3779_v57 }
 0x26e   : > { %994 = vmatprep.subr.mxu0 %v3780_v59  ;;  %1065 = vmatprep.subr.mxu1 %v3781_v60 }
 0x26f   : > { %995 = vmatpush1.msra.mxu0 %v3782_v2  ;;  %1066 = vmatpush1.msra.mxu1 %v3783_v63  ;;  %v764_v2 = vld [vmem:[%s763_s27] sm:$0xff]  ;;  %s3598_s27 = scalar_select %p355_p3, 6, 1 }
 0x270   : > { %996 = vmatprep.subr.mxu0 %v3784_v61  ;;  %1067 = vmatprep.subr.mxu1 %v3785_v6  ;;  %v3793_v61 = vld [vmem:[#allocation9_spill] sm:$0xff]  ;;  %v3794_v6 = vld [vmem:[#allocation10_spill] sm:$0xff] }
 0x271   : > { %997 = vmatpush1.msra.mxu0 %v3786_v3  ;;  %1068 = vmatpush1.msra.mxu1 %v3787_v0  ;;  %s2231_s28 = sshll.u32 %s3598_s27, 3  ;;  %s2215_s18 = sshll.u32 %s3598_s27, 1 }
 0x272   : > { %998 = vmatprep.subr.mxu0 %v3788_v9  ;;  %1069 = vmatprep.subr.mxu1 %v3789_v62  ;;  %s1768_s20 = scalar_lea.vmem %s2957_s8, %s2215_s18 [#allocation7] }
 0x273   : > { %999 = vmatpush1.msra.mxu0 %v3790_v1  ;;  %1032 = vmatprep.mubr.f32.mxu0 %v3791_v56 }
 0x274   : > { %1070 = vmatpush1.msra.mxu1 %v3792_v10  ;;  %1103 = vmatprep.mubr.f32.mxu1 %v3791_v56 }
 0x275   : > { %1170 = vmatprep.subr.mxu0 %v3793_v61  ;;  %1241 = vmatprep.subr.mxu1 %v3794_v6 }
 0x314   : > { %v832_v0 = vpop.f32.mrf.mxu0  ;;  %v903_v9 = vpop.f32.mrf.mxu1 }
 0x316   : > { %v834_v62 = vpop.f32.mrf.mxu0  ;;  %v905_v3 = vpop.f32.mrf.mxu1 }
 0x317   : > { %v912_v1 = vcombine.low %v832_v0, %v834_v62  ;;  %v913_v63 = vcombine.low %v903_v9, %v905_v3 }
 0x319   : > { %v920_v10 = vrot.slane %v912_v1, %v2950_v8  ;;  %v927_v56 = vrot.slane %v913_v63, %v2950_v8 }
 0x31b   : > { %v928_v61 = vcombine.low %v920_v10, %v927_v56 }
 0x31d   : > { %v930_v60 = vadd.f32 %v928_v61, %v764_v2  ;;  %v951_v2 = vld [vmem:[#allocation3] sm:$0x3] }
 0x31f   : > { %v931_v6 = vmul.f32 0.5, %v930_v60  ;;  %v936_v59 = vrot.slane %v930_v60, 2  ;;  %v942_v58 = vrot.slane %v930_v60, 4  ;;  %v945_v4 = vrot.slane %v930_v60, 6 }
 0x321   : > { %2307 = vtanh.f32 %v931_v6  ;;  %v938_v57 = vmul.f32 0.5, %v936_v59  ;;  %v947_v7 = vmul.f32 0.5, %v945_v4 }
 0x323   : > { %2309 = vtanh.f32 %v938_v57 }
 0x324   : > { %2311 = vtanh.f32 %v942_v58 }
 0x325   : > { %2313 = vtanh.f32 %v947_v7 }
 0x32e   : > { %v2308_v5 = vpop.eup %2307 }
 0x32f   : > { %v933_v0 = vadd.f32 1.0, %v2308_v5 }
 0x330   : > { %v2310_v3 = vpop.eup %2309 }
 0x331   : > { %v934_v9 = vmul.f32 0.5, %v933_v0  ;;  %v940_v62 = vadd.f32 1.0, %v2310_v3  ;;  %v2312_v1 = vpop.eup %2311 }
 0x332   : > { %v2314_v57 = vpop.eup %2313 }
 0x333   : > { %v941_v63 = vmul.f32 0.5, %v940_v62  ;;  %v953_v10 = vmul.f32 %v2312_v1, %v934_v9  ;;  %v949_v58 = vadd.f32 1.0, %v2314_v57  ;;  %v3207_v57 = vld [vmem:[%s2610_s3 + $0x1d8] sm:$0xff] }
 0x335   : > { %v952_v56 = vmul.f32 %v951_v2, %v941_v63  ;;  %v950_v4 = vmul.f32 0.5, %v949_v58  ;;  %v3211_v58 = vld [vmem:[%s2610_s3 + $0x1c0] sm:$0xff] }
 0x337   : > { %v954_v61 = vadd.f32 %v953_v10, %v952_v56  ;;  %v3195_v56 = vld [vmem:[%s2610_s3 + $0x1e0] sm:$0xff]  ;;  %v3199_v10 = vld [vmem:[%s2610_s3 + $0x1f0] sm:$0xff] }
 0x339   : > { %2315 = vtanh.f32 %v954_v61  ;;  %957 = vst [vmem:[#allocation3] sm:$0x3] %v954_v61  ;;  %v3203_v61 = vld [vmem:[%s2610_s3 + $0x1c8] sm:$0xff] }
 0x346   : > { %v2316_v59 = vpop.eup %2315 }
 0x347   : > { %v956_v5 = vmul.f32 %v2316_v59, %v950_v4  ;;  %v3215_v4 = vld [vmem:[%s2610_s3 + $0x1d0] sm:$0xff]  ;;  %v3219_v59 = vld [vmem:[%s2610_s3 + $0x1a8] sm:$0xff] }
 0x349   : > { %958 = vst [vmem:[#allocation2] sm:$0x3] %v956_v5  ;;  %961 = vst [vmem:[%s960_s29] sm:$0x3] %v956_v5  ;;  %v3223_v5 = vld [vmem:[%s2610_s3 + $0x1b8] sm:$0xff]  ;;  %s1571_s29 = scalar_lea.vmem %s2607_s30, %s2231_s28 [#allocation4] }
 0x350   : > { %v967_v60 = vld [vmem:[#allocation2] sm:$0x3] }
 0x351   : > { %1033 = vmatmul.mubr.f32.vlgmr.msra.gmra.mxu0 %v967_v60  ;;  %1104 = vmatmul.mubr.f32.vlgmr.msra.gmra.mxu1 %v967_v60  ;;  %v3227_v60 = vld [vmem:[%s2610_s3 + $0x1a0] sm:$0xff] }
 0x352   : > { %1171 = vmatpush1.msra.mxu0 %v2627_v11  ;;  %1242 = vmatpush1.msra.mxu1 %v2632_v12  ;;  %v3795_v11 = vld [vmem:[#allocation11_spill] sm:$0xff]  ;;  %v3796_v12 = vld [vmem:[#allocation12_spill] sm:$0xff] }
 0x353   : > { %1172 = vmatprep.subr.mxu0 %v2635_v13  ;;  %1243 = vmatprep.subr.mxu1 %v2638_v14  ;;  %v3797_v13 = vld [vmem:[#allocation13_spill] sm:$0xff]  ;;  %v3798_v14 = vld [vmem:[#allocation14_spill] sm:$0xff] }
 0x354   : > { %1173 = vmatpush1.msra.mxu0 %v2643_v15  ;;  %1244 = vmatpush1.msra.mxu1 %v2646_v16  ;;  %v3799_v15 = vld [vmem:[#allocation15_spill] sm:$0xff]  ;;  %v3800_v16 = vld [vmem:[#allocation16_spill] sm:$0xff] }
 0x355   : > { %1174 = vmatprep.subr.mxu0 %v2649_v17  ;;  %1245 = vmatprep.subr.mxu1 %v2654_v18  ;;  %v3801_v17 = vld [vmem:[#allocation17_spill] sm:$0xff]  ;;  %v3802_v18 = vld [vmem:[#allocation18_spill] sm:$0xff] }
 0x356   : > { %1175 = vmatpush1.msra.mxu0 %v2657_v19  ;;  %1246 = vmatpush1.msra.mxu1 %v2660_v20  ;;  %v3803_v19 = vld [vmem:[#allocation19_spill] sm:$0xff]  ;;  %v3804_v20 = vld [vmem:[#allocation20_spill] sm:$0xff] }
 0x357   : > { %1176 = vmatprep.subr.mxu0 %v2665_v21  ;;  %1247 = vmatprep.subr.mxu1 %v2668_v22  ;;  %v3805_v21 = vld [vmem:[#allocation21_spill] sm:$0xff]  ;;  %v3806_v22 = vld [vmem:[#allocation22_spill] sm:$0xff] }
 0x358   : > { %1177 = vmatpush1.msra.mxu0 %v2673_v23  ;;  %1248 = vmatpush1.msra.mxu1 %v2676_v24  ;;  %v3807_v23 = vld [vmem:[#allocation23_spill] sm:$0xff]  ;;  %v3808_v24 = vld [vmem:[#allocation24_spill] sm:$0xff] }
 0x359   : > { %1178 = vmatprep.subr.mxu0 %v2681_v25  ;;  %1249 = vmatprep.subr.mxu1 %v2684_v26  ;;  %v3809_v25 = vld [vmem:[#allocation25_spill] sm:$0xff]  ;;  %v3810_v26 = vld [vmem:[#allocation26_spill] sm:$0xff] }
 0x35a   : > { %1179 = vmatpush1.msra.mxu0 %v2689_v27  ;;  %1250 = vmatpush1.msra.mxu1 %v2692_v28  ;;  %v3811_v27 = vmov 0.0   ;;  %v3812_v28 = vld [vmem:[#allocation27_spill] sm:$0xff] }
 0x35b   : > { %1180 = vmatprep.subr.mxu0 %v2697_v29  ;;  %1251 = vmatprep.subr.mxu1 %v2700_v30  ;;  %v3177_v29 = vld [vmem:[%s2610_s3 + $0x1e8] sm:$0xff]  ;;  %v3181_v30 = vld [vmem:[%s2610_s3 + $0x1f8] sm:$0xff] }
 0x35c   : > { %1181 = vmatpush1.msra.mxu0 %v2705_v31  ;;  %1252 = vmatpush1.msra.mxu1 %v2708_v32  ;;  %3813 = vst [vmem:[#allocation9_spill] sm:$0xff] %v3177_v29  ;;  %3814 = vst [vmem:[#allocation10_spill] sm:$0xff] %v3181_v30 }
 0x35d   : > { %1182 = vmatprep.subr.mxu0 %v2713_v33  ;;  %1253 = vmatprep.subr.mxu1 %v2716_v34 }
 0x35e   : > { %1183 = vmatpush1.msra.mxu0 %v2721_v35  ;;  %1254 = vmatpush1.msra.mxu1 %v2724_v36 }
 0x35f   : > { %1184 = vmatprep.subr.mxu0 %v2729_v37  ;;  %1255 = vmatprep.subr.mxu1 %v2732_v38 }
 0x360   : > { %1185 = vmatpush1.msra.mxu0 %v2737_v39  ;;  %1256 = vmatpush1.msra.mxu1 %v2740_v40  ;;  %v966_v39 = vld [vmem:[%s965_s4] sm:$0xff]  ;;  %s3608_s4 = scalar_select %p355_p3, 7, 0 }
 0x361   : > { %1186 = vmatprep.subr.mxu0 %v2745_v41  ;;  %1257 = vmatprep.subr.mxu1 %v2748_v42 }
 0x362   : > { %1187 = vmatpush1.msra.mxu0 %v2753_v43  ;;  %1258 = vmatpush1.msra.mxu1 %v2756_v44  ;;  %s2232_s5 = sshll.u32 %s3608_s4, 3 }
 0x363   : > { %1188 = vmatprep.subr.mxu0 %v2761_v45  ;;  %1259 = vmatprep.subr.mxu1 %v2764_v46 }
 0x364   : > { %1189 = vmatpush1.msra.mxu0 %v2769_v47  ;;  %1260 = vmatpush1.msra.mxu1 %v2772_v48 }
 0x365   : > { %1190 = vmatprep.subr.mxu0 %v2777_v49  ;;  %1261 = vmatprep.subr.mxu1 %v2780_v50 }
 0x366   : > { %1191 = vmatpush1.msra.mxu0 %v2785_v51  ;;  %1262 = vmatpush1.msra.mxu1 %v2788_v52 }
 0x367   : > { %1192 = vmatprep.subr.mxu0 %v2793_v53  ;;  %1263 = vmatprep.subr.mxu1 %v2796_v54 }
 0x368   : > { %1193 = vmatpush1.msra.mxu0 %v2801_v55  ;;  %1264 = vmatpush1.msra.mxu1 %v3795_v11  ;;  %v1153_v55 = vld [vmem:[#allocation3] sm:$0x3]  ;;  %v3231_v11 = vld [vmem:[%s2610_s3 + $0x1b0] sm:$0xff] }
 0x369   : > { %1194 = vmatprep.subr.mxu0 %v3796_v12  ;;  %1265 = vmatprep.subr.mxu1 %v3797_v13  ;;  %v3235_v12 = vld [vmem:[%s2610_s3 + $0x188] sm:$0xff]  ;;  %v3239_v13 = vld [vmem:[%s2610_s3 + $0x198] sm:$0xff] }
 0x36a   : > { %1195 = vmatpush1.msra.mxu0 %v3798_v14  ;;  %1266 = vmatpush1.msra.mxu1 %v3799_v15  ;;  %v3243_v14 = vld [vmem:[%s2610_s3 + $0x180] sm:$0xff]  ;;  %v3247_v15 = vld [vmem:[%s2610_s3 + $0x190] sm:$0xff] }
 0x36b   : > { %1196 = vmatprep.subr.mxu0 %v3800_v16  ;;  %1267 = vmatprep.subr.mxu1 %v3801_v17  ;;  %v3251_v16 = vld [vmem:[%s2610_s3 + $0x168] sm:$0xff]  ;;  %v3255_v17 = vld [vmem:[%s2610_s3 + $0x178] sm:$0xff] }
 0x36c   : > { %1197 = vmatpush1.msra.mxu0 %v3802_v18  ;;  %1268 = vmatpush1.msra.mxu1 %v3803_v19  ;;  %v3259_v18 = vld [vmem:[%s2610_s3 + $0x160] sm:$0xff]  ;;  %v3263_v19 = vld [vmem:[%s2610_s3 + $0x170] sm:$0xff] }
 0x36d   : > { %1198 = vmatprep.subr.mxu0 %v3804_v20  ;;  %1269 = vmatprep.subr.mxu1 %v3805_v21  ;;  %v3267_v20 = vld [vmem:[%s2610_s3 + $0x148] sm:$0xff]  ;;  %v3271_v21 = vld [vmem:[%s2610_s3 + $0x158] sm:$0xff] }
 0x36e   : > { %1199 = vmatpush1.msra.mxu0 %v3806_v22  ;;  %1270 = vmatpush1.msra.mxu1 %v3807_v23  ;;  %v3275_v22 = vld [vmem:[%s2610_s3 + $0x140] sm:$0xff]  ;;  %v3279_v23 = vld [vmem:[%s2610_s3 + $0x150] sm:$0xff] }
 0x36f   : > { %1200 = vmatprep.subr.mxu0 %v3808_v24  ;;  %1271 = vmatprep.subr.mxu1 %v3809_v25  ;;  %v3283_v24 = vld [vmem:[%s2610_s3 + $0x128] sm:$0xff]  ;;  %v3287_v25 = vld [vmem:[%s2610_s3 + $0x138] sm:$0xff] }
 0x370   : > { %1201 = vmatpush1.msra.mxu0 %v3810_v26  ;;  %1234 = vmatprep.mubr.f32.mxu0 %v3811_v27  ;;  %v3291_v26 = vld [vmem:[%s2610_s3 + $0x120] sm:$0xff] }
 0x371   : > { %1272 = vmatpush1.msra.mxu1 %v3812_v28  ;;  %1305 = vmatprep.mubr.f32.mxu1 %v3811_v27  ;;  %v3295_v28 = vld [vmem:[%s2610_s3 + $0x130] sm:$0xff] }
 0x372   : > { %1372 = vmatprep.subr.mxu0 %v3177_v29  ;;  %1443 = vmatprep.subr.mxu1 %v3181_v30 }
 0x411   : > { %v1034_v31 = vpop.f32.mrf.mxu0  ;;  %v1105_v32 = vpop.f32.mrf.mxu1 }
 0x413   : > { %v1036_v33 = vpop.f32.mrf.mxu0  ;;  %v1107_v34 = vpop.f32.mrf.mxu1 }
 0x414   : > { %v1114_v35 = vcombine.low %v1034_v31, %v1036_v33  ;;  %v1115_v36 = vcombine.low %v1105_v32, %v1107_v34  ;;  %v3299_v31 = vld [vmem:[%s2610_s3 + $0x108] sm:$0xff]  ;;  %v3303_v32 = vld [vmem:[%s2610_s3 + $0x118] sm:$0xff]  ;;  %v3307_v33 = vld [vmem:[%s2610_s3 + $0x100] sm:$0xff] }
 0x415   : > { %v3311_v34 = vld [vmem:[%s2610_s3 + $0x110] sm:$0xff] }
 0x416   : > { %v1122_v37 = vrot.slane %v1114_v35, %v2950_v8  ;;  %v1129_v38 = vrot.slane %v1115_v36, %v2950_v8  ;;  %v3315_v35 = vld [vmem:[%s2610_s3 + $0xe8] sm:$0xff]  ;;  %v3319_v36 = vld [vmem:[%s2610_s3 + $0xf8] sm:$0xff] }
 0x418   : > { %v1130_v40 = vcombine.low %v1122_v37, %v1129_v38  ;;  %v3323_v37 = vld [vmem:[%s2610_s3 + $0xe0] sm:$0xff]  ;;  %v3327_v38 = vld [vmem:[%s2610_s3 + $0xf0] sm:$0xff] }
 0x41a   : > { %v1132_v41 = vadd.f32 %v1130_v40, %v966_v39  ;;  %v3331_v39 = vld [vmem:[%s2610_s3 + $0xc8] sm:$0xff]  ;;  %v3335_v40 = vld [vmem:[%s2610_s3 + $0xd8] sm:$0xff] }
 0x41c   : > { %v1133_v42 = vmul.f32 0.5, %v1132_v41  ;;  %v1138_v43 = vrot.slane %v1132_v41, 2  ;;  %v1144_v45 = vrot.slane %v1132_v41, 4  ;;  %v1147_v46 = vrot.slane %v1132_v41, 6  ;;  %v3339_v41 = vld [vmem:[%s2610_s3 + $0xc0] sm:$0xff] }
 0x41e   : > { %2317 = vtanh.f32 %v1133_v42  ;;  %v1140_v44 = vmul.f32 0.5, %v1138_v43  ;;  %v1149_v47 = vmul.f32 0.5, %v1147_v46  ;;  %v3343_v42 = vld [vmem:[%s2610_s3 + $0xd0] sm:$0xff]  ;;  %v3347_v43 = vld [vmem:[%s2610_s3 + $0xa8] sm:$0xff] }
 0x41f   : > { %v3359_v46 = vld [vmem:[%s2610_s3 + $0xb0] sm:$0xff] }
 0x420   : > { %2319 = vtanh.f32 %v1140_v44  ;;  %v3351_v44 = vld [vmem:[%s2610_s3 + $0xb8] sm:$0xff] }
 0x421   : > { %2321 = vtanh.f32 %v1144_v45  ;;  %v3355_v45 = vld [vmem:[%s2610_s3 + $0xa0] sm:$0xff] }
 0x422   : > { %2323 = vtanh.f32 %v1149_v47  ;;  %v3363_v47 = vld [vmem:[%s2610_s3 + $0x88] sm:$0xff] }
 0x42b   : > { %v2318_v48 = vpop.eup %2317 }
 0x42c   : > { %v1135_v49 = vadd.f32 1.0, %v2318_v48  ;;  %v3367_v48 = vld [vmem:[%s2610_s3 + $0x98] sm:$0xff] }
 0x42d   : > { %v2320_v50 = vpop.eup %2319 }
 0x42e   : > { %v1136_v51 = vmul.f32 0.5, %v1135_v49  ;;  %v1142_v52 = vadd.f32 1.0, %v2320_v50  ;;  %v2322_v54 = vpop.eup %2321  ;;  %v3371_v49 = vld [vmem:[%s2610_s3 + $0x80] sm:$0xff]  ;;  %v3375_v50 = vld [vmem:[%s2610_s3 + $0x90] sm:$0xff] }
 0x42f   : > { %v2324_v3 = vpop.eup %2323  ;;  %3815 = vst [vmem:[#allocation11_spill] sm:$0xff] %v3375_v50 }
 0x430   : > { %v1143_v53 = vmul.f32 0.5, %v1142_v52  ;;  %v1155_v6 = vmul.f32 %v2322_v54, %v1136_v51  ;;  %v1151_v9 = vadd.f32 1.0, %v2324_v3  ;;  %v3379_v51 = vld [vmem:[%s2610_s3 + $0x68] sm:$0xff]  ;;  %v3383_v52 = vld [vmem:[%s2610_s3 + $0x78] sm:$0xff]  ;;  %v3391_v54 = vld [vmem:[%s2610_s3 + $0x70] sm:$0xff] }
 0x431   : > { %3816 = vst [vmem:[#allocation12_spill] sm:$0xff] %v3379_v51  ;;  %3817 = vst [vmem:[#allocation13_spill] sm:$0xff] %v3383_v52  ;;  %v3411_v3 = vld [vmem:[%s2610_s3 + $0x28] sm:$0xff] }
 0x432   : > { %v1154_v7 = vmul.f32 %v1153_v55, %v1143_v53  ;;  %v1152_v62 = vmul.f32 0.5, %v1151_v9  ;;  %v3387_v53 = vld [vmem:[%s2610_s3 + $0x60] sm:$0xff]  ;;  %3819 = vst [vmem:[#allocation15_spill] sm:$0xff] %v3391_v54  ;;  %v3395_v55 = vld [vmem:[%s2610_s3 + $0x48] sm:$0xff]  ;;  %3824 = vst [vmem:[#allocation20_spill] sm:$0xff] %v3411_v3 }
 0x433   : > { %3818 = vst [vmem:[#allocation14_spill] sm:$0xff] %v3387_v53  ;;  %3820 = vst [vmem:[#allocation16_spill] sm:$0xff] %v3395_v55  ;;  %v3415_v9 = vld [vmem:[%s2610_s3 + $0x38] sm:$0xff] }
 0x434   : > { %v1156_v0 = vadd.f32 %v1155_v6, %v1154_v7  ;;  %v3399_v7 = vld [vmem:[%s2610_s3 + $0x58] sm:$0xff]  ;;  %v3403_v6 = vld [vmem:[%s2610_s3 + $0x40] sm:$0xff]  ;;  %3825 = vst [vmem:[#allocation21_spill] sm:$0xff] %v3415_v9 }
 0x435   : > { %3821 = vst [vmem:[#allocation17_spill] sm:$0xff] %v3399_v7  ;;  %3822 = vst [vmem:[#allocation18_spill] sm:$0xff] %v3403_v6 }
 0x436   : > { %2325 = vtanh.f32 %v1156_v0  ;;  %1159 = vst [vmem:[#allocation3] sm:$0x3] %v1156_v0  ;;  %v3407_v0 = vld [vmem:[%s2610_s3 + $0x50] sm:$0xff] }
 0x437   : > { %3823 = vst [vmem:[#allocation19_spill] sm:$0xff] %v3407_v0 }
 0x443   : > { %v2326_v63 = vpop.eup %2325 }
 0x444   : > { %v1158_v1 = vmul.f32 %v2326_v63, %v1152_v62  ;;  %v3419_v62 = vld [vmem:[%s2610_s3 + $0x20] sm:$0xff]  ;;  %v3423_v63 = vld [vmem:[%s2610_s3 + $0x30] sm:$0xff] }
 0x445   : > { %3826 = vst [vmem:[#allocation22_spill] sm:$0xff] %v3419_v62  ;;  %3827 = vst [vmem:[#allocation23_spill] sm:$0xff] %v3423_v63 }
 0x446   : > { %1163 = vst [vmem:[%s1162_s6] sm:$0x3] %v1158_v1  ;;  %1160 = vst [vmem:[#allocation2] sm:$0x3] %v1158_v1  ;;  %v3427_v1 = vld [vmem:[%s2610_s3 + $0x8] sm:$0xff]  ;;  %s1773_s6 = scalar_lea.vmem %s2607_s30, %s2232_s5 [#allocation4] }
 0x447   : > { %3828 = vst [vmem:[#allocation24_spill] sm:$0xff] %v3427_v1 }
 0x44d   : > { %v1169_v2 = vld [vmem:[#allocation2] sm:$0x3] }
 0x44e   : > { %1235 = vmatmul.mubr.f32.vlgmr.msra.gmra.mxu0 %v1169_v2  ;;  %1306 = vmatmul.mubr.f32.vlgmr.msra.gmra.mxu1 %v1169_v2  ;;  %v3431_v2 = vld [vmem:[%s2610_s3 + $0x18] sm:$0xff] }
 0x44f   : > { %1373 = vmatpush1.msra.mxu0 %v3195_v56  ;;  %1444 = vmatpush1.msra.mxu1 %v3199_v10  ;;  %3829 = vst [vmem:[#allocation25_spill] sm:$0xff] %v3431_v2 }
 0x450   : > { %1374 = vmatprep.subr.mxu0 %v3203_v61  ;;  %1445 = vmatprep.subr.mxu1 %v3207_v57 }
 0x451   : > { %1375 = vmatpush1.msra.mxu0 %v3211_v58  ;;  %1446 = vmatpush1.msra.mxu1 %v3215_v4 }
 0x452   : > { %1376 = vmatprep.subr.mxu0 %v3219_v59  ;;  %1447 = vmatprep.subr.mxu1 %v3223_v5 }
 0x453   : > { %1377 = vmatpush1.msra.mxu0 %v3227_v60  ;;  %1448 = vmatpush1.msra.mxu1 %v3231_v11 }
 0x454   : > { %1378 = vmatprep.subr.mxu0 %v3235_v12  ;;  %1449 = vmatprep.subr.mxu1 %v3239_v13 }
 0x455   : > { %1379 = vmatpush1.msra.mxu0 %v3243_v14  ;;  %1450 = vmatpush1.msra.mxu1 %v3247_v15 }
 0x456   : > { %1380 = vmatprep.subr.mxu0 %v3251_v16  ;;  %1451 = vmatprep.subr.mxu1 %v3255_v17 }
 0x457   : > { %1381 = vmatpush1.msra.mxu0 %v3259_v18  ;;  %1452 = vmatpush1.msra.mxu1 %v3263_v19 }
 0x458   : > { %1382 = vmatprep.subr.mxu0 %v3267_v20  ;;  %1453 = vmatprep.subr.mxu1 %v3271_v21 }
 0x459   : > { %1383 = vmatpush1.msra.mxu0 %v3275_v22  ;;  %1454 = vmatpush1.msra.mxu1 %v3279_v23 }
 0x45a   : > { %1384 = vmatprep.subr.mxu0 %v3283_v24  ;;  %1455 = vmatprep.subr.mxu1 %v3287_v25 }
 0x45b   : > { %1385 = vmatpush1.msra.mxu0 %v3291_v26  ;;  %1456 = vmatpush1.msra.mxu1 %v3295_v28 }
 0x45c   : > { %1386 = vmatprep.subr.mxu0 %v3299_v31  ;;  %1457 = vmatprep.subr.mxu1 %v3303_v32 }
 0x45d   : > { %1387 = vmatpush1.msra.mxu0 %v3307_v33  ;;  %1458 = vmatpush1.msra.mxu1 %v3311_v34 }
 0x45e   : > { %1388 = vmatprep.subr.mxu0 %v3315_v35  ;;  %1459 = vmatprep.subr.mxu1 %v3319_v36 }
 0x45f   : > { %1389 = vmatpush1.msra.mxu0 %v3323_v37  ;;  %1460 = vmatpush1.msra.mxu1 %v3327_v38 }
 0x460   : > { %1390 = vmatprep.subr.mxu0 %v3331_v39  ;;  %1461 = vmatprep.subr.mxu1 %v3335_v40 }
 0x461   : > { %1391 = vmatpush1.msra.mxu0 %v3339_v41  ;;  %1462 = vmatpush1.msra.mxu1 %v3343_v42 }
 0x462   : > { %1392 = vmatprep.subr.mxu0 %v3347_v43  ;;  %1463 = vmatprep.subr.mxu1 %v3351_v44 }
 0x463   : > { %1393 = vmatpush1.msra.mxu0 %v3355_v45  ;;  %1464 = vmatpush1.msra.mxu1 %v3359_v46 }
 0x464   : > { %1394 = vmatprep.subr.mxu0 %v3363_v47  ;;  %1465 = vmatprep.subr.mxu1 %v3367_v48 }
 0x465   : > { %1395 = vmatpush1.msra.mxu0 %v3371_v49  ;;  %1466 = vmatpush1.msra.mxu1 %v3375_v50 }
 0x466   : > { %1396 = vmatprep.subr.mxu0 %v3379_v51  ;;  %1467 = vmatprep.subr.mxu1 %v3383_v52 }
 0x467   : > { %1397 = vmatpush1.msra.mxu0 %v3387_v53  ;;  %1468 = vmatpush1.msra.mxu1 %v3391_v54 }
 0x468   : > { %1398 = vmatprep.subr.mxu0 %v3395_v55  ;;  %1469 = vmatprep.subr.mxu1 %v3399_v7 }
 0x469   : > { %1399 = vmatpush1.msra.mxu0 %v3403_v6  ;;  %1470 = vmatpush1.msra.mxu1 %v3407_v0 }
 0x46a   : > { %1400 = vmatprep.subr.mxu0 %v3411_v3  ;;  %1471 = vmatprep.subr.mxu1 %v3415_v9  ;;  %v3435_v3 = vld [vmem:[%s2610_s3] sm:$0xff] }
 0x46b   : > { %1401 = vmatpush1.msra.mxu0 %v3419_v62  ;;  %1472 = vmatpush1.msra.mxu1 %v3423_v63  ;;  %3830 = vst [vmem:[#allocation26_spill] sm:$0xff] %v3435_v3  ;;  %v3440_v62 = vld [vmem:[%s2610_s3 + $0x10] sm:$0xff]  ;;  %s1167_s3 = scalar_lea.vmem %s2607_s30, %s2229_s9 [#allocation4]  ;;  %s2218_s30 = sshll.u32 %s3608_s4, 1 }
 0x46c   : > { %1402 = vmatprep.subr.mxu0 %v3427_v1  ;;  %1473 = vmatprep.subr.mxu1 %v3431_v2  ;;  %3831 = vst [vmem:[#allocation27_spill] sm:$0xff] %v3440_v62  ;;  %v1168_v6 = vld [vmem:[%s1167_s3] sm:$0xff]  ;;  %s1970_s7 = scalar_lea.vmem %s2957_s8, %s2218_s30 [#allocation7]  ;;  %s2220_s9 = sshll.u32 (%p2579_p9), %s2499_s12, 1 }
 0x46d   : > { %1403 = vmatpush1.msra.mxu0 %v3435_v3  ;;  %1436 = vmatprep.mubr.f32.mxu0 %v3811_v27 }
 0x46e   : > { %1474 = vmatpush1.msra.mxu1 %v3440_v62  ;;  %1507 = vmatprep.mubr.f32.mxu1 %v3811_v27 }
 0x46f   : > { %1574 = vmatprep.subr.mxu0 %v3177_v29  ;;  %1645 = vmatprep.subr.mxu1 %v3181_v30 }
 0x50e   : > { %v1236_v2 = vpop.f32.mrf.mxu0  ;;  %v1307_v1 = vpop.f32.mrf.mxu1 }
 0x510   : > { %v1238_v3 = vpop.f32.mrf.mxu0  ;;  %v1309_v63 = vpop.f32.mrf.mxu1 }
 0x511   : > { %v1316_v9 = vcombine.low %v1236_v2, %v1238_v3  ;;  %v1317_v0 = vcombine.low %v1307_v1, %v1309_v63  ;;  %v3833_v2 = vld [vmem:[#allocation12_spill] sm:$0xff] }
 0x513   : > { %v1324_v62 = vrot.slane %v1316_v9, %v2950_v8  ;;  %v1331_v27 = vrot.slane %v1317_v0, %v2950_v8 }
 0x515   : > { %v1332_v29 = vcombine.low %v1324_v62, %v1331_v27 }
 0x517   : > { %v1334_v7 = vadd.f32 %v1332_v29, %v1168_v6  ;;  %v1355_v29 = vld [vmem:[#allocation3] sm:$0x3] }
 0x519   : > { %v1335_v30 = vmul.f32 0.5, %v1334_v7  ;;  %v1340_v55 = vrot.slane %v1334_v7, 2  ;;  %v1346_v53 = vrot.slane %v1334_v7, 4  ;;  %v1349_v52 = vrot.slane %v1334_v7, 6 }
 0x51b   : > { %2327 = vtanh.f32 %v1335_v30  ;;  %v1342_v54 = vmul.f32 0.5, %v1340_v55  ;;  %v1351_v51 = vmul.f32 0.5, %v1349_v52 }
 0x51d   : > { %2329 = vtanh.f32 %v1342_v54 }
 0x51e   : > { %2331 = vtanh.f32 %v1346_v53 }
 0x51f   : > { %2333 = vtanh.f32 %v1351_v51  ;;  %v3832_v51 = vld [vmem:[#allocation11_spill] sm:$0xff] }
 0x528   : > { %v2328_v50 = vpop.eup %2327 }
 0x529   : > { %v1337_v3 = vadd.f32 1.0, %v2328_v50 }
 0x52a   : > { %v2330_v63 = vpop.eup %2329 }
 0x52b   : > { %v1338_v1 = vmul.f32 0.5, %v1337_v3  ;;  %v1344_v9 = vadd.f32 1.0, %v2330_v63  ;;  %v2332_v27 = vpop.eup %2331  ;;  %v3834_v3 = vld [vmem:[#allocation13_spill] sm:$0xff]  ;;  %v3835_v63 = vld [vmem:[#allocation14_spill] sm:$0xff] }
 0x52c   : > { %v2334_v54 = vpop.eup %2333 }
 0x52d   : > { %v1345_v0 = vmul.f32 0.5, %v1344_v9  ;;  %v1357_v62 = vmul.f32 %v2332_v27, %v1338_v1  ;;  %v1353_v53 = vadd.f32 1.0, %v2334_v54  ;;  %v3836_v1 = vld [vmem:[#allocation15_spill] sm:$0xff]  ;;  %v3837_v9 = vld [vmem:[#allocation16_spill] sm:$0xff]  ;;  %v3839_v27 = vld [vmem:[#allocation18_spill] sm:$0xff] }
 0x52e   : > { %v3844_v54 = vld [vmem:[#allocation23_spill] sm:$0xff] }
 0x52f   : > { %v1356_v6 = vmul.f32 %v1355_v29, %v1345_v0  ;;  %v1354_v52 = vmul.f32 0.5, %v1353_v53  ;;  %v3838_v0 = vld [vmem:[#allocation17_spill] sm:$0xff]  ;;  %v3840_v29 = vld [vmem:[#allocation19_spill] sm:$0xff]  ;;  %v3845_v53 = vld [vmem:[#allocation24_spill] sm:$0xff] }
 0x531   : > { %v1358_v30 = vadd.f32 %v1357_v62, %v1356_v6  ;;  %v3841_v6 = vld [vmem:[#allocation20_spill] sm:$0xff]  ;;  %v3842_v62 = vld [vmem:[#allocation21_spill] sm:$0xff] }
 0x533   : > { %2335 = vtanh.f32 %v1358_v30  ;;  %1361 = vst [vmem:[#allocation3] sm:$0x3] %v1358_v30  ;;  %v3843_v30 = vld [vmem:[#allocation22_spill] sm:$0xff] }
 0x540   : > { %v2336_v55 = vpop.eup %2335 }
 0x541   : > { %v1360_v50 = vmul.f32 %v2336_v55, %v1354_v52  ;;  %v3846_v52 = vld [vmem:[#allocation25_spill] sm:$0xff]  ;;  %v3847_v55 = vld [vmem:[#allocation26_spill] sm:$0xff] }
 0x543   : > { %1365 = vst [vmem:[%s1364_s17] sm:$0x3] %v1360_v50  ;;  %1362 = vst [vmem:[#allocation2] sm:$0x3] %v1360_v50  ;;  %v3848_v50 = vmov 0.0   ;;  %s1986_s17 = scalar_lea.vmem (%p2579_p9), %s3650_s2, %s2220_s9 }
 0x54a   : > { %v1371_v7 = vld [vmem:[#allocation2] sm:$0x3] }
 0x54b   : > { %1437 = vmatmul.mubr.f32.vlgmr.msra.gmra.mxu0 %v1371_v7  ;;  %1508 = vmatmul.mubr.f32.vlgmr.msra.gmra.mxu1 %v1371_v7  ;;  %v3849_v7 = vld [vmem:[#allocation27_spill] sm:$0xff] }
 0x54c   : > { %1575 = vmatpush1.msra.mxu0 %v3195_v56  ;;  %1646 = vmatpush1.msra.mxu1 %v3199_v10 }
 0x54d   : > { %1576 = vmatprep.subr.mxu0 %v3203_v61  ;;  %1647 = vmatprep.subr.mxu1 %v3207_v57 }
 0x54e   : > { %1577 = vmatpush1.msra.mxu0 %v3211_v58  ;;  %1648 = vmatpush1.msra.mxu1 %v3215_v4 }
 0x54f   : > { %1578 = vmatprep.subr.mxu0 %v3219_v59  ;;  %1649 = vmatprep.subr.mxu1 %v3223_v5 }
 0x550   : > { %1579 = vmatpush1.msra.mxu0 %v3227_v60  ;;  %1650 = vmatpush1.msra.mxu1 %v3231_v11 }
 0x551   : > { %1580 = vmatprep.subr.mxu0 %v3235_v12  ;;  %1651 = vmatprep.subr.mxu1 %v3239_v13 }
 0x552   : > { %1581 = vmatpush1.msra.mxu0 %v3243_v14  ;;  %1652 = vmatpush1.msra.mxu1 %v3247_v15 }
 0x553   : > { %1582 = vmatprep.subr.mxu0 %v3251_v16  ;;  %1653 = vmatprep.subr.mxu1 %v3255_v17 }
 0x554   : > { %1583 = vmatpush1.msra.mxu0 %v3259_v18  ;;  %1654 = vmatpush1.msra.mxu1 %v3263_v19 }
 0x555   : > { %1584 = vmatprep.subr.mxu0 %v3267_v20  ;;  %1655 = vmatprep.subr.mxu1 %v3271_v21 }
 0x556   : > { %1585 = vmatpush1.msra.mxu0 %v3275_v22  ;;  %1656 = vmatpush1.msra.mxu1 %v3279_v23 }
 0x557   : > { %1586 = vmatprep.subr.mxu0 %v3283_v24  ;;  %1657 = vmatprep.subr.mxu1 %v3287_v25 }
 0x558   : > { %1587 = vmatpush1.msra.mxu0 %v3291_v26  ;;  %1658 = vmatpush1.msra.mxu1 %v3295_v28 }
 0x559   : > { %1588 = vmatprep.subr.mxu0 %v3299_v31  ;;  %1659 = vmatprep.subr.mxu1 %v3303_v32 }
 0x55a   : > { %1589 = vmatpush1.msra.mxu0 %v3307_v33  ;;  %1660 = vmatpush1.msra.mxu1 %v3311_v34 }
 0x55b   : > { %1590 = vmatprep.subr.mxu0 %v3315_v35  ;;  %1661 = vmatprep.subr.mxu1 %v3319_v36 }
 0x55c   : > { %1591 = vmatpush1.msra.mxu0 %v3323_v37  ;;  %1662 = vmatpush1.msra.mxu1 %v3327_v38 }
 0x55d   : > { %1592 = vmatprep.subr.mxu0 %v3331_v39  ;;  %1663 = vmatprep.subr.mxu1 %v3335_v40 }
 0x55e   : > { %1593 = vmatpush1.msra.mxu0 %v3339_v41  ;;  %1664 = vmatpush1.msra.mxu1 %v3343_v42 }
 0x55f   : > { %1594 = vmatprep.subr.mxu0 %v3347_v43  ;;  %1665 = vmatprep.subr.mxu1 %v3351_v44 }
 0x560   : > { %1595 = vmatpush1.msra.mxu0 %v3355_v45  ;;  %1666 = vmatpush1.msra.mxu1 %v3359_v46 }
 0x561   : > { %1596 = vmatprep.subr.mxu0 %v3363_v47  ;;  %1667 = vmatprep.subr.mxu1 %v3367_v48 }
 0x562   : > { %1597 = vmatpush1.msra.mxu0 %v3371_v49  ;;  %1668 = vmatpush1.msra.mxu1 %v3832_v51 }
 0x563   : > { %1598 = vmatprep.subr.mxu0 %v3833_v2  ;;  %1669 = vmatprep.subr.mxu1 %v3834_v3 }
 0x564   : > { %1599 = vmatpush1.msra.mxu0 %v3835_v63  ;;  %1670 = vmatpush1.msra.mxu1 %v3836_v1 }
 0x565   : > { %1600 = vmatprep.subr.mxu0 %v3837_v9  ;;  %1671 = vmatprep.subr.mxu1 %v3838_v0 }
 0x566   : > { %1601 = vmatpush1.msra.mxu0 %v3839_v27  ;;  %1672 = vmatpush1.msra.mxu1 %v3840_v29  ;;  %v1370_v27 = vld [vmem:[%s1369_s24] sm:$0xff] }
 0x567   : > { %1602 = vmatprep.subr.mxu0 %v3841_v6  ;;  %1673 = vmatprep.subr.mxu1 %v3842_v62  ;;  %v3850_v6 = vld [vmem:[#allocation9_spill] sm:$0xff]  ;;  %v3851_v62 = vld [vmem:[#allocation10_spill] sm:$0xff] }
 0x568   : > { %1603 = vmatpush1.msra.mxu0 %v3843_v30  ;;  %1674 = vmatpush1.msra.mxu1 %v3844_v54 }
 0x569   : > { %1604 = vmatprep.subr.mxu0 %v3845_v53  ;;  %1675 = vmatprep.subr.mxu1 %v3846_v52 }
 0x56a   : > { %1605 = vmatpush1.msra.mxu0 %v3847_v55  ;;  %1638 = vmatprep.mubr.f32.mxu0 %v3848_v50 }
 0x56b   : > { %1676 = vmatpush1.msra.mxu1 %v3849_v7  ;;  %1709 = vmatprep.mubr.f32.mxu1 %v3848_v50 }
 0x56c   : > { %1776 = vmatprep.subr.mxu0 %v3850_v6  ;;  %1847 = vmatprep.subr.mxu1 %v3851_v62 }
 0x60b   : > { %v1438_v54 = vpop.f32.mrf.mxu0  ;;  %v1509_v53 = vpop.f32.mrf.mxu1 }
 0x60d   : > { %v1440_v52 = vpop.f32.mrf.mxu0  ;;  %v1511_v30 = vpop.f32.mrf.mxu1 }
 0x60e   : > { %v1518_v55 = vcombine.low %v1438_v54, %v1440_v52  ;;  %v1519_v29 = vcombine.low %v1509_v53, %v1511_v30 }
 0x610   : > { %v1526_v7 = vrot.slane %v1518_v55, %v2950_v8  ;;  %v1533_v50 = vrot.slane %v1519_v29, %v2950_v8 }
 0x612   : > { %v1534_v6 = vcombine.low %v1526_v7, %v1533_v50 }
 0x614   : > { %v1536_v0 = vadd.f32 %v1534_v6, %v1370_v27  ;;  %v1557_v27 = vld [vmem:[#allocation3] sm:$0x3] }
 0x616   : > { %v1537_v62 = vmul.f32 0.5, %v1536_v0  ;;  %v1542_v9 = vrot.slane %v1536_v0, 2  ;;  %v1548_v63 = vrot.slane %v1536_v0, 4  ;;  %v1551_v3 = vrot.slane %v1536_v0, 6 }
 0x618   : > { %2337 = vtanh.f32 %v1537_v62  ;;  %v1544_v1 = vmul.f32 0.5, %v1542_v9  ;;  %v1553_v2 = vmul.f32 0.5, %v1551_v3 }
 0x61a   : > { %2339 = vtanh.f32 %v1544_v1 }
 0x61b   : > { %2341 = vtanh.f32 %v1548_v63 }
 0x61c   : > { %2343 = vtanh.f32 %v1553_v2 }
 0x625   : > { %v2338_v51 = vpop.eup %2337 }
 0x626   : > { %v1539_v54 = vadd.f32 1.0, %v2338_v51 }
 0x627   : > { %v2340_v30 = vpop.eup %2339 }
 0x628   : > { %v1540_v53 = vmul.f32 0.5, %v1539_v54  ;;  %v1546_v52 = vadd.f32 1.0, %v2340_v30  ;;  %v2342_v55 = vpop.eup %2341 }
 0x629   : > { %v2344_v1 = vpop.eup %2343 }
 0x62a   : > { %v1547_v29 = vmul.f32 0.5, %v1546_v52  ;;  %v1559_v7 = vmul.f32 %v2342_v55, %v1540_v53  ;;  %v1555_v63 = vadd.f32 1.0, %v2344_v1 }
 0x62c   : > { %v1558_v50 = vmul.f32 %v1557_v27, %v1547_v29  ;;  %v1556_v3 = vmul.f32 0.5, %v1555_v63 }
 0x62e   : > { %v1560_v6 = vadd.f32 %v1559_v7, %v1558_v50 }
 0x630   : > { %2345 = vtanh.f32 %v1560_v6  ;;  %1563 = vst [vmem:[#allocation3] sm:$0x3] %v1560_v6 }
 0x63d   : > { %v2346_v9 = vpop.eup %2345 }
 0x63e   : > { %v1562_v51 = vmul.f32 %v2346_v9, %v1556_v3  ;;  %v1774_v9 = vld [vmem:[%s1773_s6] sm:$0xff] }
 0x640   : > { %1567 = vst [vmem:[%s1566_s26] sm:$0x3] %v1562_v51  ;;  %1564 = vst [vmem:[#allocation2] sm:$0x3] %v1562_v51 }
 0x647   : > { %v1573_v0 = vld [vmem:[#allocation2] sm:$0x3] }
 0x648   : > { %1639 = vmatmul.mubr.f32.vlgmr.msra.gmra.mxu0 %v1573_v0  ;;  %1710 = vmatmul.mubr.f32.vlgmr.msra.gmra.mxu1 %v1573_v0 }
 0x649   : > { %1777 = vmatpush1.msra.mxu0 %v3195_v56  ;;  %1848 = vmatpush1.msra.mxu1 %v3199_v10  ;;  %v3852_v56 = vld [vmem:[#allocation11_spill] sm:$0xff]  ;;  %v3853_v10 = vld [vmem:[#allocation12_spill] sm:$0xff] }
 0x64a   : > { %1778 = vmatprep.subr.mxu0 %v3203_v61  ;;  %1849 = vmatprep.subr.mxu1 %v3207_v57  ;;  %v3854_v61 = vld [vmem:[#allocation13_spill] sm:$0xff]  ;;  %v3855_v57 = vld [vmem:[#allocation14_spill] sm:$0xff] }
 0x64b   : > { %1779 = vmatpush1.msra.mxu0 %v3211_v58  ;;  %1850 = vmatpush1.msra.mxu1 %v3215_v4  ;;  %v3856_v58 = vld [vmem:[#allocation15_spill] sm:$0xff]  ;;  %v3857_v4 = vld [vmem:[#allocation16_spill] sm:$0xff] }
 0x64c   : > { %1780 = vmatprep.subr.mxu0 %v3219_v59  ;;  %1851 = vmatprep.subr.mxu1 %v3223_v5  ;;  %v3858_v59 = vld [vmem:[#allocation17_spill] sm:$0xff]  ;;  %v3859_v5 = vld [vmem:[#allocation18_spill] sm:$0xff] }
 0x64d   : > { %1781 = vmatpush1.msra.mxu0 %v3227_v60  ;;  %1852 = vmatpush1.msra.mxu1 %v3231_v11  ;;  %v3860_v60 = vld [vmem:[#allocation19_spill] sm:$0xff]  ;;  %v3861_v11 = vld [vmem:[#allocation20_spill] sm:$0xff] }
 0x64e   : > { %1782 = vmatprep.subr.mxu0 %v3235_v12  ;;  %1853 = vmatprep.subr.mxu1 %v3239_v13  ;;  %v3862_v12 = vld [vmem:[#allocation21_spill] sm:$0xff]  ;;  %v3863_v13 = vld [vmem:[#allocation22_spill] sm:$0xff] }
 0x64f   : > { %1783 = vmatpush1.msra.mxu0 %v3243_v14  ;;  %1854 = vmatpush1.msra.mxu1 %v3247_v15  ;;  %v3864_v14 = vld [vmem:[#allocation23_spill] sm:$0xff]  ;;  %v3865_v15 = vld [vmem:[#allocation24_spill] sm:$0xff] }
 0x650   : > { %1784 = vmatprep.subr.mxu0 %v3251_v16  ;;  %1855 = vmatprep.subr.mxu1 %v3255_v17  ;;  %v3866_v16 = vld [vmem:[#allocation25_spill] sm:$0xff]  ;;  %v3867_v17 = vld [vmem:[#allocation26_spill] sm:$0xff] }
 0x651   : > { %1785 = vmatpush1.msra.mxu0 %v3259_v18  ;;  %1856 = vmatpush1.msra.mxu1 %v3263_v19  ;;  %v3868_v18 = vmov 0.0   ;;  %v3869_v19 = vld [vmem:[#allocation27_spill] sm:$0xff] }
 0x652   : > { %1786 = vmatprep.subr.mxu0 %v3267_v20  ;;  %1857 = vmatprep.subr.mxu1 %v3271_v21 }
 0x653   : > { %1787 = vmatpush1.msra.mxu0 %v3275_v22  ;;  %1858 = vmatpush1.msra.mxu1 %v3279_v23 }
 0x654   : > { %1788 = vmatprep.subr.mxu0 %v3283_v24  ;;  %1859 = vmatprep.subr.mxu1 %v3287_v25 }
 0x655   : > { %1789 = vmatpush1.msra.mxu0 %v3291_v26  ;;  %1860 = vmatpush1.msra.mxu1 %v3295_v28 }
 0x656   : > { %1790 = vmatprep.subr.mxu0 %v3299_v31  ;;  %1861 = vmatprep.subr.mxu1 %v3303_v32  ;;  %v1572_v31 = vld [vmem:[%s1571_s29] sm:$0xff] }
 0x657   : > { %1791 = vmatpush1.msra.mxu0 %v3307_v33  ;;  %1862 = vmatpush1.msra.mxu1 %v3311_v34 }
 0x658   : > { %1792 = vmatprep.subr.mxu0 %v3315_v35  ;;  %1863 = vmatprep.subr.mxu1 %v3319_v36 }
 0x659   : > { %1793 = vmatpush1.msra.mxu0 %v3323_v37  ;;  %1864 = vmatpush1.msra.mxu1 %v3327_v38 }
 0x65a   : > { %1794 = vmatprep.subr.mxu0 %v3331_v39  ;;  %1865 = vmatprep.subr.mxu1 %v3335_v40 }
 0x65b   : > { %1795 = vmatpush1.msra.mxu0 %v3339_v41  ;;  %1866 = vmatpush1.msra.mxu1 %v3343_v42 }
 0x65c   : > { %1796 = vmatprep.subr.mxu0 %v3347_v43  ;;  %1867 = vmatprep.subr.mxu1 %v3351_v44 }
 0x65d   : > { %1797 = vmatpush1.msra.mxu0 %v3355_v45  ;;  %1868 = vmatpush1.msra.mxu1 %v3359_v46 }
 0x65e   : > { %1798 = vmatprep.subr.mxu0 %v3363_v47  ;;  %1869 = vmatprep.subr.mxu1 %v3367_v48  ;;  %v1759_v47 = vld [vmem:[#allocation3] sm:$0x3] }
 0x65f   : > { %1799 = vmatpush1.msra.mxu0 %v3371_v49  ;;  %1870 = vmatpush1.msra.mxu1 %v3852_v56 }
 0x660   : > { %1800 = vmatprep.subr.mxu0 %v3853_v10  ;;  %1871 = vmatprep.subr.mxu1 %v3854_v61 }
 0x661   : > { %1801 = vmatpush1.msra.mxu0 %v3855_v57  ;;  %1872 = vmatpush1.msra.mxu1 %v3856_v58 }
 0x662   : > { %1802 = vmatprep.subr.mxu0 %v3857_v4  ;;  %1873 = vmatprep.subr.mxu1 %v3858_v59 }
 0x663   : > { %1803 = vmatpush1.msra.mxu0 %v3859_v5  ;;  %1874 = vmatpush1.msra.mxu1 %v3860_v60 }
 0x664   : > { %1804 = vmatprep.subr.mxu0 %v3861_v11  ;;  %1875 = vmatprep.subr.mxu1 %v3862_v12 }
 0x665   : > { %1805 = vmatpush1.msra.mxu0 %v3863_v13  ;;  %1876 = vmatpush1.msra.mxu1 %v3864_v14 }
 0x666   : > { %1806 = vmatprep.subr.mxu0 %v3865_v15  ;;  %1877 = vmatprep.subr.mxu1 %v3866_v16 }
 0x667   : > { %1807 = vmatpush1.msra.mxu0 %v3867_v17  ;;  %1840 = vmatprep.mubr.f32.mxu0 %v3868_v18 }
 0x668   : > { %1878 = vmatpush1.msra.mxu1 %v3869_v19  ;;  %1911 = vmatprep.mubr.f32.mxu1 %v3868_v18 }
 0x708   : > { %v1640_v20 = vpop.f32.mrf.mxu0  ;;  %v1711_v21 = vpop.f32.mrf.mxu1 }
 0x70a   : > { %v1642_v22 = vpop.f32.mrf.mxu0  ;;  %v1713_v23 = vpop.f32.mrf.mxu1 }
 0x70b   : > { %v1720_v24 = vcombine.low %v1640_v20, %v1642_v22  ;;  %v1721_v25 = vcombine.low %v1711_v21, %v1713_v23 }
 0x70d   : > { %v1728_v26 = vrot.slane %v1720_v24, %v2950_v8  ;;  %v1735_v28 = vrot.slane %v1721_v25, %v2950_v8 }
 0x70f   : > { %v1736_v32 = vcombine.low %v1728_v26, %v1735_v28 }
 0x711   : > { %v1738_v33 = vadd.f32 %v1736_v32, %v1572_v31 }
 0x713   : > { %v1739_v34 = vmul.f32 0.5, %v1738_v33  ;;  %v1744_v35 = vrot.slane %v1738_v33, 2  ;;  %v1750_v37 = vrot.slane %v1738_v33, 4  ;;  %v1753_v38 = vrot.slane %v1738_v33, 6 }
 0x715   : > { %2347 = vtanh.f32 %v1739_v34  ;;  %v1746_v36 = vmul.f32 0.5, %v1744_v35  ;;  %v1755_v39 = vmul.f32 0.5, %v1753_v38 }
 0x717   : > { %2349 = vtanh.f32 %v1746_v36 }
 0x718   : > { %2351 = vtanh.f32 %v1750_v37 }
 0x719   : > { %2353 = vtanh.f32 %v1755_v39 }
 0x722   : > { %v2348_v40 = vpop.eup %2347 }
 0x723   : > { %v1741_v41 = vadd.f32 1.0, %v2348_v40 }
 0x724   : > { %v2350_v42 = vpop.eup %2349 }
 0x725   : > { %v1742_v43 = vmul.f32 0.5, %v1741_v41  ;;  %v1748_v44 = vadd.f32 1.0, %v2350_v42  ;;  %v2352_v46 = vpop.eup %2351 }
 0x726   : > { %v2354_v62 = vpop.eup %2353 }
 0x727   : > { %v1749_v45 = vmul.f32 0.5, %v1748_v44  ;;  %v1761_v49 = vmul.f32 %v2352_v46, %v1742_v43  ;;  %v1757_v54 = vadd.f32 1.0, %v2354_v62 }
 0x729   : > { %v1760_v48 = vmul.f32 %v1759_v47, %v1749_v45  ;;  %v1758_v30 = vmul.f32 0.5, %v1757_v54 }
 0x72b   : > { %v1762_v2 = vadd.f32 %v1761_v49, %v1760_v48 }
 0x72d   : > { %2355 = vtanh.f32 %v1762_v2  ;;  %1765 = vst [vmem:[#allocation3] sm:$0x3] %v1762_v2 }
 0x734   : > { %v1961_v14 = vld [vmem:[#allocation3] sm:$0x3] }
 0x73a   : > { %v2356_v53 = vpop.eup %2355 }
 0x73b   : > { %v1764_v52 = vmul.f32 %v2356_v53, %v1758_v30 }
 0x73d   : > { %1769 = vst [vmem:[%s1768_s20] sm:$0x3] %v1764_v52  ;;  %1766 = vst [vmem:[#allocation2] sm:$0x3] %v1764_v52 }
 0x744   : > { %v1775_v29 = vld [vmem:[#allocation2] sm:$0x3] }
 0x745   : > { %1841 = vmatmul.mubr.f32.vlgmr.msra.gmra.mxu0 %v1775_v29  ;;  %1912 = vmatmul.mubr.f32.vlgmr.msra.gmra.mxu1 %v1775_v29 }
 0x805   : > { %v1842_v55 = vpop.f32.mrf.mxu0  ;;  %v1913_v27 = vpop.f32.mrf.mxu1 }
 0x807   : > { %v1844_v50 = vpop.f32.mrf.mxu0  ;;  %v1915_v7 = vpop.f32.mrf.mxu1 }
 0x808   : > { %v1922_v6 = vcombine.low %v1842_v55, %v1844_v50  ;;  %v1923_v1 = vcombine.low %v1913_v27, %v1915_v7 }
 0x80a   : > { %v1930_v63 = vrot.slane %v1922_v6, %v2950_v8  ;;  %v1937_v3 = vrot.slane %v1923_v1, %v2950_v8 }
 0x80c   : > { %v1938_v51 = vcombine.low %v1930_v63, %v1937_v3 }
 0x80e   : > { %v1940_v0 = vadd.f32 %v1938_v51, %v1774_v9 }
 0x810   : > { %v1941_v56 = vmul.f32 0.5, %v1940_v0  ;;  %v1946_v10 = vrot.slane %v1940_v0, 2  ;;  %v1952_v57 = vrot.slane %v1940_v0, 4  ;;  %v1955_v58 = vrot.slane %v1940_v0, 6 }
 0x812   : > { %2357 = vtanh.f32 %v1941_v56  ;;  %v1948_v61 = vmul.f32 0.5, %v1946_v10  ;;  %v1957_v4 = vmul.f32 0.5, %v1955_v58 }
 0x814   : > { %2359 = vtanh.f32 %v1948_v61 }
 0x815   : > { %2361 = vtanh.f32 %v1952_v57 }
 0x816   : > { %2363 = vtanh.f32 %v1957_v4 }
 0x81f   : > { %v2358_v59 = vpop.eup %2357 }
 0x820   : > { %v1943_v5 = vadd.f32 1.0, %v2358_v59 }
 0x821   : > { %v2360_v60 = vpop.eup %2359 }
 0x822   : > { %v1944_v11 = vmul.f32 0.5, %v1943_v5  ;;  %v1950_v12 = vadd.f32 1.0, %v2360_v60  ;;  %v2362_v13 = vpop.eup %2361 }
 0x823   : > { %v2364_v18 = vpop.eup %2363 }
 0x824   : > { %v1951_v8 = vmul.f32 0.5, %v1950_v12  ;;  %v1963_v16 = vmul.f32 %v2362_v13, %v1944_v11  ;;  %v1959_v19 = vadd.f32 1.0, %v2364_v18 }
 0x826   : > { %v1962_v15 = vmul.f32 %v1961_v14, %v1951_v8  ;;  %v1960_v20 = vmul.f32 0.5, %v1959_v19 }
 0x828   : > { %v1964_v17 = vadd.f32 %v1963_v16, %v1962_v15 }
 0x82a   : > { %2365 = vtanh.f32 %v1964_v17  ;;  %1967 = vst [vmem:[#allocation3] sm:$0x3] %v1964_v17 }
 0x836   : > { %1978 = sbr.rel (!%p2579_p9) target bundleno = 2119 (0x847), region = 78 }
 0x837   : > { %v2366_v21 = vpop.eup %2365 }
 0x838   : > { %v1966_v22 = vmul.f32 %v2366_v21, %v1960_v20 }
 0x83a   : > { %1968 = vst [vmem:[#allocation2] sm:$0x3] %v1966_v22  ;;  %1971 = vst [vmem:[%s1970_s7] sm:$0x3] %v1966_v22 }
 0x841   : > { %v2003_v23 = vld [vmem:[%s2957_s8] sm:$0x3]  ;;  %v2005_v24 = vld [vmem:[%s2957_s8 + $0x2] sm:$0x3]  ;;  %v2007_v25 = vld [vmem:[%s2957_s8 + $0x4] sm:$0x3] }
 0x842   : > { %v2009_v26 = vld [vmem:[%s2957_s8 + $0x6] sm:$0x3]  ;;  %v2011_v28 = vld [vmem:[%s2957_s8 + $0x8] sm:$0x3]  ;;  %2004 = vst [vmem:[%s1986_s17] sm:$0x3] %v2003_v23 }
 0x843   : > { %2006 = vst [vmem:[%s1986_s17 + $0x4] sm:$0x3] %v2005_v24  ;;  %2008 = vst [vmem:[%s1986_s17 + $0x8] sm:$0x3] %v2007_v25  ;;  %v2013_v31 = vld [vmem:[%s2957_s8 + $0xa] sm:$0x3] }
 0x844   : > { %2010 = vst [vmem:[%s1986_s17 + $0xc] sm:$0x3] %v2009_v26  ;;  %2012 = vst [vmem:[%s1986_s17 + $0x10] sm:$0x3] %v2011_v28  ;;  %v2015_v32 = vld [vmem:[%s2957_s8 + $0xc] sm:$0x3] }
 0x845   : > { %v2017_v33 = vld [vmem:[%s2957_s8 + $0xe] sm:$0x3]  ;;  %2014 = vst [vmem:[%s1986_s17 + $0x14] sm:$0x3] %v2013_v31  ;;  %2016 = vst [vmem:[%s1986_s17 + $0x18] sm:$0x3] %v2015_v32 }
 0x846   : > { %2018 = vst [vmem:[%s1986_s17 + $0x1c] sm:$0x3] %v2017_v33 }
 0x847 PF: > { %s15_s14 = sadd.s32 1, %s2507_s14   ;;  %s3870_s9 = smov %s2491_s10 }
 0x848   : > { %p12_p8 = scmp.ge.s32.totalorder %s15_s14, 4   ;;  %s3871_s10 = smov %s2495_s11 }
 0x849   : > { %s3872_s11 = smov %s2577_s21  ;;  %s3873_s12 = smov %s2503_s13 }
 0x84a   : > { %s3874_s13 = smov %s3876_s16  ;;  %14 = sbr.rel (!%p12_p8) target bundleno = 4 (0x4), region = 175 }
 0x84f   :  { %2068 = vsyncpa [#allocation6], 1 }
 0x850   :  { %2070 = vsyncpa [#allocation6 + $0x1], 1 }

// kernel: lstm_model_forward.9
= control target key start
LH: loop header
LB: loop body
LE: loop exit
PB: predicated region body
PF: predicated region fallthrough
CT: control target
= control target key end

     0   :  { %s384_s0 = inlined_call_operand.vmem [shape: f32[16,256], index: 0, kind: input, shape index: {}]   ;;  %s385_s1 = inlined_call_operand.vmem [shape: f32[256,128], index: 1, kind: input, shape index: {}]   ;;  %s386_s2 = inlined_call_operand.vmem [shape: f32[1,128], index: 2, kind: input, shape index: {}]   ;;  %s387_s3 = inlined_call_operand.hbm [shape: f32[16,128], index: 3, kind: output, shape index: {}]  }
   0x1   :  { %v50_v0 = vld [vmem:[%s385_s1 + $0xf8] sm:$0xff]  ;;  %v49_v2 = vld [vmem:[%s385_s1 + $0xf0] sm:$0xff]  ;;  %v48_v4 = vld [vmem:[%s385_s1 + $0xe8] sm:$0xff] }
   0x2   :  { %v34_v1 = vld [vmem:[%s385_s1 + $0x78] sm:$0xff]  ;;  %152 = vmatprep.subr.mxu0 %v50_v0  ;;  %190 = vmatprep.subr.mxu1 %v50_v0  ;;  %v33_v3 = vld [vmem:[%s385_s1 + $0x70] sm:$0xff]  ;;  %v32_v5 = vld [vmem:[%s385_s1 + $0x68] sm:$0xff] }
   0x3   :  { %153 = vmatpush3.msra.mxu0 %v34_v1  ;;  %206 = vmatpush3.msra.mxu1 %v34_v1  ;;  %v47_v6 = vld [vmem:[%s385_s1 + $0xe0] sm:$0xff]  ;;  %v46_v8 = vld [vmem:[%s385_s1 + $0xd8] sm:$0xff]  ;;  %v45_v10 = vld [vmem:[%s385_s1 + $0xd0] sm:$0xff] }
   0x4   :  { %154 = vmatprep.subr.mxu0 %v49_v2  ;;  %191 = vmatprep.subr.mxu1 %v49_v2  ;;  %v31_v7 = vld [vmem:[%s385_s1 + $0x60] sm:$0xff]  ;;  %v30_v9 = vld [vmem:[%s385_s1 + $0x58] sm:$0xff]  ;;  %v29_v11 = vld [vmem:[%s385_s1 + $0x50] sm:$0xff] }
   0x5   :  { %155 = vmatpush3.msra.mxu0 %v33_v3  ;;  %207 = vmatpush3.msra.mxu1 %v33_v3  ;;  %v44_v12 = vld [vmem:[%s385_s1 + $0xc8] sm:$0xff]  ;;  %v43_v14 = vld [vmem:[%s385_s1 + $0xc0] sm:$0xff] }
   0x6   :  { %156 = vmatprep.subr.mxu0 %v48_v4  ;;  %192 = vmatprep.subr.mxu1 %v48_v4  ;;  %v28_v13 = vld [vmem:[%s385_s1 + $0x48] sm:$0xff] }
   0x7   :  { %157 = vmatpush3.msra.mxu0 %v32_v5  ;;  %208 = vmatpush3.msra.mxu1 %v32_v5 }
   0x8   :  { %158 = vmatprep.subr.mxu0 %v47_v6  ;;  %193 = vmatprep.subr.mxu1 %v47_v6 }
   0x9   :  { %159 = vmatpush3.msra.mxu0 %v31_v7  ;;  %209 = vmatpush3.msra.mxu1 %v31_v7 }
   0xa   :  { %160 = vmatprep.subr.mxu0 %v46_v8  ;;  %194 = vmatprep.subr.mxu1 %v46_v8 }
   0xb   :  { %161 = vmatpush3.msra.mxu0 %v30_v9  ;;  %210 = vmatpush3.msra.mxu1 %v30_v9 }
   0xc   :  { %162 = vmatprep.subr.mxu0 %v45_v10  ;;  %195 = vmatprep.subr.mxu1 %v45_v10 }
   0xd   :  { %163 = vmatpush3.msra.mxu0 %v29_v11  ;;  %211 = vmatpush3.msra.mxu1 %v29_v11 }
   0xe   :  { %8 = vsyncpa [#allocation3], 0  ;;  %164 = vmatprep.subr.mxu0 %v44_v12  ;;  %196 = vmatprep.subr.mxu1 %v44_v12  ;;  %v27_v15 = vld [vmem:[%s385_s1 + $0x40] sm:$0xff]  ;;  %v42_v16 = vld [vmem:[%s385_s1 + $0xb8] sm:$0xff] }
   0xf   :  { %165 = vmatpush3.msra.mxu0 %v28_v13  ;;  %212 = vmatpush3.msra.mxu1 %v28_v13  ;;  %v26_v17 = vld [vmem:[%s385_s1 + $0x38] sm:$0xff]  ;;  %v41_v18 = vld [vmem:[%s385_s1 + $0xb0] sm:$0xff]  ;;  %v40_v20 = vld [vmem:[%s385_s1 + $0xa8] sm:$0xff] }
  0x10   :  { %166 = vmatprep.subr.mxu0 %v43_v14  ;;  %197 = vmatprep.subr.mxu1 %v43_v14  ;;  %v25_v19 = vld [vmem:[%s385_s1 + $0x30] sm:$0xff]  ;;  %v24_v21 = vld [vmem:[%s385_s1 + $0x28] sm:$0xff]  ;;  %v39_v22 = vld [vmem:[%s385_s1 + $0xa0] sm:$0xff] }
  0x11   :  { %167 = vmatpush3.msra.mxu0 %v27_v15  ;;  %213 = vmatpush3.msra.mxu1 %v27_v15  ;;  %v23_v23 = vld [vmem:[%s385_s1 + $0x20] sm:$0xff]  ;;  %v38_v24 = vld [vmem:[%s385_s1 + $0x98] sm:$0xff]  ;;  %v37_v26 = vld [vmem:[%s385_s1 + $0x90] sm:$0xff] }
  0x12   :  { %168 = vmatprep.subr.mxu0 %v42_v16  ;;  %198 = vmatprep.subr.mxu1 %v42_v16  ;;  %v22_v25 = vld [vmem:[%s385_s1 + $0x18] sm:$0xff]  ;;  %v21_v27 = vld [vmem:[%s385_s1 + $0x10] sm:$0xff]  ;;  %v36_v28 = vld [vmem:[%s385_s1 + $0x88] sm:$0xff] }
  0x13   :  { %169 = vmatpush3.msra.mxu0 %v26_v17  ;;  %214 = vmatpush3.msra.mxu1 %v26_v17  ;;  %v20_v29 = vld [vmem:[%s385_s1 + $0x8] sm:$0xff]  ;;  %v35_v30 = vld [vmem:[%s385_s1 + $0x80] sm:$0xff]  ;;  %v18_v33 = vld [vmem:[%s384_s0 + $0x18] sm:$0xff] }
  0x14   :  { %170 = vmatprep.subr.mxu0 %v41_v18  ;;  %199 = vmatprep.subr.mxu1 %v41_v18  ;;  %v19_v31 = vld [vmem:[%s385_s1] sm:$0xff]  ;;  %v16_v32 = vld [vmem:[%s384_s0 + $0x8] sm:$0xff]  ;;  %v17_v35 = vld [vmem:[%s384_s0 + $0x10] sm:$0xff]  ;;  %s247_s1 = smov [#allocation2]  }
  0x15   :  { %171 = vmatpush3.msra.mxu0 %v25_v19  ;;  %215 = vmatpush3.msra.mxu1 %v25_v19  ;;  %v15_v34 = vld [vmem:[%s384_s0] sm:$0xff]  ;;  %s140_s30 = sshll.u32 %s247_s1, 4  ;;  %s141_s30 = int_to_ptr.vmem [resolvable:$true] %s140_s30 }
  0x16   :  { %172 = vmatprep.subr.mxu0 %v40_v20  ;;  %200 = vmatprep.subr.mxu1 %v40_v20  ;;  %v151_v38 = vld [vmem:[%s386_s2] ss:$0 sm:$0xff]  ;;  %s225_s0 = scalar_lea.vmem %s141_s30, 256  ;;  %p230_p1 = scmp.lt.s32.totalorder %s141_s30, %s141_s30 }
  0x17   :  { %173 = vmatpush3.msra.mxu0 %v24_v21  ;;  %216 = vmatpush3.msra.mxu1 %v24_v21  ;;  %p226_p0 = scmp.ne.s32.totalorder %s141_s30, %s225_s0  ;;  %p231_p2 = scmp.lt.s32.totalorder %s225_s0, %s225_s0 }
  0x18   :  { %174 = vmatprep.subr.mxu0 %v39_v22  ;;  %201 = vmatprep.subr.mxu1 %v39_v22 }
  0x19   :  { %175 = vmatpush3.msra.mxu0 %v23_v23  ;;  %217 = vmatpush3.msra.mxu1 %v23_v23  ;;  %p232_p3 = por %p231_p2, %p230_p1 }
  0x1a   :  { %176 = vmatprep.subr.mxu0 %v38_v24  ;;  %202 = vmatprep.subr.mxu1 %v38_v24 }
  0x1b   :  { %177 = vmatpush3.msra.mxu0 %v22_v25  ;;  %218 = vmatpush3.msra.mxu1 %v22_v25  ;;  %p233_p4 = pnand %p232_p3, %p226_p0 }
  0x1c   :  { %178 = vmatprep.subr.mxu0 %v37_v26  ;;  %203 = vmatprep.subr.mxu1 %v37_v26 }
  0x1d   :  { %179 = vmatpush3.msra.mxu0 %v21_v27  ;;  %219 = vmatpush3.msra.mxu1 %v21_v27 }
  0x1e   :  { %180 = vmatprep.subr.mxu0 %v36_v28  ;;  %204 = vmatprep.subr.mxu1 %v36_v28 }
  0x1f   :  { %181 = vmatpush3.msra.mxu0 %v20_v29  ;;  %220 = vmatpush3.msra.mxu1 %v20_v29 }
  0x20   :  { %182 = vmatprep.subr.mxu0 %v35_v30  ;;  %205 = vmatprep.subr.mxu1 %v35_v30 }
  0x21   :  { %183 = vmatpush3.msra.mxu0 %v19_v31  ;;  %221 = vmatpush3.msra.mxu1 %v19_v31 }
  0x22   :  { %122 = vmatprep.mubr.f32.mxu0 %v16_v32  ;;  %127 = vmatprep.mubr.f32.mxu1 %v18_v33 }
  0x23   :  { %123 = vmatmul.mubr.f32.vlgmr.msra.gmra.mxu0 %v15_v34  ;;  %128 = vmatmul.mubr.f32.vlgmr.msra.gmra.mxu1 %v17_v35 }
  0xe3   :  { %v184_v36 = vpop.f32.mrf.mxu0  ;;  %v187_v37 = vpop.f32.mrf.mxu1 }
  0xe5   :  { %v185_v39 = vpop.f32.mrf.mxu0  ;;  %v188_v40 = vpop.f32.mrf.mxu1 }
  0xe6   :  { %v186_v41 = vadd.f32 %v185_v39, %v184_v36  ;;  %v189_v42 = vadd.f32 %v188_v40, %v187_v37 }
  0xe8   :  { %v125_v43 = vadd.f32 %v186_v41, %v151_v38  ;;  %v130_v44 = vadd.f32 %v189_v42, %v151_v38 }
  0xea   :  { %133 = vst [vmem:[#allocation2] sm:$0xff] %v125_v43  ;;  %134 = vst [vmem:[#allocation2 + $0x8] sm:$0xff] %v130_v44 }
  0xeb   :  { %236 = shalt.err (!%p233_p4)
}
  0xec   :  { %s248_s6 = smov 128   ;;  %s249_s7 = smov 8  }
  0xed   :  { %146 = dma.vmem_to_hbm [thread:$0]  %s141_s30, 256, %s387_s3, [#allocation3], %s248_s6, %s248_s6, %s249_s7  }
  0xee   :  { %245 = dma.done.wait [#allocation3], 256  }
  0xef   :  { %246 = vsyncadd [#allocation3], 4294967040 }
  0xf0   :  { %150 = vsyncpa [#allocation3], 1 }

// kernel: lstm_model_forward.8
= control target key start
LH: loop header
LB: loop body
LE: loop exit
PB: predicated region body
PF: predicated region fallthrough
CT: control target
= control target key end

     0   :  { %s2443_s9 = smov 0   ;;  %s2445_s10 = smov 0   ;;  %s3535_s0 = inlined_call_operand.vmem [shape: f32[8,2,1024], index: 0, kind: input, shape index: {}]   ;;  %s3536_s1 = inlined_call_operand.vmem [shape: f32[2,128,512], index: 1, kind: input, shape index: {}]   ;;  %s3537_s2 = inlined_call_operand.vmem [shape: f32[8,2,256], index: 2, kind: output, shape index: {}]  }
   0x1   :  { %s2447_s11 = smov 0   ;;  %s2449_s12 = smov 0  }
   0x2   :  { %s2451_s13 = smov 0  }
   0x3 LB: > { %s24_s14 = sadd.s32 1, %s2420_s12  ;;  %s2150_s15 = sadd.s32 4294967295, %s2424_s13   ;;  %s2424_s13 = sphi %s2451_s13, %s12_s13   ;;  %s2420_s12 = sphi %s2449_s12, %s3758_s12   ;;  %s2416_s11 = sphi %s2447_s11, %s3757_s11   ;;  %s2412_s10 = sphi %s2445_s10, %s3756_s10   ;;  %s2408_s9 = sphi %s2443_s9, %s3755_s9  }
   0x4   : > { %p26_p0 = scmp.ge.s32.totalorder %s24_s14, 2  ;;  %p46_p1 = scmp.ne.s32.totalorder %s2412_s10, %s2408_s9 }
   0x5   : > { %p47_p2 = scmp.eq.s32.totalorder %s2424_s13, 0  ;;  %p110_p4 = scmp.eq.s32.totalorder %s2150_s15, 1 }
   0x6   : > { %s3760_s14 = smov (%p26_p0, %s24_s14), 0  ;;  %s39_s17 = sadd.s32 1, %s2412_s10 }
   0x7   : > { %p48_p3 = por %p47_p2, %p46_p1  ;;  %s35_s16 = ssub.s32 %s2420_s12, %s3760_s14 }
   0x8   : > { %p37_p5 = scmp.eq.s32.totalorder %s35_s16, 0  ;;  %p2478_p6 = por %p110_p4, %p46_p1 }
   0x9   : > { %p2153_p7 = scmp.ge.s32.totalorder %s2424_s13, 2 }
   0xa   : > { %s2483_s19 = scalar_select %p37_p5, %s2412_s10, %s39_s17  }
   0xb   : > { %132 = sbr.rel (%p2153_p7) target bundleno = 24 (0x18), region = 16 }
  0x10   : > { %135 = sbr.rel (!%p48_p3) target bundleno = 24 (0x18), region = 20  ;;  %s137_s20 = sand.u32 (%p48_p3), 1, %s2412_s10  }
  0x11   : > { %s2190_s21 = sshll.u32 (%p48_p3), %s2420_s12, 3  ;;  %s2154_s22 = sshll.u32 (%p48_p3), %s137_s20, 6 }
  0x12   : > { %s148_s25 = scalar_lea.vmem (%p48_p3), %s3535_s0, %s2190_s21  ;;  %s139_s26 = scalar_lea.vmem (%p48_p3), [#allocation4], %s2154_s22 }
  0x13   : > { %v191_v0 = vld [vmem:[%s148_s25] sm:$0xff] (%p48_p3)  ;;  %v193_v1 = vld [vmem:[%s148_s25 + $0x10] sm:$0xff] (%p48_p3) }
  0x14   : > { %v195_v2 = vld [vmem:[%s148_s25 + $0x20] sm:$0xff] (%p48_p3)  ;;  %192 = vst [vmem:[%s139_s26] sm:$0xff] (%p48_p3), %v191_v0  ;;  %194 = vst [vmem:[%s139_s26 + $0x8] sm:$0xff] (%p48_p3), %v193_v1  ;;  %v197_v3 = vld [vmem:[%s148_s25 + $0x30] sm:$0xff] (%p48_p3) }
  0x15   : > { %196 = vst [vmem:[%s139_s26 + $0x10] sm:$0xff] %v195_v2  ;;  %v199_v4 = vld [vmem:[%s148_s25 + $0x40] sm:$0xff]  ;;  %v201_v5 = vld [vmem:[%s148_s25 + $0x50] sm:$0xff]  ;;  %198 = vst [vmem:[%s139_s26 + $0x18] sm:$0xff] %v197_v3 }
  0x16   : > { %200 = vst [vmem:[%s139_s26 + $0x20] sm:$0xff] %v199_v4  ;;  %202 = vst [vmem:[%s139_s26 + $0x28] sm:$0xff] %v201_v5  ;;  %v203_v6 = vld [vmem:[%s148_s25 + $0x60] sm:$0xff]  ;;  %v205_v7 = vld [vmem:[%s148_s25 + $0x70] sm:$0xff] }
  0x17   : > { %204 = vst [vmem:[%s139_s26 + $0x30] sm:$0xff] %v203_v6  ;;  %206 = vst [vmem:[%s139_s26 + $0x38] sm:$0xff] %v205_v7 }
  0x18 PF: > { %p2157_p8 = scmp.ge.s32.totalorder %s2424_s13, 1  ;;  %p219_p9 = scmp.lt.s32.totalorder %s2424_s13, 3 }
  0x1a   : > { %p220_p10 = pnand %p2157_p8, %p219_p9 }
  0x1c   : > { %223 = sbr.rel (%p220_p10) target bundleno = 2101 (0x835), region = 62 }
  0x21   : > { %p256_p11 = scmp.lt.s32.totalorder %s2416_s11, 1  ;;  %v3538_v8 = vmov 0.0   ;;  %p335_p12 = scmp.eq.s32.totalorder %s2416_s11, 0 }
  0x22   : > { %406 = vmatprep.mubr.f32.mxu0 %v3538_v8  ;;  %269 = vst [vmem:[#allocation2] sm:$0x3] %v3538_v8  ;;  %270 = vst [vmem:[#allocation3] sm:$0x3] %v3538_v8  ;;  %477 = vmatprep.mubr.f32.mxu1 %v3538_v8  ;;  %s226_s4 = sand.u32 1, %s2408_s9  }
  0x23   : > { %s257_s27 = scalar_select %p256_p11, %s2416_s11, 1 }
  0x24   : > { %s2832_s5 = scalar_select %p335_p12, 0, 7 }
  0x25   : > { %s2191_s28 = sshll.u32 %s257_s27, 9  ;;  %s2158_s6 = sshll.u32 %s226_s4, 6 }
  0x26   : > { %s2502_s3 = scalar_lea.vmem %s3536_s1, %s2191_s28  ;;  %s2192_s7 = sshll.u32 %s2832_s5, 3 }
  0x27   : > { %v2505_v9 = vld [vmem:[%s2502_s3 + $0x1e8] sm:$0xff]  ;;  %v2508_v10 = vld [vmem:[%s2502_s3 + $0x1f8] sm:$0xff]  ;;  %v2511_v11 = vld [vmem:[%s2502_s3 + $0x1e0] sm:$0xff]  ;;  %s2839_s8 = scalar_lea.vmem [#allocation4], %s2158_s6  ;;  %s2159_s16 = sshll.u32 %s226_s4, 4 }
  0x28   : > { %3620 = vst [vmem:[#allocation6_spill] sm:$0xff] %v2505_v9  ;;  %3621 = vst [vmem:[#allocation7_spill] sm:$0xff] %v2508_v10  ;;  %342 = vmatprep.subr.mxu0 %v2505_v9  ;;  %413 = vmatprep.subr.mxu1 %v2508_v10  ;;  %v2516_v12 = vld [vmem:[%s2502_s3 + $0x1f0] sm:$0xff]  ;;  %v2519_v13 = vld [vmem:[%s2502_s3 + $0x1c8] sm:$0xff]  ;;  %s339_s15 = scalar_lea.vmem %s2839_s8, %s2192_s7 [#allocation4]  ;;  %s2164_s17 = sshll.u32 %s2832_s5, 1 }
  0x29   : > { %v2522_v14 = vld [vmem:[%s2502_s3 + $0x1d8] sm:$0xff]  ;;  %343 = vmatpush1.msra.mxu0 %v2511_v11  ;;  %414 = vmatpush1.msra.mxu1 %v2516_v12  ;;  %v2527_v15 = vld [vmem:[%s2502_s3 + $0x1c0] sm:$0xff]  ;;  %v2530_v16 = vld [vmem:[%s2502_s3 + $0x1d0] sm:$0xff]  ;;  %s2847_s20 = scalar_lea.vmem [#allocation5], %s2159_s16 }
  0x2a   : > { %v2533_v17 = vld [vmem:[%s2502_s3 + $0x1a8] sm:$0xff]  ;;  %344 = vmatprep.subr.mxu0 %v2519_v13  ;;  %415 = vmatprep.subr.mxu1 %v2522_v14  ;;  %v2538_v18 = vld [vmem:[%s2502_s3 + $0x1b8] sm:$0xff]  ;;  %v2541_v19 = vld [vmem:[%s2502_s3 + $0x1a0] sm:$0xff]  ;;  %s536_s21 = scalar_lea.vmem %s2847_s20, %s2164_s17 [#allocation5] }
  0x2b   : > { %v2544_v20 = vld [vmem:[%s2502_s3 + $0x1b0] sm:$0xff]  ;;  %345 = vmatpush1.msra.mxu0 %v2527_v15  ;;  %416 = vmatpush1.msra.mxu1 %v2530_v16  ;;  %v2549_v21 = vld [vmem:[%s2502_s3 + $0x188] sm:$0xff]  ;;  %v2552_v22 = vld [vmem:[%s2502_s3 + $0x198] sm:$0xff]  ;;  %s2918_s9 = scalar_select %p335_p12, 1, 6 }
  0x2c   : > { %346 = vmatprep.subr.mxu0 %v2533_v17  ;;  %417 = vmatprep.subr.mxu1 %v2538_v18  ;;  %v2557_v23 = vld [vmem:[%s2502_s3 + $0x180] sm:$0xff]  ;;  %v2560_v24 = vld [vmem:[%s2502_s3 + $0x190] sm:$0xff]  ;;  %v2565_v25 = vld [vmem:[%s2502_s3 + $0x168] sm:$0xff]  ;;  %s2994_s26 = scalar_select %p335_p12, 2, 5 }
  0x2d   : > { %347 = vmatpush1.msra.mxu0 %v2541_v19  ;;  %418 = vmatpush1.msra.mxu1 %v2544_v20  ;;  %v2568_v26 = vld [vmem:[%s2502_s3 + $0x178] sm:$0xff]  ;;  %v2573_v27 = vld [vmem:[%s2502_s3 + $0x160] sm:$0xff]  ;;  %v2576_v28 = vld [vmem:[%s2502_s3 + $0x170] sm:$0xff]  ;;  %s2193_s22 = sshll.u32 %s2918_s9, 3  ;;  %s2167_s24 = sshll.u32 %s2918_s9, 1 }
  0x2e   : > { %348 = vmatprep.subr.mxu0 %v2549_v21  ;;  %419 = vmatprep.subr.mxu1 %v2552_v22  ;;  %v2581_v29 = vld [vmem:[%s2502_s3 + $0x148] sm:$0xff]  ;;  %v2584_v30 = vld [vmem:[%s2502_s3 + $0x158] sm:$0xff]  ;;  %v2589_v31 = vld [vmem:[%s2502_s3 + $0x140] sm:$0xff]  ;;  %s541_s23 = scalar_lea.vmem %s2839_s8, %s2193_s22 [#allocation4]  ;;  %s738_s25 = scalar_lea.vmem %s2847_s20, %s2167_s24 [#allocation5] }
  0x2f   : > { %349 = vmatpush1.msra.mxu0 %v2557_v23  ;;  %420 = vmatpush1.msra.mxu1 %v2560_v24  ;;  %v2592_v32 = vld [vmem:[%s2502_s3 + $0x150] sm:$0xff]  ;;  %v2597_v33 = vld [vmem:[%s2502_s3 + $0x128] sm:$0xff]  ;;  %v2600_v34 = vld [vmem:[%s2502_s3 + $0x138] sm:$0xff]  ;;  %s2194_s27 = sshll.u32 %s2994_s26, 3  ;;  %s2170_s29 = sshll.u32 %s2994_s26, 1 }
  0x30   : > { %350 = vmatprep.subr.mxu0 %v2565_v25  ;;  %421 = vmatprep.subr.mxu1 %v2568_v26  ;;  %v2605_v35 = vld [vmem:[%s2502_s3 + $0x120] sm:$0xff]  ;;  %v2608_v36 = vld [vmem:[%s2502_s3 + $0x130] sm:$0xff]  ;;  %v2613_v37 = vld [vmem:[%s2502_s3 + $0x108] sm:$0xff]  ;;  %s743_s28 = scalar_lea.vmem %s2839_s8, %s2194_s27 [#allocation4]  ;;  %s940_s30 = scalar_lea.vmem %s2847_s20, %s2170_s29 [#allocation5] }
  0x31   : > { %351 = vmatpush1.msra.mxu0 %v2573_v27  ;;  %422 = vmatpush1.msra.mxu1 %v2576_v28  ;;  %v2616_v38 = vld [vmem:[%s2502_s3 + $0x118] sm:$0xff]  ;;  %v2621_v39 = vld [vmem:[%s2502_s3 + $0x100] sm:$0xff]  ;;  %v2624_v40 = vld [vmem:[%s2502_s3 + $0x110] sm:$0xff]  ;;  %s3076_s4 = scalar_select %p335_p12, 3, 4 }
  0x32   : > { %352 = vmatprep.subr.mxu0 %v2581_v29  ;;  %423 = vmatprep.subr.mxu1 %v2584_v30  ;;  %v2629_v41 = vld [vmem:[%s2502_s3 + $0xe8] sm:$0xff]  ;;  %v2632_v42 = vld [vmem:[%s2502_s3 + $0xf8] sm:$0xff]  ;;  %v2637_v43 = vld [vmem:[%s2502_s3 + $0xe0] sm:$0xff]  ;;  %s3338_s16 = scalar_select %p335_p12, 4, 3 }
  0x33   : > { %353 = vmatpush1.msra.mxu0 %v2589_v31  ;;  %424 = vmatpush1.msra.mxu1 %v2592_v32  ;;  %v2640_v44 = vld [vmem:[%s2502_s3 + $0xf0] sm:$0xff]  ;;  %v2645_v45 = vld [vmem:[%s2502_s3 + $0xc8] sm:$0xff]  ;;  %v2648_v46 = vld [vmem:[%s2502_s3 + $0xd8] sm:$0xff]  ;;  %s2195_s5 = sshll.u32 %s3076_s4, 3  ;;  %s2173_s7 = sshll.u32 %s3076_s4, 1 }
  0x34   : > { %354 = vmatprep.subr.mxu0 %v2597_v33  ;;  %425 = vmatprep.subr.mxu1 %v2600_v34  ;;  %v2653_v47 = vld [vmem:[%s2502_s3 + $0xc0] sm:$0xff]  ;;  %v2656_v48 = vld [vmem:[%s2502_s3 + $0xd0] sm:$0xff]  ;;  %v2661_v49 = vld [vmem:[%s2502_s3 + $0xa8] sm:$0xff]  ;;  %s945_s6 = scalar_lea.vmem %s2839_s8, %s2195_s5 [#allocation4]  ;;  %s2196_s17 = sshll.u32 %s3338_s16, 3 }
  0x35   : > { %355 = vmatpush1.msra.mxu0 %v2605_v35  ;;  %426 = vmatpush1.msra.mxu1 %v2608_v36  ;;  %v2664_v50 = vld [vmem:[%s2502_s3 + $0xb8] sm:$0xff]  ;;  %v2669_v51 = vld [vmem:[%s2502_s3 + $0xa0] sm:$0xff]  ;;  %v2672_v52 = vld [vmem:[%s2502_s3 + $0xb0] sm:$0xff]  ;;  %s3414_s22 = scalar_select %p335_p12, 5, 2 }
  0x36   : > { %356 = vmatprep.subr.mxu0 %v2613_v37  ;;  %427 = vmatprep.subr.mxu1 %v2616_v38  ;;  %v2677_v53 = vld [vmem:[%s2502_s3 + $0x88] sm:$0xff]  ;;  %v2680_v54 = vld [vmem:[%s2502_s3 + $0x98] sm:$0xff]  ;;  %v2685_v55 = vld [vmem:[%s2502_s3 + $0x80] sm:$0xff]  ;;  %s3488_s27 = scalar_select %p335_p12, 6, 1 }
  0x37   : > { %357 = vmatpush1.msra.mxu0 %v2621_v39  ;;  %428 = vmatpush1.msra.mxu1 %v2624_v40  ;;  %v2688_v56 = vld [vmem:[%s2502_s3 + $0x90] sm:$0xff]  ;;  %v2693_v57 = vld [vmem:[%s2502_s3 + $0x68] sm:$0xff]  ;;  %v2696_v58 = vld [vmem:[%s2502_s3 + $0x78] sm:$0xff]  ;;  %s3498_s5 = scalar_select %p335_p12, 7, 0 }
  0x38   : > { %358 = vmatprep.subr.mxu0 %v2629_v41  ;;  %429 = vmatprep.subr.mxu1 %v2632_v42  ;;  %3622 = vst [vmem:[#allocation8_spill] sm:$0xff] %v2688_v56  ;;  %3623 = vst [vmem:[#allocation9_spill] sm:$0xff] %v2693_v57  ;;  %v2701_v59 = vld [vmem:[%s2502_s3 + $0x60] sm:$0xff]  ;;  %v2704_v60 = vld [vmem:[%s2502_s3 + $0x70] sm:$0xff] }
  0x39   : > { %359 = vmatpush1.msra.mxu0 %v2637_v43  ;;  %430 = vmatpush1.msra.mxu1 %v2640_v44  ;;  %3624 = vst [vmem:[#allocation10_spill] sm:$0xff] %v2696_v58  ;;  %3625 = vst [vmem:[#allocation11_spill] sm:$0xff] %v2701_v59  ;;  %v2709_v61 = vld [vmem:[%s2502_s3 + $0x48] sm:$0xff]  ;;  %v2712_v62 = vld [vmem:[%s2502_s3 + $0x58] sm:$0xff] }
  0x3a   : > { %360 = vmatprep.subr.mxu0 %v2645_v45  ;;  %431 = vmatprep.subr.mxu1 %v2648_v46  ;;  %3626 = vst [vmem:[#allocation12_spill] sm:$0xff] %v2704_v60  ;;  %3627 = vst [vmem:[#allocation13_spill] sm:$0xff] %v2709_v61  ;;  %v2717_v63 = vld [vmem:[%s2502_s3 + $0x40] sm:$0xff]  ;;  %v2720_v0 = vld [vmem:[%s2502_s3 + $0x50] sm:$0xff] }
  0x3b   : > { %361 = vmatpush1.msra.mxu0 %v2653_v47  ;;  %432 = vmatpush1.msra.mxu1 %v2656_v48  ;;  %3628 = vst [vmem:[#allocation14_spill] sm:$0xff] %v2712_v62  ;;  %3629 = vst [vmem:[#allocation15_spill] sm:$0xff] %v2717_v63  ;;  %v2725_v1 = vld [vmem:[%s2502_s3 + $0x28] sm:$0xff]  ;;  %v2728_v2 = vld [vmem:[%s2502_s3 + $0x38] sm:$0xff] }
  0x3c   : > { %362 = vmatprep.subr.mxu0 %v2661_v49  ;;  %433 = vmatprep.subr.mxu1 %v2664_v50  ;;  %3630 = vst [vmem:[#allocation16_spill] sm:$0xff] %v2720_v0  ;;  %3631 = vst [vmem:[#allocation17_spill] sm:$0xff] %v2725_v1  ;;  %v2733_v3 = vld [vmem:[%s2502_s3 + $0x20] sm:$0xff]  ;;  %v2736_v4 = vld [vmem:[%s2502_s3 + $0x30] sm:$0xff] }
  0x3d   : > { %363 = vmatpush1.msra.mxu0 %v2669_v51  ;;  %434 = vmatpush1.msra.mxu1 %v2672_v52  ;;  %3632 = vst [vmem:[#allocation18_spill] sm:$0xff] %v2728_v2  ;;  %3633 = vst [vmem:[#allocation19_spill] sm:$0xff] %v2733_v3  ;;  %v2741_v5 = vld [vmem:[%s2502_s3 + $0x8] sm:$0xff]  ;;  %v2744_v6 = vld [vmem:[%s2502_s3 + $0x18] sm:$0xff] }
  0x3e   : > { %364 = vmatprep.subr.mxu0 %v2677_v53  ;;  %435 = vmatprep.subr.mxu1 %v2680_v54  ;;  %3634 = vst [vmem:[#allocation20_spill] sm:$0xff] %v2736_v4  ;;  %3635 = vst [vmem:[#allocation21_spill] sm:$0xff] %v2741_v5  ;;  %v2749_v7 = vld [vmem:[%s2502_s3] sm:$0xff]  ;;  %v2752_v8 = vld [vmem:[%s2502_s3 + $0x10] sm:$0xff] }
  0x3f   : > { %365 = vmatpush1.msra.mxu0 %v2685_v55  ;;  %436 = vmatpush1.msra.mxu1 %v2688_v56  ;;  %3636 = vst [vmem:[#allocation22_spill] sm:$0xff] %v2744_v6  ;;  %3637 = vst [vmem:[#allocation23_spill] sm:$0xff] %v2749_v7 }
  0x40   : > { %366 = vmatprep.subr.mxu0 %v2693_v57  ;;  %437 = vmatprep.subr.mxu1 %v2696_v58  ;;  %3638 = vst [vmem:[#allocation24_spill] sm:$0xff] %v2752_v8 }
  0x41   : > { %367 = vmatpush1.msra.mxu0 %v2701_v59  ;;  %438 = vmatpush1.msra.mxu1 %v2704_v60 }
  0x42   : > { %368 = vmatprep.subr.mxu0 %v2709_v61  ;;  %439 = vmatprep.subr.mxu1 %v2712_v62  ;;  %v341_v62 = vld [vmem:[#allocation2] sm:$0x3] }
  0x43   : > { %369 = vmatpush1.msra.mxu0 %v2717_v63  ;;  %440 = vmatpush1.msra.mxu1 %v2720_v0 }
  0x44   : > { %370 = vmatprep.subr.mxu0 %v2725_v1  ;;  %441 = vmatprep.subr.mxu1 %v2728_v2 }
  0x45   : > { %371 = vmatpush1.msra.mxu0 %v2733_v3  ;;  %442 = vmatpush1.msra.mxu1 %v2736_v4 }
  0x46   : > { %372 = vmatprep.subr.mxu0 %v2741_v5  ;;  %443 = vmatprep.subr.mxu1 %v2744_v6 }
  0x47   : > { %373 = vmatpush1.msra.mxu0 %v2749_v7  ;;  %444 = vmatpush1.msra.mxu1 %v2752_v8 }
  0x48   : > { %407 = vmatmul.mubr.f32.vlgmr.msra.gmra.mxu0 %v341_v62  ;;  %478 = vmatmul.mubr.f32.vlgmr.msra.gmra.mxu1 %v341_v62  ;;  %v3639_v62 = vld [vmem:[#allocation14_spill] sm:$0xff] }
  0x49   : > { %544 = vmatprep.subr.mxu0 %v2505_v9  ;;  %615 = vmatprep.subr.mxu1 %v2508_v10 }
  0x4a   : > { %545 = vmatpush1.msra.mxu0 %v2511_v11  ;;  %616 = vmatpush1.msra.mxu1 %v2516_v12 }
  0x4b   : > { %546 = vmatprep.subr.mxu0 %v2519_v13  ;;  %617 = vmatprep.subr.mxu1 %v2522_v14 }
  0x4c   : > { %547 = vmatpush1.msra.mxu0 %v2527_v15  ;;  %618 = vmatpush1.msra.mxu1 %v2530_v16 }
  0x4d   : > { %548 = vmatprep.subr.mxu0 %v2533_v17  ;;  %619 = vmatprep.subr.mxu1 %v2538_v18 }
  0x4e   : > { %549 = vmatpush1.msra.mxu0 %v2541_v19  ;;  %620 = vmatpush1.msra.mxu1 %v2544_v20 }
  0x4f   : > { %550 = vmatprep.subr.mxu0 %v2549_v21  ;;  %621 = vmatprep.subr.mxu1 %v2552_v22 }
  0x50   : > { %551 = vmatpush1.msra.mxu0 %v2557_v23  ;;  %622 = vmatpush1.msra.mxu1 %v2560_v24 }
  0x51   : > { %552 = vmatprep.subr.mxu0 %v2565_v25  ;;  %623 = vmatprep.subr.mxu1 %v2568_v26 }
  0x52   : > { %553 = vmatpush1.msra.mxu0 %v2573_v27  ;;  %624 = vmatpush1.msra.mxu1 %v2576_v28 }
  0x53   : > { %554 = vmatprep.subr.mxu0 %v2581_v29  ;;  %625 = vmatprep.subr.mxu1 %v2584_v30 }
  0x54   : > { %555 = vmatpush1.msra.mxu0 %v2589_v31  ;;  %626 = vmatpush1.msra.mxu1 %v2592_v32 }
  0x55   : > { %556 = vmatprep.subr.mxu0 %v2597_v33  ;;  %627 = vmatprep.subr.mxu1 %v2600_v34 }
  0x56   : > { %557 = vmatpush1.msra.mxu0 %v2605_v35  ;;  %628 = vmatpush1.msra.mxu1 %v2608_v36 }
  0x57   : > { %558 = vmatprep.subr.mxu0 %v2613_v37  ;;  %629 = vmatprep.subr.mxu1 %v2616_v38 }
  0x58   : > { %559 = vmatpush1.msra.mxu0 %v2621_v39  ;;  %630 = vmatpush1.msra.mxu1 %v2624_v40 }
  0x59   : > { %560 = vmatprep.subr.mxu0 %v2629_v41  ;;  %631 = vmatprep.subr.mxu1 %v2632_v42 }
  0x5a   : > { %561 = vmatpush1.msra.mxu0 %v2637_v43  ;;  %632 = vmatpush1.msra.mxu1 %v2640_v44 }
  0x5b   : > { %562 = vmatprep.subr.mxu0 %v2645_v45  ;;  %633 = vmatprep.subr.mxu1 %v2648_v46 }
  0x5c   : > { %563 = vmatpush1.msra.mxu0 %v2653_v47  ;;  %634 = vmatpush1.msra.mxu1 %v2656_v48 }
  0x5d   : > { %564 = vmatprep.subr.mxu0 %v2661_v49  ;;  %635 = vmatprep.subr.mxu1 %v2664_v50 }
  0x5e   : > { %565 = vmatpush1.msra.mxu0 %v2669_v51  ;;  %636 = vmatpush1.msra.mxu1 %v2672_v52 }
  0x5f   : > { %566 = vmatprep.subr.mxu0 %v2677_v53  ;;  %637 = vmatprep.subr.mxu1 %v2680_v54 }
  0x60   : > { %567 = vmatpush1.msra.mxu0 %v2685_v55  ;;  %638 = vmatpush1.msra.mxu1 %v2688_v56 }
  0x61   : > { %568 = vmatprep.subr.mxu0 %v2693_v57  ;;  %639 = vmatprep.subr.mxu1 %v2696_v58 }
  0x62   : > { %569 = vmatpush1.msra.mxu0 %v2701_v59  ;;  %640 = vmatpush1.msra.mxu1 %v2704_v60 }
  0x63   : > { %570 = vmatprep.subr.mxu0 %v2709_v61  ;;  %641 = vmatprep.subr.mxu1 %v3639_v62 }
  0x64   : > { %571 = vmatpush1.msra.mxu0 %v2717_v63  ;;  %642 = vmatpush1.msra.mxu1 %v2720_v0  ;;  %v3640_v63 = vmov 0.0  }
  0x65   : > { %572 = vmatprep.subr.mxu0 %v2725_v1  ;;  %643 = vmatprep.subr.mxu1 %v2728_v2  ;;  %v493_v2 = vlaneseq }
  0x66   : > { %573 = vmatpush1.msra.mxu0 %v2733_v3  ;;  %644 = vmatpush1.msra.mxu1 %v2736_v4  ;;  %v2427_v3 = vmov 1983009808  }
  0x67   : > { %574 = vmatprep.subr.mxu0 %v2741_v5  ;;  %645 = vmatprep.subr.mxu1 %v2744_v6  ;;  %v491_v4 = vunpack.c.l.s4 %v2427_v3  ;;  %v494_v6 = vshrl.u32 %v493_v2, 7  ;;  %v340_v2 = vld [vmem:[%s339_s15] sm:$0xff]  ;;  %s1142_s15 = scalar_lea.vmem %s2847_s20, %s2173_s7 [#allocation5] }
  0x68   : > { %575 = vmatpush1.msra.mxu0 %v2749_v7  ;;  %608 = vmatprep.mubr.f32.mxu0 %v3640_v63 }
  0x69   : > { %646 = vmatpush1.msra.mxu1 %v2752_v8  ;;  %679 = vmatprep.mubr.f32.mxu1 %v3640_v63  ;;  %v492_v7 = vunpack.c.0.s8 %v491_v4 }
  0x6a   : > { %746 = vmatprep.subr.mxu0 %v2505_v9  ;;  %817 = vmatprep.subr.mxu1 %v2508_v10 }
  0x6b   : > { %v2837_v63 = vsub.s32 %v492_v7, %v494_v6 }
 0x108   : > { %v408_v8 = vpop.f32.mrf.mxu0  ;;  %v479_v5 = vpop.f32.mrf.mxu1 }
 0x10a   : > { %v410_v9 = vpop.f32.mrf.mxu0  ;;  %v481_v10 = vpop.f32.mrf.mxu1 }
 0x10b   : > { %v488_v1 = vcombine.low %v408_v8, %v410_v9  ;;  %v489_v3 = vcombine.low %v479_v5, %v481_v10 }
 0x10d   : > { %v496_v0 = vrot.slane %v488_v1, %v2837_v63  ;;  %v503_v4 = vrot.slane %v489_v3, %v2837_v63  ;;  %v527_v3 = vld [vmem:[#allocation3] sm:$0x3] }
 0x10f   : > { %v504_v62 = vcombine.low %v496_v0, %v503_v4 }
 0x111   : > { %v506_v61 = vadd.f32 %v504_v62, %v340_v2 }
 0x113   : > { %v507_v60 = vmul.f32 0.5, %v506_v61  ;;  %v512_v59 = vrot.slane %v506_v61, 2  ;;  %v518_v7 = vrot.slane %v506_v61, 4  ;;  %v521_v8 = vrot.slane %v506_v61, 6 }
 0x115   : > { %2242 = vtanh.f32 %v507_v60  ;;  %v514_v6 = vmul.f32 0.5, %v512_v59  ;;  %v523_v9 = vmul.f32 0.5, %v521_v8  ;;  %v3641_v8 = vld [vmem:[#allocation9_spill] sm:$0xff] }
 0x117   : > { %2244 = vtanh.f32 %v514_v6 }
 0x118   : > { %2246 = vtanh.f32 %v518_v7 }
 0x119   : > { %2248 = vtanh.f32 %v523_v9  ;;  %v3642_v9 = vld [vmem:[#allocation10_spill] sm:$0xff] }
 0x122   : > { %v2243_v58 = vpop.eup %2242 }
 0x123   : > { %v509_v57 = vadd.f32 1.0, %v2243_v58 }
 0x124   : > { %v2245_v10 = vpop.eup %2244 }
 0x125   : > { %v510_v1 = vmul.f32 0.5, %v509_v57  ;;  %v516_v5 = vadd.f32 1.0, %v2245_v10  ;;  %v2247_v62 = vpop.eup %2246  ;;  %v3643_v10 = vld [vmem:[#allocation11_spill] sm:$0xff] }
 0x126   : > { %v2249_v59 = vpop.eup %2248 }
 0x127   : > { %v517_v0 = vmul.f32 0.5, %v516_v5  ;;  %v529_v2 = vmul.f32 %v2247_v62, %v510_v1  ;;  %v525_v61 = vadd.f32 1.0, %v2249_v59  ;;  %v3644_v1 = vld [vmem:[#allocation12_spill] sm:$0xff]  ;;  %v3645_v5 = vld [vmem:[#allocation13_spill] sm:$0xff] }
 0x128   : > { %v3648_v62 = vld [vmem:[#allocation16_spill] sm:$0xff] }
 0x129   : > { %v528_v4 = vmul.f32 %v527_v3, %v517_v0  ;;  %v526_v6 = vmul.f32 0.5, %v525_v61  ;;  %v3646_v3 = vld [vmem:[#allocation14_spill] sm:$0xff]  ;;  %v3647_v0 = vld [vmem:[#allocation15_spill] sm:$0xff]  ;;  %v3652_v59 = vld [vmem:[#allocation20_spill] sm:$0xff] }
 0x12a   : > { %v3653_v61 = vld [vmem:[#allocation21_spill] sm:$0xff] }
 0x12b   : > { %v530_v60 = vadd.f32 %v529_v2, %v528_v4  ;;  %v3649_v4 = vld [vmem:[#allocation17_spill] sm:$0xff]  ;;  %v3650_v2 = vld [vmem:[#allocation18_spill] sm:$0xff] }
 0x12d   : > { %2250 = vtanh.f32 %v530_v60  ;;  %533 = vst [vmem:[#allocation3] sm:$0x3] %v530_v60  ;;  %v3651_v60 = vld [vmem:[#allocation19_spill] sm:$0xff] }
 0x13a   : > { %v2251_v58 = vpop.eup %2250 }
 0x13b   : > { %v532_v57 = vmul.f32 %v2251_v58, %v526_v6  ;;  %v3654_v6 = vld [vmem:[#allocation22_spill] sm:$0xff]  ;;  %v3655_v58 = vld [vmem:[#allocation23_spill] sm:$0xff] }
 0x13d   : > { %534 = vst [vmem:[#allocation2] sm:$0x3] %v532_v57  ;;  %537 = vst [vmem:[%s536_s21] sm:$0x3] %v532_v57  ;;  %v3656_v57 = vmov 0.0   ;;  %s2176_s21 = sshll.u32 %s3338_s16, 1  ;;  %s2187_s16 = sshll.u32 (%p2478_p6), %s2416_s11, 1 }
 0x13e   : > { %s1344_s9 = scalar_lea.vmem %s2847_s20, %s2176_s21 [#allocation5]  ;;  %s1966_s21 = scalar_lea.vmem (%p2478_p6), %s3537_s2, %s2187_s16 }
 0x144   : > { %v543_v7 = vld [vmem:[#allocation2] sm:$0x3] }
 0x145   : > { %609 = vmatmul.mubr.f32.vlgmr.msra.gmra.mxu0 %v543_v7  ;;  %680 = vmatmul.mubr.f32.vlgmr.msra.gmra.mxu1 %v543_v7  ;;  %v3657_v7 = vld [vmem:[#allocation24_spill] sm:$0xff] }
 0x146   : > { %747 = vmatpush1.msra.mxu0 %v2511_v11  ;;  %818 = vmatpush1.msra.mxu1 %v2516_v12 }
 0x147   : > { %748 = vmatprep.subr.mxu0 %v2519_v13  ;;  %819 = vmatprep.subr.mxu1 %v2522_v14 }
 0x148   : > { %749 = vmatpush1.msra.mxu0 %v2527_v15  ;;  %820 = vmatpush1.msra.mxu1 %v2530_v16 }
 0x149   : > { %750 = vmatprep.subr.mxu0 %v2533_v17  ;;  %821 = vmatprep.subr.mxu1 %v2538_v18 }
 0x14a   : > { %751 = vmatpush1.msra.mxu0 %v2541_v19  ;;  %822 = vmatpush1.msra.mxu1 %v2544_v20 }
 0x14b   : > { %752 = vmatprep.subr.mxu0 %v2549_v21  ;;  %823 = vmatprep.subr.mxu1 %v2552_v22 }
 0x14c   : > { %753 = vmatpush1.msra.mxu0 %v2557_v23  ;;  %824 = vmatpush1.msra.mxu1 %v2560_v24 }
 0x14d   : > { %754 = vmatprep.subr.mxu0 %v2565_v25  ;;  %825 = vmatprep.subr.mxu1 %v2568_v26 }
 0x14e   : > { %755 = vmatpush1.msra.mxu0 %v2573_v27  ;;  %826 = vmatpush1.msra.mxu1 %v2576_v28 }
 0x14f   : > { %756 = vmatprep.subr.mxu0 %v2581_v29  ;;  %827 = vmatprep.subr.mxu1 %v2584_v30 }
 0x150   : > { %757 = vmatpush1.msra.mxu0 %v2589_v31  ;;  %828 = vmatpush1.msra.mxu1 %v2592_v32 }
 0x151   : > { %758 = vmatprep.subr.mxu0 %v2597_v33  ;;  %829 = vmatprep.subr.mxu1 %v2600_v34 }
 0x152   : > { %759 = vmatpush1.msra.mxu0 %v2605_v35  ;;  %830 = vmatpush1.msra.mxu1 %v2608_v36 }
 0x153   : > { %760 = vmatprep.subr.mxu0 %v2613_v37  ;;  %831 = vmatprep.subr.mxu1 %v2616_v38 }
 0x154   : > { %761 = vmatpush1.msra.mxu0 %v2621_v39  ;;  %832 = vmatpush1.msra.mxu1 %v2624_v40 }
 0x155   : > { %762 = vmatprep.subr.mxu0 %v2629_v41  ;;  %833 = vmatprep.subr.mxu1 %v2632_v42 }
 0x156   : > { %763 = vmatpush1.msra.mxu0 %v2637_v43  ;;  %834 = vmatpush1.msra.mxu1 %v2640_v44 }
 0x157   : > { %764 = vmatprep.subr.mxu0 %v2645_v45  ;;  %835 = vmatprep.subr.mxu1 %v2648_v46 }
 0x158   : > { %765 = vmatpush1.msra.mxu0 %v2653_v47  ;;  %836 = vmatpush1.msra.mxu1 %v2656_v48 }
 0x159   : > { %766 = vmatprep.subr.mxu0 %v2661_v49  ;;  %837 = vmatprep.subr.mxu1 %v2664_v50 }
 0x15a   : > { %767 = vmatpush1.msra.mxu0 %v2669_v51  ;;  %838 = vmatpush1.msra.mxu1 %v2672_v52 }
 0x15b   : > { %768 = vmatprep.subr.mxu0 %v2677_v53  ;;  %839 = vmatprep.subr.mxu1 %v2680_v54 }
 0x15c   : > { %769 = vmatpush1.msra.mxu0 %v2685_v55  ;;  %840 = vmatpush1.msra.mxu1 %v2688_v56 }
 0x15d   : > { %770 = vmatprep.subr.mxu0 %v3641_v8  ;;  %841 = vmatprep.subr.mxu1 %v3642_v9 }
 0x15e   : > { %771 = vmatpush1.msra.mxu0 %v3643_v10  ;;  %842 = vmatpush1.msra.mxu1 %v3644_v1 }
 0x15f   : > { %772 = vmatprep.subr.mxu0 %v3645_v5  ;;  %843 = vmatprep.subr.mxu1 %v3646_v3 }
 0x160   : > { %773 = vmatpush1.msra.mxu0 %v3647_v0  ;;  %844 = vmatpush1.msra.mxu1 %v3648_v62  ;;  %v542_v0 = vld [vmem:[%s541_s23] sm:$0xff]  ;;  %s2197_s23 = sshll.u32 %s3414_s22, 3 }
 0x161   : > { %774 = vmatprep.subr.mxu0 %v3649_v4  ;;  %845 = vmatprep.subr.mxu1 %v3650_v2  ;;  %v3658_v4 = vld [vmem:[#allocation6_spill] sm:$0xff]  ;;  %v3659_v2 = vld [vmem:[#allocation7_spill] sm:$0xff]  ;;  %s1349_s24 = scalar_lea.vmem %s2839_s8, %s2197_s23 [#allocation4] }
 0x162   : > { %775 = vmatpush1.msra.mxu0 %v3651_v60  ;;  %846 = vmatpush1.msra.mxu1 %v3652_v59 }
 0x163   : > { %776 = vmatprep.subr.mxu0 %v3653_v61  ;;  %847 = vmatprep.subr.mxu1 %v3654_v6 }
 0x164   : > { %777 = vmatpush1.msra.mxu0 %v3655_v58  ;;  %810 = vmatprep.mubr.f32.mxu0 %v3656_v57 }
 0x165   : > { %848 = vmatpush1.msra.mxu1 %v3657_v7  ;;  %881 = vmatprep.mubr.f32.mxu1 %v3656_v57 }
 0x166   : > { %948 = vmatprep.subr.mxu0 %v3658_v4  ;;  %1019 = vmatprep.subr.mxu1 %v3659_v2 }
 0x205   : > { %v610_v59 = vpop.f32.mrf.mxu0  ;;  %v681_v61 = vpop.f32.mrf.mxu1 }
 0x207   : > { %v612_v6 = vpop.f32.mrf.mxu0  ;;  %v683_v60 = vpop.f32.mrf.mxu1 }
 0x208   : > { %v690_v58 = vcombine.low %v610_v59, %v612_v6  ;;  %v691_v62 = vcombine.low %v681_v61, %v683_v60 }
 0x20a   : > { %v698_v7 = vrot.slane %v690_v58, %v2837_v63  ;;  %v705_v57 = vrot.slane %v691_v62, %v2837_v63 }
 0x20c   : > { %v706_v4 = vcombine.low %v698_v7, %v705_v57  ;;  %v3661_v7 = vld [vmem:[#allocation9_spill] sm:$0xff] }
 0x20e   : > { %v708_v3 = vadd.f32 %v706_v4, %v542_v0  ;;  %v729_v0 = vld [vmem:[#allocation3] sm:$0x3] }
 0x210   : > { %v709_v2 = vmul.f32 0.5, %v708_v3  ;;  %v714_v5 = vrot.slane %v708_v3, 2  ;;  %v720_v10 = vrot.slane %v708_v3, 4  ;;  %v723_v9 = vrot.slane %v708_v3, 6 }
 0x212   : > { %2252 = vtanh.f32 %v709_v2  ;;  %v716_v1 = vmul.f32 0.5, %v714_v5  ;;  %v725_v8 = vmul.f32 0.5, %v723_v9 }
 0x214   : > { %2254 = vtanh.f32 %v716_v1 }
 0x215   : > { %2256 = vtanh.f32 %v720_v10 }
 0x216   : > { %2258 = vtanh.f32 %v725_v8  ;;  %v3660_v8 = vld [vmem:[#allocation8_spill] sm:$0xff] }
 0x21f   : > { %v2253_v56 = vpop.eup %2252 }
 0x220   : > { %v711_v59 = vadd.f32 1.0, %v2253_v56 }
 0x221   : > { %v2255_v60 = vpop.eup %2254 }
 0x222   : > { %v712_v61 = vmul.f32 0.5, %v711_v59  ;;  %v718_v6 = vadd.f32 1.0, %v2255_v60  ;;  %v2257_v58 = vpop.eup %2256  ;;  %v3662_v59 = vld [vmem:[#allocation10_spill] sm:$0xff]  ;;  %v3663_v60 = vld [vmem:[#allocation11_spill] sm:$0xff] }
 0x223   : > { %v2259_v1 = vpop.eup %2258 }
 0x224   : > { %v719_v62 = vmul.f32 0.5, %v718_v6  ;;  %v731_v57 = vmul.f32 %v2257_v58, %v712_v61  ;;  %v727_v10 = vadd.f32 1.0, %v2259_v1  ;;  %v3664_v61 = vld [vmem:[#allocation12_spill] sm:$0xff]  ;;  %v3665_v6 = vld [vmem:[#allocation13_spill] sm:$0xff]  ;;  %v3667_v58 = vld [vmem:[#allocation15_spill] sm:$0xff] }
 0x225   : > { %v3672_v1 = vld [vmem:[#allocation20_spill] sm:$0xff] }
 0x226   : > { %v730_v4 = vmul.f32 %v729_v0, %v719_v62  ;;  %v728_v9 = vmul.f32 0.5, %v727_v10  ;;  %v3666_v62 = vld [vmem:[#allocation14_spill] sm:$0xff]  ;;  %v3668_v0 = vld [vmem:[#allocation16_spill] sm:$0xff]  ;;  %v3673_v10 = vld [vmem:[#allocation21_spill] sm:$0xff] }
 0x228   : > { %v732_v2 = vadd.f32 %v731_v57, %v730_v4  ;;  %v3669_v4 = vld [vmem:[#allocation17_spill] sm:$0xff]  ;;  %v3670_v57 = vld [vmem:[#allocation18_spill] sm:$0xff] }
 0x22a   : > { %2260 = vtanh.f32 %v732_v2  ;;  %735 = vst [vmem:[#allocation3] sm:$0x3] %v732_v2  ;;  %v3671_v2 = vld [vmem:[#allocation19_spill] sm:$0xff] }
 0x237   : > { %v2261_v5 = vpop.eup %2260 }
 0x238   : > { %v734_v56 = vmul.f32 %v2261_v5, %v728_v9  ;;  %v3674_v9 = vld [vmem:[#allocation22_spill] sm:$0xff]  ;;  %v3675_v5 = vld [vmem:[#allocation23_spill] sm:$0xff] }
 0x23a   : > { %736 = vst [vmem:[#allocation2] sm:$0x3] %v734_v56  ;;  %739 = vst [vmem:[%s738_s25] sm:$0x3] %v734_v56  ;;  %v3676_v56 = vmov 0.0   ;;  %s2179_s25 = sshll.u32 %s3414_s22, 1 }
 0x23b   : > { %s1546_s26 = scalar_lea.vmem %s2847_s20, %s2179_s25 [#allocation5] }
 0x241   : > { %v745_v3 = vld [vmem:[#allocation2] sm:$0x3] }
 0x242   : > { %811 = vmatmul.mubr.f32.vlgmr.msra.gmra.mxu0 %v745_v3  ;;  %882 = vmatmul.mubr.f32.vlgmr.msra.gmra.mxu1 %v745_v3  ;;  %v3677_v3 = vld [vmem:[#allocation24_spill] sm:$0xff] }
 0x243   : > { %949 = vmatpush1.msra.mxu0 %v2511_v11  ;;  %1020 = vmatpush1.msra.mxu1 %v2516_v12 }
 0x244   : > { %950 = vmatprep.subr.mxu0 %v2519_v13  ;;  %1021 = vmatprep.subr.mxu1 %v2522_v14 }
 0x245   : > { %951 = vmatpush1.msra.mxu0 %v2527_v15  ;;  %1022 = vmatpush1.msra.mxu1 %v2530_v16 }
 0x246   : > { %952 = vmatprep.subr.mxu0 %v2533_v17  ;;  %1023 = vmatprep.subr.mxu1 %v2538_v18 }
 0x247   : > { %953 = vmatpush1.msra.mxu0 %v2541_v19  ;;  %1024 = vmatpush1.msra.mxu1 %v2544_v20 }
 0x248   : > { %954 = vmatprep.subr.mxu0 %v2549_v21  ;;  %1025 = vmatprep.subr.mxu1 %v2552_v22 }
 0x249   : > { %955 = vmatpush1.msra.mxu0 %v2557_v23  ;;  %1026 = vmatpush1.msra.mxu1 %v2560_v24 }
 0x24a   : > { %956 = vmatprep.subr.mxu0 %v2565_v25  ;;  %1027 = vmatprep.subr.mxu1 %v2568_v26 }
 0x24b   : > { %957 = vmatpush1.msra.mxu0 %v2573_v27  ;;  %1028 = vmatpush1.msra.mxu1 %v2576_v28 }
 0x24c   : > { %958 = vmatprep.subr.mxu0 %v2581_v29  ;;  %1029 = vmatprep.subr.mxu1 %v2584_v30 }
 0x24d   : > { %959 = vmatpush1.msra.mxu0 %v2589_v31  ;;  %1030 = vmatpush1.msra.mxu1 %v2592_v32 }
 0x24e   : > { %960 = vmatprep.subr.mxu0 %v2597_v33  ;;  %1031 = vmatprep.subr.mxu1 %v2600_v34 }
 0x24f   : > { %961 = vmatpush1.msra.mxu0 %v2605_v35  ;;  %1032 = vmatpush1.msra.mxu1 %v2608_v36 }
 0x250   : > { %962 = vmatprep.subr.mxu0 %v2613_v37  ;;  %1033 = vmatprep.subr.mxu1 %v2616_v38 }
 0x251   : > { %963 = vmatpush1.msra.mxu0 %v2621_v39  ;;  %1034 = vmatpush1.msra.mxu1 %v2624_v40 }
 0x252   : > { %964 = vmatprep.subr.mxu0 %v2629_v41  ;;  %1035 = vmatprep.subr.mxu1 %v2632_v42 }
 0x253   : > { %965 = vmatpush1.msra.mxu0 %v2637_v43  ;;  %1036 = vmatpush1.msra.mxu1 %v2640_v44 }
 0x254   : > { %966 = vmatprep.subr.mxu0 %v2645_v45  ;;  %1037 = vmatprep.subr.mxu1 %v2648_v46 }
 0x255   : > { %967 = vmatpush1.msra.mxu0 %v2653_v47  ;;  %1038 = vmatpush1.msra.mxu1 %v2656_v48 }
 0x256   : > { %968 = vmatprep.subr.mxu0 %v2661_v49  ;;  %1039 = vmatprep.subr.mxu1 %v2664_v50 }
 0x257   : > { %969 = vmatpush1.msra.mxu0 %v2669_v51  ;;  %1040 = vmatpush1.msra.mxu1 %v2672_v52 }
 0x258   : > { %970 = vmatprep.subr.mxu0 %v2677_v53  ;;  %1041 = vmatprep.subr.mxu1 %v2680_v54 }
 0x259   : > { %971 = vmatpush1.msra.mxu0 %v2685_v55  ;;  %1042 = vmatpush1.msra.mxu1 %v3660_v8 }
 0x25a   : > { %972 = vmatprep.subr.mxu0 %v3661_v7  ;;  %1043 = vmatprep.subr.mxu1 %v3662_v59 }
 0x25b   : > { %973 = vmatpush1.msra.mxu0 %v3663_v60  ;;  %1044 = vmatpush1.msra.mxu1 %v3664_v61 }
 0x25c   : > { %974 = vmatprep.subr.mxu0 %v3665_v6  ;;  %1045 = vmatprep.subr.mxu1 %v3666_v62 }
 0x25d   : > { %975 = vmatpush1.msra.mxu0 %v3667_v58  ;;  %1046 = vmatpush1.msra.mxu1 %v3668_v0  ;;  %v744_v58 = vld [vmem:[%s743_s28] sm:$0xff]  ;;  %s2198_s28 = sshll.u32 %s3488_s27, 3 }
 0x25e   : > { %976 = vmatprep.subr.mxu0 %v3669_v4  ;;  %1047 = vmatprep.subr.mxu1 %v3670_v57  ;;  %v3678_v4 = vld [vmem:[#allocation6_spill] sm:$0xff]  ;;  %v3679_v57 = vld [vmem:[#allocation7_spill] sm:$0xff]  ;;  %s1551_s29 = scalar_lea.vmem %s2839_s8, %s2198_s28 [#allocation4] }
 0x25f   : > { %977 = vmatpush1.msra.mxu0 %v3671_v2  ;;  %1048 = vmatpush1.msra.mxu1 %v3672_v1 }
 0x260   : > { %978 = vmatprep.subr.mxu0 %v3673_v10  ;;  %1049 = vmatprep.subr.mxu1 %v3674_v9 }
 0x261   : > { %979 = vmatpush1.msra.mxu0 %v3675_v5  ;;  %1012 = vmatprep.mubr.f32.mxu0 %v3676_v56 }
 0x262   : > { %1050 = vmatpush1.msra.mxu1 %v3677_v3  ;;  %1083 = vmatprep.mubr.f32.mxu1 %v3676_v56 }
 0x263   : > { %1150 = vmatprep.subr.mxu0 %v3678_v4  ;;  %1221 = vmatprep.subr.mxu1 %v3679_v57 }
 0x302   : > { %v812_v1 = vpop.f32.mrf.mxu0  ;;  %v883_v10 = vpop.f32.mrf.mxu1 }
 0x304   : > { %v814_v9 = vpop.f32.mrf.mxu0  ;;  %v885_v2 = vpop.f32.mrf.mxu1 }
 0x305   : > { %v892_v5 = vcombine.low %v812_v1, %v814_v9  ;;  %v893_v0 = vcombine.low %v883_v10, %v885_v2 }
 0x307   : > { %v900_v3 = vrot.slane %v892_v5, %v2837_v63  ;;  %v907_v56 = vrot.slane %v893_v0, %v2837_v63 }
 0x309   : > { %v908_v4 = vcombine.low %v900_v3, %v907_v56 }
 0x30b   : > { %v910_v62 = vadd.f32 %v908_v4, %v744_v58  ;;  %v931_v58 = vld [vmem:[#allocation3] sm:$0x3] }
 0x30d   : > { %v911_v57 = vmul.f32 0.5, %v910_v62  ;;  %v916_v6 = vrot.slane %v910_v62, 2  ;;  %v922_v60 = vrot.slane %v910_v62, 4  ;;  %v925_v59 = vrot.slane %v910_v62, 6 }
 0x30f   : > { %2262 = vtanh.f32 %v911_v57  ;;  %v918_v61 = vmul.f32 0.5, %v916_v6  ;;  %v927_v7 = vmul.f32 0.5, %v925_v59 }
 0x311   : > { %2264 = vtanh.f32 %v918_v61 }
 0x312   : > { %2266 = vtanh.f32 %v922_v60 }
 0x313   : > { %2268 = vtanh.f32 %v927_v7 }
 0x31c   : > { %v2263_v8 = vpop.eup %2262 }
 0x31d   : > { %v913_v1 = vadd.f32 1.0, %v2263_v8 }
 0x31e   : > { %v2265_v2 = vpop.eup %2264 }
 0x31f   : > { %v914_v10 = vmul.f32 0.5, %v913_v1  ;;  %v920_v9 = vadd.f32 1.0, %v2265_v2  ;;  %v2267_v5 = vpop.eup %2266 }
 0x320   : > { %v2269_v61 = vpop.eup %2268 }
 0x321   : > { %v921_v0 = vmul.f32 0.5, %v920_v9  ;;  %v933_v3 = vmul.f32 %v2267_v5, %v914_v10  ;;  %v929_v60 = vadd.f32 1.0, %v2269_v61  ;;  %v3097_v61 = vld [vmem:[%s2502_s3 + $0x1d8] sm:$0xff] }
 0x323   : > { %v932_v56 = vmul.f32 %v931_v58, %v921_v0  ;;  %v930_v59 = vmul.f32 0.5, %v929_v60  ;;  %v3101_v60 = vld [vmem:[%s2502_s3 + $0x1c0] sm:$0xff] }
 0x325   : > { %v934_v4 = vadd.f32 %v933_v3, %v932_v56  ;;  %v3085_v56 = vld [vmem:[%s2502_s3 + $0x1e0] sm:$0xff]  ;;  %v3089_v3 = vld [vmem:[%s2502_s3 + $0x1f0] sm:$0xff] }
 0x327   : > { %2270 = vtanh.f32 %v934_v4  ;;  %937 = vst [vmem:[#allocation3] sm:$0x3] %v934_v4  ;;  %v3093_v4 = vld [vmem:[%s2502_s3 + $0x1c8] sm:$0xff] }
 0x334   : > { %v2271_v6 = vpop.eup %2270 }
 0x335   : > { %v936_v8 = vmul.f32 %v2271_v6, %v930_v59  ;;  %v3105_v59 = vld [vmem:[%s2502_s3 + $0x1d0] sm:$0xff]  ;;  %v3109_v6 = vld [vmem:[%s2502_s3 + $0x1a8] sm:$0xff] }
 0x337   : > { %938 = vst [vmem:[#allocation2] sm:$0x3] %v936_v8  ;;  %941 = vst [vmem:[%s940_s30] sm:$0x3] %v936_v8  ;;  %v3113_v8 = vld [vmem:[%s2502_s3 + $0x1b8] sm:$0xff]  ;;  %s2182_s30 = sshll.u32 %s3488_s27, 1 }
 0x338   : > { %s1748_s4 = scalar_lea.vmem %s2847_s20, %s2182_s30 [#allocation5] }
 0x33e   : > { %v947_v62 = vld [vmem:[#allocation2] sm:$0x3] }
 0x33f   : > { %1013 = vmatmul.mubr.f32.vlgmr.msra.gmra.mxu0 %v947_v62  ;;  %1084 = vmatmul.mubr.f32.vlgmr.msra.gmra.mxu1 %v947_v62  ;;  %v3117_v62 = vld [vmem:[%s2502_s3 + $0x1a0] sm:$0xff] }
 0x340   : > { %1151 = vmatpush1.msra.mxu0 %v2511_v11  ;;  %1222 = vmatpush1.msra.mxu1 %v2516_v12  ;;  %v3680_v11 = vld [vmem:[#allocation8_spill] sm:$0xff]  ;;  %v3681_v12 = vld [vmem:[#allocation9_spill] sm:$0xff] }
 0x341   : > { %1152 = vmatprep.subr.mxu0 %v2519_v13  ;;  %1223 = vmatprep.subr.mxu1 %v2522_v14  ;;  %v3682_v13 = vld [vmem:[#allocation10_spill] sm:$0xff]  ;;  %v3683_v14 = vld [vmem:[#allocation11_spill] sm:$0xff] }
 0x342   : > { %1153 = vmatpush1.msra.mxu0 %v2527_v15  ;;  %1224 = vmatpush1.msra.mxu1 %v2530_v16  ;;  %v3684_v15 = vld [vmem:[#allocation12_spill] sm:$0xff]  ;;  %v3685_v16 = vld [vmem:[#allocation13_spill] sm:$0xff] }
 0x343   : > { %1154 = vmatprep.subr.mxu0 %v2533_v17  ;;  %1225 = vmatprep.subr.mxu1 %v2538_v18  ;;  %v3686_v17 = vld [vmem:[#allocation14_spill] sm:$0xff]  ;;  %v3687_v18 = vld [vmem:[#allocation15_spill] sm:$0xff] }
 0x344   : > { %1155 = vmatpush1.msra.mxu0 %v2541_v19  ;;  %1226 = vmatpush1.msra.mxu1 %v2544_v20  ;;  %v3688_v19 = vld [vmem:[#allocation16_spill] sm:$0xff]  ;;  %v3689_v20 = vld [vmem:[#allocation17_spill] sm:$0xff] }
 0x345   : > { %1156 = vmatprep.subr.mxu0 %v2549_v21  ;;  %1227 = vmatprep.subr.mxu1 %v2552_v22  ;;  %v3690_v21 = vld [vmem:[#allocation18_spill] sm:$0xff]  ;;  %v3691_v22 = vld [vmem:[#allocation19_spill] sm:$0xff] }
 0x346   : > { %1157 = vmatpush1.msra.mxu0 %v2557_v23  ;;  %1228 = vmatpush1.msra.mxu1 %v2560_v24  ;;  %v3692_v23 = vld [vmem:[#allocation20_spill] sm:$0xff]  ;;  %v3693_v24 = vld [vmem:[#allocation21_spill] sm:$0xff] }
 0x347   : > { %1158 = vmatprep.subr.mxu0 %v2565_v25  ;;  %1229 = vmatprep.subr.mxu1 %v2568_v26  ;;  %v3694_v25 = vld [vmem:[#allocation22_spill] sm:$0xff]  ;;  %v3695_v26 = vld [vmem:[#allocation23_spill] sm:$0xff] }
 0x348   : > { %1159 = vmatpush1.msra.mxu0 %v2573_v27  ;;  %1230 = vmatpush1.msra.mxu1 %v2576_v28  ;;  %v3696_v27 = vmov 0.0   ;;  %v3697_v28 = vld [vmem:[#allocation24_spill] sm:$0xff] }
 0x349   : > { %1160 = vmatprep.subr.mxu0 %v2581_v29  ;;  %1231 = vmatprep.subr.mxu1 %v2584_v30  ;;  %v3067_v29 = vld [vmem:[%s2502_s3 + $0x1e8] sm:$0xff]  ;;  %v3071_v30 = vld [vmem:[%s2502_s3 + $0x1f8] sm:$0xff] }
 0x34a   : > { %1161 = vmatpush1.msra.mxu0 %v2589_v31  ;;  %1232 = vmatpush1.msra.mxu1 %v2592_v32  ;;  %3698 = vst [vmem:[#allocation6_spill] sm:$0xff] %v3067_v29  ;;  %3699 = vst [vmem:[#allocation7_spill] sm:$0xff] %v3071_v30 }
 0x34b   : > { %1162 = vmatprep.subr.mxu0 %v2597_v33  ;;  %1233 = vmatprep.subr.mxu1 %v2600_v34 }
 0x34c   : > { %1163 = vmatpush1.msra.mxu0 %v2605_v35  ;;  %1234 = vmatpush1.msra.mxu1 %v2608_v36 }
 0x34d   : > { %1164 = vmatprep.subr.mxu0 %v2613_v37  ;;  %1235 = vmatprep.subr.mxu1 %v2616_v38 }
 0x34e   : > { %1165 = vmatpush1.msra.mxu0 %v2621_v39  ;;  %1236 = vmatpush1.msra.mxu1 %v2624_v40  ;;  %v946_v39 = vld [vmem:[%s945_s6] sm:$0xff]  ;;  %s2199_s6 = sshll.u32 %s3498_s5, 3 }
 0x34f   : > { %1166 = vmatprep.subr.mxu0 %v2629_v41  ;;  %1237 = vmatprep.subr.mxu1 %v2632_v42  ;;  %s1753_s7 = scalar_lea.vmem %s2839_s8, %s2199_s6 [#allocation4] }
 0x350   : > { %1167 = vmatpush1.msra.mxu0 %v2637_v43  ;;  %1238 = vmatpush1.msra.mxu1 %v2640_v44 }
 0x351   : > { %1168 = vmatprep.subr.mxu0 %v2645_v45  ;;  %1239 = vmatprep.subr.mxu1 %v2648_v46 }
 0x352   : > { %1169 = vmatpush1.msra.mxu0 %v2653_v47  ;;  %1240 = vmatpush1.msra.mxu1 %v2656_v48 }
 0x353   : > { %1170 = vmatprep.subr.mxu0 %v2661_v49  ;;  %1241 = vmatprep.subr.mxu1 %v2664_v50 }
 0x354   : > { %1171 = vmatpush1.msra.mxu0 %v2669_v51  ;;  %1242 = vmatpush1.msra.mxu1 %v2672_v52 }
 0x355   : > { %1172 = vmatprep.subr.mxu0 %v2677_v53  ;;  %1243 = vmatprep.subr.mxu1 %v2680_v54 }
 0x356   : > { %1173 = vmatpush1.msra.mxu0 %v2685_v55  ;;  %1244 = vmatpush1.msra.mxu1 %v3680_v11  ;;  %v1133_v55 = vld [vmem:[#allocation3] sm:$0x3]  ;;  %v3121_v11 = vld [vmem:[%s2502_s3 + $0x1b0] sm:$0xff] }
 0x357   : > { %1174 = vmatprep.subr.mxu0 %v3681_v12  ;;  %1245 = vmatprep.subr.mxu1 %v3682_v13  ;;  %v3125_v12 = vld [vmem:[%s2502_s3 + $0x188] sm:$0xff]  ;;  %v3129_v13 = vld [vmem:[%s2502_s3 + $0x198] sm:$0xff] }
 0x358   : > { %1175 = vmatpush1.msra.mxu0 %v3683_v14  ;;  %1246 = vmatpush1.msra.mxu1 %v3684_v15  ;;  %v3133_v14 = vld [vmem:[%s2502_s3 + $0x180] sm:$0xff]  ;;  %v3137_v15 = vld [vmem:[%s2502_s3 + $0x190] sm:$0xff] }
 0x359   : > { %1176 = vmatprep.subr.mxu0 %v3685_v16  ;;  %1247 = vmatprep.subr.mxu1 %v3686_v17  ;;  %v3141_v16 = vld [vmem:[%s2502_s3 + $0x168] sm:$0xff]  ;;  %v3145_v17 = vld [vmem:[%s2502_s3 + $0x178] sm:$0xff] }
 0x35a   : > { %1177 = vmatpush1.msra.mxu0 %v3687_v18  ;;  %1248 = vmatpush1.msra.mxu1 %v3688_v19  ;;  %v3149_v18 = vld [vmem:[%s2502_s3 + $0x160] sm:$0xff]  ;;  %v3153_v19 = vld [vmem:[%s2502_s3 + $0x170] sm:$0xff] }
 0x35b   : > { %1178 = vmatprep.subr.mxu0 %v3689_v20  ;;  %1249 = vmatprep.subr.mxu1 %v3690_v21  ;;  %v3157_v20 = vld [vmem:[%s2502_s3 + $0x148] sm:$0xff]  ;;  %v3161_v21 = vld [vmem:[%s2502_s3 + $0x158] sm:$0xff] }
 0x35c   : > { %1179 = vmatpush1.msra.mxu0 %v3691_v22  ;;  %1250 = vmatpush1.msra.mxu1 %v3692_v23  ;;  %v3165_v22 = vld [vmem:[%s2502_s3 + $0x140] sm:$0xff]  ;;  %v3169_v23 = vld [vmem:[%s2502_s3 + $0x150] sm:$0xff] }
 0x35d   : > { %1180 = vmatprep.subr.mxu0 %v3693_v24  ;;  %1251 = vmatprep.subr.mxu1 %v3694_v25  ;;  %v3173_v24 = vld [vmem:[%s2502_s3 + $0x128] sm:$0xff]  ;;  %v3177_v25 = vld [vmem:[%s2502_s3 + $0x138] sm:$0xff] }
 0x35e   : > { %1181 = vmatpush1.msra.mxu0 %v3695_v26  ;;  %1214 = vmatprep.mubr.f32.mxu0 %v3696_v27  ;;  %v3181_v26 = vld [vmem:[%s2502_s3 + $0x120] sm:$0xff] }
 0x35f   : > { %1252 = vmatpush1.msra.mxu1 %v3697_v28  ;;  %1285 = vmatprep.mubr.f32.mxu1 %v3696_v27  ;;  %v3185_v28 = vld [vmem:[%s2502_s3 + $0x130] sm:$0xff] }
 0x360   : > { %1352 = vmatprep.subr.mxu0 %v3067_v29  ;;  %1423 = vmatprep.subr.mxu1 %v3071_v30 }
 0x3ff   : > { %v1014_v31 = vpop.f32.mrf.mxu0  ;;  %v1085_v32 = vpop.f32.mrf.mxu1 }
 0x401   : > { %v1016_v33 = vpop.f32.mrf.mxu0  ;;  %v1087_v34 = vpop.f32.mrf.mxu1 }
 0x402   : > { %v1094_v35 = vcombine.low %v1014_v31, %v1016_v33  ;;  %v1095_v36 = vcombine.low %v1085_v32, %v1087_v34  ;;  %v3189_v31 = vld [vmem:[%s2502_s3 + $0x108] sm:$0xff]  ;;  %v3193_v32 = vld [vmem:[%s2502_s3 + $0x118] sm:$0xff]  ;;  %v3197_v33 = vld [vmem:[%s2502_s3 + $0x100] sm:$0xff] }
 0x403   : > { %v3201_v34 = vld [vmem:[%s2502_s3 + $0x110] sm:$0xff] }
 0x404   : > { %v1102_v37 = vrot.slane %v1094_v35, %v2837_v63  ;;  %v1109_v38 = vrot.slane %v1095_v36, %v2837_v63  ;;  %v3205_v35 = vld [vmem:[%s2502_s3 + $0xe8] sm:$0xff]  ;;  %v3209_v36 = vld [vmem:[%s2502_s3 + $0xf8] sm:$0xff] }
 0x406   : > { %v1110_v40 = vcombine.low %v1102_v37, %v1109_v38  ;;  %v3213_v37 = vld [vmem:[%s2502_s3 + $0xe0] sm:$0xff]  ;;  %v3217_v38 = vld [vmem:[%s2502_s3 + $0xf0] sm:$0xff] }
 0x408   : > { %v1112_v41 = vadd.f32 %v1110_v40, %v946_v39  ;;  %v3221_v39 = vld [vmem:[%s2502_s3 + $0xc8] sm:$0xff]  ;;  %v3225_v40 = vld [vmem:[%s2502_s3 + $0xd8] sm:$0xff] }
 0x40a   : > { %v1113_v42 = vmul.f32 0.5, %v1112_v41  ;;  %v1118_v43 = vrot.slane %v1112_v41, 2  ;;  %v1124_v45 = vrot.slane %v1112_v41, 4  ;;  %v1127_v46 = vrot.slane %v1112_v41, 6  ;;  %v3229_v41 = vld [vmem:[%s2502_s3 + $0xc0] sm:$0xff] }
 0x40c   : > { %2272 = vtanh.f32 %v1113_v42  ;;  %v1120_v44 = vmul.f32 0.5, %v1118_v43  ;;  %v1129_v47 = vmul.f32 0.5, %v1127_v46  ;;  %v3233_v42 = vld [vmem:[%s2502_s3 + $0xd0] sm:$0xff]  ;;  %v3237_v43 = vld [vmem:[%s2502_s3 + $0xa8] sm:$0xff] }
 0x40d   : > { %v3249_v46 = vld [vmem:[%s2502_s3 + $0xb0] sm:$0xff] }
 0x40e   : > { %2274 = vtanh.f32 %v1120_v44  ;;  %v3241_v44 = vld [vmem:[%s2502_s3 + $0xb8] sm:$0xff] }
 0x40f   : > { %2276 = vtanh.f32 %v1124_v45  ;;  %v3245_v45 = vld [vmem:[%s2502_s3 + $0xa0] sm:$0xff] }
 0x410   : > { %2278 = vtanh.f32 %v1129_v47  ;;  %v3253_v47 = vld [vmem:[%s2502_s3 + $0x88] sm:$0xff] }
 0x419   : > { %v2273_v48 = vpop.eup %2272 }
 0x41a   : > { %v1115_v49 = vadd.f32 1.0, %v2273_v48  ;;  %v3257_v48 = vld [vmem:[%s2502_s3 + $0x98] sm:$0xff] }
 0x41b   : > { %v2275_v50 = vpop.eup %2274 }
 0x41c   : > { %v1116_v51 = vmul.f32 0.5, %v1115_v49  ;;  %v1122_v52 = vadd.f32 1.0, %v2275_v50  ;;  %v2277_v54 = vpop.eup %2276  ;;  %v3261_v49 = vld [vmem:[%s2502_s3 + $0x80] sm:$0xff]  ;;  %v3265_v50 = vld [vmem:[%s2502_s3 + $0x90] sm:$0xff] }
 0x41d   : > { %v2279_v2 = vpop.eup %2278  ;;  %3700 = vst [vmem:[#allocation8_spill] sm:$0xff] %v3265_v50 }
 0x41e   : > { %v1123_v53 = vmul.f32 0.5, %v1122_v52  ;;  %v1135_v57 = vmul.f32 %v2277_v54, %v1116_v51  ;;  %v1131_v10 = vadd.f32 1.0, %v2279_v2  ;;  %v3269_v51 = vld [vmem:[%s2502_s3 + $0x68] sm:$0xff]  ;;  %v3273_v52 = vld [vmem:[%s2502_s3 + $0x78] sm:$0xff]  ;;  %v3281_v54 = vld [vmem:[%s2502_s3 + $0x70] sm:$0xff] }
 0x41f   : > { %3701 = vst [vmem:[#allocation9_spill] sm:$0xff] %v3269_v51  ;;  %3702 = vst [vmem:[#allocation10_spill] sm:$0xff] %v3273_v52  ;;  %v3301_v2 = vld [vmem:[%s2502_s3 + $0x28] sm:$0xff] }
 0x420   : > { %v1134_v7 = vmul.f32 %v1133_v55, %v1123_v53  ;;  %v1132_v9 = vmul.f32 0.5, %v1131_v10  ;;  %v3277_v53 = vld [vmem:[%s2502_s3 + $0x60] sm:$0xff]  ;;  %3704 = vst [vmem:[#allocation12_spill] sm:$0xff] %v3281_v54  ;;  %v3285_v55 = vld [vmem:[%s2502_s3 + $0x48] sm:$0xff]  ;;  %3709 = vst [vmem:[#allocation17_spill] sm:$0xff] %v3301_v2 }
 0x421   : > { %3703 = vst [vmem:[#allocation11_spill] sm:$0xff] %v3277_v53  ;;  %3705 = vst [vmem:[#allocation13_spill] sm:$0xff] %v3285_v55  ;;  %v3305_v10 = vld [vmem:[%s2502_s3 + $0x38] sm:$0xff] }
 0x422   : > { %v1136_v1 = vadd.f32 %v1135_v57, %v1134_v7  ;;  %v3289_v7 = vld [vmem:[%s2502_s3 + $0x58] sm:$0xff]  ;;  %v3293_v57 = vld [vmem:[%s2502_s3 + $0x40] sm:$0xff]  ;;  %3710 = vst [vmem:[#allocation18_spill] sm:$0xff] %v3305_v10 }
 0x423   : > { %3706 = vst [vmem:[#allocation14_spill] sm:$0xff] %v3289_v7  ;;  %3707 = vst [vmem:[#allocation15_spill] sm:$0xff] %v3293_v57 }
 0x424   : > { %2280 = vtanh.f32 %v1136_v1  ;;  %1139 = vst [vmem:[#allocation3] sm:$0x3] %v1136_v1  ;;  %v3297_v1 = vld [vmem:[%s2502_s3 + $0x50] sm:$0xff] }
 0x425   : > { %3708 = vst [vmem:[#allocation16_spill] sm:$0xff] %v3297_v1 }
 0x431   : > { %v2281_v0 = vpop.eup %2280 }
 0x432   : > { %v1138_v5 = vmul.f32 %v2281_v0, %v1132_v9  ;;  %v3309_v9 = vld [vmem:[%s2502_s3 + $0x20] sm:$0xff]  ;;  %v3313_v0 = vld [vmem:[%s2502_s3 + $0x30] sm:$0xff] }
 0x433   : > { %3711 = vst [vmem:[#allocation19_spill] sm:$0xff] %v3309_v9  ;;  %3712 = vst [vmem:[#allocation20_spill] sm:$0xff] %v3313_v0 }
 0x434   : > { %1140 = vst [vmem:[#allocation2] sm:$0x3] %v1138_v5  ;;  %1143 = vst [vmem:[%s1142_s15] sm:$0x3] %v1138_v5  ;;  %v3317_v5 = vld [vmem:[%s2502_s3 + $0x8] sm:$0xff] }
 0x435   : > { %3713 = vst [vmem:[#allocation21_spill] sm:$0xff] %v3317_v5 }
 0x43b   : > { %v1149_v58 = vld [vmem:[#allocation2] sm:$0x3] }
 0x43c   : > { %1215 = vmatmul.mubr.f32.vlgmr.msra.gmra.mxu0 %v1149_v58  ;;  %1286 = vmatmul.mubr.f32.vlgmr.msra.gmra.mxu1 %v1149_v58  ;;  %v3321_v58 = vld [vmem:[%s2502_s3 + $0x18] sm:$0xff] }
 0x43d   : > { %1353 = vmatpush1.msra.mxu0 %v3085_v56  ;;  %1424 = vmatpush1.msra.mxu1 %v3089_v3  ;;  %3714 = vst [vmem:[#allocation22_spill] sm:$0xff] %v3321_v58 }
 0x43e   : > { %1354 = vmatprep.subr.mxu0 %v3093_v4  ;;  %1425 = vmatprep.subr.mxu1 %v3097_v61 }
 0x43f   : > { %1355 = vmatpush1.msra.mxu0 %v3101_v60  ;;  %1426 = vmatpush1.msra.mxu1 %v3105_v59 }
 0x440   : > { %1356 = vmatprep.subr.mxu0 %v3109_v6  ;;  %1427 = vmatprep.subr.mxu1 %v3113_v8 }
 0x441   : > { %1357 = vmatpush1.msra.mxu0 %v3117_v62  ;;  %1428 = vmatpush1.msra.mxu1 %v3121_v11 }
 0x442   : > { %1358 = vmatprep.subr.mxu0 %v3125_v12  ;;  %1429 = vmatprep.subr.mxu1 %v3129_v13 }
 0x443   : > { %1359 = vmatpush1.msra.mxu0 %v3133_v14  ;;  %1430 = vmatpush1.msra.mxu1 %v3137_v15 }
 0x444   : > { %1360 = vmatprep.subr.mxu0 %v3141_v16  ;;  %1431 = vmatprep.subr.mxu1 %v3145_v17 }
 0x445   : > { %1361 = vmatpush1.msra.mxu0 %v3149_v18  ;;  %1432 = vmatpush1.msra.mxu1 %v3153_v19 }
 0x446   : > { %1362 = vmatprep.subr.mxu0 %v3157_v20  ;;  %1433 = vmatprep.subr.mxu1 %v3161_v21 }
 0x447   : > { %1363 = vmatpush1.msra.mxu0 %v3165_v22  ;;  %1434 = vmatpush1.msra.mxu1 %v3169_v23 }
 0x448   : > { %1364 = vmatprep.subr.mxu0 %v3173_v24  ;;  %1435 = vmatprep.subr.mxu1 %v3177_v25 }
 0x449   : > { %1365 = vmatpush1.msra.mxu0 %v3181_v26  ;;  %1436 = vmatpush1.msra.mxu1 %v3185_v28 }
 0x44a   : > { %1366 = vmatprep.subr.mxu0 %v3189_v31  ;;  %1437 = vmatprep.subr.mxu1 %v3193_v32 }
 0x44b   : > { %1367 = vmatpush1.msra.mxu0 %v3197_v33  ;;  %1438 = vmatpush1.msra.mxu1 %v3201_v34 }
 0x44c   : > { %1368 = vmatprep.subr.mxu0 %v3205_v35  ;;  %1439 = vmatprep.subr.mxu1 %v3209_v36 }
 0x44d   : > { %1369 = vmatpush1.msra.mxu0 %v3213_v37  ;;  %1440 = vmatpush1.msra.mxu1 %v3217_v38 }
 0x44e   : > { %1370 = vmatprep.subr.mxu0 %v3221_v39  ;;  %1441 = vmatprep.subr.mxu1 %v3225_v40 }
 0x44f   : > { %1371 = vmatpush1.msra.mxu0 %v3229_v41  ;;  %1442 = vmatpush1.msra.mxu1 %v3233_v42 }
 0x450   : > { %1372 = vmatprep.subr.mxu0 %v3237_v43  ;;  %1443 = vmatprep.subr.mxu1 %v3241_v44 }
 0x451   : > { %1373 = vmatpush1.msra.mxu0 %v3245_v45  ;;  %1444 = vmatpush1.msra.mxu1 %v3249_v46 }
 0x452   : > { %1374 = vmatprep.subr.mxu0 %v3253_v47  ;;  %1445 = vmatprep.subr.mxu1 %v3257_v48 }
 0x453   : > { %1375 = vmatpush1.msra.mxu0 %v3261_v49  ;;  %1446 = vmatpush1.msra.mxu1 %v3265_v50 }
 0x454   : > { %1376 = vmatprep.subr.mxu0 %v3269_v51  ;;  %1447 = vmatprep.subr.mxu1 %v3273_v52 }
 0x455   : > { %1377 = vmatpush1.msra.mxu0 %v3277_v53  ;;  %1448 = vmatpush1.msra.mxu1 %v3281_v54 }
 0x456   : > { %1378 = vmatprep.subr.mxu0 %v3285_v55  ;;  %1449 = vmatprep.subr.mxu1 %v3289_v7 }
 0x457   : > { %1379 = vmatpush1.msra.mxu0 %v3293_v57  ;;  %1450 = vmatpush1.msra.mxu1 %v3297_v1 }
 0x458   : > { %1380 = vmatprep.subr.mxu0 %v3301_v2  ;;  %1451 = vmatprep.subr.mxu1 %v3305_v10  ;;  %v3325_v2 = vld [vmem:[%s2502_s3] sm:$0xff] }
 0x459   : > { %1381 = vmatpush1.msra.mxu0 %v3309_v9  ;;  %1452 = vmatpush1.msra.mxu1 %v3313_v0  ;;  %3715 = vst [vmem:[#allocation23_spill] sm:$0xff] %v3325_v2  ;;  %v3330_v9 = vld [vmem:[%s2502_s3 + $0x10] sm:$0xff]  ;;  %s1147_s3 = scalar_lea.vmem %s2839_s8, %s2196_s17 [#allocation4]  ;;  %s2185_s8 = sshll.u32 %s3498_s5, 1 }
 0x45a   : > { %1382 = vmatprep.subr.mxu0 %v3317_v5  ;;  %1453 = vmatprep.subr.mxu1 %v3321_v58  ;;  %3716 = vst [vmem:[#allocation24_spill] sm:$0xff] %v3330_v9  ;;  %v1148_v57 = vld [vmem:[%s1147_s3] sm:$0xff]  ;;  %s1950_s15 = scalar_lea.vmem %s2847_s20, %s2185_s8 [#allocation5] }
 0x45b   : > { %1383 = vmatpush1.msra.mxu0 %v3325_v2  ;;  %1416 = vmatprep.mubr.f32.mxu0 %v3696_v27 }
 0x45c   : > { %1454 = vmatpush1.msra.mxu1 %v3330_v9  ;;  %1487 = vmatprep.mubr.f32.mxu1 %v3696_v27 }
 0x45d   : > { %1554 = vmatprep.subr.mxu0 %v3067_v29  ;;  %1625 = vmatprep.subr.mxu1 %v3071_v30 }
 0x4fc   : > { %v1216_v58 = vpop.f32.mrf.mxu0  ;;  %v1287_v5 = vpop.f32.mrf.mxu1 }
 0x4fe   : > { %v1218_v2 = vpop.f32.mrf.mxu0  ;;  %v1289_v0 = vpop.f32.mrf.mxu1 }
 0x4ff   : > { %v1296_v10 = vcombine.low %v1216_v58, %v1218_v2  ;;  %v1297_v1 = vcombine.low %v1287_v5, %v1289_v0  ;;  %v3718_v58 = vld [vmem:[#allocation9_spill] sm:$0xff] }
 0x501   : > { %v1304_v9 = vrot.slane %v1296_v10, %v2837_v63  ;;  %v1311_v27 = vrot.slane %v1297_v1, %v2837_v63 }
 0x503   : > { %v1312_v29 = vcombine.low %v1304_v9, %v1311_v27 }
 0x505   : > { %v1314_v7 = vadd.f32 %v1312_v29, %v1148_v57  ;;  %v1335_v29 = vld [vmem:[#allocation3] sm:$0x3] }
 0x507   : > { %v1315_v30 = vmul.f32 0.5, %v1314_v7  ;;  %v1320_v55 = vrot.slane %v1314_v7, 2  ;;  %v1326_v53 = vrot.slane %v1314_v7, 4  ;;  %v1329_v52 = vrot.slane %v1314_v7, 6 }
 0x509   : > { %2282 = vtanh.f32 %v1315_v30  ;;  %v1322_v54 = vmul.f32 0.5, %v1320_v55  ;;  %v1331_v51 = vmul.f32 0.5, %v1329_v52 }
 0x50b   : > { %2284 = vtanh.f32 %v1322_v54 }
 0x50c   : > { %2286 = vtanh.f32 %v1326_v53 }
 0x50d   : > { %2288 = vtanh.f32 %v1331_v51  ;;  %v3717_v51 = vld [vmem:[#allocation8_spill] sm:$0xff] }
 0x516   : > { %v2283_v50 = vpop.eup %2282 }
 0x517   : > { %v1317_v2 = vadd.f32 1.0, %v2283_v50 }
 0x518   : > { %v2285_v0 = vpop.eup %2284 }
 0x519   : > { %v1318_v5 = vmul.f32 0.5, %v1317_v2  ;;  %v1324_v10 = vadd.f32 1.0, %v2285_v0  ;;  %v2287_v27 = vpop.eup %2286  ;;  %v3719_v2 = vld [vmem:[#allocation10_spill] sm:$0xff]  ;;  %v3720_v0 = vld [vmem:[#allocation11_spill] sm:$0xff] }
 0x51a   : > { %v2289_v54 = vpop.eup %2288 }
 0x51b   : > { %v1325_v1 = vmul.f32 0.5, %v1324_v10  ;;  %v1337_v9 = vmul.f32 %v2287_v27, %v1318_v5  ;;  %v1333_v53 = vadd.f32 1.0, %v2289_v54  ;;  %v3721_v5 = vld [vmem:[#allocation12_spill] sm:$0xff]  ;;  %v3722_v10 = vld [vmem:[#allocation13_spill] sm:$0xff]  ;;  %v3724_v27 = vld [vmem:[#allocation15_spill] sm:$0xff] }
 0x51c   : > { %v3729_v54 = vld [vmem:[#allocation20_spill] sm:$0xff] }
 0x51d   : > { %v1336_v57 = vmul.f32 %v1335_v29, %v1325_v1  ;;  %v1334_v52 = vmul.f32 0.5, %v1333_v53  ;;  %v3723_v1 = vld [vmem:[#allocation14_spill] sm:$0xff]  ;;  %v3725_v29 = vld [vmem:[#allocation16_spill] sm:$0xff]  ;;  %v3730_v53 = vld [vmem:[#allocation21_spill] sm:$0xff] }
 0x51f   : > { %v1338_v30 = vadd.f32 %v1337_v9, %v1336_v57  ;;  %v3726_v57 = vld [vmem:[#allocation17_spill] sm:$0xff]  ;;  %v3727_v9 = vld [vmem:[#allocation18_spill] sm:$0xff] }
 0x521   : > { %2290 = vtanh.f32 %v1338_v30  ;;  %1341 = vst [vmem:[#allocation3] sm:$0x3] %v1338_v30  ;;  %v3728_v30 = vld [vmem:[#allocation19_spill] sm:$0xff] }
 0x52e   : > { %v2291_v55 = vpop.eup %2290 }
 0x52f   : > { %v1340_v50 = vmul.f32 %v2291_v55, %v1334_v52  ;;  %v3731_v52 = vld [vmem:[#allocation22_spill] sm:$0xff]  ;;  %v3732_v55 = vld [vmem:[#allocation23_spill] sm:$0xff] }
 0x531   : > { %1345 = vst [vmem:[%s1344_s9] sm:$0x3] %v1340_v50  ;;  %1342 = vst [vmem:[#allocation2] sm:$0x3] %v1340_v50  ;;  %v3733_v50 = vmov 0.0  }
 0x538   : > { %v1351_v7 = vld [vmem:[#allocation2] sm:$0x3] }
 0x539   : > { %1417 = vmatmul.mubr.f32.vlgmr.msra.gmra.mxu0 %v1351_v7  ;;  %1488 = vmatmul.mubr.f32.vlgmr.msra.gmra.mxu1 %v1351_v7  ;;  %v3734_v7 = vld [vmem:[#allocation24_spill] sm:$0xff] }
 0x53a   : > { %1555 = vmatpush1.msra.mxu0 %v3085_v56  ;;  %1626 = vmatpush1.msra.mxu1 %v3089_v3 }
 0x53b   : > { %1556 = vmatprep.subr.mxu0 %v3093_v4  ;;  %1627 = vmatprep.subr.mxu1 %v3097_v61 }
 0x53c   : > { %1557 = vmatpush1.msra.mxu0 %v3101_v60  ;;  %1628 = vmatpush1.msra.mxu1 %v3105_v59 }
 0x53d   : > { %1558 = vmatprep.subr.mxu0 %v3109_v6  ;;  %1629 = vmatprep.subr.mxu1 %v3113_v8 }
 0x53e   : > { %1559 = vmatpush1.msra.mxu0 %v3117_v62  ;;  %1630 = vmatpush1.msra.mxu1 %v3121_v11 }
 0x53f   : > { %1560 = vmatprep.subr.mxu0 %v3125_v12  ;;  %1631 = vmatprep.subr.mxu1 %v3129_v13 }
 0x540   : > { %1561 = vmatpush1.msra.mxu0 %v3133_v14  ;;  %1632 = vmatpush1.msra.mxu1 %v3137_v15 }
 0x541   : > { %1562 = vmatprep.subr.mxu0 %v3141_v16  ;;  %1633 = vmatprep.subr.mxu1 %v3145_v17 }
 0x542   : > { %1563 = vmatpush1.msra.mxu0 %v3149_v18  ;;  %1634 = vmatpush1.msra.mxu1 %v3153_v19 }
 0x543   : > { %1564 = vmatprep.subr.mxu0 %v3157_v20  ;;  %1635 = vmatprep.subr.mxu1 %v3161_v21 }
 0x544   : > { %1565 = vmatpush1.msra.mxu0 %v3165_v22  ;;  %1636 = vmatpush1.msra.mxu1 %v3169_v23 }
 0x545   : > { %1566 = vmatprep.subr.mxu0 %v3173_v24  ;;  %1637 = vmatprep.subr.mxu1 %v3177_v25 }
 0x546   : > { %1567 = vmatpush1.msra.mxu0 %v3181_v26  ;;  %1638 = vmatpush1.msra.mxu1 %v3185_v28 }
 0x547   : > { %1568 = vmatprep.subr.mxu0 %v3189_v31  ;;  %1639 = vmatprep.subr.mxu1 %v3193_v32 }
 0x548   : > { %1569 = vmatpush1.msra.mxu0 %v3197_v33  ;;  %1640 = vmatpush1.msra.mxu1 %v3201_v34 }
 0x549   : > { %1570 = vmatprep.subr.mxu0 %v3205_v35  ;;  %1641 = vmatprep.subr.mxu1 %v3209_v36 }
 0x54a   : > { %1571 = vmatpush1.msra.mxu0 %v3213_v37  ;;  %1642 = vmatpush1.msra.mxu1 %v3217_v38 }
 0x54b   : > { %1572 = vmatprep.subr.mxu0 %v3221_v39  ;;  %1643 = vmatprep.subr.mxu1 %v3225_v40 }
 0x54c   : > { %1573 = vmatpush1.msra.mxu0 %v3229_v41  ;;  %1644 = vmatpush1.msra.mxu1 %v3233_v42 }
 0x54d   : > { %1574 = vmatprep.subr.mxu0 %v3237_v43  ;;  %1645 = vmatprep.subr.mxu1 %v3241_v44 }
 0x54e   : > { %1575 = vmatpush1.msra.mxu0 %v3245_v45  ;;  %1646 = vmatpush1.msra.mxu1 %v3249_v46 }
 0x54f   : > { %1576 = vmatprep.subr.mxu0 %v3253_v47  ;;  %1647 = vmatprep.subr.mxu1 %v3257_v48 }
 0x550   : > { %1577 = vmatpush1.msra.mxu0 %v3261_v49  ;;  %1648 = vmatpush1.msra.mxu1 %v3717_v51 }
 0x551   : > { %1578 = vmatprep.subr.mxu0 %v3718_v58  ;;  %1649 = vmatprep.subr.mxu1 %v3719_v2 }
 0x552   : > { %1579 = vmatpush1.msra.mxu0 %v3720_v0  ;;  %1650 = vmatpush1.msra.mxu1 %v3721_v5 }
 0x553   : > { %1580 = vmatprep.subr.mxu0 %v3722_v10  ;;  %1651 = vmatprep.subr.mxu1 %v3723_v1 }
 0x554   : > { %1581 = vmatpush1.msra.mxu0 %v3724_v27  ;;  %1652 = vmatpush1.msra.mxu1 %v3725_v29  ;;  %v1350_v27 = vld [vmem:[%s1349_s24] sm:$0xff] }
 0x555   : > { %1582 = vmatprep.subr.mxu0 %v3726_v57  ;;  %1653 = vmatprep.subr.mxu1 %v3727_v9  ;;  %v3735_v57 = vld [vmem:[#allocation6_spill] sm:$0xff]  ;;  %v3736_v9 = vld [vmem:[#allocation7_spill] sm:$0xff] }
 0x556   : > { %1583 = vmatpush1.msra.mxu0 %v3728_v30  ;;  %1654 = vmatpush1.msra.mxu1 %v3729_v54 }
 0x557   : > { %1584 = vmatprep.subr.mxu0 %v3730_v53  ;;  %1655 = vmatprep.subr.mxu1 %v3731_v52 }
 0x558   : > { %1585 = vmatpush1.msra.mxu0 %v3732_v55  ;;  %1618 = vmatprep.mubr.f32.mxu0 %v3733_v50 }
 0x559   : > { %1656 = vmatpush1.msra.mxu1 %v3734_v7  ;;  %1689 = vmatprep.mubr.f32.mxu1 %v3733_v50 }
 0x55a   : > { %1756 = vmatprep.subr.mxu0 %v3735_v57  ;;  %1827 = vmatprep.subr.mxu1 %v3736_v9 }
 0x5f9   : > { %v1418_v54 = vpop.f32.mrf.mxu0  ;;  %v1489_v53 = vpop.f32.mrf.mxu1 }
 0x5fb   : > { %v1420_v52 = vpop.f32.mrf.mxu0  ;;  %v1491_v30 = vpop.f32.mrf.mxu1 }
 0x5fc   : > { %v1498_v55 = vcombine.low %v1418_v54, %v1420_v52  ;;  %v1499_v29 = vcombine.low %v1489_v53, %v1491_v30 }
 0x5fe   : > { %v1506_v7 = vrot.slane %v1498_v55, %v2837_v63  ;;  %v1513_v50 = vrot.slane %v1499_v29, %v2837_v63 }
 0x600   : > { %v1514_v57 = vcombine.low %v1506_v7, %v1513_v50 }
 0x602   : > { %v1516_v1 = vadd.f32 %v1514_v57, %v1350_v27  ;;  %v1537_v27 = vld [vmem:[#allocation3] sm:$0x3] }
 0x604   : > { %v1517_v9 = vmul.f32 0.5, %v1516_v1  ;;  %v1522_v10 = vrot.slane %v1516_v1, 2  ;;  %v1528_v0 = vrot.slane %v1516_v1, 4  ;;  %v1531_v2 = vrot.slane %v1516_v1, 6 }
 0x606   : > { %2292 = vtanh.f32 %v1517_v9  ;;  %v1524_v5 = vmul.f32 0.5, %v1522_v10  ;;  %v1533_v58 = vmul.f32 0.5, %v1531_v2 }
 0x608   : > { %2294 = vtanh.f32 %v1524_v5 }
 0x609   : > { %2296 = vtanh.f32 %v1528_v0 }
 0x60a   : > { %2298 = vtanh.f32 %v1533_v58 }
 0x613   : > { %v2293_v51 = vpop.eup %2292 }
 0x614   : > { %v1519_v54 = vadd.f32 1.0, %v2293_v51 }
 0x615   : > { %v2295_v30 = vpop.eup %2294 }
 0x616   : > { %v1520_v53 = vmul.f32 0.5, %v1519_v54  ;;  %v1526_v52 = vadd.f32 1.0, %v2295_v30  ;;  %v2297_v55 = vpop.eup %2296 }
 0x617   : > { %v2299_v5 = vpop.eup %2298 }
 0x618   : > { %v1527_v29 = vmul.f32 0.5, %v1526_v52  ;;  %v1539_v7 = vmul.f32 %v2297_v55, %v1520_v53  ;;  %v1535_v0 = vadd.f32 1.0, %v2299_v5 }
 0x61a   : > { %v1538_v50 = vmul.f32 %v1537_v27, %v1527_v29  ;;  %v1536_v2 = vmul.f32 0.5, %v1535_v0 }
 0x61c   : > { %v1540_v57 = vadd.f32 %v1539_v7, %v1538_v50 }
 0x61e   : > { %2300 = vtanh.f32 %v1540_v57  ;;  %1543 = vst [vmem:[#allocation3] sm:$0x3] %v1540_v57 }
 0x62b   : > { %v2301_v10 = vpop.eup %2300 }
 0x62c   : > { %v1542_v51 = vmul.f32 %v2301_v10, %v1536_v2  ;;  %v1754_v10 = vld [vmem:[%s1753_s7] sm:$0xff] }
 0x62e   : > { %1547 = vst [vmem:[%s1546_s26] sm:$0x3] %v1542_v51  ;;  %1544 = vst [vmem:[#allocation2] sm:$0x3] %v1542_v51 }
 0x635   : > { %v1553_v1 = vld [vmem:[#allocation2] sm:$0x3] }
 0x636   : > { %1619 = vmatmul.mubr.f32.vlgmr.msra.gmra.mxu0 %v1553_v1  ;;  %1690 = vmatmul.mubr.f32.vlgmr.msra.gmra.mxu1 %v1553_v1 }
 0x637   : > { %1757 = vmatpush1.msra.mxu0 %v3085_v56  ;;  %1828 = vmatpush1.msra.mxu1 %v3089_v3  ;;  %v3737_v56 = vld [vmem:[#allocation8_spill] sm:$0xff]  ;;  %v3738_v3 = vld [vmem:[#allocation9_spill] sm:$0xff] }
 0x638   : > { %1758 = vmatprep.subr.mxu0 %v3093_v4  ;;  %1829 = vmatprep.subr.mxu1 %v3097_v61  ;;  %v3739_v4 = vld [vmem:[#allocation10_spill] sm:$0xff]  ;;  %v3740_v61 = vld [vmem:[#allocation11_spill] sm:$0xff] }
 0x639   : > { %1759 = vmatpush1.msra.mxu0 %v3101_v60  ;;  %1830 = vmatpush1.msra.mxu1 %v3105_v59  ;;  %v3741_v60 = vld [vmem:[#allocation12_spill] sm:$0xff]  ;;  %v3742_v59 = vld [vmem:[#allocation13_spill] sm:$0xff] }
 0x63a   : > { %1760 = vmatprep.subr.mxu0 %v3109_v6  ;;  %1831 = vmatprep.subr.mxu1 %v3113_v8  ;;  %v3743_v6 = vld [vmem:[#allocation14_spill] sm:$0xff]  ;;  %v3744_v8 = vld [vmem:[#allocation15_spill] sm:$0xff] }
 0x63b   : > { %1761 = vmatpush1.msra.mxu0 %v3117_v62  ;;  %1832 = vmatpush1.msra.mxu1 %v3121_v11  ;;  %v3745_v62 = vld [vmem:[#allocation16_spill] sm:$0xff]  ;;  %v3746_v11 = vld [vmem:[#allocation17_spill] sm:$0xff] }
 0x63c   : > { %1762 = vmatprep.subr.mxu0 %v3125_v12  ;;  %1833 = vmatprep.subr.mxu1 %v3129_v13  ;;  %v3747_v12 = vld [vmem:[#allocation18_spill] sm:$0xff]  ;;  %v3748_v13 = vld [vmem:[#allocation19_spill] sm:$0xff] }
 0x63d   : > { %1763 = vmatpush1.msra.mxu0 %v3133_v14  ;;  %1834 = vmatpush1.msra.mxu1 %v3137_v15  ;;  %v3749_v14 = vld [vmem:[#allocation20_spill] sm:$0xff]  ;;  %v3750_v15 = vld [vmem:[#allocation21_spill] sm:$0xff] }
 0x63e   : > { %1764 = vmatprep.subr.mxu0 %v3141_v16  ;;  %1835 = vmatprep.subr.mxu1 %v3145_v17  ;;  %v3751_v16 = vld [vmem:[#allocation22_spill] sm:$0xff]  ;;  %v3752_v17 = vld [vmem:[#allocation23_spill] sm:$0xff] }
 0x63f   : > { %1765 = vmatpush1.msra.mxu0 %v3149_v18  ;;  %1836 = vmatpush1.msra.mxu1 %v3153_v19  ;;  %v3753_v18 = vmov 0.0   ;;  %v3754_v19 = vld [vmem:[#allocation24_spill] sm:$0xff] }
 0x640   : > { %1766 = vmatprep.subr.mxu0 %v3157_v20  ;;  %1837 = vmatprep.subr.mxu1 %v3161_v21 }
 0x641   : > { %1767 = vmatpush1.msra.mxu0 %v3165_v22  ;;  %1838 = vmatpush1.msra.mxu1 %v3169_v23 }
 0x642   : > { %1768 = vmatprep.subr.mxu0 %v3173_v24  ;;  %1839 = vmatprep.subr.mxu1 %v3177_v25 }
 0x643   : > { %1769 = vmatpush1.msra.mxu0 %v3181_v26  ;;  %1840 = vmatpush1.msra.mxu1 %v3185_v28 }
 0x644   : > { %1770 = vmatprep.subr.mxu0 %v3189_v31  ;;  %1841 = vmatprep.subr.mxu1 %v3193_v32  ;;  %v1552_v31 = vld [vmem:[%s1551_s29] sm:$0xff] }
 0x645   : > { %1771 = vmatpush1.msra.mxu0 %v3197_v33  ;;  %1842 = vmatpush1.msra.mxu1 %v3201_v34 }
 0x646   : > { %1772 = vmatprep.subr.mxu0 %v3205_v35  ;;  %1843 = vmatprep.subr.mxu1 %v3209_v36 }
 0x647   : > { %1773 = vmatpush1.msra.mxu0 %v3213_v37  ;;  %1844 = vmatpush1.msra.mxu1 %v3217_v38 }
 0x648   : > { %1774 = vmatprep.subr.mxu0 %v3221_v39  ;;  %1845 = vmatprep.subr.mxu1 %v3225_v40 }
 0x649   : > { %1775 = vmatpush1.msra.mxu0 %v3229_v41  ;;  %1846 = vmatpush1.msra.mxu1 %v3233_v42 }
 0x64a   : > { %1776 = vmatprep.subr.mxu0 %v3237_v43  ;;  %1847 = vmatprep.subr.mxu1 %v3241_v44 }
 0x64b   : > { %1777 = vmatpush1.msra.mxu0 %v3245_v45  ;;  %1848 = vmatpush1.msra.mxu1 %v3249_v46 }
 0x64c   : > { %1778 = vmatprep.subr.mxu0 %v3253_v47  ;;  %1849 = vmatprep.subr.mxu1 %v3257_v48  ;;  %v1739_v47 = vld [vmem:[#allocation3] sm:$0x3] }
 0x64d   : > { %1779 = vmatpush1.msra.mxu0 %v3261_v49  ;;  %1850 = vmatpush1.msra.mxu1 %v3737_v56 }
 0x64e   : > { %1780 = vmatprep.subr.mxu0 %v3738_v3  ;;  %1851 = vmatprep.subr.mxu1 %v3739_v4 }
 0x64f   : > { %1781 = vmatpush1.msra.mxu0 %v3740_v61  ;;  %1852 = vmatpush1.msra.mxu1 %v3741_v60 }
 0x650   : > { %1782 = vmatprep.subr.mxu0 %v3742_v59  ;;  %1853 = vmatprep.subr.mxu1 %v3743_v6 }
 0x651   : > { %1783 = vmatpush1.msra.mxu0 %v3744_v8  ;;  %1854 = vmatpush1.msra.mxu1 %v3745_v62 }
 0x652   : > { %1784 = vmatprep.subr.mxu0 %v3746_v11  ;;  %1855 = vmatprep.subr.mxu1 %v3747_v12 }
 0x653   : > { %1785 = vmatpush1.msra.mxu0 %v3748_v13  ;;  %1856 = vmatpush1.msra.mxu1 %v3749_v14 }
 0x654   : > { %1786 = vmatprep.subr.mxu0 %v3750_v15  ;;  %1857 = vmatprep.subr.mxu1 %v3751_v16 }
 0x655   : > { %1787 = vmatpush1.msra.mxu0 %v3752_v17  ;;  %1820 = vmatprep.mubr.f32.mxu0 %v3753_v18 }
 0x656   : > { %1858 = vmatpush1.msra.mxu1 %v3754_v19  ;;  %1891 = vmatprep.mubr.f32.mxu1 %v3753_v18 }
 0x6f6   : > { %v1620_v20 = vpop.f32.mrf.mxu0  ;;  %v1691_v21 = vpop.f32.mrf.mxu1 }
 0x6f8   : > { %v1622_v22 = vpop.f32.mrf.mxu0  ;;  %v1693_v23 = vpop.f32.mrf.mxu1 }
 0x6f9   : > { %v1700_v24 = vcombine.low %v1620_v20, %v1622_v22  ;;  %v1701_v25 = vcombine.low %v1691_v21, %v1693_v23 }
 0x6fb   : > { %v1708_v26 = vrot.slane %v1700_v24, %v2837_v63  ;;  %v1715_v28 = vrot.slane %v1701_v25, %v2837_v63 }
 0x6fd   : > { %v1716_v32 = vcombine.low %v1708_v26, %v1715_v28 }
 0x6ff   : > { %v1718_v33 = vadd.f32 %v1716_v32, %v1552_v31 }
 0x701   : > { %v1719_v34 = vmul.f32 0.5, %v1718_v33  ;;  %v1724_v35 = vrot.slane %v1718_v33, 2  ;;  %v1730_v37 = vrot.slane %v1718_v33, 4  ;;  %v1733_v38 = vrot.slane %v1718_v33, 6 }
 0x703   : > { %2302 = vtanh.f32 %v1719_v34  ;;  %v1726_v36 = vmul.f32 0.5, %v1724_v35  ;;  %v1735_v39 = vmul.f32 0.5, %v1733_v38 }
 0x705   : > { %2304 = vtanh.f32 %v1726_v36 }
 0x706   : > { %2306 = vtanh.f32 %v1730_v37 }
 0x707   : > { %2308 = vtanh.f32 %v1735_v39 }
 0x710   : > { %v2303_v40 = vpop.eup %2302 }
 0x711   : > { %v1721_v41 = vadd.f32 1.0, %v2303_v40 }
 0x712   : > { %v2305_v42 = vpop.eup %2304 }
 0x713   : > { %v1722_v43 = vmul.f32 0.5, %v1721_v41  ;;  %v1728_v44 = vadd.f32 1.0, %v2305_v42  ;;  %v2307_v46 = vpop.eup %2306 }
 0x714   : > { %v2309_v9 = vpop.eup %2308 }
 0x715   : > { %v1729_v45 = vmul.f32 0.5, %v1728_v44  ;;  %v1741_v49 = vmul.f32 %v2307_v46, %v1722_v43  ;;  %v1737_v54 = vadd.f32 1.0, %v2309_v9 }
 0x717   : > { %v1740_v48 = vmul.f32 %v1739_v47, %v1729_v45  ;;  %v1738_v30 = vmul.f32 0.5, %v1737_v54 }
 0x719   : > { %v1742_v58 = vadd.f32 %v1741_v49, %v1740_v48 }
 0x71b   : > { %2310 = vtanh.f32 %v1742_v58  ;;  %1745 = vst [vmem:[#allocation3] sm:$0x3] %v1742_v58 }
 0x722   : > { %v1941_v14 = vld [vmem:[#allocation3] sm:$0x3] }
 0x728   : > { %v2311_v53 = vpop.eup %2310 }
 0x729   : > { %v1744_v52 = vmul.f32 %v2311_v53, %v1738_v30 }
 0x72b   : > { %1749 = vst [vmem:[%s1748_s4] sm:$0x3] %v1744_v52  ;;  %1746 = vst [vmem:[#allocation2] sm:$0x3] %v1744_v52 }
 0x732   : > { %v1755_v29 = vld [vmem:[#allocation2] sm:$0x3] }
 0x733   : > { %1821 = vmatmul.mubr.f32.vlgmr.msra.gmra.mxu0 %v1755_v29  ;;  %1892 = vmatmul.mubr.f32.vlgmr.msra.gmra.mxu1 %v1755_v29 }
 0x7f3   : > { %v1822_v55 = vpop.f32.mrf.mxu0  ;;  %v1893_v27 = vpop.f32.mrf.mxu1 }
 0x7f5   : > { %v1824_v50 = vpop.f32.mrf.mxu0  ;;  %v1895_v7 = vpop.f32.mrf.mxu1 }
 0x7f6   : > { %v1902_v57 = vcombine.low %v1822_v55, %v1824_v50  ;;  %v1903_v5 = vcombine.low %v1893_v27, %v1895_v7 }
 0x7f8   : > { %v1910_v0 = vrot.slane %v1902_v57, %v2837_v63  ;;  %v1917_v2 = vrot.slane %v1903_v5, %v2837_v63 }
 0x7fa   : > { %v1918_v51 = vcombine.low %v1910_v0, %v1917_v2 }
 0x7fc   : > { %v1920_v1 = vadd.f32 %v1918_v51, %v1754_v10 }
 0x7fe   : > { %v1921_v56 = vmul.f32 0.5, %v1920_v1  ;;  %v1926_v3 = vrot.slane %v1920_v1, 2  ;;  %v1932_v61 = vrot.slane %v1920_v1, 4  ;;  %v1935_v60 = vrot.slane %v1920_v1, 6 }
 0x800   : > { %2312 = vtanh.f32 %v1921_v56  ;;  %v1928_v4 = vmul.f32 0.5, %v1926_v3  ;;  %v1937_v59 = vmul.f32 0.5, %v1935_v60 }
 0x802   : > { %2314 = vtanh.f32 %v1928_v4 }
 0x803   : > { %2316 = vtanh.f32 %v1932_v61 }
 0x804   : > { %2318 = vtanh.f32 %v1937_v59 }
 0x80d   : > { %v2313_v6 = vpop.eup %2312 }
 0x80e   : > { %v1923_v8 = vadd.f32 1.0, %v2313_v6 }
 0x80f   : > { %v2315_v62 = vpop.eup %2314 }
 0x810   : > { %v1924_v11 = vmul.f32 0.5, %v1923_v8  ;;  %v1930_v12 = vadd.f32 1.0, %v2315_v62  ;;  %v2317_v13 = vpop.eup %2316 }
 0x811   : > { %v2319_v18 = vpop.eup %2318 }
 0x812   : > { %v1931_v63 = vmul.f32 0.5, %v1930_v12  ;;  %v1943_v16 = vmul.f32 %v2317_v13, %v1924_v11  ;;  %v1939_v19 = vadd.f32 1.0, %v2319_v18 }
 0x814   : > { %v1942_v15 = vmul.f32 %v1941_v14, %v1931_v63  ;;  %v1940_v20 = vmul.f32 0.5, %v1939_v19 }
 0x816   : > { %v1944_v17 = vadd.f32 %v1943_v16, %v1942_v15 }
 0x818   : > { %2320 = vtanh.f32 %v1944_v17  ;;  %1947 = vst [vmem:[#allocation3] sm:$0x3] %v1944_v17 }
 0x824   : > { %1958 = sbr.rel (!%p2478_p6) target bundleno = 2101 (0x835), region = 74 }
 0x825   : > { %v2321_v21 = vpop.eup %2320 }
 0x826   : > { %v1946_v22 = vmul.f32 %v2321_v21, %v1940_v20 }
 0x828   : > { %1948 = vst [vmem:[#allocation2] sm:$0x3] %v1946_v22  ;;  %1951 = vst [vmem:[%s1950_s15] sm:$0x3] %v1946_v22 }
 0x82f   : > { %v1983_v23 = vld [vmem:[%s2847_s20] sm:$0x3]  ;;  %v1985_v24 = vld [vmem:[%s2847_s20 + $0x2] sm:$0x3]  ;;  %v1987_v25 = vld [vmem:[%s2847_s20 + $0x4] sm:$0x3] }
 0x830   : > { %v1989_v26 = vld [vmem:[%s2847_s20 + $0x6] sm:$0x3]  ;;  %v1991_v28 = vld [vmem:[%s2847_s20 + $0x8] sm:$0x3]  ;;  %1984 = vst [vmem:[%s1966_s21] sm:$0x3] %v1983_v23 }
 0x831   : > { %1986 = vst [vmem:[%s1966_s21 + $0x4] sm:$0x3] %v1985_v24  ;;  %1988 = vst [vmem:[%s1966_s21 + $0x8] sm:$0x3] %v1987_v25  ;;  %v1993_v31 = vld [vmem:[%s2847_s20 + $0xa] sm:$0x3] }
 0x832   : > { %1990 = vst [vmem:[%s1966_s21 + $0xc] sm:$0x3] %v1989_v26  ;;  %1992 = vst [vmem:[%s1966_s21 + $0x10] sm:$0x3] %v1991_v28  ;;  %v1995_v32 = vld [vmem:[%s2847_s20 + $0xc] sm:$0x3] }
 0x833   : > { %v1997_v33 = vld [vmem:[%s2847_s20 + $0xe] sm:$0x3]  ;;  %1994 = vst [vmem:[%s1966_s21 + $0x14] sm:$0x3] %v1993_v31  ;;  %1996 = vst [vmem:[%s1966_s21 + $0x18] sm:$0x3] %v1995_v32 }
 0x834   : > { %1998 = vst [vmem:[%s1966_s21 + $0x1c] sm:$0x3] %v1997_v33 }
 0x835 PF: > { %s12_s13 = sadd.s32 1, %s2424_s13   ;;  %s3755_s9 = smov %s2412_s10 }
 0x836   : > { %p9_p13 = scmp.ge.s32.totalorder %s12_s13, 4   ;;  %s3756_s10 = smov %s2483_s19 }
 0x837   : > { %s3757_s11 = smov %s2420_s12  ;;  %s3758_s12 = smov %s3760_s14 }
 0x838   :  { %11 = sbr.rel (!%p9_p13) target bundleno = 3 (0x3), region = 165 }

</bundles_post_ra>
